<compile_context>
chip_gen: v6e
topology: v6e:2x2x1
jax: 0.10.0
libtpu: 0.0.40
codegen_flags: <defaults>
</compile_context>

<pallas_src>
import functools

import jax
import jax.numpy as jnp
from jax.experimental import pallas as pl
from jax.experimental.pallas import tpu as pltpu


# Order of per-layer parameters (each stacked over a leading num_layers axis).
# Must match the kernel signature below.
_LAYER_PARAM_ORDER = (
    "sa_wqk", "sa_bqk", "sa_wv", "sa_bv", "sa_wo", "sa_bo", "ln1_g", "ln1_b",
    "ca_wq", "ca_bq", "ca_wk", "ca_bk", "ca_wv", "ca_bv", "ca_wo", "ca_bo",
    "ln2_g", "ln2_b",
    "ff_w1", "ff_b1", "ff_w2", "ff_b2", "ln3_g", "ln3_b",
)


# ------------------------------ fused kernel ------------------------------- #

def _decoder_stack_kernel(
    # batch-tile activations
    tgt_ref, mem_ref, qp_ref, mp_ref,
    # per-layer params, full stacks resident in VMEM (leading num_layers axis)
    sa_wqk, sa_bqk, sa_wv, sa_bv, sa_wo, sa_bo, ln1_g, ln1_b,
    ca_wq, ca_bq, ca_wk, ca_bk, ca_wv, ca_bv, ca_wo, ca_bo, ln2_g, ln2_b,
    ff_w1, ff_b1, ff_w2, ff_b2, ln3_g, ln3_b,
    # final norm
    fn_g, fn_b,
    # output
    out_ref,
    *, nhead, eps):
    f32, bf16 = jnp.float32, jnp.bfloat16
    bB, Lq, D = tgt_ref.shape
    Lk = mem_ref.shape[1]
    num_layers = sa_wqk.shape[0]
    dh = D // nhead
    scale = 1.0 / float(dh) ** 0.5

    def matmul(a_bf, w):
        # bf16 MXU matmul, f32 accumulation.
        return jnp.dot(a_bf, w, preferred_element_type=f32)

    def layer_norm(y, g, b):
        mean = jnp.mean(y, axis=-1, keepdims=True)
        yc = y - mean
        var = jnp.mean(yc * yc, axis=-1, keepdims=True)
        return (yc * jax.lax.rsqrt(var + eps)) * g + b

    def softmax(s):
        s = s - jnp.max(s, axis=-1, keepdims=True)
        p = jnp.exp(s)
        return p * pl.reciprocal(jnp.sum(p, axis=-1, keepdims=True), approx=True)

    def mha_fused(q, k, v, wo_ref, bo_ref, li, lk_rows):
        """q: (bB*Lq, D), k/v: (bB*lk_rows, D) f32.  Head concat fused into Wo:
        per head, accumulate (p @ v_h) @ Wo[h*dh:(h+1)*dh, :] into a lane-dense
        (Lq, D) f32 accumulator.  Bias added once at the end."""
        outs = []
        for e in range(bB):
            qe = q[e * Lq:(e + 1) * Lq, :]
            ke = k[e * lk_rows:(e + 1) * lk_rows, :]
            ve = v[e * lk_rows:(e + 1) * lk_rows, :]
            acc = jnp.zeros((Lq, D), f32)
            for h in range(nhead):
                sl = slice(h * dh, (h + 1) * dh)
                qh = (qe[:, sl] * scale).astype(bf16)
                kh = ke[:, sl].astype(bf16)
                vh = ve[:, sl].astype(bf16)
                # q @ k^T without an explicit transpose: contract over dh.
                s = jax.lax.dot_general(qh, kh, (((1,), (1,)), ((), ())),
                                        preferred_element_type=f32)
                p = softmax(s)
                oh = jnp.dot(p.astype(bf16), vh, preferred_element_type=f32)
                acc = acc + matmul(oh.astype(bf16), wo_ref[li, sl, :])
            outs.append(acc)
        attn = outs[0] if bB == 1 else jnp.concatenate(outs, axis=0)
        return attn + bo_ref[li]

    # -------- layer-invariant prep (hoisted out of the layer loop) -------- #
    x = tgt_ref[...].astype(f32).reshape(bB * Lq, D)       # running activation
    qp = qp_ref[...].astype(f32)                           # (Lq, D)
    qp_b = qp if bB == 1 else jnp.concatenate([qp] * bB, axis=0)
    mem = mem_ref[...].astype(f32).reshape(bB * Lk, D)
    mp = mp_ref[...].astype(f32)
    mp_b = mp if bB == 1 else jnp.concatenate([mp] * bB, axis=0)
    memk_bf = (mem + mp_b).astype(bf16)                    # cross-attn K input
    memv_bf = mem.astype(bf16)                             # cross-attn V input

    # ------------------------- unrolled layer loop ------------------------- #
    for li in range(num_layers):
        # self attention: q = k = x + querypos, v = x (DETR post-norm)
        qin_bf = (x + qp_b).astype(bf16)
        x_bf = x.astype(bf16)
        qk = matmul(qin_bf, sa_wqk[li]) + sa_bqk[li]        # fused wq|wk (.., 2D)
        v = matmul(x_bf, sa_wv[li]) + sa_bv[li]
        sa_out = mha_fused(qk[:, :D], qk[:, D:], v, sa_wo, sa_bo, li, Lq)
        x = layer_norm(x + sa_out, ln1_g[li], ln1_b[li])

        # cross attention: q = x + querypos, k = memory + mempos, v = memory
        q = matmul((x + qp_b).astype(bf16), ca_wq[li]) + ca_bq[li]
        k = matmul(memk_bf, ca_wk[li]) + ca_bk[li]
        v = matmul(memv_bf, ca_wv[li]) + ca_bv[li]
        ca_out = mha_fused(q, k, v, ca_wo, ca_bo, li, Lk)
        x = layer_norm(x + ca_out, ln2_g[li], ln2_b[li])

        # feed forward (hidden (rows, dim_ff) never leaves VMEM)
        h1 = jnp.maximum(matmul(x.astype(bf16), ff_w1[li]) + ff_b1[li], 0.0)
        y = matmul(h1.astype(bf16), ff_w2[li]) + ff_b2[li]
        x = layer_norm(x + y, ln3_g[li], ln3_b[li])

    out = layer_norm(x, fn_g[...], fn_b[...])
    out_ref[...] = out.reshape(bB, Lq, D).astype(out_ref.dtype)


# ------------------------------ host wrapper -------------------------------- #

def transformer_decoder_forward(tgt, memory, params, querypos_embed,
                                memorypos_embed, *, nhead, eps=1e-5,
                                batch_tile=None, out_dtype=None,
                                tgt_mask=None, memory_mask=None,
                                tgt_key_padding_mask=None,
                                memory_key_padding_mask=None,
                                contextpos_embed=None,
                                vmem_limit_bytes=48 * 1024 * 1024):
    """tgt: (B, Lq, D), memory: (B, Lk, D); returns (B, Lq, D).

    Masks / contextpos / dropout are not supported by the fused kernel.
    """
    assert tgt_mask is None and memory_mask is None, "masks not supported"
    assert tgt_key_padding_mask is None and memory_key_padding_mask is None, \
        "key padding masks not supported"
    assert contextpos_embed is None, "contextpos_embed not supported"

    B, Lq, D = tgt.shape
    Lk = memory.shape[1]
    out_dtype = out_dtype or tgt.dtype

    # Pick a batch tile that divides B, preferring >= 2 grid steps (v7x: keep
    # both TensorCores busy via the "parallel" batch axis).
    if batch_tile is None:
        batch_tile = 1
        for cand in (8, 4, 2):
            if B % cand == 0 and B // cand >= 2:
                batch_tile = cand
                break
    assert B % batch_tile == 0, "batch_tile must divide batch size"
    grid = (B // batch_tile,)

    qp = querypos_embed.reshape(Lq, D)          # shared across batch
    mp = memorypos_embed.reshape(Lk, D)         # shared across batch

    def batch_spec(length):
        return pl.BlockSpec((batch_tile, length, D), lambda b: (b, 0, 0))

    def const_spec(arr):
        nd = arr.ndim
        # Full array, constant block index -> DMA'd into VMEM once and kept
        # resident across all grid steps (no per-batch-element re-streaming).
        return pl.BlockSpec(tuple(arr.shape), lambda b, _nd=nd: (0,) * _nd)

    layer_inputs = [params[name] for name in _LAYER_PARAM_ORDER]
    inputs = ([tgt, memory, qp, mp] + layer_inputs
              + [params["norm_g"], params["norm_b"]])
    in_specs = ([batch_spec(Lq), batch_spec(Lk), const_spec(qp), const_spec(mp)]
                + [const_spec(a) for a in layer_inputs]
                + [const_spec(params["norm_g"]), const_spec(params["norm_b"])])

    kernel = functools.partial(_decoder_stack_kernel, nhead=nhead, eps=eps)

    return pl.pallas_call(
        kernel,
        out_shape=jax.ShapeDtypeStruct((B, Lq, D), out_dtype),
        grid_spec=pltpu.PrefetchScalarGridSpec(
            num_scalar_prefetch=0,
            grid=grid,                                  # batch tiles only
            in_specs=in_specs,
            out_specs=pl.BlockSpec((batch_tile, Lq, D), lambda b: (b, 0, 0)),
            scratch_shapes=[],
        ),
        compiler_params=pltpu.CompilerParams(
            dimension_semantics=("parallel",),
            vmem_limit_bytes=vmem_limit_bytes,
        ),
    )(*inputs)


# -------------------------------- param init -------------------------------- #

def init_params(key, num_layers, d_model, nhead, dim_ff):
    """Per-layer weights stacked along a leading num_layers axis.

    Matmul weights are stored in bf16 (MXU-native); biases and LayerNorm
    params stay f32 (accumulation / LN math is f32 inside the kernel).
    """
    D, F, L = d_model, dim_ff, num_layers
    ks = jax.random.split(key, 9)
    w_scale = 0.05

    def w(k, shape):
        return (w_scale * jax.random.normal(k, shape, jnp.float32)).astype(jnp.bfloat16)

    p = {
        "sa_wqk": w(ks[0], (L, D, 2 * D)),
        "sa_bqk": jnp.zeros((L, 1, 2 * D), jnp.float32),
        "sa_wv": w(ks[1], (L, D, D)),
        "sa_bv": jnp.zeros((L, 1, D), jnp.float32),
        "sa_wo": w(ks[2], (L, D, D)),
        "sa_bo": jnp.zeros((L, 1, D), jnp.float32),
        "ca_wq": w(ks[3], (L, D, D)),
        "ca_bq": jnp.zeros((L, 1, D), jnp.float32),
        "ca_wk": w(ks[4], (L, D, D)),
        "ca_bk": jnp.zeros((L, 1, D), jnp.float32),
        "ca_wv": w(ks[5], (L, D, D)),
        "ca_bv": jnp.zeros((L, 1, D), jnp.float32),
        "ca_wo": w(ks[6], (L, D, D)),
        "ca_bo": jnp.zeros((L, 1, D), jnp.float32),
        "ff_w1": w(ks[7], (L, D, F)),
        "ff_b1": jnp.zeros((L, 1, F), jnp.float32),
        "ff_w2": w(ks[8], (L, F, D)),
        "ff_b2": jnp.zeros((L, 1, D), jnp.float32),
        "norm_g": jnp.ones((1, D), jnp.float32),
        "norm_b": jnp.zeros((1, D), jnp.float32),
    }
    for ln in ("ln1", "ln2", "ln3"):
        p[ln + "_g"] = jnp.ones((L, 1, D), jnp.float32)
        p[ln + "_b"] = jnp.zeros((L, 1, D), jnp.float32)
    return p


# ----------------------------------- main ----------------------------------- #

if __name__ == "__main__":
    # Small test shapes (B=4 so the batch_tile=2 path and both v7x TCs get
    # exercised).  Real DETR sizes (D=256, dim_ff=2048, Lq~100) keep the last
    # two dims lane/sublane aligned; these toy sizes are for correctness only.
    B, Lq, Lk = 4, 8, 16
    d_model, nhead, dim_ff = 32, 4, 64
    num_layers = 2

    root = jax.random.PRNGKey(0)
    k_tgt, k_mem, k_qp, k_mp, k_par = jax.random.split(root, 5)

    tgt = jax.random.normal(k_tgt, (B, Lq, d_model), jnp.float32)
    memory = jax.random.normal(k_mem, (B, Lk, d_model), jnp.float32)
    querypos_embed = 0.1 * jax.random.normal(k_qp, (1, Lq, d_model), jnp.float32)
    memorypos_embed = 0.1 * jax.random.normal(k_mp, (1, Lk, d_model), jnp.float32)

    params = init_params(k_par, num_layers, d_model, nhead, dim_ff)

    fwd = jax.jit(transformer_decoder_forward,
                  static_argnames=("nhead", "eps", "batch_tile", "out_dtype",
                                   "vmem_limit_bytes"))
    out = fwd(tgt, memory, params, querypos_embed, memorypos_embed, nhead=nhead)
    out = jax.block_until_ready(out)

    assert out.shape == (B, Lq, d_model)
    assert bool(jnp.all(jnp.isfinite(out)))
    print("KERNEL_OK")
</pallas_src>

<mosaic_0001>
module attributes {stable_mosaic.version = 11 : i64} {
  func.func @_decoder_stack_kernel(%arg0: i32, %arg1: memref<2x8x32xf32, #tpu.memory_space<vmem>>, %arg2: memref<2x16x32xf32, #tpu.memory_space<vmem>>, %arg3: memref<8x32xf32, #tpu.memory_space<vmem>>, %arg4: memref<16x32xf32, #tpu.memory_space<vmem>>, %arg5: memref<2x32x64xbf16, #tpu.memory_space<vmem>>, %arg6: memref<2x1x64xf32, #tpu.memory_space<vmem>>, %arg7: memref<2x32x32xbf16, #tpu.memory_space<vmem>>, %arg8: memref<2x1x32xf32, #tpu.memory_space<vmem>>, %arg9: memref<2x32x32xbf16, #tpu.memory_space<vmem>>, %arg10: memref<2x1x32xf32, #tpu.memory_space<vmem>>, %arg11: memref<2x1x32xf32, #tpu.memory_space<vmem>>, %arg12: memref<2x1x32xf32, #tpu.memory_space<vmem>>, %arg13: memref<2x32x32xbf16, #tpu.memory_space<vmem>>, %arg14: memref<2x1x32xf32, #tpu.memory_space<vmem>>, %arg15: memref<2x32x32xbf16, #tpu.memory_space<vmem>>, %arg16: memref<2x1x32xf32, #tpu.memory_space<vmem>>, %arg17: memref<2x32x32xbf16, #tpu.memory_space<vmem>>, %arg18: memref<2x1x32xf32, #tpu.memory_space<vmem>>, %arg19: memref<2x32x32xbf16, #tpu.memory_space<vmem>>, %arg20: memref<2x1x32xf32, #tpu.memory_space<vmem>>, %arg21: memref<2x1x32xf32, #tpu.memory_space<vmem>>, %arg22: memref<2x1x32xf32, #tpu.memory_space<vmem>>, %arg23: memref<2x32x64xbf16, #tpu.memory_space<vmem>>, %arg24: memref<2x1x64xf32, #tpu.memory_space<vmem>>, %arg25: memref<2x64x32xbf16, #tpu.memory_space<vmem>>, %arg26: memref<2x1x32xf32, #tpu.memory_space<vmem>>, %arg27: memref<2x1x32xf32, #tpu.memory_space<vmem>>, %arg28: memref<2x1x32xf32, #tpu.memory_space<vmem>>, %arg29: memref<1x32xf32, #tpu.memory_space<vmem>>, %arg30: memref<1x32xf32, #tpu.memory_space<vmem>>, %arg31: memref<2x8x32xf32, #tpu.memory_space<vmem>>) attributes {dimension_semantics = [#tpu.dimension_semantics<parallel>], iteration_bounds = array<i64: 2>, scalar_prefetch = 0 : i64, scratch_operands = 0 : i64, tpu.core_type = #tpu.core_type<tc>, window_params = [{transform_indices = @transform_0, window_bounds = array<i64: 2, 8, 32>}, {transform_indices = @transform_1, window_bounds = array<i64: 2, 16, 32>}, {pipeline_mode = #tpu.pipeline_mode<synchronous>, transform_indices = @transform_2, window_bounds = array<i64: 8, 32>}, {pipeline_mode = #tpu.pipeline_mode<synchronous>, transform_indices = @transform_3, window_bounds = array<i64: 16, 32>}, {pipeline_mode = #tpu.pipeline_mode<synchronous>, transform_indices = @transform_4, window_bounds = array<i64: 2, 32, 64>}, {pipeline_mode = #tpu.pipeline_mode<synchronous>, transform_indices = @transform_5, window_bounds = array<i64: 2, 1, 64>}, {pipeline_mode = #tpu.pipeline_mode<synchronous>, transform_indices = @transform_6, window_bounds = array<i64: 2, 32, 32>}, {pipeline_mode = #tpu.pipeline_mode<synchronous>, transform_indices = @transform_7, window_bounds = array<i64: 2, 1, 32>}, {pipeline_mode = #tpu.pipeline_mode<synchronous>, transform_indices = @transform_8, window_bounds = array<i64: 2, 32, 32>}, {pipeline_mode = #tpu.pipeline_mode<synchronous>, transform_indices = @transform_9, window_bounds = array<i64: 2, 1, 32>}, {pipeline_mode = #tpu.pipeline_mode<synchronous>, transform_indices = @transform_10, window_bounds = array<i64: 2, 1, 32>}, {pipeline_mode = #tpu.pipeline_mode<synchronous>, transform_indices = @transform_11, window_bounds = array<i64: 2, 1, 32>}, {pipeline_mode = #tpu.pipeline_mode<synchronous>, transform_indices = @transform_12, window_bounds = array<i64: 2, 32, 32>}, {pipeline_mode = #tpu.pipeline_mode<synchronous>, transform_indices = @transform_13, window_bounds = array<i64: 2, 1, 32>}, {pipeline_mode = #tpu.pipeline_mode<synchronous>, transform_indices = @transform_14, window_bounds = array<i64: 2, 32, 32>}, {pipeline_mode = #tpu.pipeline_mode<synchronous>, transform_indices = @transform_15, window_bounds = array<i64: 2, 1, 32>}, {pipeline_mode = #tpu.pipeline_mode<synchronous>, transform_indices = @transform_16, window_bounds = array<i64: 2, 32, 32>}, {pipeline_mode = #tpu.pipeline_mode<synchronous>, transform_indices = @transform_17, window_bounds = array<i64: 2, 1, 32>}, {pipeline_mode = #tpu.pipeline_mode<synchronous>, transform_indices = @transform_18, window_bounds = array<i64: 2, 32, 32>}, {pipeline_mode = #tpu.pipeline_mode<synchronous>, transform_indices = @transform_19, window_bounds = array<i64: 2, 1, 32>}, {pipeline_mode = #tpu.pipeline_mode<synchronous>, transform_indices = @transform_20, window_bounds = array<i64: 2, 1, 32>}, {pipeline_mode = #tpu.pipeline_mode<synchronous>, transform_indices = @transform_21, window_bounds = array<i64: 2, 1, 32>}, {pipeline_mode = #tpu.pipeline_mode<synchronous>, transform_indices = @transform_22, window_bounds = array<i64: 2, 32, 64>}, {pipeline_mode = #tpu.pipeline_mode<synchronous>, transform_indices = @transform_23, window_bounds = array<i64: 2, 1, 64>}, {pipeline_mode = #tpu.pipeline_mode<synchronous>, transform_indices = @transform_24, window_bounds = array<i64: 2, 64, 32>}, {pipeline_mode = #tpu.pipeline_mode<synchronous>, transform_indices = @transform_25, window_bounds = array<i64: 2, 1, 32>}, {pipeline_mode = #tpu.pipeline_mode<synchronous>, transform_indices = @transform_26, window_bounds = array<i64: 2, 1, 32>}, {pipeline_mode = #tpu.pipeline_mode<synchronous>, transform_indices = @transform_27, window_bounds = array<i64: 2, 1, 32>}, {pipeline_mode = #tpu.pipeline_mode<synchronous>, transform_indices = @transform_28, window_bounds = array<i64: 1, 32>}, {pipeline_mode = #tpu.pipeline_mode<synchronous>, transform_indices = @transform_29, window_bounds = array<i64: 1, 32>}, {transform_indices = @transform_30, window_bounds = array<i64: 2, 8, 32>}]} {
    %c0 = arith.constant 0 : index
    %c0_0 = arith.constant 0 : index
    %c0_1 = arith.constant 0 : index
    %0 = vector.load %arg1[%c0, %c0_0, %c0_1] : memref<2x8x32xf32, #tpu.memory_space<vmem>>, vector<2x8x32xf32>
    %1 = vector.shape_cast %0 : vector<2x8x32xf32> to vector<16x32xf32>
    %c0_2 = arith.constant 0 : index
    %c0_3 = arith.constant 0 : index
    %2 = vector.load %arg3[%c0_2, %c0_3] : memref<8x32xf32, #tpu.memory_space<vmem>>, vector<8x32xf32>
    %3 = tpu.concatenate %2, %2 in 0 : vector<8x32xf32>, vector<8x32xf32> -> vector<16x32xf32>
    %c0_4 = arith.constant 0 : index
    %c0_5 = arith.constant 0 : index
    %c0_6 = arith.constant 0 : index
    %4 = vector.load %arg2[%c0_4, %c0_5, %c0_6] : memref<2x16x32xf32, #tpu.memory_space<vmem>>, vector<2x16x32xf32>
    %5 = vector.shape_cast %4 : vector<2x16x32xf32> to vector<32x32xf32>
    %c0_7 = arith.constant 0 : index
    %c0_8 = arith.constant 0 : index
    %6 = vector.load %arg4[%c0_7, %c0_8] : memref<16x32xf32, #tpu.memory_space<vmem>>, vector<16x32xf32>
    %7 = tpu.concatenate %6, %6 in 0 : vector<16x32xf32>, vector<16x32xf32> -> vector<32x32xf32>
    %8 = arith.addf %5, %7 : vector<32x32xf32>
    %9 = arith.truncf %8 : vector<32x32xf32> to vector<32x32xbf16>
    %10 = arith.truncf %5 : vector<32x32xf32> to vector<32x32xbf16>
    %11 = arith.addf %1, %3 : vector<16x32xf32>
    %12 = arith.truncf %11 : vector<16x32xf32> to vector<16x32xbf16>
    %13 = arith.truncf %1 : vector<16x32xf32> to vector<16x32xbf16>
    %c0_9 = arith.constant 0 : index
    %c0_10 = arith.constant 0 : index
    %c0_11 = arith.constant 0 : index
    %14 = vector.load %arg5[%c0_9, %c0_10, %c0_11] : memref<2x32x64xbf16, #tpu.memory_space<vmem>>, vector<1x32x64xbf16>
    %15 = vector.shape_cast %14 : vector<1x32x64xbf16> to vector<32x64xbf16>
    %cst = arith.constant dense<0.000000e+00> : vector<16x64xf32>
    %16 = tpu.matmul %12, %15, %cst {dimension_numbers = #tpu.dot_dimension_numbers<[1], [0], [0], [1], [0, 0, 1, 1], [], []>} : vector<16x32xbf16>, vector<32x64xbf16>, vector<16x64xf32> -> vector<16x64xf32>
    %c0_12 = arith.constant 0 : index
    %c0_13 = arith.constant 0 : index
    %c0_14 = arith.constant 0 : index
    %17 = vector.load %arg6[%c0_12, %c0_13, %c0_14] : memref<2x1x64xf32, #tpu.memory_space<vmem>>, vector<1x1x64xf32>
    %18 = vector.shape_cast %17 : vector<1x1x64xf32> to vector<1x64xf32>
    %19 = vector.broadcast %18 : vector<1x64xf32> to vector<16x64xf32>
    %20 = arith.addf %16, %19 : vector<16x64xf32>
    %c0_15 = arith.constant 0 : index
    %c0_16 = arith.constant 0 : index
    %c0_17 = arith.constant 0 : index
    %21 = vector.load %arg7[%c0_15, %c0_16, %c0_17] : memref<2x32x32xbf16, #tpu.memory_space<vmem>>, vector<1x32x32xbf16>
    %22 = vector.shape_cast %21 : vector<1x32x32xbf16> to vector<32x32xbf16>
    %cst_18 = arith.constant dense<0.000000e+00> : vector<16x32xf32>
    %23 = tpu.matmul %13, %22, %cst_18 {dimension_numbers = #tpu.dot_dimension_numbers<[1], [0], [0], [1], [0, 0, 1, 1], [], []>} : vector<16x32xbf16>, vector<32x32xbf16>, vector<16x32xf32> -> vector<16x32xf32>
    %c0_19 = arith.constant 0 : index
    %c0_20 = arith.constant 0 : index
    %c0_21 = arith.constant 0 : index
    %24 = vector.load %arg8[%c0_19, %c0_20, %c0_21] : memref<2x1x32xf32, #tpu.memory_space<vmem>>, vector<1x1x32xf32>
    %25 = vector.shape_cast %24 : vector<1x1x32xf32> to vector<1x32xf32>
    %26 = vector.broadcast %25 : vector<1x32xf32> to vector<16x32xf32>
    %27 = arith.addf %23, %26 : vector<16x32xf32>
    %28 = vector.extract_strided_slice %20 {offsets = [0, 0], sizes = [16, 32], strides = [1, 1]} : vector<16x64xf32> to vector<16x32xf32>
    %29 = vector.extract_strided_slice %20 {offsets = [0, 32], sizes = [16, 32], strides = [1, 1]} : vector<16x64xf32> to vector<16x32xf32>
    %30 = vector.extract_strided_slice %28 {offsets = [0, 0], sizes = [8, 32], strides = [1, 1]} : vector<16x32xf32> to vector<8x32xf32>
    %31 = vector.extract_strided_slice %29 {offsets = [0, 0], sizes = [8, 32], strides = [1, 1]} : vector<16x32xf32> to vector<8x32xf32>
    %32 = vector.extract_strided_slice %27 {offsets = [0, 0], sizes = [8, 32], strides = [1, 1]} : vector<16x32xf32> to vector<8x32xf32>
    %cst_22 = arith.constant 0.000000e+00 : f32
    %33 = vector.broadcast %cst_22 : f32 to vector<8x32xf32>
    %34 = vector.extract_strided_slice %30 {offsets = [0, 0], sizes = [8, 8], strides = [1, 1]} : vector<8x32xf32> to vector<8x8xf32>
    %cst_23 = arith.constant 0.353553385 : f32
    %35 = vector.broadcast %cst_23 : f32 to vector<8x8xf32>
    %36 = arith.mulf %34, %35 : vector<8x8xf32>
    %37 = arith.truncf %36 : vector<8x8xf32> to vector<8x8xbf16>
    %38 = vector.extract_strided_slice %31 {offsets = [0, 0], sizes = [8, 8], strides = [1, 1]} : vector<8x32xf32> to vector<8x8xf32>
    %39 = arith.truncf %38 : vector<8x8xf32> to vector<8x8xbf16>
    %40 = vector.extract_strided_slice %32 {offsets = [0, 0], sizes = [8, 8], strides = [1, 1]} : vector<8x32xf32> to vector<8x8xf32>
    %41 = arith.truncf %40 : vector<8x8xf32> to vector<8x8xbf16>
    %cst_24 = arith.constant dense<0.000000e+00> : vector<8x8xf32>
    %42 = tpu.matmul %37, %39, %cst_24 {dimension_numbers = #tpu.dot_dimension_numbers<[1], [1], [0], [0], [0, 0, 1, 0], [], []>} : vector<8x8xbf16>, vector<8x8xbf16>, vector<8x8xf32> -> vector<8x8xf32>
    %cst_25 = arith.constant dense<0xFF800000> : vector<8xf32>
    %43 = vector.multi_reduction <maximumf>, %42, %cst_25 [1] : vector<8x8xf32> to vector<8xf32>
    %44 = vector.shape_cast %43 : vector<8xf32> to vector<8x1xf32>
    %45 = vector.broadcast %44 : vector<8x1xf32> to vector<8x8xf32>
    %46 = arith.subf %42, %45 : vector<8x8xf32>
    %47 = math.exp %46 : vector<8x8xf32>
    %cst_26 = arith.constant dense<0.000000e+00> : vector<8xf32>
    %48 = vector.multi_reduction <add>, %47, %cst_26 [1] : vector<8x8xf32> to vector<8xf32>
    %49 = vector.shape_cast %48 : vector<8xf32> to vector<8x1xf32>
    %50 = tpu.reciprocal %49 {approx = true} : vector<8x1xf32> -> vector<8x1xf32>
    %51 = vector.broadcast %50 : vector<8x1xf32> to vector<8x8xf32>
    %52 = arith.mulf %47, %51 : vector<8x8xf32>
    %53 = arith.truncf %52 : vector<8x8xf32> to vector<8x8xbf16>
    %cst_27 = arith.constant dense<0.000000e+00> : vector<8x8xf32>
    %54 = tpu.matmul %53, %41, %cst_27 {dimension_numbers = #tpu.dot_dimension_numbers<[1], [0], [0], [1], [0, 0, 1, 1], [], []>} : vector<8x8xbf16>, vector<8x8xbf16>, vector<8x8xf32> -> vector<8x8xf32>
    %55 = arith.truncf %54 : vector<8x8xf32> to vector<8x8xbf16>
    %c0_28 = arith.constant 0 : index
    %c0_29 = arith.constant 0 : index
    %c0_30 = arith.constant 0 : index
    %56 = vector.load %arg9[%c0_28, %c0_29, %c0_30] : memref<2x32x32xbf16, #tpu.memory_space<vmem>>, vector<1x8x32xbf16>
    %57 = vector.shape_cast %56 : vector<1x8x32xbf16> to vector<8x32xbf16>
    %cst_31 = arith.constant dense<0.000000e+00> : vector<8x32xf32>
    %58 = tpu.matmul %55, %57, %cst_31 {dimension_numbers = #tpu.dot_dimension_numbers<[1], [0], [0], [1], [0, 0, 1, 1], [], []>} : vector<8x8xbf16>, vector<8x32xbf16>, vector<8x32xf32> -> vector<8x32xf32>
    %59 = arith.addf %33, %58 : vector<8x32xf32>
    %60 = vector.extract_strided_slice %30 {offsets = [0, 8], sizes = [8, 8], strides = [1, 1]} : vector<8x32xf32> to vector<8x8xf32>
    %cst_32 = arith.constant 0.353553385 : f32
    %61 = vector.broadcast %cst_32 : f32 to vector<8x8xf32>
    %62 = arith.mulf %60, %61 : vector<8x8xf32>
    %63 = arith.truncf %62 : vector<8x8xf32> to vector<8x8xbf16>
    %64 = vector.extract_strided_slice %31 {offsets = [0, 8], sizes = [8, 8], strides = [1, 1]} : vector<8x32xf32> to vector<8x8xf32>
    %65 = arith.truncf %64 : vector<8x8xf32> to vector<8x8xbf16>
    %66 = vector.extract_strided_slice %32 {offsets = [0, 8], sizes = [8, 8], strides = [1, 1]} : vector<8x32xf32> to vector<8x8xf32>
    %67 = arith.truncf %66 : vector<8x8xf32> to vector<8x8xbf16>
    %cst_33 = arith.constant dense<0.000000e+00> : vector<8x8xf32>
    %68 = tpu.matmul %63, %65, %cst_33 {dimension_numbers = #tpu.dot_dimension_numbers<[1], [1], [0], [0], [0, 0, 1, 0], [], []>} : vector<8x8xbf16>, vector<8x8xbf16>, vector<8x8xf32> -> vector<8x8xf32>
    %cst_34 = arith.constant dense<0xFF800000> : vector<8xf32>
    %69 = vector.multi_reduction <maximumf>, %68, %cst_34 [1] : vector<8x8xf32> to vector<8xf32>
    %70 = vector.shape_cast %69 : vector<8xf32> to vector<8x1xf32>
    %71 = vector.broadcast %70 : vector<8x1xf32> to vector<8x8xf32>
    %72 = arith.subf %68, %71 : vector<8x8xf32>
    %73 = math.exp %72 : vector<8x8xf32>
    %cst_35 = arith.constant dense<0.000000e+00> : vector<8xf32>
    %74 = vector.multi_reduction <add>, %73, %cst_35 [1] : vector<8x8xf32> to vector<8xf32>
    %75 = vector.shape_cast %74 : vector<8xf32> to vector<8x1xf32>
    %76 = tpu.reciprocal %75 {approx = true} : vector<8x1xf32> -> vector<8x1xf32>
    %77 = vector.broadcast %76 : vector<8x1xf32> to vector<8x8xf32>
    %78 = arith.mulf %73, %77 : vector<8x8xf32>
    %79 = arith.truncf %78 : vector<8x8xf32> to vector<8x8xbf16>
    %cst_36 = arith.constant dense<0.000000e+00> : vector<8x8xf32>
    %80 = tpu.matmul %79, %67, %cst_36 {dimension_numbers = #tpu.dot_dimension_numbers<[1], [0], [0], [1], [0, 0, 1, 1], [], []>} : vector<8x8xbf16>, vector<8x8xbf16>, vector<8x8xf32> -> vector<8x8xf32>
    %81 = arith.truncf %80 : vector<8x8xf32> to vector<8x8xbf16>
    %c0_37 = arith.constant 0 : index
    %c8 = arith.constant 8 : index
    %c0_38 = arith.constant 0 : index
    %82 = vector.load %arg9[%c0_37, %c8, %c0_38] : memref<2x32x32xbf16, #tpu.memory_space<vmem>>, vector<1x8x32xbf16>
    %83 = vector.shape_cast %82 : vector<1x8x32xbf16> to vector<8x32xbf16>
    %cst_39 = arith.constant dense<0.000000e+00> : vector<8x32xf32>
    %84 = tpu.matmul %81, %83, %cst_39 {dimension_numbers = #tpu.dot_dimension_numbers<[1], [0], [0], [1], [0, 0, 1, 1], [], []>} : vector<8x8xbf16>, vector<8x32xbf16>, vector<8x32xf32> -> vector<8x32xf32>
    %85 = arith.addf %59, %84 : vector<8x32xf32>
    %86 = vector.extract_strided_slice %30 {offsets = [0, 16], sizes = [8, 8], strides = [1, 1]} : vector<8x32xf32> to vector<8x8xf32>
    %cst_40 = arith.constant 0.353553385 : f32
    %87 = vector.broadcast %cst_40 : f32 to vector<8x8xf32>
    %88 = arith.mulf %86, %87 : vector<8x8xf32>
    %89 = arith.truncf %88 : vector<8x8xf32> to vector<8x8xbf16>
    %90 = vector.extract_strided_slice %31 {offsets = [0, 16], sizes = [8, 8], strides = [1, 1]} : vector<8x32xf32> to vector<8x8xf32>
    %91 = arith.truncf %90 : vector<8x8xf32> to vector<8x8xbf16>
    %92 = vector.extract_strided_slice %32 {offsets = [0, 16], sizes = [8, 8], strides = [1, 1]} : vector<8x32xf32> to vector<8x8xf32>
    %93 = arith.truncf %92 : vector<8x8xf32> to vector<8x8xbf16>
    %cst_41 = arith.constant dense<0.000000e+00> : vector<8x8xf32>
    %94 = tpu.matmul %89, %91, %cst_41 {dimension_numbers = #tpu.dot_dimension_numbers<[1], [1], [0], [0], [0, 0, 1, 0], [], []>} : vector<8x8xbf16>, vector<8x8xbf16>, vector<8x8xf32> -> vector<8x8xf32>
    %cst_42 = arith.constant dense<0xFF800000> : vector<8xf32>
    %95 = vector.multi_reduction <maximumf>, %94, %cst_42 [1] : vector<8x8xf32> to vector<8xf32>
    %96 = vector.shape_cast %95 : vector<8xf32> to vector<8x1xf32>
    %97 = vector.broadcast %96 : vector<8x1xf32> to vector<8x8xf32>
    %98 = arith.subf %94, %97 : vector<8x8xf32>
    %99 = math.exp %98 : vector<8x8xf32>
    %cst_43 = arith.constant dense<0.000000e+00> : vector<8xf32>
    %100 = vector.multi_reduction <add>, %99, %cst_43 [1] : vector<8x8xf32> to vector<8xf32>
    %101 = vector.shape_cast %100 : vector<8xf32> to vector<8x1xf32>
    %102 = tpu.reciprocal %101 {approx = true} : vector<8x1xf32> -> vector<8x1xf32>
    %103 = vector.broadcast %102 : vector<8x1xf32> to vector<8x8xf32>
    %104 = arith.mulf %99, %103 : vector<8x8xf32>
    %105 = arith.truncf %104 : vector<8x8xf32> to vector<8x8xbf16>
    %cst_44 = arith.constant dense<0.000000e+00> : vector<8x8xf32>
    %106 = tpu.matmul %105, %93, %cst_44 {dimension_numbers = #tpu.dot_dimension_numbers<[1], [0], [0], [1], [0, 0, 1, 1], [], []>} : vector<8x8xbf16>, vector<8x8xbf16>, vector<8x8xf32> -> vector<8x8xf32>
    %107 = arith.truncf %106 : vector<8x8xf32> to vector<8x8xbf16>
    %c0_45 = arith.constant 0 : index
    %c16 = arith.constant 16 : index
    %c0_46 = arith.constant 0 : index
    %108 = vector.load %arg9[%c0_45, %c16, %c0_46] : memref<2x32x32xbf16, #tpu.memory_space<vmem>>, vector<1x8x32xbf16>
    %109 = vector.shape_cast %108 : vector<1x8x32xbf16> to vector<8x32xbf16>
    %cst_47 = arith.constant dense<0.000000e+00> : vector<8x32xf32>
    %110 = tpu.matmul %107, %109, %cst_47 {dimension_numbers = #tpu.dot_dimension_numbers<[1], [0], [0], [1], [0, 0, 1, 1], [], []>} : vector<8x8xbf16>, vector<8x32xbf16>, vector<8x32xf32> -> vector<8x32xf32>
    %111 = arith.addf %85, %110 : vector<8x32xf32>
    %112 = vector.extract_strided_slice %30 {offsets = [0, 24], sizes = [8, 8], strides = [1, 1]} : vector<8x32xf32> to vector<8x8xf32>
    %cst_48 = arith.constant 0.353553385 : f32
    %113 = vector.broadcast %cst_48 : f32 to vector<8x8xf32>
    %114 = arith.mulf %112, %113 : vector<8x8xf32>
    %115 = arith.truncf %114 : vector<8x8xf32> to vector<8x8xbf16>
    %116 = vector.extract_strided_slice %31 {offsets = [0, 24], sizes = [8, 8], strides = [1, 1]} : vector<8x32xf32> to vector<8x8xf32>
    %117 = arith.truncf %116 : vector<8x8xf32> to vector<8x8xbf16>
    %118 = vector.extract_strided_slice %32 {offsets = [0, 24], sizes = [8, 8], strides = [1, 1]} : vector<8x32xf32> to vector<8x8xf32>
    %119 = arith.truncf %118 : vector<8x8xf32> to vector<8x8xbf16>
    %cst_49 = arith.constant dense<0.000000e+00> : vector<8x8xf32>
    %120 = tpu.matmul %115, %117, %cst_49 {dimension_numbers = #tpu.dot_dimension_numbers<[1], [1], [0], [0], [0, 0, 1, 0], [], []>} : vector<8x8xbf16>, vector<8x8xbf16>, vector<8x8xf32> -> vector<8x8xf32>
    %cst_50 = arith.constant dense<0xFF800000> : vector<8xf32>
    %121 = vector.multi_reduction <maximumf>, %120, %cst_50 [1] : vector<8x8xf32> to vector<8xf32>
    %122 = vector.shape_cast %121 : vector<8xf32> to vector<8x1xf32>
    %123 = vector.broadcast %122 : vector<8x1xf32> to vector<8x8xf32>
    %124 = arith.subf %120, %123 : vector<8x8xf32>
    %125 = math.exp %124 : vector<8x8xf32>
    %cst_51 = arith.constant dense<0.000000e+00> : vector<8xf32>
    %126 = vector.multi_reduction <add>, %125, %cst_51 [1] : vector<8x8xf32> to vector<8xf32>
    %127 = vector.shape_cast %126 : vector<8xf32> to vector<8x1xf32>
    %128 = tpu.reciprocal %127 {approx = true} : vector<8x1xf32> -> vector<8x1xf32>
    %129 = vector.broadcast %128 : vector<8x1xf32> to vector<8x8xf32>
    %130 = arith.mulf %125, %129 : vector<8x8xf32>
    %131 = arith.truncf %130 : vector<8x8xf32> to vector<8x8xbf16>
    %cst_52 = arith.constant dense<0.000000e+00> : vector<8x8xf32>
    %132 = tpu.matmul %131, %119, %cst_52 {dimension_numbers = #tpu.dot_dimension_numbers<[1], [0], [0], [1], [0, 0, 1, 1], [], []>} : vector<8x8xbf16>, vector<8x8xbf16>, vector<8x8xf32> -> vector<8x8xf32>
    %133 = arith.truncf %132 : vector<8x8xf32> to vector<8x8xbf16>
    %c0_53 = arith.constant 0 : index
    %c24 = arith.constant 24 : index
    %c0_54 = arith.constant 0 : index
    %134 = vector.load %arg9[%c0_53, %c24, %c0_54] : memref<2x32x32xbf16, #tpu.memory_space<vmem>>, vector<1x8x32xbf16>
    %135 = vector.shape_cast %134 : vector<1x8x32xbf16> to vector<8x32xbf16>
    %cst_55 = arith.constant dense<0.000000e+00> : vector<8x32xf32>
    %136 = tpu.matmul %133, %135, %cst_55 {dimension_numbers = #tpu.dot_dimension_numbers<[1], [0], [0], [1], [0, 0, 1, 1], [], []>} : vector<8x8xbf16>, vector<8x32xbf16>, vector<8x32xf32> -> vector<8x32xf32>
    %137 = arith.addf %111, %136 : vector<8x32xf32>
    %138 = vector.extract_strided_slice %28 {offsets = [8, 0], sizes = [8, 32], strides = [1, 1]} : vector<16x32xf32> to vector<8x32xf32>
    %139 = vector.extract_strided_slice %29 {offsets = [8, 0], sizes = [8, 32], strides = [1, 1]} : vector<16x32xf32> to vector<8x32xf32>
    %140 = vector.extract_strided_slice %27 {offsets = [8, 0], sizes = [8, 32], strides = [1, 1]} : vector<16x32xf32> to vector<8x32xf32>
    %cst_56 = arith.constant 0.000000e+00 : f32
    %141 = vector.broadcast %cst_56 : f32 to vector<8x32xf32>
    %142 = vector.extract_strided_slice %138 {offsets = [0, 0], sizes = [8, 8], strides = [1, 1]} : vector<8x32xf32> to vector<8x8xf32>
    %cst_57 = arith.constant 0.353553385 : f32
    %143 = vector.broadcast %cst_57 : f32 to vector<8x8xf32>
    %144 = arith.mulf %142, %143 : vector<8x8xf32>
    %145 = arith.truncf %144 : vector<8x8xf32> to vector<8x8xbf16>
    %146 = vector.extract_strided_slice %139 {offsets = [0, 0], sizes = [8, 8], strides = [1, 1]} : vector<8x32xf32> to vector<8x8xf32>
    %147 = arith.truncf %146 : vector<8x8xf32> to vector<8x8xbf16>
    %148 = vector.extract_strided_slice %140 {offsets = [0, 0], sizes = [8, 8], strides = [1, 1]} : vector<8x32xf32> to vector<8x8xf32>
    %149 = arith.truncf %148 : vector<8x8xf32> to vector<8x8xbf16>
    %cst_58 = arith.constant dense<0.000000e+00> : vector<8x8xf32>
    %150 = tpu.matmul %145, %147, %cst_58 {dimension_numbers = #tpu.dot_dimension_numbers<[1], [1], [0], [0], [0, 0, 1, 0], [], []>} : vector<8x8xbf16>, vector<8x8xbf16>, vector<8x8xf32> -> vector<8x8xf32>
    %cst_59 = arith.constant dense<0xFF800000> : vector<8xf32>
    %151 = vector.multi_reduction <maximumf>, %150, %cst_59 [1] : vector<8x8xf32> to vector<8xf32>
    %152 = vector.shape_cast %151 : vector<8xf32> to vector<8x1xf32>
    %153 = vector.broadcast %152 : vector<8x1xf32> to vector<8x8xf32>
    %154 = arith.subf %150, %153 : vector<8x8xf32>
    %155 = math.exp %154 : vector<8x8xf32>
    %cst_60 = arith.constant dense<0.000000e+00> : vector<8xf32>
    %156 = vector.multi_reduction <add>, %155, %cst_60 [1] : vector<8x8xf32> to vector<8xf32>
    %157 = vector.shape_cast %156 : vector<8xf32> to vector<8x1xf32>
    %158 = tpu.reciprocal %157 {approx = true} : vector<8x1xf32> -> vector<8x1xf32>
    %159 = vector.broadcast %158 : vector<8x1xf32> to vector<8x8xf32>
    %160 = arith.mulf %155, %159 : vector<8x8xf32>
    %161 = arith.truncf %160 : vector<8x8xf32> to vector<8x8xbf16>
    %cst_61 = arith.constant dense<0.000000e+00> : vector<8x8xf32>
    %162 = tpu.matmul %161, %149, %cst_61 {dimension_numbers = #tpu.dot_dimension_numbers<[1], [0], [0], [1], [0, 0, 1, 1], [], []>} : vector<8x8xbf16>, vector<8x8xbf16>, vector<8x8xf32> -> vector<8x8xf32>
    %163 = arith.truncf %162 : vector<8x8xf32> to vector<8x8xbf16>
    %c0_62 = arith.constant 0 : index
    %c0_63 = arith.constant 0 : index
    %c0_64 = arith.constant 0 : index
    %164 = vector.load %arg9[%c0_62, %c0_63, %c0_64] : memref<2x32x32xbf16, #tpu.memory_space<vmem>>, vector<1x8x32xbf16>
    %165 = vector.shape_cast %164 : vector<1x8x32xbf16> to vector<8x32xbf16>
    %cst_65 = arith.constant dense<0.000000e+00> : vector<8x32xf32>
    %166 = tpu.matmul %163, %165, %cst_65 {dimension_numbers = #tpu.dot_dimension_numbers<[1], [0], [0], [1], [0, 0, 1, 1], [], []>} : vector<8x8xbf16>, vector<8x32xbf16>, vector<8x32xf32> -> vector<8x32xf32>
    %167 = arith.addf %141, %166 : vector<8x32xf32>
    %168 = vector.extract_strided_slice %138 {offsets = [0, 8], sizes = [8, 8], strides = [1, 1]} : vector<8x32xf32> to vector<8x8xf32>
    %cst_66 = arith.constant 0.353553385 : f32
    %169 = vector.broadcast %cst_66 : f32 to vector<8x8xf32>
    %170 = arith.mulf %168, %169 : vector<8x8xf32>
    %171 = arith.truncf %170 : vector<8x8xf32> to vector<8x8xbf16>
    %172 = vector.extract_strided_slice %139 {offsets = [0, 8], sizes = [8, 8], strides = [1, 1]} : vector<8x32xf32> to vector<8x8xf32>
    %173 = arith.truncf %172 : vector<8x8xf32> to vector<8x8xbf16>
    %174 = vector.extract_strided_slice %140 {offsets = [0, 8], sizes = [8, 8], strides = [1, 1]} : vector<8x32xf32> to vector<8x8xf32>
    %175 = arith.truncf %174 : vector<8x8xf32> to vector<8x8xbf16>
    %cst_67 = arith.constant dense<0.000000e+00> : vector<8x8xf32>
    %176 = tpu.matmul %171, %173, %cst_67 {dimension_numbers = #tpu.dot_dimension_numbers<[1], [1], [0], [0], [0, 0, 1, 0], [], []>} : vector<8x8xbf16>, vector<8x8xbf16>, vector<8x8xf32> -> vector<8x8xf32>
    %cst_68 = arith.constant dense<0xFF800000> : vector<8xf32>
    %177 = vector.multi_reduction <maximumf>, %176, %cst_68 [1] : vector<8x8xf32> to vector<8xf32>
    %178 = vector.shape_cast %177 : vector<8xf32> to vector<8x1xf32>
    %179 = vector.broadcast %178 : vector<8x1xf32> to vector<8x8xf32>
    %180 = arith.subf %176, %179 : vector<8x8xf32>
    %181 = math.exp %180 : vector<8x8xf32>
    %cst_69 = arith.constant dense<0.000000e+00> : vector<8xf32>
    %182 = vector.multi_reduction <add>, %181, %cst_69 [1] : vector<8x8xf32> to vector<8xf32>
    %183 = vector.shape_cast %182 : vector<8xf32> to vector<8x1xf32>
    %184 = tpu.reciprocal %183 {approx = true} : vector<8x1xf32> -> vector<8x1xf32>
    %185 = vector.broadcast %184 : vector<8x1xf32> to vector<8x8xf32>
    %186 = arith.mulf %181, %185 : vector<8x8xf32>
    %187 = arith.truncf %186 : vector<8x8xf32> to vector<8x8xbf16>
    %cst_70 = arith.constant dense<0.000000e+00> : vector<8x8xf32>
    %188 = tpu.matmul %187, %175, %cst_70 {dimension_numbers = #tpu.dot_dimension_numbers<[1], [0], [0], [1], [0, 0, 1, 1], [], []>} : vector<8x8xbf16>, vector<8x8xbf16>, vector<8x8xf32> -> vector<8x8xf32>
    %189 = arith.truncf %188 : vector<8x8xf32> to vector<8x8xbf16>
    %c0_71 = arith.constant 0 : index
    %c8_72 = arith.constant 8 : index
    %c0_73 = arith.constant 0 : index
    %190 = vector.load %arg9[%c0_71, %c8_72, %c0_73] : memref<2x32x32xbf16, #tpu.memory_space<vmem>>, vector<1x8x32xbf16>
    %191 = vector.shape_cast %190 : vector<1x8x32xbf16> to vector<8x32xbf16>
    %cst_74 = arith.constant dense<0.000000e+00> : vector<8x32xf32>
    %192 = tpu.matmul %189, %191, %cst_74 {dimension_numbers = #tpu.dot_dimension_numbers<[1], [0], [0], [1], [0, 0, 1, 1], [], []>} : vector<8x8xbf16>, vector<8x32xbf16>, vector<8x32xf32> -> vector<8x32xf32>
    %193 = arith.addf %167, %192 : vector<8x32xf32>
    %194 = vector.extract_strided_slice %138 {offsets = [0, 16], sizes = [8, 8], strides = [1, 1]} : vector<8x32xf32> to vector<8x8xf32>
    %cst_75 = arith.constant 0.353553385 : f32
    %195 = vector.broadcast %cst_75 : f32 to vector<8x8xf32>
    %196 = arith.mulf %194, %195 : vector<8x8xf32>
    %197 = arith.truncf %196 : vector<8x8xf32> to vector<8x8xbf16>
    %198 = vector.extract_strided_slice %139 {offsets = [0, 16], sizes = [8, 8], strides = [1, 1]} : vector<8x32xf32> to vector<8x8xf32>
    %199 = arith.truncf %198 : vector<8x8xf32> to vector<8x8xbf16>
    %200 = vector.extract_strided_slice %140 {offsets = [0, 16], sizes = [8, 8], strides = [1, 1]} : vector<8x32xf32> to vector<8x8xf32>
    %201 = arith.truncf %200 : vector<8x8xf32> to vector<8x8xbf16>
    %cst_76 = arith.constant dense<0.000000e+00> : vector<8x8xf32>
    %202 = tpu.matmul %197, %199, %cst_76 {dimension_numbers = #tpu.dot_dimension_numbers<[1], [1], [0], [0], [0, 0, 1, 0], [], []>} : vector<8x8xbf16>, vector<8x8xbf16>, vector<8x8xf32> -> vector<8x8xf32>
    %cst_77 = arith.constant dense<0xFF800000> : vector<8xf32>
    %203 = vector.multi_reduction <maximumf>, %202, %cst_77 [1] : vector<8x8xf32> to vector<8xf32>
    %204 = vector.shape_cast %203 : vector<8xf32> to vector<8x1xf32>
    %205 = vector.broadcast %204 : vector<8x1xf32> to vector<8x8xf32>
    %206 = arith.subf %202, %205 : vector<8x8xf32>
    %207 = math.exp %206 : vector<8x8xf32>
    %cst_78 = arith.constant dense<0.000000e+00> : vector<8xf32>
    %208 = vector.multi_reduction <add>, %207, %cst_78 [1] : vector<8x8xf32> to vector<8xf32>
    %209 = vector.shape_cast %208 : vector<8xf32> to vector<8x1xf32>
    %210 = tpu.reciprocal %209 {approx = true} : vector<8x1xf32> -> vector<8x1xf32>
    %211 = vector.broadcast %210 : vector<8x1xf32> to vector<8x8xf32>
    %212 = arith.mulf %207, %211 : vector<8x8xf32>
    %213 = arith.truncf %212 : vector<8x8xf32> to vector<8x8xbf16>
    %cst_79 = arith.constant dense<0.000000e+00> : vector<8x8xf32>
    %214 = tpu.matmul %213, %201, %cst_79 {dimension_numbers = #tpu.dot_dimension_numbers<[1], [0], [0], [1], [0, 0, 1, 1], [], []>} : vector<8x8xbf16>, vector<8x8xbf16>, vector<8x8xf32> -> vector<8x8xf32>
    %215 = arith.truncf %214 : vector<8x8xf32> to vector<8x8xbf16>
    %c0_80 = arith.constant 0 : index
    %c16_81 = arith.constant 16 : index
    %c0_82 = arith.constant 0 : index
    %216 = vector.load %arg9[%c0_80, %c16_81, %c0_82] : memref<2x32x32xbf16, #tpu.memory_space<vmem>>, vector<1x8x32xbf16>
    %217 = vector.shape_cast %216 : vector<1x8x32xbf16> to vector<8x32xbf16>
    %cst_83 = arith.constant dense<0.000000e+00> : vector<8x32xf32>
    %218 = tpu.matmul %215, %217, %cst_83 {dimension_numbers = #tpu.dot_dimension_numbers<[1], [0], [0], [1], [0, 0, 1, 1], [], []>} : vector<8x8xbf16>, vector<8x32xbf16>, vector<8x32xf32> -> vector<8x32xf32>
    %219 = arith.addf %193, %218 : vector<8x32xf32>
    %220 = vector.extract_strided_slice %138 {offsets = [0, 24], sizes = [8, 8], strides = [1, 1]} : vector<8x32xf32> to vector<8x8xf32>
    %cst_84 = arith.constant 0.353553385 : f32
    %221 = vector.broadcast %cst_84 : f32 to vector<8x8xf32>
    %222 = arith.mulf %220, %221 : vector<8x8xf32>
    %223 = arith.truncf %222 : vector<8x8xf32> to vector<8x8xbf16>
    %224 = vector.extract_strided_slice %139 {offsets = [0, 24], sizes = [8, 8], strides = [1, 1]} : vector<8x32xf32> to vector<8x8xf32>
    %225 = arith.truncf %224 : vector<8x8xf32> to vector<8x8xbf16>
    %226 = vector.extract_strided_slice %140 {offsets = [0, 24], sizes = [8, 8], strides = [1, 1]} : vector<8x32xf32> to vector<8x8xf32>
    %227 = arith.truncf %226 : vector<8x8xf32> to vector<8x8xbf16>
    %cst_85 = arith.constant dense<0.000000e+00> : vector<8x8xf32>
    %228 = tpu.matmul %223, %225, %cst_85 {dimension_numbers = #tpu.dot_dimension_numbers<[1], [1], [0], [0], [0, 0, 1, 0], [], []>} : vector<8x8xbf16>, vector<8x8xbf16>, vector<8x8xf32> -> vector<8x8xf32>
    %cst_86 = arith.constant dense<0xFF800000> : vector<8xf32>
    %229 = vector.multi_reduction <maximumf>, %228, %cst_86 [1] : vector<8x8xf32> to vector<8xf32>
    %230 = vector.shape_cast %229 : vector<8xf32> to vector<8x1xf32>
    %231 = vector.broadcast %230 : vector<8x1xf32> to vector<8x8xf32>
    %232 = arith.subf %228, %231 : vector<8x8xf32>
    %233 = math.exp %232 : vector<8x8xf32>
    %cst_87 = arith.constant dense<0.000000e+00> : vector<8xf32>
    %234 = vector.multi_reduction <add>, %233, %cst_87 [1] : vector<8x8xf32> to vector<8xf32>
    %235 = vector.shape_cast %234 : vector<8xf32> to vector<8x1xf32>
    %236 = tpu.reciprocal %235 {approx = true} : vector<8x1xf32> -> vector<8x1xf32>
    %237 = vector.broadcast %236 : vector<8x1xf32> to vector<8x8xf32>
    %238 = arith.mulf %233, %237 : vector<8x8xf32>
    %239 = arith.truncf %238 : vector<8x8xf32> to vector<8x8xbf16>
    %cst_88 = arith.constant dense<0.000000e+00> : vector<8x8xf32>
    %240 = tpu.matmul %239, %227, %cst_88 {dimension_numbers = #tpu.dot_dimension_numbers<[1], [0], [0], [1], [0, 0, 1, 1], [], []>} : vector<8x8xbf16>, vector<8x8xbf16>, vector<8x8xf32> -> vector<8x8xf32>
    %241 = arith.truncf %240 : vector<8x8xf32> to vector<8x8xbf16>
    %c0_89 = arith.constant 0 : index
    %c24_90 = arith.constant 24 : index
    %c0_91 = arith.constant 0 : index
    %242 = vector.load %arg9[%c0_89, %c24_90, %c0_91] : memref<2x32x32xbf16, #tpu.memory_space<vmem>>, vector<1x8x32xbf16>
    %243 = vector.shape_cast %242 : vector<1x8x32xbf16> to vector<8x32xbf16>
    %cst_92 = arith.constant dense<0.000000e+00> : vector<8x32xf32>
    %244 = tpu.matmul %241, %243, %cst_92 {dimension_numbers = #tpu.dot_dimension_numbers<[1], [0], [0], [1], [0, 0, 1, 1], [], []>} : vector<8x8xbf16>, vector<8x32xbf16>, vector<8x32xf32> -> vector<8x32xf32>
    %245 = arith.addf %219, %244 : vector<8x32xf32>
    %246 = tpu.concatenate %137, %245 in 0 : vector<8x32xf32>, vector<8x32xf32> -> vector<16x32xf32>
    %c0_93 = arith.constant 0 : index
    %c0_94 = arith.constant 0 : index
    %c0_95 = arith.constant 0 : index
    %247 = vector.load %arg10[%c0_93, %c0_94, %c0_95] : memref<2x1x32xf32, #tpu.memory_space<vmem>>, vector<1x1x32xf32>
    %248 = vector.shape_cast %247 : vector<1x1x32xf32> to vector<1x32xf32>
    %249 = vector.broadcast %248 : vector<1x32xf32> to vector<16x32xf32>
    %250 = arith.addf %246, %249 : vector<16x32xf32>
    %251 = arith.addf %1, %250 : vector<16x32xf32>
    %c0_96 = arith.constant 0 : index
    %c0_97 = arith.constant 0 : index
    %c0_98 = arith.constant 0 : index
    %252 = vector.load %arg11[%c0_96, %c0_97, %c0_98] : memref<2x1x32xf32, #tpu.memory_space<vmem>>, vector<1x1x32xf32>
    %253 = vector.shape_cast %252 : vector<1x1x32xf32> to vector<1x32xf32>
    %c0_99 = arith.constant 0 : index
    %c0_100 = arith.constant 0 : index
    %c0_101 = arith.constant 0 : index
    %254 = vector.load %arg12[%c0_99, %c0_100, %c0_101] : memref<2x1x32xf32, #tpu.memory_space<vmem>>, vector<1x1x32xf32>
    %255 = vector.shape_cast %254 : vector<1x1x32xf32> to vector<1x32xf32>
    %cst_102 = arith.constant dense<0.000000e+00> : vector<16xf32>
    %256 = vector.multi_reduction <add>, %251, %cst_102 [1] : vector<16x32xf32> to vector<16xf32>
    %257 = vector.shape_cast %256 : vector<16xf32> to vector<16x1xf32>
    %cst_103 = arith.constant 3.200000e+01 : f32
    %258 = vector.broadcast %cst_103 : f32 to vector<16x1xf32>
    %259 = arith.divf %257, %258 : vector<16x1xf32>
    %260 = vector.broadcast %259 : vector<16x1xf32> to vector<16x32xf32>
    %261 = arith.subf %251, %260 : vector<16x32xf32>
    %262 = arith.mulf %261, %261 : vector<16x32xf32>
    %cst_104 = arith.constant dense<0.000000e+00> : vector<16xf32>
    %263 = vector.multi_reduction <add>, %262, %cst_104 [1] : vector<16x32xf32> to vector<16xf32>
    %264 = vector.shape_cast %263 : vector<16xf32> to vector<16x1xf32>
    %cst_105 = arith.constant 3.200000e+01 : f32
    %265 = vector.broadcast %cst_105 : f32 to vector<16x1xf32>
    %266 = arith.divf %264, %265 : vector<16x1xf32>
    %cst_106 = arith.constant 9.99999974E-6 : f32
    %267 = vector.broadcast %cst_106 : f32 to vector<16x1xf32>
    %268 = arith.addf %266, %267 : vector<16x1xf32>
    %269 = math.rsqrt %268 : vector<16x1xf32>
    %270 = vector.broadcast %269 : vector<16x1xf32> to vector<16x32xf32>
    %271 = arith.mulf %261, %270 : vector<16x32xf32>
    %272 = vector.broadcast %253 : vector<1x32xf32> to vector<16x32xf32>
    %273 = arith.mulf %271, %272 : vector<16x32xf32>
    %274 = vector.broadcast %255 : vector<1x32xf32> to vector<16x32xf32>
    %275 = arith.addf %273, %274 : vector<16x32xf32>
    %276 = arith.addf %275, %3 : vector<16x32xf32>
    %277 = arith.truncf %276 : vector<16x32xf32> to vector<16x32xbf16>
    %c0_107 = arith.constant 0 : index
    %c0_108 = arith.constant 0 : index
    %c0_109 = arith.constant 0 : index
    %278 = vector.load %arg13[%c0_107, %c0_108, %c0_109] : memref<2x32x32xbf16, #tpu.memory_space<vmem>>, vector<1x32x32xbf16>
    %279 = vector.shape_cast %278 : vector<1x32x32xbf16> to vector<32x32xbf16>
    %cst_110 = arith.constant dense<0.000000e+00> : vector<16x32xf32>
    %280 = tpu.matmul %277, %279, %cst_110 {dimension_numbers = #tpu.dot_dimension_numbers<[1], [0], [0], [1], [0, 0, 1, 1], [], []>} : vector<16x32xbf16>, vector<32x32xbf16>, vector<16x32xf32> -> vector<16x32xf32>
    %c0_111 = arith.constant 0 : index
    %c0_112 = arith.constant 0 : index
    %c0_113 = arith.constant 0 : index
    %281 = vector.load %arg14[%c0_111, %c0_112, %c0_113] : memref<2x1x32xf32, #tpu.memory_space<vmem>>, vector<1x1x32xf32>
    %282 = vector.shape_cast %281 : vector<1x1x32xf32> to vector<1x32xf32>
    %283 = vector.broadcast %282 : vector<1x32xf32> to vector<16x32xf32>
    %284 = arith.addf %280, %283 : vector<16x32xf32>
    %c0_114 = arith.constant 0 : index
    %c0_115 = arith.constant 0 : index
    %c0_116 = arith.constant 0 : index
    %285 = vector.load %arg15[%c0_114, %c0_115, %c0_116] : memref<2x32x32xbf16, #tpu.memory_space<vmem>>, vector<1x32x32xbf16>
    %286 = vector.shape_cast %285 : vector<1x32x32xbf16> to vector<32x32xbf16>
    %cst_117 = arith.constant dense<0.000000e+00> : vector<32x32xf32>
    %287 = tpu.matmul %9, %286, %cst_117 {dimension_numbers = #tpu.dot_dimension_numbers<[1], [0], [0], [1], [0, 0, 1, 1], [], []>} : vector<32x32xbf16>, vector<32x32xbf16>, vector<32x32xf32> -> vector<32x32xf32>
    %c0_118 = arith.constant 0 : index
    %c0_119 = arith.constant 0 : index
    %c0_120 = arith.constant 0 : index
    %288 = vector.load %arg16[%c0_118, %c0_119, %c0_120] : memref<2x1x32xf32, #tpu.memory_space<vmem>>, vector<1x1x32xf32>
    %289 = vector.shape_cast %288 : vector<1x1x32xf32> to vector<1x32xf32>
    %290 = vector.broadcast %289 : vector<1x32xf32> to vector<32x32xf32>
    %291 = arith.addf %287, %290 : vector<32x32xf32>
    %c0_121 = arith.constant 0 : index
    %c0_122 = arith.constant 0 : index
    %c0_123 = arith.constant 0 : index
    %292 = vector.load %arg17[%c0_121, %c0_122, %c0_123] : memref<2x32x32xbf16, #tpu.memory_space<vmem>>, vector<1x32x32xbf16>
    %293 = vector.shape_cast %292 : vector<1x32x32xbf16> to vector<32x32xbf16>
    %cst_124 = arith.constant dense<0.000000e+00> : vector<32x32xf32>
    %294 = tpu.matmul %10, %293, %cst_124 {dimension_numbers = #tpu.dot_dimension_numbers<[1], [0], [0], [1], [0, 0, 1, 1], [], []>} : vector<32x32xbf16>, vector<32x32xbf16>, vector<32x32xf32> -> vector<32x32xf32>
    %c0_125 = arith.constant 0 : index
    %c0_126 = arith.constant 0 : index
    %c0_127 = arith.constant 0 : index
    %295 = vector.load %arg18[%c0_125, %c0_126, %c0_127] : memref<2x1x32xf32, #tpu.memory_space<vmem>>, vector<1x1x32xf32>
    %296 = vector.shape_cast %295 : vector<1x1x32xf32> to vector<1x32xf32>
    %297 = vector.broadcast %296 : vector<1x32xf32> to vector<32x32xf32>
    %298 = arith.addf %294, %297 : vector<32x32xf32>
    %299 = vector.extract_strided_slice %284 {offsets = [0, 0], sizes = [8, 32], strides = [1, 1]} : vector<16x32xf32> to vector<8x32xf32>
    %300 = vector.extract_strided_slice %291 {offsets = [0, 0], sizes = [16, 32], strides = [1, 1]} : vector<32x32xf32> to vector<16x32xf32>
    %301 = vector.extract_strided_slice %298 {offsets = [0, 0], sizes = [16, 32], strides = [1, 1]} : vector<32x32xf32> to vector<16x32xf32>
    %cst_128 = arith.constant 0.000000e+00 : f32
    %302 = vector.broadcast %cst_128 : f32 to vector<8x32xf32>
    %303 = vector.extract_strided_slice %299 {offsets = [0, 0], sizes = [8, 8], strides = [1, 1]} : vector<8x32xf32> to vector<8x8xf32>
    %cst_129 = arith.constant 0.353553385 : f32
    %304 = vector.broadcast %cst_129 : f32 to vector<8x8xf32>
    %305 = arith.mulf %303, %304 : vector<8x8xf32>
    %306 = arith.truncf %305 : vector<8x8xf32> to vector<8x8xbf16>
    %307 = vector.extract_strided_slice %300 {offsets = [0, 0], sizes = [16, 8], strides = [1, 1]} : vector<16x32xf32> to vector<16x8xf32>
    %308 = arith.truncf %307 : vector<16x8xf32> to vector<16x8xbf16>
    %309 = vector.extract_strided_slice %301 {offsets = [0, 0], sizes = [16, 8], strides = [1, 1]} : vector<16x32xf32> to vector<16x8xf32>
    %310 = arith.truncf %309 : vector<16x8xf32> to vector<16x8xbf16>
    %cst_130 = arith.constant dense<0.000000e+00> : vector<8x16xf32>
    %311 = tpu.matmul %306, %308, %cst_130 {dimension_numbers = #tpu.dot_dimension_numbers<[1], [1], [0], [0], [0, 0, 1, 0], [], []>} : vector<8x8xbf16>, vector<16x8xbf16>, vector<8x16xf32> -> vector<8x16xf32>
    %cst_131 = arith.constant dense<0xFF800000> : vector<8xf32>
    %312 = vector.multi_reduction <maximumf>, %311, %cst_131 [1] : vector<8x16xf32> to vector<8xf32>
    %313 = vector.shape_cast %312 : vector<8xf32> to vector<8x1xf32>
    %314 = vector.broadcast %313 : vector<8x1xf32> to vector<8x16xf32>
    %315 = arith.subf %311, %314 : vector<8x16xf32>
    %316 = math.exp %315 : vector<8x16xf32>
    %cst_132 = arith.constant dense<0.000000e+00> : vector<8xf32>
    %317 = vector.multi_reduction <add>, %316, %cst_132 [1] : vector<8x16xf32> to vector<8xf32>
    %318 = vector.shape_cast %317 : vector<8xf32> to vector<8x1xf32>
    %319 = tpu.reciprocal %318 {approx = true} : vector<8x1xf32> -> vector<8x1xf32>
    %320 = vector.broadcast %319 : vector<8x1xf32> to vector<8x16xf32>
    %321 = arith.mulf %316, %320 : vector<8x16xf32>
    %322 = arith.truncf %321 : vector<8x16xf32> to vector<8x16xbf16>
    %cst_133 = arith.constant dense<0.000000e+00> : vector<8x8xf32>
    %323 = tpu.matmul %322, %310, %cst_133 {dimension_numbers = #tpu.dot_dimension_numbers<[1], [0], [0], [1], [0, 0, 1, 1], [], []>} : vector<8x16xbf16>, vector<16x8xbf16>, vector<8x8xf32> -> vector<8x8xf32>
    %324 = arith.truncf %323 : vector<8x8xf32> to vector<8x8xbf16>
    %c0_134 = arith.constant 0 : index
    %c0_135 = arith.constant 0 : index
    %c0_136 = arith.constant 0 : index
    %325 = vector.load %arg19[%c0_134, %c0_135, %c0_136] : memref<2x32x32xbf16, #tpu.memory_space<vmem>>, vector<1x8x32xbf16>
    %326 = vector.shape_cast %325 : vector<1x8x32xbf16> to vector<8x32xbf16>
    %cst_137 = arith.constant dense<0.000000e+00> : vector<8x32xf32>
    %327 = tpu.matmul %324, %326, %cst_137 {dimension_numbers = #tpu.dot_dimension_numbers<[1], [0], [0], [1], [0, 0, 1, 1], [], []>} : vector<8x8xbf16>, vector<8x32xbf16>, vector<8x32xf32> -> vector<8x32xf32>
    %328 = arith.addf %302, %327 : vector<8x32xf32>
    %329 = vector.extract_strided_slice %299 {offsets = [0, 8], sizes = [8, 8], strides = [1, 1]} : vector<8x32xf32> to vector<8x8xf32>
    %cst_138 = arith.constant 0.353553385 : f32
    %330 = vector.broadcast %cst_138 : f32 to vector<8x8xf32>
    %331 = arith.mulf %329, %330 : vector<8x8xf32>
    %332 = arith.truncf %331 : vector<8x8xf32> to vector<8x8xbf16>
    %333 = vector.extract_strided_slice %300 {offsets = [0, 8], sizes = [16, 8], strides = [1, 1]} : vector<16x32xf32> to vector<16x8xf32>
    %334 = arith.truncf %333 : vector<16x8xf32> to vector<16x8xbf16>
    %335 = vector.extract_strided_slice %301 {offsets = [0, 8], sizes = [16, 8], strides = [1, 1]} : vector<16x32xf32> to vector<16x8xf32>
    %336 = arith.truncf %335 : vector<16x8xf32> to vector<16x8xbf16>
    %cst_139 = arith.constant dense<0.000000e+00> : vector<8x16xf32>
    %337 = tpu.matmul %332, %334, %cst_139 {dimension_numbers = #tpu.dot_dimension_numbers<[1], [1], [0], [0], [0, 0, 1, 0], [], []>} : vector<8x8xbf16>, vector<16x8xbf16>, vector<8x16xf32> -> vector<8x16xf32>
    %cst_140 = arith.constant dense<0xFF800000> : vector<8xf32>
    %338 = vector.multi_reduction <maximumf>, %337, %cst_140 [1] : vector<8x16xf32> to vector<8xf32>
    %339 = vector.shape_cast %338 : vector<8xf32> to vector<8x1xf32>
    %340 = vector.broadcast %339 : vector<8x1xf32> to vector<8x16xf32>
    %341 = arith.subf %337, %340 : vector<8x16xf32>
    %342 = math.exp %341 : vector<8x16xf32>
    %cst_141 = arith.constant dense<0.000000e+00> : vector<8xf32>
    %343 = vector.multi_reduction <add>, %342, %cst_141 [1] : vector<8x16xf32> to vector<8xf32>
    %344 = vector.shape_cast %343 : vector<8xf32> to vector<8x1xf32>
    %345 = tpu.reciprocal %344 {approx = true} : vector<8x1xf32> -> vector<8x1xf32>
    %346 = vector.broadcast %345 : vector<8x1xf32> to vector<8x16xf32>
    %347 = arith.mulf %342, %346 : vector<8x16xf32>
    %348 = arith.truncf %347 : vector<8x16xf32> to vector<8x16xbf16>
    %cst_142 = arith.constant dense<0.000000e+00> : vector<8x8xf32>
    %349 = tpu.matmul %348, %336, %cst_142 {dimension_numbers = #tpu.dot_dimension_numbers<[1], [0], [0], [1], [0, 0, 1, 1], [], []>} : vector<8x16xbf16>, vector<16x8xbf16>, vector<8x8xf32> -> vector<8x8xf32>
    %350 = arith.truncf %349 : vector<8x8xf32> to vector<8x8xbf16>
    %c0_143 = arith.constant 0 : index
    %c8_144 = arith.constant 8 : index
    %c0_145 = arith.constant 0 : index
    %351 = vector.load %arg19[%c0_143, %c8_144, %c0_145] : memref<2x32x32xbf16, #tpu.memory_space<vmem>>, vector<1x8x32xbf16>
    %352 = vector.shape_cast %351 : vector<1x8x32xbf16> to vector<8x32xbf16>
    %cst_146 = arith.constant dense<0.000000e+00> : vector<8x32xf32>
    %353 = tpu.matmul %350, %352, %cst_146 {dimension_numbers = #tpu.dot_dimension_numbers<[1], [0], [0], [1], [0, 0, 1, 1], [], []>} : vector<8x8xbf16>, vector<8x32xbf16>, vector<8x32xf32> -> vector<8x32xf32>
    %354 = arith.addf %328, %353 : vector<8x32xf32>
    %355 = vector.extract_strided_slice %299 {offsets = [0, 16], sizes = [8, 8], strides = [1, 1]} : vector<8x32xf32> to vector<8x8xf32>
    %cst_147 = arith.constant 0.353553385 : f32
    %356 = vector.broadcast %cst_147 : f32 to vector<8x8xf32>
    %357 = arith.mulf %355, %356 : vector<8x8xf32>
    %358 = arith.truncf %357 : vector<8x8xf32> to vector<8x8xbf16>
    %359 = vector.extract_strided_slice %300 {offsets = [0, 16], sizes = [16, 8], strides = [1, 1]} : vector<16x32xf32> to vector<16x8xf32>
    %360 = arith.truncf %359 : vector<16x8xf32> to vector<16x8xbf16>
    %361 = vector.extract_strided_slice %301 {offsets = [0, 16], sizes = [16, 8], strides = [1, 1]} : vector<16x32xf32> to vector<16x8xf32>
    %362 = arith.truncf %361 : vector<16x8xf32> to vector<16x8xbf16>
    %cst_148 = arith.constant dense<0.000000e+00> : vector<8x16xf32>
    %363 = tpu.matmul %358, %360, %cst_148 {dimension_numbers = #tpu.dot_dimension_numbers<[1], [1], [0], [0], [0, 0, 1, 0], [], []>} : vector<8x8xbf16>, vector<16x8xbf16>, vector<8x16xf32> -> vector<8x16xf32>
    %cst_149 = arith.constant dense<0xFF800000> : vector<8xf32>
    %364 = vector.multi_reduction <maximumf>, %363, %cst_149 [1] : vector<8x16xf32> to vector<8xf32>
    %365 = vector.shape_cast %364 : vector<8xf32> to vector<8x1xf32>
    %366 = vector.broadcast %365 : vector<8x1xf32> to vector<8x16xf32>
    %367 = arith.subf %363, %366 : vector<8x16xf32>
    %368 = math.exp %367 : vector<8x16xf32>
    %cst_150 = arith.constant dense<0.000000e+00> : vector<8xf32>
    %369 = vector.multi_reduction <add>, %368, %cst_150 [1] : vector<8x16xf32> to vector<8xf32>
    %370 = vector.shape_cast %369 : vector<8xf32> to vector<8x1xf32>
    %371 = tpu.reciprocal %370 {approx = true} : vector<8x1xf32> -> vector<8x1xf32>
    %372 = vector.broadcast %371 : vector<8x1xf32> to vector<8x16xf32>
    %373 = arith.mulf %368, %372 : vector<8x16xf32>
    %374 = arith.truncf %373 : vector<8x16xf32> to vector<8x16xbf16>
    %cst_151 = arith.constant dense<0.000000e+00> : vector<8x8xf32>
    %375 = tpu.matmul %374, %362, %cst_151 {dimension_numbers = #tpu.dot_dimension_numbers<[1], [0], [0], [1], [0, 0, 1, 1], [], []>} : vector<8x16xbf16>, vector<16x8xbf16>, vector<8x8xf32> -> vector<8x8xf32>
    %376 = arith.truncf %375 : vector<8x8xf32> to vector<8x8xbf16>
    %c0_152 = arith.constant 0 : index
    %c16_153 = arith.constant 16 : index
    %c0_154 = arith.constant 0 : index
    %377 = vector.load %arg19[%c0_152, %c16_153, %c0_154] : memref<2x32x32xbf16, #tpu.memory_space<vmem>>, vector<1x8x32xbf16>
    %378 = vector.shape_cast %377 : vector<1x8x32xbf16> to vector<8x32xbf16>
    %cst_155 = arith.constant dense<0.000000e+00> : vector<8x32xf32>
    %379 = tpu.matmul %376, %378, %cst_155 {dimension_numbers = #tpu.dot_dimension_numbers<[1], [0], [0], [1], [0, 0, 1, 1], [], []>} : vector<8x8xbf16>, vector<8x32xbf16>, vector<8x32xf32> -> vector<8x32xf32>
    %380 = arith.addf %354, %379 : vector<8x32xf32>
    %381 = vector.extract_strided_slice %299 {offsets = [0, 24], sizes = [8, 8], strides = [1, 1]} : vector<8x32xf32> to vector<8x8xf32>
    %cst_156 = arith.constant 0.353553385 : f32
    %382 = vector.broadcast %cst_156 : f32 to vector<8x8xf32>
    %383 = arith.mulf %381, %382 : vector<8x8xf32>
    %384 = arith.truncf %383 : vector<8x8xf32> to vector<8x8xbf16>
    %385 = vector.extract_strided_slice %300 {offsets = [0, 24], sizes = [16, 8], strides = [1, 1]} : vector<16x32xf32> to vector<16x8xf32>
    %386 = arith.truncf %385 : vector<16x8xf32> to vector<16x8xbf16>
    %387 = vector.extract_strided_slice %301 {offsets = [0, 24], sizes = [16, 8], strides = [1, 1]} : vector<16x32xf32> to vector<16x8xf32>
    %388 = arith.truncf %387 : vector<16x8xf32> to vector<16x8xbf16>
    %cst_157 = arith.constant dense<0.000000e+00> : vector<8x16xf32>
    %389 = tpu.matmul %384, %386, %cst_157 {dimension_numbers = #tpu.dot_dimension_numbers<[1], [1], [0], [0], [0, 0, 1, 0], [], []>} : vector<8x8xbf16>, vector<16x8xbf16>, vector<8x16xf32> -> vector<8x16xf32>
    %cst_158 = arith.constant dense<0xFF800000> : vector<8xf32>
    %390 = vector.multi_reduction <maximumf>, %389, %cst_158 [1] : vector<8x16xf32> to vector<8xf32>
    %391 = vector.shape_cast %390 : vector<8xf32> to vector<8x1xf32>
    %392 = vector.broadcast %391 : vector<8x1xf32> to vector<8x16xf32>
    %393 = arith.subf %389, %392 : vector<8x16xf32>
    %394 = math.exp %393 : vector<8x16xf32>
    %cst_159 = arith.constant dense<0.000000e+00> : vector<8xf32>
    %395 = vector.multi_reduction <add>, %394, %cst_159 [1] : vector<8x16xf32> to vector<8xf32>
    %396 = vector.shape_cast %395 : vector<8xf32> to vector<8x1xf32>
    %397 = tpu.reciprocal %396 {approx = true} : vector<8x1xf32> -> vector<8x1xf32>
    %398 = vector.broadcast %397 : vector<8x1xf32> to vector<8x16xf32>
    %399 = arith.mulf %394, %398 : vector<8x16xf32>
    %400 = arith.truncf %399 : vector<8x16xf32> to vector<8x16xbf16>
    %cst_160 = arith.constant dense<0.000000e+00> : vector<8x8xf32>
    %401 = tpu.matmul %400, %388, %cst_160 {dimension_numbers = #tpu.dot_dimension_numbers<[1], [0], [0], [1], [0, 0, 1, 1], [], []>} : vector<8x16xbf16>, vector<16x8xbf16>, vector<8x8xf32> -> vector<8x8xf32>
    %402 = arith.truncf %401 : vector<8x8xf32> to vector<8x8xbf16>
    %c0_161 = arith.constant 0 : index
    %c24_162 = arith.constant 24 : index
    %c0_163 = arith.constant 0 : index
    %403 = vector.load %arg19[%c0_161, %c24_162, %c0_163] : memref<2x32x32xbf16, #tpu.memory_space<vmem>>, vector<1x8x32xbf16>
    %404 = vector.shape_cast %403 : vector<1x8x32xbf16> to vector<8x32xbf16>
    %cst_164 = arith.constant dense<0.000000e+00> : vector<8x32xf32>
    %405 = tpu.matmul %402, %404, %cst_164 {dimension_numbers = #tpu.dot_dimension_numbers<[1], [0], [0], [1], [0, 0, 1, 1], [], []>} : vector<8x8xbf16>, vector<8x32xbf16>, vector<8x32xf32> -> vector<8x32xf32>
    %406 = arith.addf %380, %405 : vector<8x32xf32>
    %407 = vector.extract_strided_slice %284 {offsets = [8, 0], sizes = [8, 32], strides = [1, 1]} : vector<16x32xf32> to vector<8x32xf32>
    %408 = vector.extract_strided_slice %291 {offsets = [16, 0], sizes = [16, 32], strides = [1, 1]} : vector<32x32xf32> to vector<16x32xf32>
    %409 = vector.extract_strided_slice %298 {offsets = [16, 0], sizes = [16, 32], strides = [1, 1]} : vector<32x32xf32> to vector<16x32xf32>
    %cst_165 = arith.constant 0.000000e+00 : f32
    %410 = vector.broadcast %cst_165 : f32 to vector<8x32xf32>
    %411 = vector.extract_strided_slice %407 {offsets = [0, 0], sizes = [8, 8], strides = [1, 1]} : vector<8x32xf32> to vector<8x8xf32>
    %cst_166 = arith.constant 0.353553385 : f32
    %412 = vector.broadcast %cst_166 : f32 to vector<8x8xf32>
    %413 = arith.mulf %411, %412 : vector<8x8xf32>
    %414 = arith.truncf %413 : vector<8x8xf32> to vector<8x8xbf16>
    %415 = vector.extract_strided_slice %408 {offsets = [0, 0], sizes = [16, 8], strides = [1, 1]} : vector<16x32xf32> to vector<16x8xf32>
    %416 = arith.truncf %415 : vector<16x8xf32> to vector<16x8xbf16>
    %417 = vector.extract_strided_slice %409 {offsets = [0, 0], sizes = [16, 8], strides = [1, 1]} : vector<16x32xf32> to vector<16x8xf32>
    %418 = arith.truncf %417 : vector<16x8xf32> to vector<16x8xbf16>
    %cst_167 = arith.constant dense<0.000000e+00> : vector<8x16xf32>
    %419 = tpu.matmul %414, %416, %cst_167 {dimension_numbers = #tpu.dot_dimension_numbers<[1], [1], [0], [0], [0, 0, 1, 0], [], []>} : vector<8x8xbf16>, vector<16x8xbf16>, vector<8x16xf32> -> vector<8x16xf32>
    %cst_168 = arith.constant dense<0xFF800000> : vector<8xf32>
    %420 = vector.multi_reduction <maximumf>, %419, %cst_168 [1] : vector<8x16xf32> to vector<8xf32>
    %421 = vector.shape_cast %420 : vector<8xf32> to vector<8x1xf32>
    %422 = vector.broadcast %421 : vector<8x1xf32> to vector<8x16xf32>
    %423 = arith.subf %419, %422 : vector<8x16xf32>
    %424 = math.exp %423 : vector<8x16xf32>
    %cst_169 = arith.constant dense<0.000000e+00> : vector<8xf32>
    %425 = vector.multi_reduction <add>, %424, %cst_169 [1] : vector<8x16xf32> to vector<8xf32>
    %426 = vector.shape_cast %425 : vector<8xf32> to vector<8x1xf32>
    %427 = tpu.reciprocal %426 {approx = true} : vector<8x1xf32> -> vector<8x1xf32>
    %428 = vector.broadcast %427 : vector<8x1xf32> to vector<8x16xf32>
    %429 = arith.mulf %424, %428 : vector<8x16xf32>
    %430 = arith.truncf %429 : vector<8x16xf32> to vector<8x16xbf16>
    %cst_170 = arith.constant dense<0.000000e+00> : vector<8x8xf32>
    %431 = tpu.matmul %430, %418, %cst_170 {dimension_numbers = #tpu.dot_dimension_numbers<[1], [0], [0], [1], [0, 0, 1, 1], [], []>} : vector<8x16xbf16>, vector<16x8xbf16>, vector<8x8xf32> -> vector<8x8xf32>
    %432 = arith.truncf %431 : vector<8x8xf32> to vector<8x8xbf16>
    %c0_171 = arith.constant 0 : index
    %c0_172 = arith.constant 0 : index
    %c0_173 = arith.constant 0 : index
    %433 = vector.load %arg19[%c0_171, %c0_172, %c0_173] : memref<2x32x32xbf16, #tpu.memory_space<vmem>>, vector<1x8x32xbf16>
    %434 = vector.shape_cast %433 : vector<1x8x32xbf16> to vector<8x32xbf16>
    %cst_174 = arith.constant dense<0.000000e+00> : vector<8x32xf32>
    %435 = tpu.matmul %432, %434, %cst_174 {dimension_numbers = #tpu.dot_dimension_numbers<[1], [0], [0], [1], [0, 0, 1, 1], [], []>} : vector<8x8xbf16>, vector<8x32xbf16>, vector<8x32xf32> -> vector<8x32xf32>
    %436 = arith.addf %410, %435 : vector<8x32xf32>
    %437 = vector.extract_strided_slice %407 {offsets = [0, 8], sizes = [8, 8], strides = [1, 1]} : vector<8x32xf32> to vector<8x8xf32>
    %cst_175 = arith.constant 0.353553385 : f32
    %438 = vector.broadcast %cst_175 : f32 to vector<8x8xf32>
    %439 = arith.mulf %437, %438 : vector<8x8xf32>
    %440 = arith.truncf %439 : vector<8x8xf32> to vector<8x8xbf16>
    %441 = vector.extract_strided_slice %408 {offsets = [0, 8], sizes = [16, 8], strides = [1, 1]} : vector<16x32xf32> to vector<16x8xf32>
    %442 = arith.truncf %441 : vector<16x8xf32> to vector<16x8xbf16>
    %443 = vector.extract_strided_slice %409 {offsets = [0, 8], sizes = [16, 8], strides = [1, 1]} : vector<16x32xf32> to vector<16x8xf32>
    %444 = arith.truncf %443 : vector<16x8xf32> to vector<16x8xbf16>
    %cst_176 = arith.constant dense<0.000000e+00> : vector<8x16xf32>
    %445 = tpu.matmul %440, %442, %cst_176 {dimension_numbers = #tpu.dot_dimension_numbers<[1], [1], [0], [0], [0, 0, 1, 0], [], []>} : vector<8x8xbf16>, vector<16x8xbf16>, vector<8x16xf32> -> vector<8x16xf32>
    %cst_177 = arith.constant dense<0xFF800000> : vector<8xf32>
    %446 = vector.multi_reduction <maximumf>, %445, %cst_177 [1] : vector<8x16xf32> to vector<8xf32>
    %447 = vector.shape_cast %446 : vector<8xf32> to vector<8x1xf32>
    %448 = vector.broadcast %447 : vector<8x1xf32> to vector<8x16xf32>
    %449 = arith.subf %445, %448 : vector<8x16xf32>
    %450 = math.exp %449 : vector<8x16xf32>
    %cst_178 = arith.constant dense<0.000000e+00> : vector<8xf32>
    %451 = vector.multi_reduction <add>, %450, %cst_178 [1] : vector<8x16xf32> to vector<8xf32>
    %452 = vector.shape_cast %451 : vector<8xf32> to vector<8x1xf32>
    %453 = tpu.reciprocal %452 {approx = true} : vector<8x1xf32> -> vector<8x1xf32>
    %454 = vector.broadcast %453 : vector<8x1xf32> to vector<8x16xf32>
    %455 = arith.mulf %450, %454 : vector<8x16xf32>
    %456 = arith.truncf %455 : vector<8x16xf32> to vector<8x16xbf16>
    %cst_179 = arith.constant dense<0.000000e+00> : vector<8x8xf32>
    %457 = tpu.matmul %456, %444, %cst_179 {dimension_numbers = #tpu.dot_dimension_numbers<[1], [0], [0], [1], [0, 0, 1, 1], [], []>} : vector<8x16xbf16>, vector<16x8xbf16>, vector<8x8xf32> -> vector<8x8xf32>
    %458 = arith.truncf %457 : vector<8x8xf32> to vector<8x8xbf16>
    %c0_180 = arith.constant 0 : index
    %c8_181 = arith.constant 8 : index
    %c0_182 = arith.constant 0 : index
    %459 = vector.load %arg19[%c0_180, %c8_181, %c0_182] : memref<2x32x32xbf16, #tpu.memory_space<vmem>>, vector<1x8x32xbf16>
    %460 = vector.shape_cast %459 : vector<1x8x32xbf16> to vector<8x32xbf16>
    %cst_183 = arith.constant dense<0.000000e+00> : vector<8x32xf32>
    %461 = tpu.matmul %458, %460, %cst_183 {dimension_numbers = #tpu.dot_dimension_numbers<[1], [0], [0], [1], [0, 0, 1, 1], [], []>} : vector<8x8xbf16>, vector<8x32xbf16>, vector<8x32xf32> -> vector<8x32xf32>
    %462 = arith.addf %436, %461 : vector<8x32xf32>
    %463 = vector.extract_strided_slice %407 {offsets = [0, 16], sizes = [8, 8], strides = [1, 1]} : vector<8x32xf32> to vector<8x8xf32>
    %cst_184 = arith.constant 0.353553385 : f32
    %464 = vector.broadcast %cst_184 : f32 to vector<8x8xf32>
    %465 = arith.mulf %463, %464 : vector<8x8xf32>
    %466 = arith.truncf %465 : vector<8x8xf32> to vector<8x8xbf16>
    %467 = vector.extract_strided_slice %408 {offsets = [0, 16], sizes = [16, 8], strides = [1, 1]} : vector<16x32xf32> to vector<16x8xf32>
    %468 = arith.truncf %467 : vector<16x8xf32> to vector<16x8xbf16>
    %469 = vector.extract_strided_slice %409 {offsets = [0, 16], sizes = [16, 8], strides = [1, 1]} : vector<16x32xf32> to vector<16x8xf32>
    %470 = arith.truncf %469 : vector<16x8xf32> to vector<16x8xbf16>
    %cst_185 = arith.constant dense<0.000000e+00> : vector<8x16xf32>
    %471 = tpu.matmul %466, %468, %cst_185 {dimension_numbers = #tpu.dot_dimension_numbers<[1], [1], [0], [0], [0, 0, 1, 0], [], []>} : vector<8x8xbf16>, vector<16x8xbf16>, vector<8x16xf32> -> vector<8x16xf32>
    %cst_186 = arith.constant dense<0xFF800000> : vector<8xf32>
    %472 = vector.multi_reduction <maximumf>, %471, %cst_186 [1] : vector<8x16xf32> to vector<8xf32>
    %473 = vector.shape_cast %472 : vector<8xf32> to vector<8x1xf32>
    %474 = vector.broadcast %473 : vector<8x1xf32> to vector<8x16xf32>
    %475 = arith.subf %471, %474 : vector<8x16xf32>
    %476 = math.exp %475 : vector<8x16xf32>
    %cst_187 = arith.constant dense<0.000000e+00> : vector<8xf32>
    %477 = vector.multi_reduction <add>, %476, %cst_187 [1] : vector<8x16xf32> to vector<8xf32>
    %478 = vector.shape_cast %477 : vector<8xf32> to vector<8x1xf32>
    %479 = tpu.reciprocal %478 {approx = true} : vector<8x1xf32> -> vector<8x1xf32>
    %480 = vector.broadcast %479 : vector<8x1xf32> to vector<8x16xf32>
    %481 = arith.mulf %476, %480 : vector<8x16xf32>
    %482 = arith.truncf %481 : vector<8x16xf32> to vector<8x16xbf16>
    %cst_188 = arith.constant dense<0.000000e+00> : vector<8x8xf32>
    %483 = tpu.matmul %482, %470, %cst_188 {dimension_numbers = #tpu.dot_dimension_numbers<[1], [0], [0], [1], [0, 0, 1, 1], [], []>} : vector<8x16xbf16>, vector<16x8xbf16>, vector<8x8xf32> -> vector<8x8xf32>
    %484 = arith.truncf %483 : vector<8x8xf32> to vector<8x8xbf16>
    %c0_189 = arith.constant 0 : index
    %c16_190 = arith.constant 16 : index
    %c0_191 = arith.constant 0 : index
    %485 = vector.load %arg19[%c0_189, %c16_190, %c0_191] : memref<2x32x32xbf16, #tpu.memory_space<vmem>>, vector<1x8x32xbf16>
    %486 = vector.shape_cast %485 : vector<1x8x32xbf16> to vector<8x32xbf16>
    %cst_192 = arith.constant dense<0.000000e+00> : vector<8x32xf32>
    %487 = tpu.matmul %484, %486, %cst_192 {dimension_numbers = #tpu.dot_dimension_numbers<[1], [0], [0], [1], [0, 0, 1, 1], [], []>} : vector<8x8xbf16>, vector<8x32xbf16>, vector<8x32xf32> -> vector<8x32xf32>
    %488 = arith.addf %462, %487 : vector<8x32xf32>
    %489 = vector.extract_strided_slice %407 {offsets = [0, 24], sizes = [8, 8], strides = [1, 1]} : vector<8x32xf32> to vector<8x8xf32>
    %cst_193 = arith.constant 0.353553385 : f32
    %490 = vector.broadcast %cst_193 : f32 to vector<8x8xf32>
    %491 = arith.mulf %489, %490 : vector<8x8xf32>
    %492 = arith.truncf %491 : vector<8x8xf32> to vector<8x8xbf16>
    %493 = vector.extract_strided_slice %408 {offsets = [0, 24], sizes = [16, 8], strides = [1, 1]} : vector<16x32xf32> to vector<16x8xf32>
    %494 = arith.truncf %493 : vector<16x8xf32> to vector<16x8xbf16>
    %495 = vector.extract_strided_slice %409 {offsets = [0, 24], sizes = [16, 8], strides = [1, 1]} : vector<16x32xf32> to vector<16x8xf32>
    %496 = arith.truncf %495 : vector<16x8xf32> to vector<16x8xbf16>
    %cst_194 = arith.constant dense<0.000000e+00> : vector<8x16xf32>
    %497 = tpu.matmul %492, %494, %cst_194 {dimension_numbers = #tpu.dot_dimension_numbers<[1], [1], [0], [0], [0, 0, 1, 0], [], []>} : vector<8x8xbf16>, vector<16x8xbf16>, vector<8x16xf32> -> vector<8x16xf32>
    %cst_195 = arith.constant dense<0xFF800000> : vector<8xf32>
    %498 = vector.multi_reduction <maximumf>, %497, %cst_195 [1] : vector<8x16xf32> to vector<8xf32>
    %499 = vector.shape_cast %498 : vector<8xf32> to vector<8x1xf32>
    %500 = vector.broadcast %499 : vector<8x1xf32> to vector<8x16xf32>
    %501 = arith.subf %497, %500 : vector<8x16xf32>
    %502 = math.exp %501 : vector<8x16xf32>
    %cst_196 = arith.constant dense<0.000000e+00> : vector<8xf32>
    %503 = vector.multi_reduction <add>, %502, %cst_196 [1] : vector<8x16xf32> to vector<8xf32>
    %504 = vector.shape_cast %503 : vector<8xf32> to vector<8x1xf32>
    %505 = tpu.reciprocal %504 {approx = true} : vector<8x1xf32> -> vector<8x1xf32>
    %506 = vector.broadcast %505 : vector<8x1xf32> to vector<8x16xf32>
    %507 = arith.mulf %502, %506 : vector<8x16xf32>
    %508 = arith.truncf %507 : vector<8x16xf32> to vector<8x16xbf16>
    %cst_197 = arith.constant dense<0.000000e+00> : vector<8x8xf32>
    %509 = tpu.matmul %508, %496, %cst_197 {dimension_numbers = #tpu.dot_dimension_numbers<[1], [0], [0], [1], [0, 0, 1, 1], [], []>} : vector<8x16xbf16>, vector<16x8xbf16>, vector<8x8xf32> -> vector<8x8xf32>
    %510 = arith.truncf %509 : vector<8x8xf32> to vector<8x8xbf16>
    %c0_198 = arith.constant 0 : index
    %c24_199 = arith.constant 24 : index
    %c0_200 = arith.constant 0 : index
    %511 = vector.load %arg19[%c0_198, %c24_199, %c0_200] : memref<2x32x32xbf16, #tpu.memory_space<vmem>>, vector<1x8x32xbf16>
    %512 = vector.shape_cast %511 : vector<1x8x32xbf16> to vector<8x32xbf16>
    %cst_201 = arith.constant dense<0.000000e+00> : vector<8x32xf32>
    %513 = tpu.matmul %510, %512, %cst_201 {dimension_numbers = #tpu.dot_dimension_numbers<[1], [0], [0], [1], [0, 0, 1, 1], [], []>} : vector<8x8xbf16>, vector<8x32xbf16>, vector<8x32xf32> -> vector<8x32xf32>
    %514 = arith.addf %488, %513 : vector<8x32xf32>
    %515 = tpu.concatenate %406, %514 in 0 : vector<8x32xf32>, vector<8x32xf32> -> vector<16x32xf32>
    %c0_202 = arith.constant 0 : index
    %c0_203 = arith.constant 0 : index
    %c0_204 = arith.constant 0 : index
    %516 = vector.load %arg20[%c0_202, %c0_203, %c0_204] : memref<2x1x32xf32, #tpu.memory_space<vmem>>, vector<1x1x32xf32>
    %517 = vector.shape_cast %516 : vector<1x1x32xf32> to vector<1x32xf32>
    %518 = vector.broadcast %517 : vector<1x32xf32> to vector<16x32xf32>
    %519 = arith.addf %515, %518 : vector<16x32xf32>
    %520 = arith.addf %275, %519 : vector<16x32xf32>
    %c0_205 = arith.constant 0 : index
    %c0_206 = arith.constant 0 : index
    %c0_207 = arith.constant 0 : index
    %521 = vector.load %arg21[%c0_205, %c0_206, %c0_207] : memref<2x1x32xf32, #tpu.memory_space<vmem>>, vector<1x1x32xf32>
    %522 = vector.shape_cast %521 : vector<1x1x32xf32> to vector<1x32xf32>
    %c0_208 = arith.constant 0 : index
    %c0_209 = arith.constant 0 : index
    %c0_210 = arith.constant 0 : index
    %523 = vector.load %arg22[%c0_208, %c0_209, %c0_210] : memref<2x1x32xf32, #tpu.memory_space<vmem>>, vector<1x1x32xf32>
    %524 = vector.shape_cast %523 : vector<1x1x32xf32> to vector<1x32xf32>
    %cst_211 = arith.constant dense<0.000000e+00> : vector<16xf32>
    %525 = vector.multi_reduction <add>, %520, %cst_211 [1] : vector<16x32xf32> to vector<16xf32>
    %526 = vector.shape_cast %525 : vector<16xf32> to vector<16x1xf32>
    %cst_212 = arith.constant 3.200000e+01 : f32
    %527 = vector.broadcast %cst_212 : f32 to vector<16x1xf32>
    %528 = arith.divf %526, %527 : vector<16x1xf32>
    %529 = vector.broadcast %528 : vector<16x1xf32> to vector<16x32xf32>
    %530 = arith.subf %520, %529 : vector<16x32xf32>
    %531 = arith.mulf %530, %530 : vector<16x32xf32>
    %cst_213 = arith.constant dense<0.000000e+00> : vector<16xf32>
    %532 = vector.multi_reduction <add>, %531, %cst_213 [1] : vector<16x32xf32> to vector<16xf32>
    %533 = vector.shape_cast %532 : vector<16xf32> to vector<16x1xf32>
    %cst_214 = arith.constant 3.200000e+01 : f32
    %534 = vector.broadcast %cst_214 : f32 to vector<16x1xf32>
    %535 = arith.divf %533, %534 : vector<16x1xf32>
    %cst_215 = arith.constant 9.99999974E-6 : f32
    %536 = vector.broadcast %cst_215 : f32 to vector<16x1xf32>
    %537 = arith.addf %535, %536 : vector<16x1xf32>
    %538 = math.rsqrt %537 : vector<16x1xf32>
    %539 = vector.broadcast %538 : vector<16x1xf32> to vector<16x32xf32>
    %540 = arith.mulf %530, %539 : vector<16x32xf32>
    %541 = vector.broadcast %522 : vector<1x32xf32> to vector<16x32xf32>
    %542 = arith.mulf %540, %541 : vector<16x32xf32>
    %543 = vector.broadcast %524 : vector<1x32xf32> to vector<16x32xf32>
    %544 = arith.addf %542, %543 : vector<16x32xf32>
    %545 = arith.truncf %544 : vector<16x32xf32> to vector<16x32xbf16>
    %c0_216 = arith.constant 0 : index
    %c0_217 = arith.constant 0 : index
    %c0_218 = arith.constant 0 : index
    %546 = vector.load %arg23[%c0_216, %c0_217, %c0_218] : memref<2x32x64xbf16, #tpu.memory_space<vmem>>, vector<1x32x64xbf16>
    %547 = vector.shape_cast %546 : vector<1x32x64xbf16> to vector<32x64xbf16>
    %cst_219 = arith.constant dense<0.000000e+00> : vector<16x64xf32>
    %548 = tpu.matmul %545, %547, %cst_219 {dimension_numbers = #tpu.dot_dimension_numbers<[1], [0], [0], [1], [0, 0, 1, 1], [], []>} : vector<16x32xbf16>, vector<32x64xbf16>, vector<16x64xf32> -> vector<16x64xf32>
    %c0_220 = arith.constant 0 : index
    %c0_221 = arith.constant 0 : index
    %c0_222 = arith.constant 0 : index
    %549 = vector.load %arg24[%c0_220, %c0_221, %c0_222] : memref<2x1x64xf32, #tpu.memory_space<vmem>>, vector<1x1x64xf32>
    %550 = vector.shape_cast %549 : vector<1x1x64xf32> to vector<1x64xf32>
    %551 = vector.broadcast %550 : vector<1x64xf32> to vector<16x64xf32>
    %552 = arith.addf %548, %551 : vector<16x64xf32>
    %cst_223 = arith.constant 0.000000e+00 : f32
    %553 = vector.broadcast %cst_223 : f32 to vector<16x64xf32>
    %554 = arith.maximumf %552, %553 : vector<16x64xf32>
    %555 = arith.truncf %554 : vector<16x64xf32> to vector<16x64xbf16>
    %c0_224 = arith.constant 0 : index
    %c0_225 = arith.constant 0 : index
    %c0_226 = arith.constant 0 : index
    %556 = vector.load %arg25[%c0_224, %c0_225, %c0_226] : memref<2x64x32xbf16, #tpu.memory_space<vmem>>, vector<1x64x32xbf16>
    %557 = vector.shape_cast %556 : vector<1x64x32xbf16> to vector<64x32xbf16>
    %cst_227 = arith.constant dense<0.000000e+00> : vector<16x32xf32>
    %558 = tpu.matmul %555, %557, %cst_227 {dimension_numbers = #tpu.dot_dimension_numbers<[1], [0], [0], [1], [0, 0, 1, 1], [], []>} : vector<16x64xbf16>, vector<64x32xbf16>, vector<16x32xf32> -> vector<16x32xf32>
    %c0_228 = arith.constant 0 : index
    %c0_229 = arith.constant 0 : index
    %c0_230 = arith.constant 0 : index
    %559 = vector.load %arg26[%c0_228, %c0_229, %c0_230] : memref<2x1x32xf32, #tpu.memory_space<vmem>>, vector<1x1x32xf32>
    %560 = vector.shape_cast %559 : vector<1x1x32xf32> to vector<1x32xf32>
    %561 = vector.broadcast %560 : vector<1x32xf32> to vector<16x32xf32>
    %562 = arith.addf %558, %561 : vector<16x32xf32>
    %563 = arith.addf %544, %562 : vector<16x32xf32>
    %c0_231 = arith.constant 0 : index
    %c0_232 = arith.constant 0 : index
    %c0_233 = arith.constant 0 : index
    %564 = vector.load %arg27[%c0_231, %c0_232, %c0_233] : memref<2x1x32xf32, #tpu.memory_space<vmem>>, vector<1x1x32xf32>
    %565 = vector.shape_cast %564 : vector<1x1x32xf32> to vector<1x32xf32>
    %c0_234 = arith.constant 0 : index
    %c0_235 = arith.constant 0 : index
    %c0_236 = arith.constant 0 : index
    %566 = vector.load %arg28[%c0_234, %c0_235, %c0_236] : memref<2x1x32xf32, #tpu.memory_space<vmem>>, vector<1x1x32xf32>
    %567 = vector.shape_cast %566 : vector<1x1x32xf32> to vector<1x32xf32>
    %cst_237 = arith.constant dense<0.000000e+00> : vector<16xf32>
    %568 = vector.multi_reduction <add>, %563, %cst_237 [1] : vector<16x32xf32> to vector<16xf32>
    %569 = vector.shape_cast %568 : vector<16xf32> to vector<16x1xf32>
    %cst_238 = arith.constant 3.200000e+01 : f32
    %570 = vector.broadcast %cst_238 : f32 to vector<16x1xf32>
    %571 = arith.divf %569, %570 : vector<16x1xf32>
    %572 = vector.broadcast %571 : vector<16x1xf32> to vector<16x32xf32>
    %573 = arith.subf %563, %572 : vector<16x32xf32>
    %574 = arith.mulf %573, %573 : vector<16x32xf32>
    %cst_239 = arith.constant dense<0.000000e+00> : vector<16xf32>
    %575 = vector.multi_reduction <add>, %574, %cst_239 [1] : vector<16x32xf32> to vector<16xf32>
    %576 = vector.shape_cast %575 : vector<16xf32> to vector<16x1xf32>
    %cst_240 = arith.constant 3.200000e+01 : f32
    %577 = vector.broadcast %cst_240 : f32 to vector<16x1xf32>
    %578 = arith.divf %576, %577 : vector<16x1xf32>
    %cst_241 = arith.constant 9.99999974E-6 : f32
    %579 = vector.broadcast %cst_241 : f32 to vector<16x1xf32>
    %580 = arith.addf %578, %579 : vector<16x1xf32>
    %581 = math.rsqrt %580 : vector<16x1xf32>
    %582 = vector.broadcast %581 : vector<16x1xf32> to vector<16x32xf32>
    %583 = arith.mulf %573, %582 : vector<16x32xf32>
    %584 = vector.broadcast %565 : vector<1x32xf32> to vector<16x32xf32>
    %585 = arith.mulf %583, %584 : vector<16x32xf32>
    %586 = vector.broadcast %567 : vector<1x32xf32> to vector<16x32xf32>
    %587 = arith.addf %585, %586 : vector<16x32xf32>
    %588 = arith.addf %587, %3 : vector<16x32xf32>
    %589 = arith.truncf %588 : vector<16x32xf32> to vector<16x32xbf16>
    %590 = arith.truncf %587 : vector<16x32xf32> to vector<16x32xbf16>
    %c1 = arith.constant 1 : index
    %c0_242 = arith.constant 0 : index
    %c0_243 = arith.constant 0 : index
    %591 = vector.load %arg5[%c1, %c0_242, %c0_243] : memref<2x32x64xbf16, #tpu.memory_space<vmem>>, vector<1x32x64xbf16>
    %592 = vector.shape_cast %591 : vector<1x32x64xbf16> to vector<32x64xbf16>
    %cst_244 = arith.constant dense<0.000000e+00> : vector<16x64xf32>
    %593 = tpu.matmul %589, %592, %cst_244 {dimension_numbers = #tpu.dot_dimension_numbers<[1], [0], [0], [1], [0, 0, 1, 1], [], []>} : vector<16x32xbf16>, vector<32x64xbf16>, vector<16x64xf32> -> vector<16x64xf32>
    %c1_245 = arith.constant 1 : index
    %c0_246 = arith.constant 0 : index
    %c0_247 = arith.constant 0 : index
    %594 = vector.load %arg6[%c1_245, %c0_246, %c0_247] : memref<2x1x64xf32, #tpu.memory_space<vmem>>, vector<1x1x64xf32>
    %595 = vector.shape_cast %594 : vector<1x1x64xf32> to vector<1x64xf32>
    %596 = vector.broadcast %595 : vector<1x64xf32> to vector<16x64xf32>
    %597 = arith.addf %593, %596 : vector<16x64xf32>
    %c1_248 = arith.constant 1 : index
    %c0_249 = arith.constant 0 : index
    %c0_250 = arith.constant 0 : index
    %598 = vector.load %arg7[%c1_248, %c0_249, %c0_250] : memref<2x32x32xbf16, #tpu.memory_space<vmem>>, vector<1x32x32xbf16>
    %599 = vector.shape_cast %598 : vector<1x32x32xbf16> to vector<32x32xbf16>
    %cst_251 = arith.constant dense<0.000000e+00> : vector<16x32xf32>
    %600 = tpu.matmul %590, %599, %cst_251 {dimension_numbers = #tpu.dot_dimension_numbers<[1], [0], [0], [1], [0, 0, 1, 1], [], []>} : vector<16x32xbf16>, vector<32x32xbf16>, vector<16x32xf32> -> vector<16x32xf32>
    %c1_252 = arith.constant 1 : index
    %c0_253 = arith.constant 0 : index
    %c0_254 = arith.constant 0 : index
    %601 = vector.load %arg8[%c1_252, %c0_253, %c0_254] : memref<2x1x32xf32, #tpu.memory_space<vmem>>, vector<1x1x32xf32>
    %602 = vector.shape_cast %601 : vector<1x1x32xf32> to vector<1x32xf32>
    %603 = vector.broadcast %602 : vector<1x32xf32> to vector<16x32xf32>
    %604 = arith.addf %600, %603 : vector<16x32xf32>
    %605 = vector.extract_strided_slice %597 {offsets = [0, 0], sizes = [16, 32], strides = [1, 1]} : vector<16x64xf32> to vector<16x32xf32>
    %606 = vector.extract_strided_slice %597 {offsets = [0, 32], sizes = [16, 32], strides = [1, 1]} : vector<16x64xf32> to vector<16x32xf32>
    %607 = vector.extract_strided_slice %605 {offsets = [0, 0], sizes = [8, 32], strides = [1, 1]} : vector<16x32xf32> to vector<8x32xf32>
    %608 = vector.extract_strided_slice %606 {offsets = [0, 0], sizes = [8, 32], strides = [1, 1]} : vector<16x32xf32> to vector<8x32xf32>
    %609 = vector.extract_strided_slice %604 {offsets = [0, 0], sizes = [8, 32], strides = [1, 1]} : vector<16x32xf32> to vector<8x32xf32>
    %cst_255 = arith.constant 0.000000e+00 : f32
    %610 = vector.broadcast %cst_255 : f32 to vector<8x32xf32>
    %611 = vector.extract_strided_slice %607 {offsets = [0, 0], sizes = [8, 8], strides = [1, 1]} : vector<8x32xf32> to vector<8x8xf32>
    %cst_256 = arith.constant 0.353553385 : f32
    %612 = vector.broadcast %cst_256 : f32 to vector<8x8xf32>
    %613 = arith.mulf %611, %612 : vector<8x8xf32>
    %614 = arith.truncf %613 : vector<8x8xf32> to vector<8x8xbf16>
    %615 = vector.extract_strided_slice %608 {offsets = [0, 0], sizes = [8, 8], strides = [1, 1]} : vector<8x32xf32> to vector<8x8xf32>
    %616 = arith.truncf %615 : vector<8x8xf32> to vector<8x8xbf16>
    %617 = vector.extract_strided_slice %609 {offsets = [0, 0], sizes = [8, 8], strides = [1, 1]} : vector<8x32xf32> to vector<8x8xf32>
    %618 = arith.truncf %617 : vector<8x8xf32> to vector<8x8xbf16>
    %cst_257 = arith.constant dense<0.000000e+00> : vector<8x8xf32>
    %619 = tpu.matmul %614, %616, %cst_257 {dimension_numbers = #tpu.dot_dimension_numbers<[1], [1], [0], [0], [0, 0, 1, 0], [], []>} : vector<8x8xbf16>, vector<8x8xbf16>, vector<8x8xf32> -> vector<8x8xf32>
    %cst_258 = arith.constant dense<0xFF800000> : vector<8xf32>
    %620 = vector.multi_reduction <maximumf>, %619, %cst_258 [1] : vector<8x8xf32> to vector<8xf32>
    %621 = vector.shape_cast %620 : vector<8xf32> to vector<8x1xf32>
    %622 = vector.broadcast %621 : vector<8x1xf32> to vector<8x8xf32>
    %623 = arith.subf %619, %622 : vector<8x8xf32>
    %624 = math.exp %623 : vector<8x8xf32>
    %cst_259 = arith.constant dense<0.000000e+00> : vector<8xf32>
    %625 = vector.multi_reduction <add>, %624, %cst_259 [1] : vector<8x8xf32> to vector<8xf32>
    %626 = vector.shape_cast %625 : vector<8xf32> to vector<8x1xf32>
    %627 = tpu.reciprocal %626 {approx = true} : vector<8x1xf32> -> vector<8x1xf32>
    %628 = vector.broadcast %627 : vector<8x1xf32> to vector<8x8xf32>
    %629 = arith.mulf %624, %628 : vector<8x8xf32>
    %630 = arith.truncf %629 : vector<8x8xf32> to vector<8x8xbf16>
    %cst_260 = arith.constant dense<0.000000e+00> : vector<8x8xf32>
    %631 = tpu.matmul %630, %618, %cst_260 {dimension_numbers = #tpu.dot_dimension_numbers<[1], [0], [0], [1], [0, 0, 1, 1], [], []>} : vector<8x8xbf16>, vector<8x8xbf16>, vector<8x8xf32> -> vector<8x8xf32>
    %632 = arith.truncf %631 : vector<8x8xf32> to vector<8x8xbf16>
    %c1_261 = arith.constant 1 : index
    %c0_262 = arith.constant 0 : index
    %c0_263 = arith.constant 0 : index
    %633 = vector.load %arg9[%c1_261, %c0_262, %c0_263] : memref<2x32x32xbf16, #tpu.memory_space<vmem>>, vector<1x8x32xbf16>
    %634 = vector.shape_cast %633 : vector<1x8x32xbf16> to vector<8x32xbf16>
    %cst_264 = arith.constant dense<0.000000e+00> : vector<8x32xf32>
    %635 = tpu.matmul %632, %634, %cst_264 {dimension_numbers = #tpu.dot_dimension_numbers<[1], [0], [0], [1], [0, 0, 1, 1], [], []>} : vector<8x8xbf16>, vector<8x32xbf16>, vector<8x32xf32> -> vector<8x32xf32>
    %636 = arith.addf %610, %635 : vector<8x32xf32>
    %637 = vector.extract_strided_slice %607 {offsets = [0, 8], sizes = [8, 8], strides = [1, 1]} : vector<8x32xf32> to vector<8x8xf32>
    %cst_265 = arith.constant 0.353553385 : f32
    %638 = vector.broadcast %cst_265 : f32 to vector<8x8xf32>
    %639 = arith.mulf %637, %638 : vector<8x8xf32>
    %640 = arith.truncf %639 : vector<8x8xf32> to vector<8x8xbf16>
    %641 = vector.extract_strided_slice %608 {offsets = [0, 8], sizes = [8, 8], strides = [1, 1]} : vector<8x32xf32> to vector<8x8xf32>
    %642 = arith.truncf %641 : vector<8x8xf32> to vector<8x8xbf16>
    %643 = vector.extract_strided_slice %609 {offsets = [0, 8], sizes = [8, 8], strides = [1, 1]} : vector<8x32xf32> to vector<8x8xf32>
    %644 = arith.truncf %643 : vector<8x8xf32> to vector<8x8xbf16>
    %cst_266 = arith.constant dense<0.000000e+00> : vector<8x8xf32>
    %645 = tpu.matmul %640, %642, %cst_266 {dimension_numbers = #tpu.dot_dimension_numbers<[1], [1], [0], [0], [0, 0, 1, 0], [], []>} : vector<8x8xbf16>, vector<8x8xbf16>, vector<8x8xf32> -> vector<8x8xf32>
    %cst_267 = arith.constant dense<0xFF800000> : vector<8xf32>
    %646 = vector.multi_reduction <maximumf>, %645, %cst_267 [1] : vector<8x8xf32> to vector<8xf32>
    %647 = vector.shape_cast %646 : vector<8xf32> to vector<8x1xf32>
    %648 = vector.broadcast %647 : vector<8x1xf32> to vector<8x8xf32>
    %649 = arith.subf %645, %648 : vector<8x8xf32>
    %650 = math.exp %649 : vector<8x8xf32>
    %cst_268 = arith.constant dense<0.000000e+00> : vector<8xf32>
    %651 = vector.multi_reduction <add>, %650, %cst_268 [1] : vector<8x8xf32> to vector<8xf32>
    %652 = vector.shape_cast %651 : vector<8xf32> to vector<8x1xf32>
    %653 = tpu.reciprocal %652 {approx = true} : vector<8x1xf32> -> vector<8x1xf32>
    %654 = vector.broadcast %653 : vector<8x1xf32> to vector<8x8xf32>
    %655 = arith.mulf %650, %654 : vector<8x8xf32>
    %656 = arith.truncf %655 : vector<8x8xf32> to vector<8x8xbf16>
    %cst_269 = arith.constant dense<0.000000e+00> : vector<8x8xf32>
    %657 = tpu.matmul %656, %644, %cst_269 {dimension_numbers = #tpu.dot_dimension_numbers<[1], [0], [0], [1], [0, 0, 1, 1], [], []>} : vector<8x8xbf16>, vector<8x8xbf16>, vector<8x8xf32> -> vector<8x8xf32>
    %658 = arith.truncf %657 : vector<8x8xf32> to vector<8x8xbf16>
    %c1_270 = arith.constant 1 : index
    %c8_271 = arith.constant 8 : index
    %c0_272 = arith.constant 0 : index
    %659 = vector.load %arg9[%c1_270, %c8_271, %c0_272] : memref<2x32x32xbf16, #tpu.memory_space<vmem>>, vector<1x8x32xbf16>
    %660 = vector.shape_cast %659 : vector<1x8x32xbf16> to vector<8x32xbf16>
    %cst_273 = arith.constant dense<0.000000e+00> : vector<8x32xf32>
    %661 = tpu.matmul %658, %660, %cst_273 {dimension_numbers = #tpu.dot_dimension_numbers<[1], [0], [0], [1], [0, 0, 1, 1], [], []>} : vector<8x8xbf16>, vector<8x32xbf16>, vector<8x32xf32> -> vector<8x32xf32>
    %662 = arith.addf %636, %661 : vector<8x32xf32>
    %663 = vector.extract_strided_slice %607 {offsets = [0, 16], sizes = [8, 8], strides = [1, 1]} : vector<8x32xf32> to vector<8x8xf32>
    %cst_274 = arith.constant 0.353553385 : f32
    %664 = vector.broadcast %cst_274 : f32 to vector<8x8xf32>
    %665 = arith.mulf %663, %664 : vector<8x8xf32>
    %666 = arith.truncf %665 : vector<8x8xf32> to vector<8x8xbf16>
    %667 = vector.extract_strided_slice %608 {offsets = [0, 16], sizes = [8, 8], strides = [1, 1]} : vector<8x32xf32> to vector<8x8xf32>
    %668 = arith.truncf %667 : vector<8x8xf32> to vector<8x8xbf16>
    %669 = vector.extract_strided_slice %609 {offsets = [0, 16], sizes = [8, 8], strides = [1, 1]} : vector<8x32xf32> to vector<8x8xf32>
    %670 = arith.truncf %669 : vector<8x8xf32> to vector<8x8xbf16>
    %cst_275 = arith.constant dense<0.000000e+00> : vector<8x8xf32>
    %671 = tpu.matmul %666, %668, %cst_275 {dimension_numbers = #tpu.dot_dimension_numbers<[1], [1], [0], [0], [0, 0, 1, 0], [], []>} : vector<8x8xbf16>, vector<8x8xbf16>, vector<8x8xf32> -> vector<8x8xf32>
    %cst_276 = arith.constant dense<0xFF800000> : vector<8xf32>
    %672 = vector.multi_reduction <maximumf>, %671, %cst_276 [1] : vector<8x8xf32> to vector<8xf32>
    %673 = vector.shape_cast %672 : vector<8xf32> to vector<8x1xf32>
    %674 = vector.broadcast %673 : vector<8x1xf32> to vector<8x8xf32>
    %675 = arith.subf %671, %674 : vector<8x8xf32>
    %676 = math.exp %675 : vector<8x8xf32>
    %cst_277 = arith.constant dense<0.000000e+00> : vector<8xf32>
    %677 = vector.multi_reduction <add>, %676, %cst_277 [1] : vector<8x8xf32> to vector<8xf32>
    %678 = vector.shape_cast %677 : vector<8xf32> to vector<8x1xf32>
    %679 = tpu.reciprocal %678 {approx = true} : vector<8x1xf32> -> vector<8x1xf32>
    %680 = vector.broadcast %679 : vector<8x1xf32> to vector<8x8xf32>
    %681 = arith.mulf %676, %680 : vector<8x8xf32>
    %682 = arith.truncf %681 : vector<8x8xf32> to vector<8x8xbf16>
    %cst_278 = arith.constant dense<0.000000e+00> : vector<8x8xf32>
    %683 = tpu.matmul %682, %670, %cst_278 {dimension_numbers = #tpu.dot_dimension_numbers<[1], [0], [0], [1], [0, 0, 1, 1], [], []>} : vector<8x8xbf16>, vector<8x8xbf16>, vector<8x8xf32> -> vector<8x8xf32>
    %684 = arith.truncf %683 : vector<8x8xf32> to vector<8x8xbf16>
    %c1_279 = arith.constant 1 : index
    %c16_280 = arith.constant 16 : index
    %c0_281 = arith.constant 0 : index
    %685 = vector.load %arg9[%c1_279, %c16_280, %c0_281] : memref<2x32x32xbf16, #tpu.memory_space<vmem>>, vector<1x8x32xbf16>
    %686 = vector.shape_cast %685 : vector<1x8x32xbf16> to vector<8x32xbf16>
    %cst_282 = arith.constant dense<0.000000e+00> : vector<8x32xf32>
    %687 = tpu.matmul %684, %686, %cst_282 {dimension_numbers = #tpu.dot_dimension_numbers<[1], [0], [0], [1], [0, 0, 1, 1], [], []>} : vector<8x8xbf16>, vector<8x32xbf16>, vector<8x32xf32> -> vector<8x32xf32>
    %688 = arith.addf %662, %687 : vector<8x32xf32>
    %689 = vector.extract_strided_slice %607 {offsets = [0, 24], sizes = [8, 8], strides = [1, 1]} : vector<8x32xf32> to vector<8x8xf32>
    %cst_283 = arith.constant 0.353553385 : f32
    %690 = vector.broadcast %cst_283 : f32 to vector<8x8xf32>
    %691 = arith.mulf %689, %690 : vector<8x8xf32>
    %692 = arith.truncf %691 : vector<8x8xf32> to vector<8x8xbf16>
    %693 = vector.extract_strided_slice %608 {offsets = [0, 24], sizes = [8, 8], strides = [1, 1]} : vector<8x32xf32> to vector<8x8xf32>
    %694 = arith.truncf %693 : vector<8x8xf32> to vector<8x8xbf16>
    %695 = vector.extract_strided_slice %609 {offsets = [0, 24], sizes = [8, 8], strides = [1, 1]} : vector<8x32xf32> to vector<8x8xf32>
    %696 = arith.truncf %695 : vector<8x8xf32> to vector<8x8xbf16>
    %cst_284 = arith.constant dense<0.000000e+00> : vector<8x8xf32>
    %697 = tpu.matmul %692, %694, %cst_284 {dimension_numbers = #tpu.dot_dimension_numbers<[1], [1], [0], [0], [0, 0, 1, 0], [], []>} : vector<8x8xbf16>, vector<8x8xbf16>, vector<8x8xf32> -> vector<8x8xf32>
    %cst_285 = arith.constant dense<0xFF800000> : vector<8xf32>
    %698 = vector.multi_reduction <maximumf>, %697, %cst_285 [1] : vector<8x8xf32> to vector<8xf32>
    %699 = vector.shape_cast %698 : vector<8xf32> to vector<8x1xf32>
    %700 = vector.broadcast %699 : vector<8x1xf32> to vector<8x8xf32>
    %701 = arith.subf %697, %700 : vector<8x8xf32>
    %702 = math.exp %701 : vector<8x8xf32>
    %cst_286 = arith.constant dense<0.000000e+00> : vector<8xf32>
    %703 = vector.multi_reduction <add>, %702, %cst_286 [1] : vector<8x8xf32> to vector<8xf32>
    %704 = vector.shape_cast %703 : vector<8xf32> to vector<8x1xf32>
    %705 = tpu.reciprocal %704 {approx = true} : vector<8x1xf32> -> vector<8x1xf32>
    %706 = vector.broadcast %705 : vector<8x1xf32> to vector<8x8xf32>
    %707 = arith.mulf %702, %706 : vector<8x8xf32>
    %708 = arith.truncf %707 : vector<8x8xf32> to vector<8x8xbf16>
    %cst_287 = arith.constant dense<0.000000e+00> : vector<8x8xf32>
    %709 = tpu.matmul %708, %696, %cst_287 {dimension_numbers = #tpu.dot_dimension_numbers<[1], [0], [0], [1], [0, 0, 1, 1], [], []>} : vector<8x8xbf16>, vector<8x8xbf16>, vector<8x8xf32> -> vector<8x8xf32>
    %710 = arith.truncf %709 : vector<8x8xf32> to vector<8x8xbf16>
    %c1_288 = arith.constant 1 : index
    %c24_289 = arith.constant 24 : index
    %c0_290 = arith.constant 0 : index
    %711 = vector.load %arg9[%c1_288, %c24_289, %c0_290] : memref<2x32x32xbf16, #tpu.memory_space<vmem>>, vector<1x8x32xbf16>
    %712 = vector.shape_cast %711 : vector<1x8x32xbf16> to vector<8x32xbf16>
    %cst_291 = arith.constant dense<0.000000e+00> : vector<8x32xf32>
    %713 = tpu.matmul %710, %712, %cst_291 {dimension_numbers = #tpu.dot_dimension_numbers<[1], [0], [0], [1], [0, 0, 1, 1], [], []>} : vector<8x8xbf16>, vector<8x32xbf16>, vector<8x32xf32> -> vector<8x32xf32>
    %714 = arith.addf %688, %713 : vector<8x32xf32>
    %715 = vector.extract_strided_slice %605 {offsets = [8, 0], sizes = [8, 32], strides = [1, 1]} : vector<16x32xf32> to vector<8x32xf32>
    %716 = vector.extract_strided_slice %606 {offsets = [8, 0], sizes = [8, 32], strides = [1, 1]} : vector<16x32xf32> to vector<8x32xf32>
    %717 = vector.extract_strided_slice %604 {offsets = [8, 0], sizes = [8, 32], strides = [1, 1]} : vector<16x32xf32> to vector<8x32xf32>
    %cst_292 = arith.constant 0.000000e+00 : f32
    %718 = vector.broadcast %cst_292 : f32 to vector<8x32xf32>
    %719 = vector.extract_strided_slice %715 {offsets = [0, 0], sizes = [8, 8], strides = [1, 1]} : vector<8x32xf32> to vector<8x8xf32>
    %cst_293 = arith.constant 0.353553385 : f32
    %720 = vector.broadcast %cst_293 : f32 to vector<8x8xf32>
    %721 = arith.mulf %719, %720 : vector<8x8xf32>
    %722 = arith.truncf %721 : vector<8x8xf32> to vector<8x8xbf16>
    %723 = vector.extract_strided_slice %716 {offsets = [0, 0], sizes = [8, 8], strides = [1, 1]} : vector<8x32xf32> to vector<8x8xf32>
    %724 = arith.truncf %723 : vector<8x8xf32> to vector<8x8xbf16>
    %725 = vector.extract_strided_slice %717 {offsets = [0, 0], sizes = [8, 8], strides = [1, 1]} : vector<8x32xf32> to vector<8x8xf32>
    %726 = arith.truncf %725 : vector<8x8xf32> to vector<8x8xbf16>
    %cst_294 = arith.constant dense<0.000000e+00> : vector<8x8xf32>
    %727 = tpu.matmul %722, %724, %cst_294 {dimension_numbers = #tpu.dot_dimension_numbers<[1], [1], [0], [0], [0, 0, 1, 0], [], []>} : vector<8x8xbf16>, vector<8x8xbf16>, vector<8x8xf32> -> vector<8x8xf32>
    %cst_295 = arith.constant dense<0xFF800000> : vector<8xf32>
    %728 = vector.multi_reduction <maximumf>, %727, %cst_295 [1] : vector<8x8xf32> to vector<8xf32>
    %729 = vector.shape_cast %728 : vector<8xf32> to vector<8x1xf32>
    %730 = vector.broadcast %729 : vector<8x1xf32> to vector<8x8xf32>
    %731 = arith.subf %727, %730 : vector<8x8xf32>
    %732 = math.exp %731 : vector<8x8xf32>
    %cst_296 = arith.constant dense<0.000000e+00> : vector<8xf32>
    %733 = vector.multi_reduction <add>, %732, %cst_296 [1] : vector<8x8xf32> to vector<8xf32>
    %734 = vector.shape_cast %733 : vector<8xf32> to vector<8x1xf32>
    %735 = tpu.reciprocal %734 {approx = true} : vector<8x1xf32> -> vector<8x1xf32>
    %736 = vector.broadcast %735 : vector<8x1xf32> to vector<8x8xf32>
    %737 = arith.mulf %732, %736 : vector<8x8xf32>
    %738 = arith.truncf %737 : vector<8x8xf32> to vector<8x8xbf16>
    %cst_297 = arith.constant dense<0.000000e+00> : vector<8x8xf32>
    %739 = tpu.matmul %738, %726, %cst_297 {dimension_numbers = #tpu.dot_dimension_numbers<[1], [0], [0], [1], [0, 0, 1, 1], [], []>} : vector<8x8xbf16>, vector<8x8xbf16>, vector<8x8xf32> -> vector<8x8xf32>
    %740 = arith.truncf %739 : vector<8x8xf32> to vector<8x8xbf16>
    %c1_298 = arith.constant 1 : index
    %c0_299 = arith.constant 0 : index
    %c0_300 = arith.constant 0 : index
    %741 = vector.load %arg9[%c1_298, %c0_299, %c0_300] : memref<2x32x32xbf16, #tpu.memory_space<vmem>>, vector<1x8x32xbf16>
    %742 = vector.shape_cast %741 : vector<1x8x32xbf16> to vector<8x32xbf16>
    %cst_301 = arith.constant dense<0.000000e+00> : vector<8x32xf32>
    %743 = tpu.matmul %740, %742, %cst_301 {dimension_numbers = #tpu.dot_dimension_numbers<[1], [0], [0], [1], [0, 0, 1, 1], [], []>} : vector<8x8xbf16>, vector<8x32xbf16>, vector<8x32xf32> -> vector<8x32xf32>
    %744 = arith.addf %718, %743 : vector<8x32xf32>
    %745 = vector.extract_strided_slice %715 {offsets = [0, 8], sizes = [8, 8], strides = [1, 1]} : vector<8x32xf32> to vector<8x8xf32>
    %cst_302 = arith.constant 0.353553385 : f32
    %746 = vector.broadcast %cst_302 : f32 to vector<8x8xf32>
    %747 = arith.mulf %745, %746 : vector<8x8xf32>
    %748 = arith.truncf %747 : vector<8x8xf32> to vector<8x8xbf16>
    %749 = vector.extract_strided_slice %716 {offsets = [0, 8], sizes = [8, 8], strides = [1, 1]} : vector<8x32xf32> to vector<8x8xf32>
    %750 = arith.truncf %749 : vector<8x8xf32> to vector<8x8xbf16>
    %751 = vector.extract_strided_slice %717 {offsets = [0, 8], sizes = [8, 8], strides = [1, 1]} : vector<8x32xf32> to vector<8x8xf32>
    %752 = arith.truncf %751 : vector<8x8xf32> to vector<8x8xbf16>
    %cst_303 = arith.constant dense<0.000000e+00> : vector<8x8xf32>
    %753 = tpu.matmul %748, %750, %cst_303 {dimension_numbers = #tpu.dot_dimension_numbers<[1], [1], [0], [0], [0, 0, 1, 0], [], []>} : vector<8x8xbf16>, vector<8x8xbf16>, vector<8x8xf32> -> vector<8x8xf32>
    %cst_304 = arith.constant dense<0xFF800000> : vector<8xf32>
    %754 = vector.multi_reduction <maximumf>, %753, %cst_304 [1] : vector<8x8xf32> to vector<8xf32>
    %755 = vector.shape_cast %754 : vector<8xf32> to vector<8x1xf32>
    %756 = vector.broadcast %755 : vector<8x1xf32> to vector<8x8xf32>
    %757 = arith.subf %753, %756 : vector<8x8xf32>
    %758 = math.exp %757 : vector<8x8xf32>
    %cst_305 = arith.constant dense<0.000000e+00> : vector<8xf32>
    %759 = vector.multi_reduction <add>, %758, %cst_305 [1] : vector<8x8xf32> to vector<8xf32>
    %760 = vector.shape_cast %759 : vector<8xf32> to vector<8x1xf32>
    %761 = tpu.reciprocal %760 {approx = true} : vector<8x1xf32> -> vector<8x1xf32>
    %762 = vector.broadcast %761 : vector<8x1xf32> to vector<8x8xf32>
    %763 = arith.mulf %758, %762 : vector<8x8xf32>
    %764 = arith.truncf %763 : vector<8x8xf32> to vector<8x8xbf16>
    %cst_306 = arith.constant dense<0.000000e+00> : vector<8x8xf32>
    %765 = tpu.matmul %764, %752, %cst_306 {dimension_numbers = #tpu.dot_dimension_numbers<[1], [0], [0], [1], [0, 0, 1, 1], [], []>} : vector<8x8xbf16>, vector<8x8xbf16>, vector<8x8xf32> -> vector<8x8xf32>
    %766 = arith.truncf %765 : vector<8x8xf32> to vector<8x8xbf16>
    %c1_307 = arith.constant 1 : index
    %c8_308 = arith.constant 8 : index
    %c0_309 = arith.constant 0 : index
    %767 = vector.load %arg9[%c1_307, %c8_308, %c0_309] : memref<2x32x32xbf16, #tpu.memory_space<vmem>>, vector<1x8x32xbf16>
    %768 = vector.shape_cast %767 : vector<1x8x32xbf16> to vector<8x32xbf16>
    %cst_310 = arith.constant dense<0.000000e+00> : vector<8x32xf32>
    %769 = tpu.matmul %766, %768, %cst_310 {dimension_numbers = #tpu.dot_dimension_numbers<[1], [0], [0], [1], [0, 0, 1, 1], [], []>} : vector<8x8xbf16>, vector<8x32xbf16>, vector<8x32xf32> -> vector<8x32xf32>
    %770 = arith.addf %744, %769 : vector<8x32xf32>
    %771 = vector.extract_strided_slice %715 {offsets = [0, 16], sizes = [8, 8], strides = [1, 1]} : vector<8x32xf32> to vector<8x8xf32>
    %cst_311 = arith.constant 0.353553385 : f32
    %772 = vector.broadcast %cst_311 : f32 to vector<8x8xf32>
    %773 = arith.mulf %771, %772 : vector<8x8xf32>
    %774 = arith.truncf %773 : vector<8x8xf32> to vector<8x8xbf16>
    %775 = vector.extract_strided_slice %716 {offsets = [0, 16], sizes = [8, 8], strides = [1, 1]} : vector<8x32xf32> to vector<8x8xf32>
    %776 = arith.truncf %775 : vector<8x8xf32> to vector<8x8xbf16>
    %777 = vector.extract_strided_slice %717 {offsets = [0, 16], sizes = [8, 8], strides = [1, 1]} : vector<8x32xf32> to vector<8x8xf32>
    %778 = arith.truncf %777 : vector<8x8xf32> to vector<8x8xbf16>
    %cst_312 = arith.constant dense<0.000000e+00> : vector<8x8xf32>
    %779 = tpu.matmul %774, %776, %cst_312 {dimension_numbers = #tpu.dot_dimension_numbers<[1], [1], [0], [0], [0, 0, 1, 0], [], []>} : vector<8x8xbf16>, vector<8x8xbf16>, vector<8x8xf32> -> vector<8x8xf32>
    %cst_313 = arith.constant dense<0xFF800000> : vector<8xf32>
    %780 = vector.multi_reduction <maximumf>, %779, %cst_313 [1] : vector<8x8xf32> to vector<8xf32>
    %781 = vector.shape_cast %780 : vector<8xf32> to vector<8x1xf32>
    %782 = vector.broadcast %781 : vector<8x1xf32> to vector<8x8xf32>
    %783 = arith.subf %779, %782 : vector<8x8xf32>
    %784 = math.exp %783 : vector<8x8xf32>
    %cst_314 = arith.constant dense<0.000000e+00> : vector<8xf32>
    %785 = vector.multi_reduction <add>, %784, %cst_314 [1] : vector<8x8xf32> to vector<8xf32>
    %786 = vector.shape_cast %785 : vector<8xf32> to vector<8x1xf32>
    %787 = tpu.reciprocal %786 {approx = true} : vector<8x1xf32> -> vector<8x1xf32>
    %788 = vector.broadcast %787 : vector<8x1xf32> to vector<8x8xf32>
    %789 = arith.mulf %784, %788 : vector<8x8xf32>
    %790 = arith.truncf %789 : vector<8x8xf32> to vector<8x8xbf16>
    %cst_315 = arith.constant dense<0.000000e+00> : vector<8x8xf32>
    %791 = tpu.matmul %790, %778, %cst_315 {dimension_numbers = #tpu.dot_dimension_numbers<[1], [0], [0], [1], [0, 0, 1, 1], [], []>} : vector<8x8xbf16>, vector<8x8xbf16>, vector<8x8xf32> -> vector<8x8xf32>
    %792 = arith.truncf %791 : vector<8x8xf32> to vector<8x8xbf16>
    %c1_316 = arith.constant 1 : index
    %c16_317 = arith.constant 16 : index
    %c0_318 = arith.constant 0 : index
    %793 = vector.load %arg9[%c1_316, %c16_317, %c0_318] : memref<2x32x32xbf16, #tpu.memory_space<vmem>>, vector<1x8x32xbf16>
    %794 = vector.shape_cast %793 : vector<1x8x32xbf16> to vector<8x32xbf16>
    %cst_319 = arith.constant dense<0.000000e+00> : vector<8x32xf32>
    %795 = tpu.matmul %792, %794, %cst_319 {dimension_numbers = #tpu.dot_dimension_numbers<[1], [0], [0], [1], [0, 0, 1, 1], [], []>} : vector<8x8xbf16>, vector<8x32xbf16>, vector<8x32xf32> -> vector<8x32xf32>
    %796 = arith.addf %770, %795 : vector<8x32xf32>
    %797 = vector.extract_strided_slice %715 {offsets = [0, 24], sizes = [8, 8], strides = [1, 1]} : vector<8x32xf32> to vector<8x8xf32>
    %cst_320 = arith.constant 0.353553385 : f32
    %798 = vector.broadcast %cst_320 : f32 to vector<8x8xf32>
    %799 = arith.mulf %797, %798 : vector<8x8xf32>
    %800 = arith.truncf %799 : vector<8x8xf32> to vector<8x8xbf16>
    %801 = vector.extract_strided_slice %716 {offsets = [0, 24], sizes = [8, 8], strides = [1, 1]} : vector<8x32xf32> to vector<8x8xf32>
    %802 = arith.truncf %801 : vector<8x8xf32> to vector<8x8xbf16>
    %803 = vector.extract_strided_slice %717 {offsets = [0, 24], sizes = [8, 8], strides = [1, 1]} : vector<8x32xf32> to vector<8x8xf32>
    %804 = arith.truncf %803 : vector<8x8xf32> to vector<8x8xbf16>
    %cst_321 = arith.constant dense<0.000000e+00> : vector<8x8xf32>
    %805 = tpu.matmul %800, %802, %cst_321 {dimension_numbers = #tpu.dot_dimension_numbers<[1], [1], [0], [0], [0, 0, 1, 0], [], []>} : vector<8x8xbf16>, vector<8x8xbf16>, vector<8x8xf32> -> vector<8x8xf32>
    %cst_322 = arith.constant dense<0xFF800000> : vector<8xf32>
    %806 = vector.multi_reduction <maximumf>, %805, %cst_322 [1] : vector<8x8xf32> to vector<8xf32>
    %807 = vector.shape_cast %806 : vector<8xf32> to vector<8x1xf32>
    %808 = vector.broadcast %807 : vector<8x1xf32> to vector<8x8xf32>
    %809 = arith.subf %805, %808 : vector<8x8xf32>
    %810 = math.exp %809 : vector<8x8xf32>
    %cst_323 = arith.constant dense<0.000000e+00> : vector<8xf32>
    %811 = vector.multi_reduction <add>, %810, %cst_323 [1] : vector<8x8xf32> to vector<8xf32>
    %812 = vector.shape_cast %811 : vector<8xf32> to vector<8x1xf32>
    %813 = tpu.reciprocal %812 {approx = true} : vector<8x1xf32> -> vector<8x1xf32>
    %814 = vector.broadcast %813 : vector<8x1xf32> to vector<8x8xf32>
    %815 = arith.mulf %810, %814 : vector<8x8xf32>
    %816 = arith.truncf %815 : vector<8x8xf32> to vector<8x8xbf16>
    %cst_324 = arith.constant dense<0.000000e+00> : vector<8x8xf32>
    %817 = tpu.matmul %816, %804, %cst_324 {dimension_numbers = #tpu.dot_dimension_numbers<[1], [0], [0], [1], [0, 0, 1, 1], [], []>} : vector<8x8xbf16>, vector<8x8xbf16>, vector<8x8xf32> -> vector<8x8xf32>
    %818 = arith.truncf %817 : vector<8x8xf32> to vector<8x8xbf16>
    %c1_325 = arith.constant 1 : index
    %c24_326 = arith.constant 24 : index
    %c0_327 = arith.constant 0 : index
    %819 = vector.load %arg9[%c1_325, %c24_326, %c0_327] : memref<2x32x32xbf16, #tpu.memory_space<vmem>>, vector<1x8x32xbf16>
    %820 = vector.shape_cast %819 : vector<1x8x32xbf16> to vector<8x32xbf16>
    %cst_328 = arith.constant dense<0.000000e+00> : vector<8x32xf32>
    %821 = tpu.matmul %818, %820, %cst_328 {dimension_numbers = #tpu.dot_dimension_numbers<[1], [0], [0], [1], [0, 0, 1, 1], [], []>} : vector<8x8xbf16>, vector<8x32xbf16>, vector<8x32xf32> -> vector<8x32xf32>
    %822 = arith.addf %796, %821 : vector<8x32xf32>
    %823 = tpu.concatenate %714, %822 in 0 : vector<8x32xf32>, vector<8x32xf32> -> vector<16x32xf32>
    %c1_329 = arith.constant 1 : index
    %c0_330 = arith.constant 0 : index
    %c0_331 = arith.constant 0 : index
    %824 = vector.load %arg10[%c1_329, %c0_330, %c0_331] : memref<2x1x32xf32, #tpu.memory_space<vmem>>, vector<1x1x32xf32>
    %825 = vector.shape_cast %824 : vector<1x1x32xf32> to vector<1x32xf32>
    %826 = vector.broadcast %825 : vector<1x32xf32> to vector<16x32xf32>
    %827 = arith.addf %823, %826 : vector<16x32xf32>
    %828 = arith.addf %587, %827 : vector<16x32xf32>
    %c1_332 = arith.constant 1 : index
    %c0_333 = arith.constant 0 : index
    %c0_334 = arith.constant 0 : index
    %829 = vector.load %arg11[%c1_332, %c0_333, %c0_334] : memref<2x1x32xf32, #tpu.memory_space<vmem>>, vector<1x1x32xf32>
    %830 = vector.shape_cast %829 : vector<1x1x32xf32> to vector<1x32xf32>
    %c1_335 = arith.constant 1 : index
    %c0_336 = arith.constant 0 : index
    %c0_337 = arith.constant 0 : index
    %831 = vector.load %arg12[%c1_335, %c0_336, %c0_337] : memref<2x1x32xf32, #tpu.memory_space<vmem>>, vector<1x1x32xf32>
    %832 = vector.shape_cast %831 : vector<1x1x32xf32> to vector<1x32xf32>
    %cst_338 = arith.constant dense<0.000000e+00> : vector<16xf32>
    %833 = vector.multi_reduction <add>, %828, %cst_338 [1] : vector<16x32xf32> to vector<16xf32>
    %834 = vector.shape_cast %833 : vector<16xf32> to vector<16x1xf32>
    %cst_339 = arith.constant 3.200000e+01 : f32
    %835 = vector.broadcast %cst_339 : f32 to vector<16x1xf32>
    %836 = arith.divf %834, %835 : vector<16x1xf32>
    %837 = vector.broadcast %836 : vector<16x1xf32> to vector<16x32xf32>
    %838 = arith.subf %828, %837 : vector<16x32xf32>
    %839 = arith.mulf %838, %838 : vector<16x32xf32>
    %cst_340 = arith.constant dense<0.000000e+00> : vector<16xf32>
    %840 = vector.multi_reduction <add>, %839, %cst_340 [1] : vector<16x32xf32> to vector<16xf32>
    %841 = vector.shape_cast %840 : vector<16xf32> to vector<16x1xf32>
    %cst_341 = arith.constant 3.200000e+01 : f32
    %842 = vector.broadcast %cst_341 : f32 to vector<16x1xf32>
    %843 = arith.divf %841, %842 : vector<16x1xf32>
    %cst_342 = arith.constant 9.99999974E-6 : f32
    %844 = vector.broadcast %cst_342 : f32 to vector<16x1xf32>
    %845 = arith.addf %843, %844 : vector<16x1xf32>
    %846 = math.rsqrt %845 : vector<16x1xf32>
    %847 = vector.broadcast %846 : vector<16x1xf32> to vector<16x32xf32>
    %848 = arith.mulf %838, %847 : vector<16x32xf32>
    %849 = vector.broadcast %830 : vector<1x32xf32> to vector<16x32xf32>
    %850 = arith.mulf %848, %849 : vector<16x32xf32>
    %851 = vector.broadcast %832 : vector<1x32xf32> to vector<16x32xf32>
    %852 = arith.addf %850, %851 : vector<16x32xf32>
    %853 = arith.addf %852, %3 : vector<16x32xf32>
    %854 = arith.truncf %853 : vector<16x32xf32> to vector<16x32xbf16>
    %c1_343 = arith.constant 1 : index
    %c0_344 = arith.constant 0 : index
    %c0_345 = arith.constant 0 : index
    %855 = vector.load %arg13[%c1_343, %c0_344, %c0_345] : memref<2x32x32xbf16, #tpu.memory_space<vmem>>, vector<1x32x32xbf16>
    %856 = vector.shape_cast %855 : vector<1x32x32xbf16> to vector<32x32xbf16>
    %cst_346 = arith.constant dense<0.000000e+00> : vector<16x32xf32>
    %857 = tpu.matmul %854, %856, %cst_346 {dimension_numbers = #tpu.dot_dimension_numbers<[1], [0], [0], [1], [0, 0, 1, 1], [], []>} : vector<16x32xbf16>, vector<32x32xbf16>, vector<16x32xf32> -> vector<16x32xf32>
    %c1_347 = arith.constant 1 : index
    %c0_348 = arith.constant 0 : index
    %c0_349 = arith.constant 0 : index
    %858 = vector.load %arg14[%c1_347, %c0_348, %c0_349] : memref<2x1x32xf32, #tpu.memory_space<vmem>>, vector<1x1x32xf32>
    %859 = vector.shape_cast %858 : vector<1x1x32xf32> to vector<1x32xf32>
    %860 = vector.broadcast %859 : vector<1x32xf32> to vector<16x32xf32>
    %861 = arith.addf %857, %860 : vector<16x32xf32>
    %c1_350 = arith.constant 1 : index
    %c0_351 = arith.constant 0 : index
    %c0_352 = arith.constant 0 : index
    %862 = vector.load %arg15[%c1_350, %c0_351, %c0_352] : memref<2x32x32xbf16, #tpu.memory_space<vmem>>, vector<1x32x32xbf16>
    %863 = vector.shape_cast %862 : vector<1x32x32xbf16> to vector<32x32xbf16>
    %cst_353 = arith.constant dense<0.000000e+00> : vector<32x32xf32>
    %864 = tpu.matmul %9, %863, %cst_353 {dimension_numbers = #tpu.dot_dimension_numbers<[1], [0], [0], [1], [0, 0, 1, 1], [], []>} : vector<32x32xbf16>, vector<32x32xbf16>, vector<32x32xf32> -> vector<32x32xf32>
    %c1_354 = arith.constant 1 : index
    %c0_355 = arith.constant 0 : index
    %c0_356 = arith.constant 0 : index
    %865 = vector.load %arg16[%c1_354, %c0_355, %c0_356] : memref<2x1x32xf32, #tpu.memory_space<vmem>>, vector<1x1x32xf32>
    %866 = vector.shape_cast %865 : vector<1x1x32xf32> to vector<1x32xf32>
    %867 = vector.broadcast %866 : vector<1x32xf32> to vector<32x32xf32>
    %868 = arith.addf %864, %867 : vector<32x32xf32>
    %c1_357 = arith.constant 1 : index
    %c0_358 = arith.constant 0 : index
    %c0_359 = arith.constant 0 : index
    %869 = vector.load %arg17[%c1_357, %c0_358, %c0_359] : memref<2x32x32xbf16, #tpu.memory_space<vmem>>, vector<1x32x32xbf16>
    %870 = vector.shape_cast %869 : vector<1x32x32xbf16> to vector<32x32xbf16>
    %cst_360 = arith.constant dense<0.000000e+00> : vector<32x32xf32>
    %871 = tpu.matmul %10, %870, %cst_360 {dimension_numbers = #tpu.dot_dimension_numbers<[1], [0], [0], [1], [0, 0, 1, 1], [], []>} : vector<32x32xbf16>, vector<32x32xbf16>, vector<32x32xf32> -> vector<32x32xf32>
    %c1_361 = arith.constant 1 : index
    %c0_362 = arith.constant 0 : index
    %c0_363 = arith.constant 0 : index
    %872 = vector.load %arg18[%c1_361, %c0_362, %c0_363] : memref<2x1x32xf32, #tpu.memory_space<vmem>>, vector<1x1x32xf32>
    %873 = vector.shape_cast %872 : vector<1x1x32xf32> to vector<1x32xf32>
    %874 = vector.broadcast %873 : vector<1x32xf32> to vector<32x32xf32>
    %875 = arith.addf %871, %874 : vector<32x32xf32>
    %876 = vector.extract_strided_slice %861 {offsets = [0, 0], sizes = [8, 32], strides = [1, 1]} : vector<16x32xf32> to vector<8x32xf32>
    %877 = vector.extract_strided_slice %868 {offsets = [0, 0], sizes = [16, 32], strides = [1, 1]} : vector<32x32xf32> to vector<16x32xf32>
    %878 = vector.extract_strided_slice %875 {offsets = [0, 0], sizes = [16, 32], strides = [1, 1]} : vector<32x32xf32> to vector<16x32xf32>
    %cst_364 = arith.constant 0.000000e+00 : f32
    %879 = vector.broadcast %cst_364 : f32 to vector<8x32xf32>
    %880 = vector.extract_strided_slice %876 {offsets = [0, 0], sizes = [8, 8], strides = [1, 1]} : vector<8x32xf32> to vector<8x8xf32>
    %cst_365 = arith.constant 0.353553385 : f32
    %881 = vector.broadcast %cst_365 : f32 to vector<8x8xf32>
    %882 = arith.mulf %880, %881 : vector<8x8xf32>
    %883 = arith.truncf %882 : vector<8x8xf32> to vector<8x8xbf16>
    %884 = vector.extract_strided_slice %877 {offsets = [0, 0], sizes = [16, 8], strides = [1, 1]} : vector<16x32xf32> to vector<16x8xf32>
    %885 = arith.truncf %884 : vector<16x8xf32> to vector<16x8xbf16>
    %886 = vector.extract_strided_slice %878 {offsets = [0, 0], sizes = [16, 8], strides = [1, 1]} : vector<16x32xf32> to vector<16x8xf32>
    %887 = arith.truncf %886 : vector<16x8xf32> to vector<16x8xbf16>
    %cst_366 = arith.constant dense<0.000000e+00> : vector<8x16xf32>
    %888 = tpu.matmul %883, %885, %cst_366 {dimension_numbers = #tpu.dot_dimension_numbers<[1], [1], [0], [0], [0, 0, 1, 0], [], []>} : vector<8x8xbf16>, vector<16x8xbf16>, vector<8x16xf32> -> vector<8x16xf32>
    %cst_367 = arith.constant dense<0xFF800000> : vector<8xf32>
    %889 = vector.multi_reduction <maximumf>, %888, %cst_367 [1] : vector<8x16xf32> to vector<8xf32>
    %890 = vector.shape_cast %889 : vector<8xf32> to vector<8x1xf32>
    %891 = vector.broadcast %890 : vector<8x1xf32> to vector<8x16xf32>
    %892 = arith.subf %888, %891 : vector<8x16xf32>
    %893 = math.exp %892 : vector<8x16xf32>
    %cst_368 = arith.constant dense<0.000000e+00> : vector<8xf32>
    %894 = vector.multi_reduction <add>, %893, %cst_368 [1] : vector<8x16xf32> to vector<8xf32>
    %895 = vector.shape_cast %894 : vector<8xf32> to vector<8x1xf32>
    %896 = tpu.reciprocal %895 {approx = true} : vector<8x1xf32> -> vector<8x1xf32>
    %897 = vector.broadcast %896 : vector<8x1xf32> to vector<8x16xf32>
    %898 = arith.mulf %893, %897 : vector<8x16xf32>
    %899 = arith.truncf %898 : vector<8x16xf32> to vector<8x16xbf16>
    %cst_369 = arith.constant dense<0.000000e+00> : vector<8x8xf32>
    %900 = tpu.matmul %899, %887, %cst_369 {dimension_numbers = #tpu.dot_dimension_numbers<[1], [0], [0], [1], [0, 0, 1, 1], [], []>} : vector<8x16xbf16>, vector<16x8xbf16>, vector<8x8xf32> -> vector<8x8xf32>
    %901 = arith.truncf %900 : vector<8x8xf32> to vector<8x8xbf16>
    %c1_370 = arith.constant 1 : index
    %c0_371 = arith.constant 0 : index
    %c0_372 = arith.constant 0 : index
    %902 = vector.load %arg19[%c1_370, %c0_371, %c0_372] : memref<2x32x32xbf16, #tpu.memory_space<vmem>>, vector<1x8x32xbf16>
    %903 = vector.shape_cast %902 : vector<1x8x32xbf16> to vector<8x32xbf16>
    %cst_373 = arith.constant dense<0.000000e+00> : vector<8x32xf32>
    %904 = tpu.matmul %901, %903, %cst_373 {dimension_numbers = #tpu.dot_dimension_numbers<[1], [0], [0], [1], [0, 0, 1, 1], [], []>} : vector<8x8xbf16>, vector<8x32xbf16>, vector<8x32xf32> -> vector<8x32xf32>
    %905 = arith.addf %879, %904 : vector<8x32xf32>
    %906 = vector.extract_strided_slice %876 {offsets = [0, 8], sizes = [8, 8], strides = [1, 1]} : vector<8x32xf32> to vector<8x8xf32>
    %cst_374 = arith.constant 0.353553385 : f32
    %907 = vector.broadcast %cst_374 : f32 to vector<8x8xf32>
    %908 = arith.mulf %906, %907 : vector<8x8xf32>
    %909 = arith.truncf %908 : vector<8x8xf32> to vector<8x8xbf16>
    %910 = vector.extract_strided_slice %877 {offsets = [0, 8], sizes = [16, 8], strides = [1, 1]} : vector<16x32xf32> to vector<16x8xf32>
    %911 = arith.truncf %910 : vector<16x8xf32> to vector<16x8xbf16>
    %912 = vector.extract_strided_slice %878 {offsets = [0, 8], sizes = [16, 8], strides = [1, 1]} : vector<16x32xf32> to vector<16x8xf32>
    %913 = arith.truncf %912 : vector<16x8xf32> to vector<16x8xbf16>
    %cst_375 = arith.constant dense<0.000000e+00> : vector<8x16xf32>
    %914 = tpu.matmul %909, %911, %cst_375 {dimension_numbers = #tpu.dot_dimension_numbers<[1], [1], [0], [0], [0, 0, 1, 0], [], []>} : vector<8x8xbf16>, vector<16x8xbf16>, vector<8x16xf32> -> vector<8x16xf32>
    %cst_376 = arith.constant dense<0xFF800000> : vector<8xf32>
    %915 = vector.multi_reduction <maximumf>, %914, %cst_376 [1] : vector<8x16xf32> to vector<8xf32>
    %916 = vector.shape_cast %915 : vector<8xf32> to vector<8x1xf32>
    %917 = vector.broadcast %916 : vector<8x1xf32> to vector<8x16xf32>
    %918 = arith.subf %914, %917 : vector<8x16xf32>
    %919 = math.exp %918 : vector<8x16xf32>
    %cst_377 = arith.constant dense<0.000000e+00> : vector<8xf32>
    %920 = vector.multi_reduction <add>, %919, %cst_377 [1] : vector<8x16xf32> to vector<8xf32>
    %921 = vector.shape_cast %920 : vector<8xf32> to vector<8x1xf32>
    %922 = tpu.reciprocal %921 {approx = true} : vector<8x1xf32> -> vector<8x1xf32>
    %923 = vector.broadcast %922 : vector<8x1xf32> to vector<8x16xf32>
    %924 = arith.mulf %919, %923 : vector<8x16xf32>
    %925 = arith.truncf %924 : vector<8x16xf32> to vector<8x16xbf16>
    %cst_378 = arith.constant dense<0.000000e+00> : vector<8x8xf32>
    %926 = tpu.matmul %925, %913, %cst_378 {dimension_numbers = #tpu.dot_dimension_numbers<[1], [0], [0], [1], [0, 0, 1, 1], [], []>} : vector<8x16xbf16>, vector<16x8xbf16>, vector<8x8xf32> -> vector<8x8xf32>
    %927 = arith.truncf %926 : vector<8x8xf32> to vector<8x8xbf16>
    %c1_379 = arith.constant 1 : index
    %c8_380 = arith.constant 8 : index
    %c0_381 = arith.constant 0 : index
    %928 = vector.load %arg19[%c1_379, %c8_380, %c0_381] : memref<2x32x32xbf16, #tpu.memory_space<vmem>>, vector<1x8x32xbf16>
    %929 = vector.shape_cast %928 : vector<1x8x32xbf16> to vector<8x32xbf16>
    %cst_382 = arith.constant dense<0.000000e+00> : vector<8x32xf32>
    %930 = tpu.matmul %927, %929, %cst_382 {dimension_numbers = #tpu.dot_dimension_numbers<[1], [0], [0], [1], [0, 0, 1, 1], [], []>} : vector<8x8xbf16>, vector<8x32xbf16>, vector<8x32xf32> -> vector<8x32xf32>
    %931 = arith.addf %905, %930 : vector<8x32xf32>
    %932 = vector.extract_strided_slice %876 {offsets = [0, 16], sizes = [8, 8], strides = [1, 1]} : vector<8x32xf32> to vector<8x8xf32>
    %cst_383 = arith.constant 0.353553385 : f32
    %933 = vector.broadcast %cst_383 : f32 to vector<8x8xf32>
    %934 = arith.mulf %932, %933 : vector<8x8xf32>
    %935 = arith.truncf %934 : vector<8x8xf32> to vector<8x8xbf16>
    %936 = vector.extract_strided_slice %877 {offsets = [0, 16], sizes = [16, 8], strides = [1, 1]} : vector<16x32xf32> to vector<16x8xf32>
    %937 = arith.truncf %936 : vector<16x8xf32> to vector<16x8xbf16>
    %938 = vector.extract_strided_slice %878 {offsets = [0, 16], sizes = [16, 8], strides = [1, 1]} : vector<16x32xf32> to vector<16x8xf32>
    %939 = arith.truncf %938 : vector<16x8xf32> to vector<16x8xbf16>
    %cst_384 = arith.constant dense<0.000000e+00> : vector<8x16xf32>
    %940 = tpu.matmul %935, %937, %cst_384 {dimension_numbers = #tpu.dot_dimension_numbers<[1], [1], [0], [0], [0, 0, 1, 0], [], []>} : vector<8x8xbf16>, vector<16x8xbf16>, vector<8x16xf32> -> vector<8x16xf32>
    %cst_385 = arith.constant dense<0xFF800000> : vector<8xf32>
    %941 = vector.multi_reduction <maximumf>, %940, %cst_385 [1] : vector<8x16xf32> to vector<8xf32>
    %942 = vector.shape_cast %941 : vector<8xf32> to vector<8x1xf32>
    %943 = vector.broadcast %942 : vector<8x1xf32> to vector<8x16xf32>
    %944 = arith.subf %940, %943 : vector<8x16xf32>
    %945 = math.exp %944 : vector<8x16xf32>
    %cst_386 = arith.constant dense<0.000000e+00> : vector<8xf32>
    %946 = vector.multi_reduction <add>, %945, %cst_386 [1] : vector<8x16xf32> to vector<8xf32>
    %947 = vector.shape_cast %946 : vector<8xf32> to vector<8x1xf32>
    %948 = tpu.reciprocal %947 {approx = true} : vector<8x1xf32> -> vector<8x1xf32>
    %949 = vector.broadcast %948 : vector<8x1xf32> to vector<8x16xf32>
    %950 = arith.mulf %945, %949 : vector<8x16xf32>
    %951 = arith.truncf %950 : vector<8x16xf32> to vector<8x16xbf16>
    %cst_387 = arith.constant dense<0.000000e+00> : vector<8x8xf32>
    %952 = tpu.matmul %951, %939, %cst_387 {dimension_numbers = #tpu.dot_dimension_numbers<[1], [0], [0], [1], [0, 0, 1, 1], [], []>} : vector<8x16xbf16>, vector<16x8xbf16>, vector<8x8xf32> -> vector<8x8xf32>
    %953 = arith.truncf %952 : vector<8x8xf32> to vector<8x8xbf16>
    %c1_388 = arith.constant 1 : index
    %c16_389 = arith.constant 16 : index
    %c0_390 = arith.constant 0 : index
    %954 = vector.load %arg19[%c1_388, %c16_389, %c0_390] : memref<2x32x32xbf16, #tpu.memory_space<vmem>>, vector<1x8x32xbf16>
    %955 = vector.shape_cast %954 : vector<1x8x32xbf16> to vector<8x32xbf16>
    %cst_391 = arith.constant dense<0.000000e+00> : vector<8x32xf32>
    %956 = tpu.matmul %953, %955, %cst_391 {dimension_numbers = #tpu.dot_dimension_numbers<[1], [0], [0], [1], [0, 0, 1, 1], [], []>} : vector<8x8xbf16>, vector<8x32xbf16>, vector<8x32xf32> -> vector<8x32xf32>
    %957 = arith.addf %931, %956 : vector<8x32xf32>
    %958 = vector.extract_strided_slice %876 {offsets = [0, 24], sizes = [8, 8], strides = [1, 1]} : vector<8x32xf32> to vector<8x8xf32>
    %cst_392 = arith.constant 0.353553385 : f32
    %959 = vector.broadcast %cst_392 : f32 to vector<8x8xf32>
    %960 = arith.mulf %958, %959 : vector<8x8xf32>
    %961 = arith.truncf %960 : vector<8x8xf32> to vector<8x8xbf16>
    %962 = vector.extract_strided_slice %877 {offsets = [0, 24], sizes = [16, 8], strides = [1, 1]} : vector<16x32xf32> to vector<16x8xf32>
    %963 = arith.truncf %962 : vector<16x8xf32> to vector<16x8xbf16>
    %964 = vector.extract_strided_slice %878 {offsets = [0, 24], sizes = [16, 8], strides = [1, 1]} : vector<16x32xf32> to vector<16x8xf32>
    %965 = arith.truncf %964 : vector<16x8xf32> to vector<16x8xbf16>
    %cst_393 = arith.constant dense<0.000000e+00> : vector<8x16xf32>
    %966 = tpu.matmul %961, %963, %cst_393 {dimension_numbers = #tpu.dot_dimension_numbers<[1], [1], [0], [0], [0, 0, 1, 0], [], []>} : vector<8x8xbf16>, vector<16x8xbf16>, vector<8x16xf32> -> vector<8x16xf32>
    %cst_394 = arith.constant dense<0xFF800000> : vector<8xf32>
    %967 = vector.multi_reduction <maximumf>, %966, %cst_394 [1] : vector<8x16xf32> to vector<8xf32>
    %968 = vector.shape_cast %967 : vector<8xf32> to vector<8x1xf32>
    %969 = vector.broadcast %968 : vector<8x1xf32> to vector<8x16xf32>
    %970 = arith.subf %966, %969 : vector<8x16xf32>
    %971 = math.exp %970 : vector<8x16xf32>
    %cst_395 = arith.constant dense<0.000000e+00> : vector<8xf32>
    %972 = vector.multi_reduction <add>, %971, %cst_395 [1] : vector<8x16xf32> to vector<8xf32>
    %973 = vector.shape_cast %972 : vector<8xf32> to vector<8x1xf32>
    %974 = tpu.reciprocal %973 {approx = true} : vector<8x1xf32> -> vector<8x1xf32>
    %975 = vector.broadcast %974 : vector<8x1xf32> to vector<8x16xf32>
    %976 = arith.mulf %971, %975 : vector<8x16xf32>
    %977 = arith.truncf %976 : vector<8x16xf32> to vector<8x16xbf16>
    %cst_396 = arith.constant dense<0.000000e+00> : vector<8x8xf32>
    %978 = tpu.matmul %977, %965, %cst_396 {dimension_numbers = #tpu.dot_dimension_numbers<[1], [0], [0], [1], [0, 0, 1, 1], [], []>} : vector<8x16xbf16>, vector<16x8xbf16>, vector<8x8xf32> -> vector<8x8xf32>
    %979 = arith.truncf %978 : vector<8x8xf32> to vector<8x8xbf16>
    %c1_397 = arith.constant 1 : index
    %c24_398 = arith.constant 24 : index
    %c0_399 = arith.constant 0 : index
    %980 = vector.load %arg19[%c1_397, %c24_398, %c0_399] : memref<2x32x32xbf16, #tpu.memory_space<vmem>>, vector<1x8x32xbf16>
    %981 = vector.shape_cast %980 : vector<1x8x32xbf16> to vector<8x32xbf16>
    %cst_400 = arith.constant dense<0.000000e+00> : vector<8x32xf32>
    %982 = tpu.matmul %979, %981, %cst_400 {dimension_numbers = #tpu.dot_dimension_numbers<[1], [0], [0], [1], [0, 0, 1, 1], [], []>} : vector<8x8xbf16>, vector<8x32xbf16>, vector<8x32xf32> -> vector<8x32xf32>
    %983 = arith.addf %957, %982 : vector<8x32xf32>
    %984 = vector.extract_strided_slice %861 {offsets = [8, 0], sizes = [8, 32], strides = [1, 1]} : vector<16x32xf32> to vector<8x32xf32>
    %985 = vector.extract_strided_slice %868 {offsets = [16, 0], sizes = [16, 32], strides = [1, 1]} : vector<32x32xf32> to vector<16x32xf32>
    %986 = vector.extract_strided_slice %875 {offsets = [16, 0], sizes = [16, 32], strides = [1, 1]} : vector<32x32xf32> to vector<16x32xf32>
    %cst_401 = arith.constant 0.000000e+00 : f32
    %987 = vector.broadcast %cst_401 : f32 to vector<8x32xf32>
    %988 = vector.extract_strided_slice %984 {offsets = [0, 0], sizes = [8, 8], strides = [1, 1]} : vector<8x32xf32> to vector<8x8xf32>
    %cst_402 = arith.constant 0.353553385 : f32
    %989 = vector.broadcast %cst_402 : f32 to vector<8x8xf32>
    %990 = arith.mulf %988, %989 : vector<8x8xf32>
    %991 = arith.truncf %990 : vector<8x8xf32> to vector<8x8xbf16>
    %992 = vector.extract_strided_slice %985 {offsets = [0, 0], sizes = [16, 8], strides = [1, 1]} : vector<16x32xf32> to vector<16x8xf32>
    %993 = arith.truncf %992 : vector<16x8xf32> to vector<16x8xbf16>
    %994 = vector.extract_strided_slice %986 {offsets = [0, 0], sizes = [16, 8], strides = [1, 1]} : vector<16x32xf32> to vector<16x8xf32>
    %995 = arith.truncf %994 : vector<16x8xf32> to vector<16x8xbf16>
    %cst_403 = arith.constant dense<0.000000e+00> : vector<8x16xf32>
    %996 = tpu.matmul %991, %993, %cst_403 {dimension_numbers = #tpu.dot_dimension_numbers<[1], [1], [0], [0], [0, 0, 1, 0], [], []>} : vector<8x8xbf16>, vector<16x8xbf16>, vector<8x16xf32> -> vector<8x16xf32>
    %cst_404 = arith.constant dense<0xFF800000> : vector<8xf32>
    %997 = vector.multi_reduction <maximumf>, %996, %cst_404 [1] : vector<8x16xf32> to vector<8xf32>
    %998 = vector.shape_cast %997 : vector<8xf32> to vector<8x1xf32>
    %999 = vector.broadcast %998 : vector<8x1xf32> to vector<8x16xf32>
    %1000 = arith.subf %996, %999 : vector<8x16xf32>
    %1001 = math.exp %1000 : vector<8x16xf32>
    %cst_405 = arith.constant dense<0.000000e+00> : vector<8xf32>
    %1002 = vector.multi_reduction <add>, %1001, %cst_405 [1] : vector<8x16xf32> to vector<8xf32>
    %1003 = vector.shape_cast %1002 : vector<8xf32> to vector<8x1xf32>
    %1004 = tpu.reciprocal %1003 {approx = true} : vector<8x1xf32> -> vector<8x1xf32>
    %1005 = vector.broadcast %1004 : vector<8x1xf32> to vector<8x16xf32>
    %1006 = arith.mulf %1001, %1005 : vector<8x16xf32>
    %1007 = arith.truncf %1006 : vector<8x16xf32> to vector<8x16xbf16>
    %cst_406 = arith.constant dense<0.000000e+00> : vector<8x8xf32>
    %1008 = tpu.matmul %1007, %995, %cst_406 {dimension_numbers = #tpu.dot_dimension_numbers<[1], [0], [0], [1], [0, 0, 1, 1], [], []>} : vector<8x16xbf16>, vector<16x8xbf16>, vector<8x8xf32> -> vector<8x8xf32>
    %1009 = arith.truncf %1008 : vector<8x8xf32> to vector<8x8xbf16>
    %c1_407 = arith.constant 1 : index
    %c0_408 = arith.constant 0 : index
    %c0_409 = arith.constant 0 : index
    %1010 = vector.load %arg19[%c1_407, %c0_408, %c0_409] : memref<2x32x32xbf16, #tpu.memory_space<vmem>>, vector<1x8x32xbf16>
    %1011 = vector.shape_cast %1010 : vector<1x8x32xbf16> to vector<8x32xbf16>
    %cst_410 = arith.constant dense<0.000000e+00> : vector<8x32xf32>
    %1012 = tpu.matmul %1009, %1011, %cst_410 {dimension_numbers = #tpu.dot_dimension_numbers<[1], [0], [0], [1], [0, 0, 1, 1], [], []>} : vector<8x8xbf16>, vector<8x32xbf16>, vector<8x32xf32> -> vector<8x32xf32>
    %1013 = arith.addf %987, %1012 : vector<8x32xf32>
    %1014 = vector.extract_strided_slice %984 {offsets = [0, 8], sizes = [8, 8], strides = [1, 1]} : vector<8x32xf32> to vector<8x8xf32>
    %cst_411 = arith.constant 0.353553385 : f32
    %1015 = vector.broadcast %cst_411 : f32 to vector<8x8xf32>
    %1016 = arith.mulf %1014, %1015 : vector<8x8xf32>
    %1017 = arith.truncf %1016 : vector<8x8xf32> to vector<8x8xbf16>
    %1018 = vector.extract_strided_slice %985 {offsets = [0, 8], sizes = [16, 8], strides = [1, 1]} : vector<16x32xf32> to vector<16x8xf32>
    %1019 = arith.truncf %1018 : vector<16x8xf32> to vector<16x8xbf16>
    %1020 = vector.extract_strided_slice %986 {offsets = [0, 8], sizes = [16, 8], strides = [1, 1]} : vector<16x32xf32> to vector<16x8xf32>
    %1021 = arith.truncf %1020 : vector<16x8xf32> to vector<16x8xbf16>
    %cst_412 = arith.constant dense<0.000000e+00> : vector<8x16xf32>
    %1022 = tpu.matmul %1017, %1019, %cst_412 {dimension_numbers = #tpu.dot_dimension_numbers<[1], [1], [0], [0], [0, 0, 1, 0], [], []>} : vector<8x8xbf16>, vector<16x8xbf16>, vector<8x16xf32> -> vector<8x16xf32>
    %cst_413 = arith.constant dense<0xFF800000> : vector<8xf32>
    %1023 = vector.multi_reduction <maximumf>, %1022, %cst_413 [1] : vector<8x16xf32> to vector<8xf32>
    %1024 = vector.shape_cast %1023 : vector<8xf32> to vector<8x1xf32>
    %1025 = vector.broadcast %1024 : vector<8x1xf32> to vector<8x16xf32>
    %1026 = arith.subf %1022, %1025 : vector<8x16xf32>
    %1027 = math.exp %1026 : vector<8x16xf32>
    %cst_414 = arith.constant dense<0.000000e+00> : vector<8xf32>
    %1028 = vector.multi_reduction <add>, %1027, %cst_414 [1] : vector<8x16xf32> to vector<8xf32>
    %1029 = vector.shape_cast %1028 : vector<8xf32> to vector<8x1xf32>
    %1030 = tpu.reciprocal %1029 {approx = true} : vector<8x1xf32> -> vector<8x1xf32>
    %1031 = vector.broadcast %1030 : vector<8x1xf32> to vector<8x16xf32>
    %1032 = arith.mulf %1027, %1031 : vector<8x16xf32>
    %1033 = arith.truncf %1032 : vector<8x16xf32> to vector<8x16xbf16>
    %cst_415 = arith.constant dense<0.000000e+00> : vector<8x8xf32>
    %1034 = tpu.matmul %1033, %1021, %cst_415 {dimension_numbers = #tpu.dot_dimension_numbers<[1], [0], [0], [1], [0, 0, 1, 1], [], []>} : vector<8x16xbf16>, vector<16x8xbf16>, vector<8x8xf32> -> vector<8x8xf32>
    %1035 = arith.truncf %1034 : vector<8x8xf32> to vector<8x8xbf16>
    %c1_416 = arith.constant 1 : index
    %c8_417 = arith.constant 8 : index
    %c0_418 = arith.constant 0 : index
    %1036 = vector.load %arg19[%c1_416, %c8_417, %c0_418] : memref<2x32x32xbf16, #tpu.memory_space<vmem>>, vector<1x8x32xbf16>
    %1037 = vector.shape_cast %1036 : vector<1x8x32xbf16> to vector<8x32xbf16>
    %cst_419 = arith.constant dense<0.000000e+00> : vector<8x32xf32>
    %1038 = tpu.matmul %1035, %1037, %cst_419 {dimension_numbers = #tpu.dot_dimension_numbers<[1], [0], [0], [1], [0, 0, 1, 1], [], []>} : vector<8x8xbf16>, vector<8x32xbf16>, vector<8x32xf32> -> vector<8x32xf32>
    %1039 = arith.addf %1013, %1038 : vector<8x32xf32>
    %1040 = vector.extract_strided_slice %984 {offsets = [0, 16], sizes = [8, 8], strides = [1, 1]} : vector<8x32xf32> to vector<8x8xf32>
    %cst_420 = arith.constant 0.353553385 : f32
    %1041 = vector.broadcast %cst_420 : f32 to vector<8x8xf32>
    %1042 = arith.mulf %1040, %1041 : vector<8x8xf32>
    %1043 = arith.truncf %1042 : vector<8x8xf32> to vector<8x8xbf16>
    %1044 = vector.extract_strided_slice %985 {offsets = [0, 16], sizes = [16, 8], strides = [1, 1]} : vector<16x32xf32> to vector<16x8xf32>
    %1045 = arith.truncf %1044 : vector<16x8xf32> to vector<16x8xbf16>
    %1046 = vector.extract_strided_slice %986 {offsets = [0, 16], sizes = [16, 8], strides = [1, 1]} : vector<16x32xf32> to vector<16x8xf32>
    %1047 = arith.truncf %1046 : vector<16x8xf32> to vector<16x8xbf16>
    %cst_421 = arith.constant dense<0.000000e+00> : vector<8x16xf32>
    %1048 = tpu.matmul %1043, %1045, %cst_421 {dimension_numbers = #tpu.dot_dimension_numbers<[1], [1], [0], [0], [0, 0, 1, 0], [], []>} : vector<8x8xbf16>, vector<16x8xbf16>, vector<8x16xf32> -> vector<8x16xf32>
    %cst_422 = arith.constant dense<0xFF800000> : vector<8xf32>
    %1049 = vector.multi_reduction <maximumf>, %1048, %cst_422 [1] : vector<8x16xf32> to vector<8xf32>
    %1050 = vector.shape_cast %1049 : vector<8xf32> to vector<8x1xf32>
    %1051 = vector.broadcast %1050 : vector<8x1xf32> to vector<8x16xf32>
    %1052 = arith.subf %1048, %1051 : vector<8x16xf32>
    %1053 = math.exp %1052 : vector<8x16xf32>
    %cst_423 = arith.constant dense<0.000000e+00> : vector<8xf32>
    %1054 = vector.multi_reduction <add>, %1053, %cst_423 [1] : vector<8x16xf32> to vector<8xf32>
    %1055 = vector.shape_cast %1054 : vector<8xf32> to vector<8x1xf32>
    %1056 = tpu.reciprocal %1055 {approx = true} : vector<8x1xf32> -> vector<8x1xf32>
    %1057 = vector.broadcast %1056 : vector<8x1xf32> to vector<8x16xf32>
    %1058 = arith.mulf %1053, %1057 : vector<8x16xf32>
    %1059 = arith.truncf %1058 : vector<8x16xf32> to vector<8x16xbf16>
    %cst_424 = arith.constant dense<0.000000e+00> : vector<8x8xf32>
    %1060 = tpu.matmul %1059, %1047, %cst_424 {dimension_numbers = #tpu.dot_dimension_numbers<[1], [0], [0], [1], [0, 0, 1, 1], [], []>} : vector<8x16xbf16>, vector<16x8xbf16>, vector<8x8xf32> -> vector<8x8xf32>
    %1061 = arith.truncf %1060 : vector<8x8xf32> to vector<8x8xbf16>
    %c1_425 = arith.constant 1 : index
    %c16_426 = arith.constant 16 : index
    %c0_427 = arith.constant 0 : index
    %1062 = vector.load %arg19[%c1_425, %c16_426, %c0_427] : memref<2x32x32xbf16, #tpu.memory_space<vmem>>, vector<1x8x32xbf16>
    %1063 = vector.shape_cast %1062 : vector<1x8x32xbf16> to vector<8x32xbf16>
    %cst_428 = arith.constant dense<0.000000e+00> : vector<8x32xf32>
    %1064 = tpu.matmul %1061, %1063, %cst_428 {dimension_numbers = #tpu.dot_dimension_numbers<[1], [0], [0], [1], [0, 0, 1, 1], [], []>} : vector<8x8xbf16>, vector<8x32xbf16>, vector<8x32xf32> -> vector<8x32xf32>
    %1065 = arith.addf %1039, %1064 : vector<8x32xf32>
    %1066 = vector.extract_strided_slice %984 {offsets = [0, 24], sizes = [8, 8], strides = [1, 1]} : vector<8x32xf32> to vector<8x8xf32>
    %cst_429 = arith.constant 0.353553385 : f32
    %1067 = vector.broadcast %cst_429 : f32 to vector<8x8xf32>
    %1068 = arith.mulf %1066, %1067 : vector<8x8xf32>
    %1069 = arith.truncf %1068 : vector<8x8xf32> to vector<8x8xbf16>
    %1070 = vector.extract_strided_slice %985 {offsets = [0, 24], sizes = [16, 8], strides = [1, 1]} : vector<16x32xf32> to vector<16x8xf32>
    %1071 = arith.truncf %1070 : vector<16x8xf32> to vector<16x8xbf16>
    %1072 = vector.extract_strided_slice %986 {offsets = [0, 24], sizes = [16, 8], strides = [1, 1]} : vector<16x32xf32> to vector<16x8xf32>
    %1073 = arith.truncf %1072 : vector<16x8xf32> to vector<16x8xbf16>
    %cst_430 = arith.constant dense<0.000000e+00> : vector<8x16xf32>
    %1074 = tpu.matmul %1069, %1071, %cst_430 {dimension_numbers = #tpu.dot_dimension_numbers<[1], [1], [0], [0], [0, 0, 1, 0], [], []>} : vector<8x8xbf16>, vector<16x8xbf16>, vector<8x16xf32> -> vector<8x16xf32>
    %cst_431 = arith.constant dense<0xFF800000> : vector<8xf32>
    %1075 = vector.multi_reduction <maximumf>, %1074, %cst_431 [1] : vector<8x16xf32> to vector<8xf32>
    %1076 = vector.shape_cast %1075 : vector<8xf32> to vector<8x1xf32>
    %1077 = vector.broadcast %1076 : vector<8x1xf32> to vector<8x16xf32>
    %1078 = arith.subf %1074, %1077 : vector<8x16xf32>
    %1079 = math.exp %1078 : vector<8x16xf32>
    %cst_432 = arith.constant dense<0.000000e+00> : vector<8xf32>
    %1080 = vector.multi_reduction <add>, %1079, %cst_432 [1] : vector<8x16xf32> to vector<8xf32>
    %1081 = vector.shape_cast %1080 : vector<8xf32> to vector<8x1xf32>
    %1082 = tpu.reciprocal %1081 {approx = true} : vector<8x1xf32> -> vector<8x1xf32>
    %1083 = vector.broadcast %1082 : vector<8x1xf32> to vector<8x16xf32>
    %1084 = arith.mulf %1079, %1083 : vector<8x16xf32>
    %1085 = arith.truncf %1084 : vector<8x16xf32> to vector<8x16xbf16>
    %cst_433 = arith.constant dense<0.000000e+00> : vector<8x8xf32>
    %1086 = tpu.matmul %1085, %1073, %cst_433 {dimension_numbers = #tpu.dot_dimension_numbers<[1], [0], [0], [1], [0, 0, 1, 1], [], []>} : vector<8x16xbf16>, vector<16x8xbf16>, vector<8x8xf32> -> vector<8x8xf32>
    %1087 = arith.truncf %1086 : vector<8x8xf32> to vector<8x8xbf16>
    %c1_434 = arith.constant 1 : index
    %c24_435 = arith.constant 24 : index
    %c0_436 = arith.constant 0 : index
    %1088 = vector.load %arg19[%c1_434, %c24_435, %c0_436] : memref<2x32x32xbf16, #tpu.memory_space<vmem>>, vector<1x8x32xbf16>
    %1089 = vector.shape_cast %1088 : vector<1x8x32xbf16> to vector<8x32xbf16>
    %cst_437 = arith.constant dense<0.000000e+00> : vector<8x32xf32>
    %1090 = tpu.matmul %1087, %1089, %cst_437 {dimension_numbers = #tpu.dot_dimension_numbers<[1], [0], [0], [1], [0, 0, 1, 1], [], []>} : vector<8x8xbf16>, vector<8x32xbf16>, vector<8x32xf32> -> vector<8x32xf32>
    %1091 = arith.addf %1065, %1090 : vector<8x32xf32>
    %1092 = tpu.concatenate %983, %1091 in 0 : vector<8x32xf32>, vector<8x32xf32> -> vector<16x32xf32>
    %c1_438 = arith.constant 1 : index
    %c0_439 = arith.constant 0 : index
    %c0_440 = arith.constant 0 : index
    %1093 = vector.load %arg20[%c1_438, %c0_439, %c0_440] : memref<2x1x32xf32, #tpu.memory_space<vmem>>, vector<1x1x32xf32>
    %1094 = vector.shape_cast %1093 : vector<1x1x32xf32> to vector<1x32xf32>
    %1095 = vector.broadcast %1094 : vector<1x32xf32> to vector<16x32xf32>
    %1096 = arith.addf %1092, %1095 : vector<16x32xf32>
    %1097 = arith.addf %852, %1096 : vector<16x32xf32>
    %c1_441 = arith.constant 1 : index
    %c0_442 = arith.constant 0 : index
    %c0_443 = arith.constant 0 : index
    %1098 = vector.load %arg21[%c1_441, %c0_442, %c0_443] : memref<2x1x32xf32, #tpu.memory_space<vmem>>, vector<1x1x32xf32>
    %1099 = vector.shape_cast %1098 : vector<1x1x32xf32> to vector<1x32xf32>
    %c1_444 = arith.constant 1 : index
    %c0_445 = arith.constant 0 : index
    %c0_446 = arith.constant 0 : index
    %1100 = vector.load %arg22[%c1_444, %c0_445, %c0_446] : memref<2x1x32xf32, #tpu.memory_space<vmem>>, vector<1x1x32xf32>
    %1101 = vector.shape_cast %1100 : vector<1x1x32xf32> to vector<1x32xf32>
    %cst_447 = arith.constant dense<0.000000e+00> : vector<16xf32>
    %1102 = vector.multi_reduction <add>, %1097, %cst_447 [1] : vector<16x32xf32> to vector<16xf32>
    %1103 = vector.shape_cast %1102 : vector<16xf32> to vector<16x1xf32>
    %cst_448 = arith.constant 3.200000e+01 : f32
    %1104 = vector.broadcast %cst_448 : f32 to vector<16x1xf32>
    %1105 = arith.divf %1103, %1104 : vector<16x1xf32>
    %1106 = vector.broadcast %1105 : vector<16x1xf32> to vector<16x32xf32>
    %1107 = arith.subf %1097, %1106 : vector<16x32xf32>
    %1108 = arith.mulf %1107, %1107 : vector<16x32xf32>
    %cst_449 = arith.constant dense<0.000000e+00> : vector<16xf32>
    %1109 = vector.multi_reduction <add>, %1108, %cst_449 [1] : vector<16x32xf32> to vector<16xf32>
    %1110 = vector.shape_cast %1109 : vector<16xf32> to vector<16x1xf32>
    %cst_450 = arith.constant 3.200000e+01 : f32
    %1111 = vector.broadcast %cst_450 : f32 to vector<16x1xf32>
    %1112 = arith.divf %1110, %1111 : vector<16x1xf32>
    %cst_451 = arith.constant 9.99999974E-6 : f32
    %1113 = vector.broadcast %cst_451 : f32 to vector<16x1xf32>
    %1114 = arith.addf %1112, %1113 : vector<16x1xf32>
    %1115 = math.rsqrt %1114 : vector<16x1xf32>
    %1116 = vector.broadcast %1115 : vector<16x1xf32> to vector<16x32xf32>
    %1117 = arith.mulf %1107, %1116 : vector<16x32xf32>
    %1118 = vector.broadcast %1099 : vector<1x32xf32> to vector<16x32xf32>
    %1119 = arith.mulf %1117, %1118 : vector<16x32xf32>
    %1120 = vector.broadcast %1101 : vector<1x32xf32> to vector<16x32xf32>
    %1121 = arith.addf %1119, %1120 : vector<16x32xf32>
    %1122 = arith.truncf %1121 : vector<16x32xf32> to vector<16x32xbf16>
    %c1_452 = arith.constant 1 : index
    %c0_453 = arith.constant 0 : index
    %c0_454 = arith.constant 0 : index
    %1123 = vector.load %arg23[%c1_452, %c0_453, %c0_454] : memref<2x32x64xbf16, #tpu.memory_space<vmem>>, vector<1x32x64xbf16>
    %1124 = vector.shape_cast %1123 : vector<1x32x64xbf16> to vector<32x64xbf16>
    %cst_455 = arith.constant dense<0.000000e+00> : vector<16x64xf32>
    %1125 = tpu.matmul %1122, %1124, %cst_455 {dimension_numbers = #tpu.dot_dimension_numbers<[1], [0], [0], [1], [0, 0, 1, 1], [], []>} : vector<16x32xbf16>, vector<32x64xbf16>, vector<16x64xf32> -> vector<16x64xf32>
    %c1_456 = arith.constant 1 : index
    %c0_457 = arith.constant 0 : index
    %c0_458 = arith.constant 0 : index
    %1126 = vector.load %arg24[%c1_456, %c0_457, %c0_458] : memref<2x1x64xf32, #tpu.memory_space<vmem>>, vector<1x1x64xf32>
    %1127 = vector.shape_cast %1126 : vector<1x1x64xf32> to vector<1x64xf32>
    %1128 = vector.broadcast %1127 : vector<1x64xf32> to vector<16x64xf32>
    %1129 = arith.addf %1125, %1128 : vector<16x64xf32>
    %cst_459 = arith.constant 0.000000e+00 : f32
    %1130 = vector.broadcast %cst_459 : f32 to vector<16x64xf32>
    %1131 = arith.maximumf %1129, %1130 : vector<16x64xf32>
    %1132 = arith.truncf %1131 : vector<16x64xf32> to vector<16x64xbf16>
    %c1_460 = arith.constant 1 : index
    %c0_461 = arith.constant 0 : index
    %c0_462 = arith.constant 0 : index
    %1133 = vector.load %arg25[%c1_460, %c0_461, %c0_462] : memref<2x64x32xbf16, #tpu.memory_space<vmem>>, vector<1x64x32xbf16>
    %1134 = vector.shape_cast %1133 : vector<1x64x32xbf16> to vector<64x32xbf16>
    %cst_463 = arith.constant dense<0.000000e+00> : vector<16x32xf32>
    %1135 = tpu.matmul %1132, %1134, %cst_463 {dimension_numbers = #tpu.dot_dimension_numbers<[1], [0], [0], [1], [0, 0, 1, 1], [], []>} : vector<16x64xbf16>, vector<64x32xbf16>, vector<16x32xf32> -> vector<16x32xf32>
    %c1_464 = arith.constant 1 : index
    %c0_465 = arith.constant 0 : index
    %c0_466 = arith.constant 0 : index
    %1136 = vector.load %arg26[%c1_464, %c0_465, %c0_466] : memref<2x1x32xf32, #tpu.memory_space<vmem>>, vector<1x1x32xf32>
    %1137 = vector.shape_cast %1136 : vector<1x1x32xf32> to vector<1x32xf32>
    %1138 = vector.broadcast %1137 : vector<1x32xf32> to vector<16x32xf32>
    %1139 = arith.addf %1135, %1138 : vector<16x32xf32>
    %1140 = arith.addf %1121, %1139 : vector<16x32xf32>
    %c1_467 = arith.constant 1 : index
    %c0_468 = arith.constant 0 : index
    %c0_469 = arith.constant 0 : index
    %1141 = vector.load %arg27[%c1_467, %c0_468, %c0_469] : memref<2x1x32xf32, #tpu.memory_space<vmem>>, vector<1x1x32xf32>
    %1142 = vector.shape_cast %1141 : vector<1x1x32xf32> to vector<1x32xf32>
    %c1_470 = arith.constant 1 : index
    %c0_471 = arith.constant 0 : index
    %c0_472 = arith.constant 0 : index
    %1143 = vector.load %arg28[%c1_470, %c0_471, %c0_472] : memref<2x1x32xf32, #tpu.memory_space<vmem>>, vector<1x1x32xf32>
    %1144 = vector.shape_cast %1143 : vector<1x1x32xf32> to vector<1x32xf32>
    %cst_473 = arith.constant dense<0.000000e+00> : vector<16xf32>
    %1145 = vector.multi_reduction <add>, %1140, %cst_473 [1] : vector<16x32xf32> to vector<16xf32>
    %1146 = vector.shape_cast %1145 : vector<16xf32> to vector<16x1xf32>
    %cst_474 = arith.constant 3.200000e+01 : f32
    %1147 = vector.broadcast %cst_474 : f32 to vector<16x1xf32>
    %1148 = arith.divf %1146, %1147 : vector<16x1xf32>
    %1149 = vector.broadcast %1148 : vector<16x1xf32> to vector<16x32xf32>
    %1150 = arith.subf %1140, %1149 : vector<16x32xf32>
    %1151 = arith.mulf %1150, %1150 : vector<16x32xf32>
    %cst_475 = arith.constant dense<0.000000e+00> : vector<16xf32>
    %1152 = vector.multi_reduction <add>, %1151, %cst_475 [1] : vector<16x32xf32> to vector<16xf32>
    %1153 = vector.shape_cast %1152 : vector<16xf32> to vector<16x1xf32>
    %cst_476 = arith.constant 3.200000e+01 : f32
    %1154 = vector.broadcast %cst_476 : f32 to vector<16x1xf32>
    %1155 = arith.divf %1153, %1154 : vector<16x1xf32>
    %cst_477 = arith.constant 9.99999974E-6 : f32
    %1156 = vector.broadcast %cst_477 : f32 to vector<16x1xf32>
    %1157 = arith.addf %1155, %1156 : vector<16x1xf32>
    %1158 = math.rsqrt %1157 : vector<16x1xf32>
    %1159 = vector.broadcast %1158 : vector<16x1xf32> to vector<16x32xf32>
    %1160 = arith.mulf %1150, %1159 : vector<16x32xf32>
    %1161 = vector.broadcast %1142 : vector<1x32xf32> to vector<16x32xf32>
    %1162 = arith.mulf %1160, %1161 : vector<16x32xf32>
    %1163 = vector.broadcast %1144 : vector<1x32xf32> to vector<16x32xf32>
    %1164 = arith.addf %1162, %1163 : vector<16x32xf32>
    %c0_478 = arith.constant 0 : index
    %c0_479 = arith.constant 0 : index
    %1165 = vector.load %arg29[%c0_478, %c0_479] : memref<1x32xf32, #tpu.memory_space<vmem>>, vector<1x32xf32>
    %c0_480 = arith.constant 0 : index
    %c0_481 = arith.constant 0 : index
    %1166 = vector.load %arg30[%c0_480, %c0_481] : memref<1x32xf32, #tpu.memory_space<vmem>>, vector<1x32xf32>
    %cst_482 = arith.constant dense<0.000000e+00> : vector<16xf32>
    %1167 = vector.multi_reduction <add>, %1164, %cst_482 [1] : vector<16x32xf32> to vector<16xf32>
    %1168 = vector.shape_cast %1167 : vector<16xf32> to vector<16x1xf32>
    %cst_483 = arith.constant 3.200000e+01 : f32
    %1169 = vector.broadcast %cst_483 : f32 to vector<16x1xf32>
    %1170 = arith.divf %1168, %1169 : vector<16x1xf32>
    %1171 = vector.broadcast %1170 : vector<16x1xf32> to vector<16x32xf32>
    %1172 = arith.subf %1164, %1171 : vector<16x32xf32>
    %1173 = arith.mulf %1172, %1172 : vector<16x32xf32>
    %cst_484 = arith.constant dense<0.000000e+00> : vector<16xf32>
    %1174 = vector.multi_reduction <add>, %1173, %cst_484 [1] : vector<16x32xf32> to vector<16xf32>
    %1175 = vector.shape_cast %1174 : vector<16xf32> to vector<16x1xf32>
    %cst_485 = arith.constant 3.200000e+01 : f32
    %1176 = vector.broadcast %cst_485 : f32 to vector<16x1xf32>
    %1177 = arith.divf %1175, %1176 : vector<16x1xf32>
    %cst_486 = arith.constant 9.99999974E-6 : f32
    %1178 = vector.broadcast %cst_486 : f32 to vector<16x1xf32>
    %1179 = arith.addf %1177, %1178 : vector<16x1xf32>
    %1180 = math.rsqrt %1179 : vector<16x1xf32>
    %1181 = vector.broadcast %1180 : vector<16x1xf32> to vector<16x32xf32>
    %1182 = arith.mulf %1172, %1181 : vector<16x32xf32>
    %1183 = vector.broadcast %1165 : vector<1x32xf32> to vector<16x32xf32>
    %1184 = arith.mulf %1182, %1183 : vector<16x32xf32>
    %1185 = vector.broadcast %1166 : vector<1x32xf32> to vector<16x32xf32>
    %1186 = arith.addf %1184, %1185 : vector<16x32xf32>
    %1187 = vector.shape_cast %1186 : vector<16x32xf32> to vector<2x8x32xf32>
    %c0_487 = arith.constant 0 : index
    %c0_488 = arith.constant 0 : index
    %c0_489 = arith.constant 0 : index
    %1188 = vector.load %arg31[%c0_487, %c0_488, %c0_489] : memref<2x8x32xf32, #tpu.memory_space<vmem>>, vector<2x8x32xf32>
    tpu.vector_store %arg31[%c0_487, %c0_488, %c0_489], %1187 {strides = array<i32>} : memref<2x8x32xf32, #tpu.memory_space<vmem>>, vector<2x8x32xf32>,
    return
  }
  func.func @transform_0(%arg0: i32) -> (i32, i32, i32) {
    %c0_i32 = arith.constant 0 : i32
    %c0_i32_0 = arith.constant 0 : i32
    %c0_i32_1 = arith.constant 0 : i32
    return %arg0, %c0_i32, %c0_i32_0 : i32, i32, i32
  }
  func.func @transform_1(%arg0: i32) -> (i32, i32, i32) {
    %c0_i32 = arith.constant 0 : i32
    %c0_i32_0 = arith.constant 0 : i32
    %c0_i32_1 = arith.constant 0 : i32
    return %arg0, %c0_i32, %c0_i32_0 : i32, i32, i32
  }
  func.func @transform_2(%arg0: i32) -> (i32, i32) {
    %c0_i32 = arith.constant 0 : i32
    %c0_i32_0 = arith.constant 0 : i32
    %c0_i32_1 = arith.constant 0 : i32
    return %c0_i32, %c0_i32_0 : i32, i32
  }
  func.func @transform_3(%arg0: i32) -> (i32, i32) {
    %c0_i32 = arith.constant 0 : i32
    %c0_i32_0 = arith.constant 0 : i32
    %c0_i32_1 = arith.constant 0 : i32
    return %c0_i32, %c0_i32_0 : i32, i32
  }
  func.func @transform_4(%arg0: i32) -> (i32, i32, i32) {
    %c0_i32 = arith.constant 0 : i32
    %c0_i32_0 = arith.constant 0 : i32
    %c0_i32_1 = arith.constant 0 : i32
    %c0_i32_2 = arith.constant 0 : i32
    return %c0_i32, %c0_i32_0, %c0_i32_1 : i32, i32, i32
  }
  func.func @transform_5(%arg0: i32) -> (i32, i32, i32) {
    %c0_i32 = arith.constant 0 : i32
    %c0_i32_0 = arith.constant 0 : i32
    %c0_i32_1 = arith.constant 0 : i32
    %c0_i32_2 = arith.constant 0 : i32
    return %c0_i32, %c0_i32_0, %c0_i32_1 : i32, i32, i32
  }
  func.func @transform_6(%arg0: i32) -> (i32, i32, i32) {
    %c0_i32 = arith.constant 0 : i32
    %c0_i32_0 = arith.constant 0 : i32
    %c0_i32_1 = arith.constant 0 : i32
    %c0_i32_2 = arith.constant 0 : i32
    return %c0_i32, %c0_i32_0, %c0_i32_1 : i32, i32, i32
  }
  func.func @transform_7(%arg0: i32) -> (i32, i32, i32) {
    %c0_i32 = arith.constant 0 : i32
    %c0_i32_0 = arith.constant 0 : i32
    %c0_i32_1 = arith.constant 0 : i32
    %c0_i32_2 = arith.constant 0 : i32
    return %c0_i32, %c0_i32_0, %c0_i32_1 : i32, i32, i32
  }
  func.func @transform_8(%arg0: i32) -> (i32, i32, i32) {
    %c0_i32 = arith.constant 0 : i32
    %c0_i32_0 = arith.constant 0 : i32
    %c0_i32_1 = arith.constant 0 : i32
    %c0_i32_2 = arith.constant 0 : i32
    return %c0_i32, %c0_i32_0, %c0_i32_1 : i32, i32, i32
  }
  func.func @transform_9(%arg0: i32) -> (i32, i32, i32) {
    %c0_i32 = arith.constant 0 : i32
    %c0_i32_0 = arith.constant 0 : i32
    %c0_i32_1 = arith.constant 0 : i32
    %c0_i32_2 = arith.constant 0 : i32
    return %c0_i32, %c0_i32_0, %c0_i32_1 : i32, i32, i32
  }
  func.func @transform_10(%arg0: i32) -> (i32, i32, i32) {
    %c0_i32 = arith.constant 0 : i32
    %c0_i32_0 = arith.constant 0 : i32
    %c0_i32_1 = arith.constant 0 : i32
    %c0_i32_2 = arith.constant 0 : i32
    return %c0_i32, %c0_i32_0, %c0_i32_1 : i32, i32, i32
  }
  func.func @transform_11(%arg0: i32) -> (i32, i32, i32) {
    %c0_i32 = arith.constant 0 : i32
    %c0_i32_0 = arith.constant 0 : i32
    %c0_i32_1 = arith.constant 0 : i32
    %c0_i32_2 = arith.constant 0 : i32
    return %c0_i32, %c0_i32_0, %c0_i32_1 : i32, i32, i32
  }
  func.func @transform_12(%arg0: i32) -> (i32, i32, i32) {
    %c0_i32 = arith.constant 0 : i32
    %c0_i32_0 = arith.constant 0 : i32
    %c0_i32_1 = arith.constant 0 : i32
    %c0_i32_2 = arith.constant 0 : i32
    return %c0_i32, %c0_i32_0, %c0_i32_1 : i32, i32, i32
  }
  func.func @transform_13(%arg0: i32) -> (i32, i32, i32) {
    %c0_i32 = arith.constant 0 : i32
    %c0_i32_0 = arith.constant 0 : i32
    %c0_i32_1 = arith.constant 0 : i32
    %c0_i32_2 = arith.constant 0 : i32
    return %c0_i32, %c0_i32_0, %c0_i32_1 : i32, i32, i32
  }
  func.func @transform_14(%arg0: i32) -> (i32, i32, i32) {
    %c0_i32 = arith.constant 0 : i32
    %c0_i32_0 = arith.constant 0 : i32
    %c0_i32_1 = arith.constant 0 : i32
    %c0_i32_2 = arith.constant 0 : i32
    return %c0_i32, %c0_i32_0, %c0_i32_1 : i32, i32, i32
  }
  func.func @transform_15(%arg0: i32) -> (i32, i32, i32) {
    %c0_i32 = arith.constant 0 : i32
    %c0_i32_0 = arith.constant 0 : i32
    %c0_i32_1 = arith.constant 0 : i32
    %c0_i32_2 = arith.constant 0 : i32
    return %c0_i32, %c0_i32_0, %c0_i32_1 : i32, i32, i32
  }
  func.func @transform_16(%arg0: i32) -> (i32, i32, i32) {
    %c0_i32 = arith.constant 0 : i32
    %c0_i32_0 = arith.constant 0 : i32
    %c0_i32_1 = arith.constant 0 : i32
    %c0_i32_2 = arith.constant 0 : i32
    return %c0_i32, %c0_i32_0, %c0_i32_1 : i32, i32, i32
  }
  func.func @transform_17(%arg0: i32) -> (i32, i32, i32) {
    %c0_i32 = arith.constant 0 : i32
    %c0_i32_0 = arith.constant 0 : i32
    %c0_i32_1 = arith.constant 0 : i32
    %c0_i32_2 = arith.constant 0 : i32
    return %c0_i32, %c0_i32_0, %c0_i32_1 : i32, i32, i32
  }
  func.func @transform_18(%arg0: i32) -> (i32, i32, i32) {
    %c0_i32 = arith.constant 0 : i32
    %c0_i32_0 = arith.constant 0 : i32
    %c0_i32_1 = arith.constant 0 : i32
    %c0_i32_2 = arith.constant 0 : i32
    return %c0_i32, %c0_i32_0, %c0_i32_1 : i32, i32, i32
  }
  func.func @transform_19(%arg0: i32) -> (i32, i32, i32) {
    %c0_i32 = arith.constant 0 : i32
    %c0_i32_0 = arith.constant 0 : i32
    %c0_i32_1 = arith.constant 0 : i32
    %c0_i32_2 = arith.constant 0 : i32
    return %c0_i32, %c0_i32_0, %c0_i32_1 : i32, i32, i32
  }
  func.func @transform_20(%arg0: i32) -> (i32, i32, i32) {
    %c0_i32 = arith.constant 0 : i32
    %c0_i32_0 = arith.constant 0 : i32
    %c0_i32_1 = arith.constant 0 : i32
    %c0_i32_2 = arith.constant 0 : i32
    return %c0_i32, %c0_i32_0, %c0_i32_1 : i32, i32, i32
  }
  func.func @transform_21(%arg0: i32) -> (i32, i32, i32) {
    %c0_i32 = arith.constant 0 : i32
    %c0_i32_0 = arith.constant 0 : i32
    %c0_i32_1 = arith.constant 0 : i32
    %c0_i32_2 = arith.constant 0 : i32
    return %c0_i32, %c0_i32_0, %c0_i32_1 : i32, i32, i32
  }
  func.func @transform_22(%arg0: i32) -> (i32, i32, i32) {
    %c0_i32 = arith.constant 0 : i32
    %c0_i32_0 = arith.constant 0 : i32
    %c0_i32_1 = arith.constant 0 : i32
    %c0_i32_2 = arith.constant 0 : i32
    return %c0_i32, %c0_i32_0, %c0_i32_1 : i32, i32, i32
  }
  func.func @transform_23(%arg0: i32) -> (i32, i32, i32) {
    %c0_i32 = arith.constant 0 : i32
    %c0_i32_0 = arith.constant 0 : i32
    %c0_i32_1 = arith.constant 0 : i32
    %c0_i32_2 = arith.constant 0 : i32
    return %c0_i32, %c0_i32_0, %c0_i32_1 : i32, i32, i32
  }
  func.func @transform_24(%arg0: i32) -> (i32, i32, i32) {
    %c0_i32 = arith.constant 0 : i32
    %c0_i32_0 = arith.constant 0 : i32
    %c0_i32_1 = arith.constant 0 : i32
    %c0_i32_2 = arith.constant 0 : i32
    return %c0_i32, %c0_i32_0, %c0_i32_1 : i32, i32, i32
  }
  func.func @transform_25(%arg0: i32) -> (i32, i32, i32) {
    %c0_i32 = arith.constant 0 : i32
    %c0_i32_0 = arith.constant 0 : i32
    %c0_i32_1 = arith.constant 0 : i32
    %c0_i32_2 = arith.constant 0 : i32
    return %c0_i32, %c0_i32_0, %c0_i32_1 : i32, i32, i32
  }
  func.func @transform_26(%arg0: i32) -> (i32, i32, i32) {
    %c0_i32 = arith.constant 0 : i32
    %c0_i32_0 = arith.constant 0 : i32
    %c0_i32_1 = arith.constant 0 : i32
    %c0_i32_2 = arith.constant 0 : i32
    return %c0_i32, %c0_i32_0, %c0_i32_1 : i32, i32, i32
  }
  func.func @transform_27(%arg0: i32) -> (i32, i32, i32) {
    %c0_i32 = arith.constant 0 : i32
    %c0_i32_0 = arith.constant 0 : i32
    %c0_i32_1 = arith.constant 0 : i32
    %c0_i32_2 = arith.constant 0 : i32
    return %c0_i32, %c0_i32_0, %c0_i32_1 : i32, i32, i32
  }
  func.func @transform_28(%arg0: i32) -> (i32, i32) {
    %c0_i32 = arith.constant 0 : i32
    %c0_i32_0 = arith.constant 0 : i32
    %c0_i32_1 = arith.constant 0 : i32
    return %c0_i32, %c0_i32_0 : i32, i32
  }
  func.func @transform_29(%arg0: i32) -> (i32, i32) {
    %c0_i32 = arith.constant 0 : i32
    %c0_i32_0 = arith.constant 0 : i32
    %c0_i32_1 = arith.constant 0 : i32
    return %c0_i32, %c0_i32_0 : i32, i32
  }
  func.func @transform_30(%arg0: i32) -> (i32, i32, i32) {
    %c0_i32 = arith.constant 0 : i32
    %c0_i32_0 = arith.constant 0 : i32
    %c0_i32_1 = arith.constant 0 : i32
    return %arg0, %c0_i32, %c0_i32_0 : i32, i32, i32
  }
}

</mosaic_0001>

<bundles_post_ra>
// kernel: transformer_decoder_forward.1
= control target key start
LH: loop header
LB: loop body
LE: loop exit
PB: predicated region body
PF: predicated region fallthrough
CT: control target
= control target key end

     0   :  { %s10515_s6 = smov 1   ;;  %s10516_s10 = smov 2   ;;  %s12157_s0 = inlined_call_operand.smem [shape: u32[31], index: -1, kind: input, shape index: {}] }
   0x1   :  { %s10593_s5 = sld [smem:[%s12157_s0]]   ;;  %s10517_s14 = smov 3  }
   0x2   :  { %s10598_s9 = sld [smem:[%s12157_s0 + %s10515_s6]]   ;;  %s10518_s18 = smov 4  }
   0x3   :  { %s10603_s13 = sld [smem:[%s12157_s0 + %s10516_s10]]   ;;  %s10519_s22 = smov 5  }
   0x4   :  { %s10608_s17 = sld [smem:[%s12157_s0 + %s10517_s14]]   ;;  %s10520_s26 = smov 6  }
   0x5   :  { %s10613_s21 = sld [smem:[%s12157_s0 + %s10518_s18]]   ;;  %s10521_s30 = smov 7  }
   0x6   :  { %s10618_s25 = sld [smem:[%s12157_s0 + %s10519_s22]]   ;;  %s10522_s4 = smov 8  }
   0x7   :  { %12178 = sst [smem:[#allocation55_spill]] %s10593_s5  ;;  %s10523_s10 = smov 9  }
   0x8   :  { %12179 = sst [smem:[#allocation56_spill]] %s10598_s9  ;;  %s10524_s15 = smov 10  }
   0x9   :  { %s10623_s29 = sld [smem:[%s12157_s0 + %s10520_s26]]   ;;  %s10525_s20 = smov 11  }
   0xa   :  { %12180 = sst [smem:[#allocation57_spill]] %s10608_s17  ;;  %s10526_s26 = smov 12  }
   0xb   :  { %12181 = sst [smem:[#allocation58_spill]] %s10613_s21  ;;  %s10527_s1 = smov 13  }
   0xc   :  { %12182 = sst [smem:[#allocation59_spill]] %s10618_s25  ;;  %s10528_s7 = smov 14  }
   0xd   :  { %s10628_s3 = sld [smem:[%s12157_s0 + %s10521_s30]]   ;;  %s10530_s22 = smov 16  }
   0xe   :  { %s10633_s8 = sld [smem:[%s12157_s0 + %s10522_s4]]   ;;  %s10531_s28 = smov 17  }
   0xf   :  { %s10638_s14 = sld [smem:[%s12157_s0 + %s10523_s10]]  }
  0x10   :  { %s10643_s19 = sld [smem:[%s12157_s0 + %s10524_s15]]   ;;  %s10529_s15 = smov 15  }
  0x11   :  { %s10648_s24 = sld [smem:[%s12157_s0 + %s10525_s20]]  }
  0x12   :  { %s10653_s30 = sld [smem:[%s12157_s0 + %s10526_s26]]  }
  0x13   :  { %12183 = sst [smem:[#allocation60_spill]] %s10628_s3 }
  0x14   :  { %s10658_s6 = sld [smem:[%s12157_s0 + %s10527_s1]]  }
  0x15   :  { %s10663_s12 = sld [smem:[%s12157_s0 + %s10528_s7]]   ;;  %s10532_s7 = smov 18  }
  0x16   :  { %12184 = sst [smem:[#allocation61_spill]] %s10643_s19 }
  0x17   :  { %s10668_s20 = sld [smem:[%s12157_s0 + %s10529_s15]]   ;;  %s10533_s15 = smov 19  }
  0x18   :  { %12185 = sst [smem:[#allocation62_spill]] %s10653_s30 }
  0x19   :  { %s10673_s27 = sld [smem:[%s12157_s0 + %s10530_s22]]   ;;  %s10534_s22 = smov 20  }
  0x1a   :  { %12186 = sst [smem:[#allocation63_spill]] %s10658_s6 }
  0x1b   :  { %12187 = sst [smem:[#allocation64_spill]] %s10663_s12 }
  0x1c   :  { %s10678_s4 = sld [smem:[%s12157_s0 + %s10531_s28]]   ;;  %s10535_s28 = smov 21  }
  0x1d   :  { %s10683_s17 = sld [smem:[%s12157_s0 + %s10532_s7]]   ;;  %s10536_s7 = smov 22  }
  0x1e   :  { %s10688_s9 = sld [smem:[%s12157_s0 + %s10533_s15]]   ;;  %s10537_s15 = smov 23  }
  0x1f   :  { %12188 = sst [smem:[#allocation65_spill]] %s10673_s27 }
  0x20   :  { %s10693_s21 = sld [smem:[%s12157_s0 + %s10534_s22]]   ;;  %s10538_s22 = smov 24  }
  0x21   :  { %s10698_s5 = sld [smem:[%s12157_s0 + %s10535_s28]]   ;;  %s10539_s28 = smov 25  }
  0x22   :  { %12189 = sst [smem:[#allocation66_spill]] %s10678_s4 }
  0x23   :  { %12190 = sst [smem:[#allocation67_spill]] %s10683_s17 }
  0x24   :  { %s10703_s17 = sld [smem:[%s12157_s0 + %s10536_s7]]   ;;  %s10540_s7 = smov 26  }
  0x25   :  { %s10708_s27 = sld [smem:[%s12157_s0 + %s10537_s15]]   ;;  %s10541_s15 = smov 27  }
  0x26   :  { %12191 = sst [smem:[#allocation68_spill]] %s10693_s21 }
  0x27   :  { %12192 = sst [smem:[#allocation69_spill]] %s10698_s5 }
  0x28   :  { %s10713_s21 = sld [smem:[%s12157_s0 + %s10538_s22]]   ;;  %s10542_s22 = smov 28  }
  0x29   :  { %s10718_s12 = sld [smem:[%s12157_s0 + %s10539_s28]]   ;;  %s10543_s28 = smov 29  }
  0x2a   :  { %12193 = sst [smem:[#allocation70_spill]] %s10703_s17 }
  0x2b   :  { %s10723_s17 = sld [smem:[%s12157_s0 + %s10540_s7]]   ;;  %s10544_s7 = smov 30  }
  0x2c   :  { %s10728_s30 = sld [smem:[%s12157_s0 + %s10541_s15]]  }
  0x2d   :  { %s10743_s19 = sld [smem:[%s12157_s0 + %s10544_s7]]  }
  0x2e   :  { %12194 = sst [smem:[#allocation71_spill]] %s10713_s21 }
  0x2f   :  { %12195 = sst [smem:[#allocation72_spill]] %s10718_s12 }
  0x30   :  { %s10733_s21 = sld [smem:[%s12157_s0 + %s10542_s22]]  }
  0x31   :  { %s10738_s12 = sld [smem:[%s12157_s0 + %s10543_s28]]  }
  0x32   :  { %66 = vsyncpa [#allocation3], 0 }
  0x33   :  { %67 = vsyncpa [#allocation6], 0 }
  0x34   :  { %68 = vsyncpa [#allocation9], 0 }
  0x35   :  { %69 = vsyncpa [#allocation12], 0 }
  0x36   :  { %70 = vsyncpa [#allocation15], 0 }
  0x37   :  { %71 = vsyncpa [#allocation18], 0 }
  0x38   :  { %72 = vsyncpa [#allocation21], 0 }
  0x39   :  { %73 = vsyncpa [#allocation24], 0 }
  0x3a   :  { %74 = vsyncpa [#allocation27], 0 }
  0x3b   :  { %75 = vsyncpa [#allocation30], 0 }
  0x3c   :  { %76 = vsyncpa [#allocation33], 0 }
  0x3d   :  { %77 = vsyncpa [#allocation36], 0 }
  0x3e   :  { %78 = vsyncpa [#allocation39], 0 }
  0x3f   :  { %79 = vsyncpa [#allocation4], 0 }
  0x40   :  { %81 = vsyncpa [#allocation4 + $0x1], 0  ;;  %s10745_s15 = smov 0   ;;  %s10747_s16 = smov 0  }
  0x41   :  { %s10749_s0 = smov 0   ;;  %s10751_s18 = smov 0  }
  0x42 LB: > { %12196 = sst [smem:[#allocation73_spill]] %s10501_s15  ;;  %s10766_s22 = sadd.s32 4294967295, %s10513_s18   ;;  %s10513_s18 = sphi %s10751_s18, %s12260_s18   ;;  %s10509_s0 = sphi %s10749_s0, %s12265_s0   ;;  %s10505_s16 = sphi %s10747_s16, %s12264_s16   ;;  %s10501_s15 = sphi %s10745_s15, %s12263_s15  }
  0x43   : > { %12197 = sst [smem:[#allocation74_spill]] %s10509_s0  ;;  %s8069_s23 = sadd.s32 4294967294, %s10513_s18  }
  0x44   : > { %12198 = sst [smem:[#allocation75_spill]] %s10513_s18  ;;  %s10770_s26 = sadd.s32 1, %s10513_s18  }
  0x45   : > { %12199 = sst [smem:[#allocation76_spill]] %s10770_s26  ;;  %s734_s28 = sadd.s32 1, %s10509_s0 }
  0x46   : > { %s731_s1 = ssub.s32 %s10513_s18, %s10770_s26  ;;  %p744_p0 = scmp.ne.s32.totalorder %s10509_s0, %s10505_s16 }
  0x47   : > { %p732_p1 = scmp.eq.s32.totalorder %s731_s1, 0  ;;  %p745_p2 = scmp.eq.s32.totalorder %s10766_s22, 1 }
  0x48   : > { %p750_p3 = scmp.ne.s32.totalorder %s10505_s16, %s10501_s15  ;;  %p751_p4 = scmp.eq.s32.totalorder %s8069_s23, 1 }
  0x49   : > { %s10781_s2 = scalar_select %p732_p1, %s10509_s0, %s734_s28  }
  0x4a   : > { %p10783_p5 = por %p745_p2, %p744_p0  ;;  %p10787_p6 = por %p751_p4, %p750_p3 }
  0x4b   : > { %12200 = sst [smem:[#allocation77_spill]] %s10781_s2  ;;  %p8070_p7 = scmp.ge.s32.totalorder %s10513_s18, 1 }
  0x4c   : > { %s12201_s7 = scalar_select %p10783_p5, 1, 0 }
  0x4d   : > { %s12202_s10 = scalar_select %p10787_p6, 1, 0 }
  0x4e   : > { %p758_p8 = scmp.lt.s32.totalorder %s10513_s18, 3  ;;  %p12167_p9 = scmp.eq.s32.totalorder %s10766_s22, 0 }
  0x4f   : > { %12203 = sst [smem:[#allocation78_spill]] %s12202_s10  ;;  %s10545_s1 = smov [#allocation5]  }
  0x50   : > { %p10794_p10 = pnand %p8070_p7, %p758_p8  ;;  %s787_s23 = sshll.u32 %s10545_s1, 4  ;;  %s788_s23 = int_to_ptr.vmem [resolvable:$true] %s787_s23 }
  0x51   : > { %s10546_s2 = smov [#allocation8]   ;;  %s10547_s26 = smov [#allocation11]  }
  0x52   : > { %s12204_s11 = scalar_select %p10794_p10, 1, 0 }
  0x53   : > { %p9360_p11 = pneg %p10794_p10  ;;  %s813_s0 = sshll.u32 %s10546_s2, 4  ;;  %s814_s0 = int_to_ptr.vmem [resolvable:$true] %s813_s0 }
  0x54   : > { %s839_s10 = sshll.u32 %s10547_s26, 4  ;;  %s9788_s1 = scalar_lea.vmem %s788_s23, 32  ;;  %s840_s10 = int_to_ptr.vmem [resolvable:$true] %s839_s10 }
  0x55   : > { %p10802_p12 = pnand %p12167_p9, %p9360_p11  ;;  %p9789_p0 = scmp.ne.s32.totalorder %s788_s23, %s9788_s1 }
  0x56   : > { %p9796_p3 = scmp.lt.s32.totalorder %s788_s23, %s788_s23  ;;  %p9797_p4 = scmp.lt.s32.totalorder %s9788_s1, %s9788_s1 }
  0x57   : > { %p10808_p13 = pneg %p10802_p12 }
  0x58   : > { %p9798_p7 = por %p9797_p4, %p9796_p3 }
  0x59   : > { %p9791_p1 = pnand %p9789_p0, %p10808_p13 }
  0x5b   : > { %p9792_p2 = pneg %p9791_p1 }
  0x5d   : > { %p9799_p8 = pnand %p9798_p7, %p9792_p2 }
  0x5f   : > { %9802 = shalt.err (!%p9799_p8)
}
  0x60   : > { %s12170_s2 = smov 16   ;;  %s12207_s25 = sld [smem:[#allocation59_spill]] }
  0x61   : > { %s12172_s26 = smov 1   ;;  %s9814_s18 = scalar_lea.vmem %s814_s0, 32 }
  0x62   : > { %p9815_p11 = scmp.ne.s32.totalorder %s814_s0, %s9814_s18  ;;  %p9822_p9 = scmp.lt.s32.totalorder %s814_s0, %s814_s0 }
  0x63   : > { %p9823_p6 = scmp.lt.s32.totalorder %s9814_s18, %s9814_s18 }
  0x64   : > { %p9817_p0 = pnand %p9815_p11, %p10808_p13 }
  0x65   : > { %p9824_p3 = por %p9823_p6, %p9822_p9 }
  0x66   : > { %9366 = dma.hbm_to_vmem [thread:$0]  (!%p10802_p12), %s12207_s25, 32, %s788_s23, [#allocation6], %s12170_s2, %s12170_s2, %s12172_s26  }
  0x67   : > { %p9818_p1 = pneg %p9817_p0 }
  0x69   : > { %p9825_p2 = pnand %p9824_p3, %p9818_p1 }
  0x6b   : > { %9828 = shalt.err (!%p9825_p2)
}
  0x6c   : > { %s12208_s3 = sld [smem:[#allocation60_spill]]  ;;  %s9840_s23 = scalar_lea.vmem %s840_s10, 32 }
  0x6d   : > { %p9841_p4 = scmp.ne.s32.totalorder %s840_s10, %s9840_s23  ;;  %p9848_p11 = scmp.lt.s32.totalorder %s840_s10, %s840_s10 }
  0x6e   : > { %p9849_p0 = scmp.lt.s32.totalorder %s9840_s23, %s9840_s23 }
  0x6f   : > { %p9843_p7 = pnand %p9841_p4, %p10808_p13 }
  0x70   : > { %p9850_p5 = por %p9849_p0, %p9848_p11 }
  0x71   : > { %p9844_p8 = pneg %p9843_p7 }
  0x72   : > { %9372 = dma.hbm_to_vmem [thread:$0]  (!%p10802_p12), %s12208_s3, 32, %s814_s0, [#allocation9], %s12170_s2, %s12170_s2, %s12172_s26  }
  0x73   : > { %p9851_p6 = pnand %p9850_p5, %p9844_p8 }
  0x75   : > { %9854 = shalt.err (!%p9851_p6)
}
  0x76   : > { %9378 = dma.hbm_to_vmem [thread:$0]  (!%p10802_p12), %s10638_s14, 32, %s840_s10, [#allocation12], %s12170_s2, %s12170_s2, %s12172_s26  }
  0x77   : > { %s10550_s0 = smov [#allocation14]   ;;  %s10551_s1 = smov [#allocation17]  }
  0x78   : > { %s865_s18 = sshll.u32 %s10550_s0, 4  ;;  %s891_s3 = sshll.u32 %s10551_s1, 4  ;;  %s866_s18 = int_to_ptr.vmem [resolvable:$true] %s865_s18  ;;  %s892_s3 = int_to_ptr.vmem [resolvable:$true] %s891_s3 }
  0x79   : > { %s9866_s25 = scalar_lea.vmem %s866_s18, 32  ;;  %p9874_p5 = scmp.lt.s32.totalorder %s866_s18, %s866_s18 }
  0x7a   : > { %p9867_p9 = scmp.ne.s32.totalorder %s866_s18, %s9866_s25  ;;  %p9875_p2 = scmp.lt.s32.totalorder %s9866_s25, %s9866_s25 }
  0x7c   : > { %p9869_p1 = pnand %p9867_p9, %p10808_p13  ;;  %p9876_p4 = por %p9875_p2, %p9874_p5 }
  0x7e   : > { %p9870_p3 = pneg %p9869_p1 }
  0x80   : > { %p9877_p7 = pnand %p9876_p4, %p9870_p3 }
  0x82   : > { %9880 = shalt.err (!%p9877_p7)
}
  0x83   : > { %9384 = dma.hbm_to_vmem [thread:$0]  (!%p10802_p12), %s10648_s24, 32, %s866_s18, [#allocation15], %s12170_s2, %s12170_s2, %s12172_s26  }
  0x84   : > { %s9892_s10 = scalar_lea.vmem %s892_s3, 32  ;;  %p9900_p6 = scmp.lt.s32.totalorder %s892_s3, %s892_s3 }
  0x85   : > { %p9893_p8 = scmp.ne.s32.totalorder %s892_s3, %s9892_s10  ;;  %p9901_p9 = scmp.lt.s32.totalorder %s9892_s10, %s9892_s10 }
  0x87   : > { %p9895_p11 = pnand %p9893_p8, %p10808_p13  ;;  %p9902_p1 = por %p9901_p9, %p9900_p6 }
  0x89   : > { %p9896_p0 = pneg %p9895_p11 }
  0x8b   : > { %p9903_p5 = pnand %p9902_p1, %p9896_p0 }
  0x8d   : > { %9906 = shalt.err (!%p9903_p5)
}
  0x8e   : > { %s12209_s6 = sld [smem:[#allocation63_spill]]  ;;  %s10552_s25 = smov [#allocation20]  }
  0x8f   : > { %s917_s23 = sshll.u32 %s10552_s25, 4  ;;  %s10553_s0 = smov [#allocation23]   ;;  %s918_s23 = int_to_ptr.vmem [resolvable:$true] %s917_s23 }
  0x90   : > { %s943_s18 = sshll.u32 %s10553_s0, 4  ;;  %s9918_s1 = scalar_lea.vmem %s918_s23, 32  ;;  %s944_s18 = int_to_ptr.vmem [resolvable:$true] %s943_s18 }
  0x91   : > { %p9919_p3 = scmp.ne.s32.totalorder %s918_s23, %s9918_s1  ;;  %p9926_p7 = scmp.lt.s32.totalorder %s918_s23, %s918_s23 }
  0x92   : > { %p9927_p8 = scmp.lt.s32.totalorder %s9918_s1, %s9918_s1 }
  0x93   : > { %p9921_p2 = pnand %p9919_p3, %p10808_p13 }
  0x94   : > { %9390 = dma.hbm_to_vmem [thread:$0]  (!%p10802_p12), %s12209_s6, 32, %s892_s3, [#allocation18], %s12170_s2, %s12170_s2, %s12172_s26  }
  0x95   : > { %p9922_p4 = pneg %p9921_p2  ;;  %p9928_p11 = por %p9927_p8, %p9926_p7 }
  0x97   : > { %p9929_p0 = pnand %p9928_p11, %p9922_p4 }
  0x99   : > { %9932 = shalt.err (!%p9929_p0)
}
  0x9a   : > { %9396 = dma.hbm_to_vmem [thread:$0]  (!%p10802_p12), %s10668_s20, 32, %s918_s23, [#allocation21], %s12170_s2, %s12170_s2, %s12172_s26  }
  0x9b   : > { %s9944_s3 = scalar_lea.vmem %s944_s18, 32  ;;  %p9952_p5 = scmp.lt.s32.totalorder %s944_s18, %s944_s18 }
  0x9c   : > { %p9945_p6 = scmp.ne.s32.totalorder %s944_s18, %s9944_s3  ;;  %p9953_p3 = scmp.lt.s32.totalorder %s9944_s3, %s9944_s3 }
  0x9e   : > { %p9947_p9 = pnand %p9945_p6, %p10808_p13  ;;  %p9954_p2 = por %p9953_p3, %p9952_p5 }
  0xa0   : > { %p9948_p1 = pneg %p9947_p9 }
  0xa2   : > { %p9955_p7 = pnand %p9954_p2, %p9948_p1 }
  0xa4   : > { %9958 = shalt.err (!%p9955_p7)
}
  0xa5   : > { %s12210_s4 = sld [smem:[#allocation66_spill]]  ;;  %s10554_s10 = smov [#allocation26]  }
  0xa6   : > { %s969_s25 = sshll.u32 %s10554_s10, 4  ;;  %s10555_s23 = smov [#allocation29]   ;;  %s970_s25 = int_to_ptr.vmem [resolvable:$true] %s969_s25 }
  0xa7   : > { %s995_s0 = sshll.u32 %s10555_s23, 4  ;;  %s9970_s1 = scalar_lea.vmem %s970_s25, 32  ;;  %s996_s0 = int_to_ptr.vmem [resolvable:$true] %s995_s0 }
  0xa8   : > { %p9971_p4 = scmp.ne.s32.totalorder %s970_s25, %s9970_s1  ;;  %p9978_p0 = scmp.lt.s32.totalorder %s970_s25, %s970_s25 }
  0xa9   : > { %p9979_p6 = scmp.lt.s32.totalorder %s9970_s1, %s9970_s1 }
  0xaa   : > { %p9973_p8 = pnand %p9971_p4, %p10808_p13 }
  0xab   : > { %9402 = dma.hbm_to_vmem [thread:$0]  (!%p10802_p12), %s12210_s4, 32, %s944_s18, [#allocation24], %s12170_s2, %s12170_s2, %s12172_s26  }
  0xac   : > { %p9974_p11 = pneg %p9973_p8  ;;  %p9980_p9 = por %p9979_p6, %p9978_p0 }
  0xae   : > { %p9981_p1 = pnand %p9980_p9, %p9974_p11 }
  0xb0   : > { %9984 = shalt.err (!%p9981_p1)
}
  0xb1   : > { %9408 = dma.hbm_to_vmem [thread:$0]  (!%p10802_p12), %s10688_s9, 32, %s970_s25, [#allocation27], %s12170_s2, %s12170_s2, %s12172_s26  }
  0xb2   : > { %s9996_s18 = scalar_lea.vmem %s996_s0, 32  ;;  %p10004_p7 = scmp.lt.s32.totalorder %s996_s0, %s996_s0 }
  0xb3   : > { %p9997_p5 = scmp.ne.s32.totalorder %s996_s0, %s9996_s18  ;;  %p10005_p4 = scmp.lt.s32.totalorder %s9996_s18, %s9996_s18 }
  0xb5   : > { %p9999_p3 = pnand %p9997_p5, %p10808_p13  ;;  %p10006_p8 = por %p10005_p4, %p10004_p7 }
  0xb7   : > { %p10000_p2 = pneg %p9999_p3 }
  0xb9   : > { %p10007_p0 = pnand %p10006_p8, %p10000_p2 }
  0xbb   : > { %10010 = shalt.err (!%p10007_p0)
}
  0xbc   : > { %s12211_s5 = sld [smem:[#allocation69_spill]]  ;;  %s10556_s3 = smov [#allocation32]  }
  0xbd   : > { %s1021_s10 = sshll.u32 %s10556_s3, 4  ;;  %s10557_s25 = smov [#allocation35]   ;;  %s1022_s10 = int_to_ptr.vmem [resolvable:$true] %s1021_s10 }
  0xbe   : > { %s1050_s23 = sshll.u32 %s10557_s25, 4  ;;  %s10022_s1 = scalar_lea.vmem %s1022_s10, 32  ;;  %s1051_s23 = int_to_ptr.vmem [resolvable:$true] %s1050_s23 }
  0xbf   : > { %p10023_p11 = scmp.ne.s32.totalorder %s1022_s10, %s10022_s1  ;;  %p10030_p1 = scmp.lt.s32.totalorder %s1022_s10, %s1022_s10 }
  0xc0   : > { %p10031_p5 = scmp.lt.s32.totalorder %s10022_s1, %s10022_s1 }
  0xc1   : > { %p10025_p6 = pnand %p10023_p11, %p10808_p13 }
  0xc2   : > { %9414 = dma.hbm_to_vmem [thread:$0]  (!%p10802_p12), %s12211_s5, 32, %s996_s0, [#allocation30], %s12170_s2, %s12170_s2, %s12172_s26  }
  0xc3   : > { %p10026_p9 = pneg %p10025_p6  ;;  %p10032_p3 = por %p10031_p5, %p10030_p1 }
  0xc5   : > { %p10033_p2 = pnand %p10032_p3, %p10026_p9 }
  0xc7   : > { %10036 = shalt.err (!%p10033_p2)
}
  0xc8   : > { %9420 = dma.hbm_to_vmem [thread:$0]  (!%p10802_p12), %s10708_s27, 32, %s1022_s10, [#allocation33], %s12170_s2, %s12170_s2, %s12172_s26  }
  0xc9   : > { %s10048_s0 = scalar_lea.vmem %s1051_s23, 32  ;;  %p10056_p0 = scmp.lt.s32.totalorder %s1051_s23, %s1051_s23 }
  0xca   : > { %p10049_p7 = scmp.ne.s32.totalorder %s1051_s23, %s10048_s0  ;;  %p10057_p11 = scmp.lt.s32.totalorder %s10048_s0, %s10048_s0 }
  0xcc   : > { %p10051_p4 = pnand %p10049_p7, %p10808_p13  ;;  %p10058_p6 = por %p10057_p11, %p10056_p0 }
  0xce   : > { %p10052_p8 = pneg %p10051_p4 }
  0xd0   : > { %p10059_p1 = pnand %p10058_p6, %p10052_p8 }
  0xd2   : > { %10062 = shalt.err (!%p10059_p1)
}
  0xd3   : > { %9426 = dma.hbm_to_vmem [thread:$0]  (!%p10802_p12), %s10723_s17, 32, %s1051_s23, [#allocation36], %s12170_s2, %s12170_s2, %s12172_s26  }
  0xd4   : > { %s10558_s18 = smov [#allocation2]   ;;  %s10559_s10 = smov [#allocation7]  }
  0xd5   : > { %s771_s3 = sshll.u32 %s10558_s18, 4  ;;  %s800_s25 = sshll.u32 %s10559_s10, 4  ;;  %s772_s3 = int_to_ptr.vmem [resolvable:$true] %s771_s3  ;;  %s801_s25 = int_to_ptr.vmem [resolvable:$true] %s800_s25 }
  0xd6   : > { %s10074_s1 = scalar_lea.vmem %s772_s3, 128  ;;  %p10082_p2 = scmp.lt.s32.totalorder %s772_s3, %s772_s3 }
  0xd7   : > { %p10075_p9 = scmp.ne.s32.totalorder %s772_s3, %s10074_s1  ;;  %p10083_p7 = scmp.lt.s32.totalorder %s10074_s1, %s10074_s1 }
  0xd9   : > { %p10077_p5 = pnand %p10075_p9, %p10808_p13  ;;  %p10084_p4 = por %p10083_p7, %p10082_p2 }
  0xdb   : > { %p10078_p3 = pneg %p10077_p5 }
  0xdd   : > { %p10085_p8 = pnand %p10084_p4, %p10078_p3 }
  0xdf   : > { %10088 = shalt.err (!%p10085_p8)
}
  0xe0   : > { %9363 = dma.hbm_to_vmem [thread:$0]  (!%p10802_p12), %s10603_s13, 128, %s772_s3, [#allocation3]  }
  0xe1   : > { %s10100_s23 = scalar_lea.vmem %s801_s25, 512  ;;  %p10108_p1 = scmp.lt.s32.totalorder %s801_s25, %s801_s25 }
  0xe2   : > { %p10101_p0 = scmp.ne.s32.totalorder %s801_s25, %s10100_s23  ;;  %p10109_p10 = scmp.lt.s32.totalorder %s10100_s23, %s10100_s23 }
  0xe4   : > { %p10103_p11 = pnand %p10101_p0, %p10808_p13  ;;  %p10110_p9 = por %p10109_p10, %p10108_p1 }
  0xe6   : > { %p10104_p6 = pneg %p10103_p11 }
  0xe8   : > { %p10111_p5 = pnand %p10110_p9, %p10104_p6 }
  0xea   : > { %10114 = shalt.err (!%p10111_p5)
}
  0xeb   : > { %s12174_s0 = smov 64   ;;  %s12176_s18 = smov 4  }
  0xec   : > { %9369 = dma.hbm_to_vmem [thread:$0]  (!%p10802_p12), %s10623_s29, 512, %s801_s25, [#allocation6], %s12174_s0, %s12174_s0, %s12176_s18  }
  0xed   : > { %s10562_s3 = smov [#allocation10]   ;;  %s10563_s1 = smov [#allocation13]  }
  0xee   : > { %s826_s10 = sshll.u32 %s10562_s3, 4  ;;  %s852_s2 = sshll.u32 %s10563_s1, 4  ;;  %s827_s10 = int_to_ptr.vmem [resolvable:$true] %s826_s10  ;;  %s853_s2 = int_to_ptr.vmem [resolvable:$true] %s852_s2 }
  0xef   : > { %s10126_s26 = scalar_lea.vmem %s827_s10, 512  ;;  %p10134_p7 = scmp.lt.s32.totalorder %s827_s10, %s827_s10 }
  0xf0   : > { %p10127_p3 = scmp.ne.s32.totalorder %s827_s10, %s10126_s26  ;;  %p10135_p4 = scmp.lt.s32.totalorder %s10126_s26, %s10126_s26 }
  0xf2   : > { %p10129_p10 = pnand %p10127_p3, %p10808_p13  ;;  %p10136_p8 = por %p10135_p4, %p10134_p7 }
  0xf4   : > { %p10130_p2 = pneg %p10129_p10 }
  0xf6   : > { %p10137_p0 = pnand %p10136_p8, %p10130_p2 }
  0xf8   : > { %10140 = shalt.err (!%p10137_p0)
}
  0xf9   : > { %9375 = dma.hbm_to_vmem [thread:$0]  (!%p10802_p12), %s10633_s8, 512, %s827_s10, [#allocation9], %s12174_s0, %s12174_s0, %s12176_s18  }
  0xfa   : > { %s10152_s25 = scalar_lea.vmem %s853_s2, 32  ;;  %p10160_p9 = scmp.lt.s32.totalorder %s853_s2, %s853_s2 }
  0xfb   : > { %p10153_p11 = scmp.ne.s32.totalorder %s853_s2, %s10152_s25  ;;  %p10161_p5 = scmp.lt.s32.totalorder %s10152_s25, %s10152_s25 }
  0xfd   : > { %p10155_p6 = pnand %p10153_p11, %p10808_p13  ;;  %p10162_p3 = por %p10161_p5, %p10160_p9 }
  0xff   : > { %p10156_p1 = pneg %p10155_p6 }
 0x101   : > { %p10163_p10 = pnand %p10162_p3, %p10156_p1 }
 0x103   : > { %10166 = shalt.err (!%p10163_p10)
}
 0x104   : > { %s12212_s26 = smov 1   ;;  %s12213_s23 = smov 16  }
 0x105   : > { %s12214_s3 = sld [smem:[#allocation61_spill]]  ;;  %s10564_s10 = smov [#allocation16]  }
 0x106   : > { %s878_s1 = sshll.u32 %s10564_s10, 4  ;;  %s10565_s0 = smov [#allocation19]   ;;  %s879_s1 = int_to_ptr.vmem [resolvable:$true] %s878_s1 }
 0x107   : > { %s904_s18 = sshll.u32 %s10565_s0, 4  ;;  %s10178_s4 = scalar_lea.vmem %s879_s1, 512  ;;  %s905_s18 = int_to_ptr.vmem [resolvable:$true] %s904_s18 }
 0x108   : > { %p10179_p2 = scmp.ne.s32.totalorder %s879_s1, %s10178_s4  ;;  %p10186_p8 = scmp.lt.s32.totalorder %s879_s1, %s879_s1 }
 0x109   : > { %p10187_p0 = scmp.lt.s32.totalorder %s10178_s4, %s10178_s4 }
 0x10a   : > { %p10181_p7 = pnand %p10179_p2, %p10808_p13 }
 0x10b   : > { %9381 = dma.hbm_to_vmem [thread:$0]  (!%p10802_p12), %s12214_s3, 32, %s853_s2, [#allocation12], %s12213_s23, %s12213_s23, %s12212_s26  }
 0x10c   : > { %p10182_p4 = pneg %p10181_p7  ;;  %p10188_p11 = por %p10187_p0, %p10186_p8 }
 0x10e   : > { %p10189_p6 = pnand %p10188_p11, %p10182_p4 }
 0x110   : > { %10192 = shalt.err (!%p10189_p6)
}
 0x111   : > { %s12215_s25 = smov 4   ;;  %s12216_s5 = smov 64  }
 0x112   : > { %s12217_s2 = sld [smem:[#allocation62_spill]]  ;;  %s10204_s0 = scalar_lea.vmem %s905_s18, 512 }
 0x113   : > { %p10205_p1 = scmp.ne.s32.totalorder %s905_s18, %s10204_s0  ;;  %p10212_p3 = scmp.lt.s32.totalorder %s905_s18, %s905_s18 }
 0x114   : > { %p10213_p10 = scmp.lt.s32.totalorder %s10204_s0, %s10204_s0 }
 0x115   : > { %p10207_p9 = pnand %p10205_p1, %p10808_p13 }
 0x116   : > { %p10214_p2 = por %p10213_p10, %p10212_p3 }
 0x117   : > { %p10208_p5 = pneg %p10207_p9 }
 0x118   : > { %9387 = dma.hbm_to_vmem [thread:$0]  (!%p10802_p12), %s12217_s2, 512, %s879_s1, [#allocation15], %s12216_s5, %s12216_s5, %s12215_s25  }
 0x119   : > { %p10215_p7 = pnand %p10214_p2, %p10208_p5 }
 0x11b   : > { %10218 = shalt.err (!%p10215_p7)
}
 0x11c   : > { %s12218_s4 = sld [smem:[#allocation64_spill]]  ;;  %s10566_s3 = smov [#allocation22]  }
 0x11d   : > { %s930_s10 = sshll.u32 %s10566_s3, 4  ;;  %s10567_s1 = smov [#allocation25]   ;;  %s931_s10 = int_to_ptr.vmem [resolvable:$true] %s930_s10 }
 0x11e   : > { %s956_s2 = sshll.u32 %s10567_s1, 4  ;;  %s10230_s6 = scalar_lea.vmem %s931_s10, 512  ;;  %s957_s2 = int_to_ptr.vmem [resolvable:$true] %s956_s2 }
 0x11f   : > { %p10231_p4 = scmp.ne.s32.totalorder %s931_s10, %s10230_s6  ;;  %p10238_p11 = scmp.lt.s32.totalorder %s931_s10, %s931_s10 }
 0x120   : > { %p10239_p6 = scmp.lt.s32.totalorder %s10230_s6, %s10230_s6 }
 0x121   : > { %p10233_p8 = pnand %p10231_p4, %p10808_p13 }
 0x122   : > { %9393 = dma.hbm_to_vmem [thread:$0]  (!%p10802_p12), %s12218_s4, 512, %s905_s18, [#allocation18], %s12216_s5, %s12216_s5, %s12215_s25  }
 0x123   : > { %p10234_p0 = pneg %p10233_p8  ;;  %p10240_p1 = por %p10239_p6, %p10238_p11 }
 0x125   : > { %p10241_p9 = pnand %p10240_p1, %p10234_p0 }
 0x127   : > { %10244 = shalt.err (!%p10241_p9)
}
 0x128   : > { %s12219_s18 = sld [smem:[#allocation65_spill]]  ;;  %s10256_s0 = scalar_lea.vmem %s957_s2, 512 }
 0x129   : > { %p10257_p5 = scmp.ne.s32.totalorder %s957_s2, %s10256_s0  ;;  %p10264_p2 = scmp.lt.s32.totalorder %s957_s2, %s957_s2 }
 0x12a   : > { %p10265_p7 = scmp.lt.s32.totalorder %s10256_s0, %s10256_s0 }
 0x12b   : > { %p10259_p3 = pnand %p10257_p5, %p10808_p13 }
 0x12c   : > { %p10266_p4 = por %p10265_p7, %p10264_p2 }
 0x12d   : > { %p10260_p10 = pneg %p10259_p3 }
 0x12e   : > { %9399 = dma.hbm_to_vmem [thread:$0]  (!%p10802_p12), %s12219_s18, 512, %s931_s10, [#allocation21], %s12216_s5, %s12216_s5, %s12215_s25  }
 0x12f   : > { %p10267_p8 = pnand %p10266_p4, %p10260_p10 }
 0x131   : > { %10270 = shalt.err (!%p10267_p8)
}
 0x132   : > { %s12220_s6 = sld [smem:[#allocation67_spill]]  ;;  %s10568_s4 = smov [#allocation28]  }
 0x133   : > { %s982_s3 = sshll.u32 %s10568_s4, 4  ;;  %s10569_s10 = smov [#allocation31]   ;;  %s983_s3 = int_to_ptr.vmem [resolvable:$true] %s982_s3 }
 0x134   : > { %s1008_s1 = sshll.u32 %s10569_s10, 4  ;;  %s10282_s18 = scalar_lea.vmem %s983_s3, 32  ;;  %s1009_s1 = int_to_ptr.vmem [resolvable:$true] %s1008_s1 }
 0x135   : > { %p10283_p0 = scmp.ne.s32.totalorder %s983_s3, %s10282_s18  ;;  %p10290_p1 = scmp.lt.s32.totalorder %s983_s3, %s983_s3 }
 0x136   : > { %p10291_p9 = scmp.lt.s32.totalorder %s10282_s18, %s10282_s18 }
 0x137   : > { %p10285_p11 = pnand %p10283_p0, %p10808_p13 }
 0x138   : > { %9405 = dma.hbm_to_vmem [thread:$0]  (!%p10802_p12), %s12220_s6, 512, %s957_s2, [#allocation24], %s12216_s5, %s12216_s5, %s12215_s25  }
 0x139   : > { %p10286_p6 = pneg %p10285_p11  ;;  %p10292_p5 = por %p10291_p9, %p10290_p1 }
 0x13b   : > { %p10293_p3 = pnand %p10292_p5, %p10286_p6 }
 0x13d   : > { %10296 = shalt.err (!%p10293_p3)
}
 0x13e   : > { %s12221_s2 = sld [smem:[#allocation68_spill]]  ;;  %s10308_s0 = scalar_lea.vmem %s1009_s1, 512 }
 0x13f   : > { %p10309_p10 = scmp.ne.s32.totalorder %s1009_s1, %s10308_s0  ;;  %p10316_p4 = scmp.lt.s32.totalorder %s1009_s1, %s1009_s1 }
 0x140   : > { %p10317_p8 = scmp.lt.s32.totalorder %s10308_s0, %s10308_s0 }
 0x141   : > { %p10311_p2 = pnand %p10309_p10, %p10808_p13 }
 0x142   : > { %p10318_p0 = por %p10317_p8, %p10316_p4 }
 0x143   : > { %p10312_p7 = pneg %p10311_p2 }
 0x144   : > { %9411 = dma.hbm_to_vmem [thread:$0]  (!%p10802_p12), %s12221_s2, 32, %s983_s3, [#allocation27], %s12213_s23, %s12213_s23, %s12212_s26  }
 0x145   : > { %p10319_p11 = pnand %p10318_p0, %p10312_p7 }
 0x147   : > { %10322 = shalt.err (!%p10319_p11)
}
 0x148   : > { %s12222_s6 = sld [smem:[#allocation70_spill]]  ;;  %s10570_s4 = smov [#allocation34]  }
 0x149   : > { %s1037_s3 = sshll.u32 %s10570_s4, 4  ;;  %s10571_s10 = smov [#allocation37]   ;;  %s1038_s3 = int_to_ptr.vmem [resolvable:$true] %s1037_s3 }
 0x14a   : > { %s1063_s18 = sshll.u32 %s10571_s10, 4  ;;  %s10334_s2 = scalar_lea.vmem %s1038_s3, 32  ;;  %s1064_s18 = int_to_ptr.vmem [resolvable:$true] %s1063_s18 }
 0x14b   : > { %p10335_p6 = scmp.ne.s32.totalorder %s1038_s3, %s10334_s2  ;;  %p10342_p5 = scmp.lt.s32.totalorder %s1038_s3, %s1038_s3 }
 0x14c   : > { %p10343_p3 = scmp.lt.s32.totalorder %s10334_s2, %s10334_s2 }
 0x14d   : > { %p10337_p1 = pnand %p10335_p6, %p10808_p13 }
 0x14e   : > { %9417 = dma.hbm_to_vmem [thread:$0]  (!%p10802_p12), %s12222_s6, 512, %s1009_s1, [#allocation30], %s12216_s5, %s12216_s5, %s12215_s25  }
 0x14f   : > { %p10338_p9 = pneg %p10337_p1  ;;  %p10344_p10 = por %p10343_p3, %p10342_p5 }
 0x151   : > { %p10345_p2 = pnand %p10344_p10, %p10338_p9 }
 0x153   : > { %10348 = shalt.err (!%p10345_p2)
}
 0x154   : > { %s12223_s5 = sld [smem:[#allocation72_spill]]  ;;  %s10360_s25 = scalar_lea.vmem %s1064_s18, 32 }
 0x155   : > { %p10361_p7 = scmp.ne.s32.totalorder %s1064_s18, %s10360_s25  ;;  %p10368_p0 = scmp.lt.s32.totalorder %s1064_s18, %s1064_s18 }
 0x156   : > { %p10369_p11 = scmp.lt.s32.totalorder %s10360_s25, %s10360_s25 }
 0x157   : > { %p10363_p4 = pnand %p10361_p7, %p10808_p13 }
 0x158   : > { %p10370_p6 = por %p10369_p11, %p10368_p0 }
 0x159   : > { %p10364_p8 = pneg %p10363_p4 }
 0x15a   : > { %9423 = dma.hbm_to_vmem [thread:$0]  (!%p10802_p12), %s12223_s5, 32, %s1038_s3, [#allocation33], %s12213_s23, %s12213_s23, %s12212_s26  }
 0x15b   : > { %p10371_p1 = pnand %p10370_p6, %p10364_p8 }
 0x15d   : > { %10374 = shalt.err (!%p10371_p1)
}
 0x15e   : > { %9429 = dma.hbm_to_vmem [thread:$0]  (!%p10802_p12), %s10728_s30, 32, %s1064_s18, [#allocation36], %s12213_s23, %s12213_s23, %s12212_s26  }
 0x15f   : > { %s10572_s1 = smov [#allocation38]  }
 0x160   : > { %s1080_s0 = sshll.u32 %s10572_s1, 4  ;;  %s1081_s0 = int_to_ptr.vmem [resolvable:$true] %s1080_s0 }
 0x161   : > { %s10386_s6 = scalar_lea.vmem %s1081_s0, 16  ;;  %s10393_s4 = scalar_lea.vmem %s1081_s0, 32 }
 0x162   : > { %p10387_p9 = scmp.ne.s32.totalorder %s1081_s0, %s10386_s6  ;;  %p10394_p10 = scmp.lt.s32.totalorder %s1081_s0, %s1081_s0 }
 0x163   : > { %p10395_p2 = scmp.lt.s32.totalorder %s10393_s4, %s10386_s6 }
 0x164   : > { %p10389_p5 = pnand %p10387_p9, %p10808_p13 }
 0x165   : > { %p10396_p7 = por %p10395_p2, %p10394_p10 }
 0x166   : > { %p10390_p3 = pneg %p10389_p5 }
 0x168   : > { %p10397_p4 = pnand %p10396_p7, %p10390_p3 }
 0x16a   : > { %10400 = shalt.err (!%p10397_p4)
}
 0x16b   : > { %9432 = dma.hbm_to_vmem [thread:$0]  (!%p10802_p12), %s10738_s12, 16, %s1081_s0, [#allocation39]  }
 0x16c   : > { %p12224_p8 = scmp.ne.s32.totalorder %s12204_s11, 0 }
 0x16d   : > { %p12225_p0 = scmp.eq.s32.totalorder (!%p12224_p8), %s10766_s22, 0 }
 0x16e   : > { %1112 = sbr.rel (%p12224_p8) target bundleno = 20197 (0x4ee5), region = 140 }
 0x173   : > { %10444 = dma.done.wait (%p12225_p0), [#allocation3], 128   ;;  %p12226_p11 = pmov %p12225_p0 }
 0x174   : > { %p12227_p13 = pmov %p12225_p0 }
 0x175   : > { %10446 = vsyncadd (%p12226_p11), [#allocation3], 4294967168 }
 0x176   : > { %10448 = dma.done.wait (%p12227_p13), [#allocation6], 544   ;;  %p12228_p6 = pmov %p12225_p0 }
 0x177   : > { %p12229_p1 = pmov %p12225_p0 }
 0x178   : > { %10450 = vsyncadd (%p12228_p6), [#allocation6], 4294966752 }
 0x179   : > { %10452 = dma.done.wait (%p12229_p1), [#allocation9], 544   ;;  %p12230_p12 = pmov %p12225_p0 }
 0x17a   : > { %p12231_p9 = pmov %p12225_p0 }
 0x17b   : > { %10454 = vsyncadd (%p12230_p12), [#allocation9], 4294966752 }
 0x17c   : > { %10456 = dma.done.wait (%p12231_p9), [#allocation12], 64   ;;  %p12232_p5 = pmov %p12225_p0 }
 0x17d   : > { %p12233_p3 = pmov %p12225_p0 }
 0x17e   : > { %10458 = vsyncadd (%p12232_p5), [#allocation12], 4294967232 }
 0x17f   : > { %10460 = dma.done.wait (%p12233_p3), [#allocation15], 544   ;;  %p12234_p10 = pmov %p12225_p0 }
 0x180   : > { %p12235_p2 = pmov %p12225_p0 }
 0x181   : > { %10462 = vsyncadd (%p12234_p10), [#allocation15], 4294966752 }
 0x182   : > { %10464 = dma.done.wait (%p12235_p2), [#allocation18], 544   ;;  %p12236_p7 = pmov %p12225_p0 }
 0x183   : > { %p12237_p4 = pmov %p12225_p0 }
 0x184   : > { %10466 = vsyncadd (%p12236_p7), [#allocation18], 4294966752 }
 0x185   : > { %10468 = dma.done.wait (%p12237_p4), [#allocation21], 544   ;;  %p12238_p8 = pmov %p12225_p0 }
 0x187   : > { %10470 = vsyncadd (%p12238_p8), [#allocation21], 4294966752 }
 0x188   : > { %10472 = dma.done.wait (%p12225_p0), [#allocation24], 544   ;;  %p12239_p11 = pmov %p12225_p0 }
 0x189   : > { %p12240_p13 = pmov %p12225_p0 }
 0x18a   : > { %10474 = vsyncadd (%p12239_p11), [#allocation24], 4294966752 }
 0x18b   : > { %10476 = dma.done.wait (%p12240_p13), [#allocation27], 64   ;;  %p12241_p6 = pmov %p12225_p0 }
 0x18c   : > { %p12242_p1 = pmov %p12225_p0 }
 0x18d   : > { %10478 = vsyncadd (%p12241_p6), [#allocation27], 4294967232 }
 0x18e   : > { %10480 = dma.done.wait (%p12242_p1), [#allocation30], 544   ;;  %p12243_p12 = pmov %p12225_p0 }
 0x18f   : > { %p12244_p9 = pmov %p12225_p0 }
 0x190   : > { %10482 = vsyncadd (%p12243_p12), [#allocation30], 4294966752 }
 0x191   : > { %10484 = dma.done.wait (%p12244_p9), [#allocation33], 64   ;;  %p12245_p5 = pmov %p12225_p0 }
 0x192   : > { %p12246_p3 = pmov %p12225_p0 }
 0x193   : > { %10486 = vsyncadd (%p12245_p5), [#allocation33], 4294967232 }
 0x194   : > { %10488 = dma.done.wait (%p12246_p3), [#allocation36], 64   ;;  %p12247_p10 = pmov %p12225_p0 }
 0x195   : > { %p12248_p2 = pmov %p12225_p0 }
 0x196   : > { %10490 = vsyncadd (%p12247_p10), [#allocation36], 4294967232 }
 0x197   : > { %10492 = dma.done.wait (%p12248_p2), [#allocation39], 16   ;;  %p12249_p7 = pmov %p12225_p0 }
 0x198   : > { %s12250_s15 = sld [smem:[#allocation55_spill]]  ;;  %s8122_s28 = sshll.u32 %s10766_s22, 1  ;;  %v10573_v0 = vmov 0.0   ;;  %vm10574_vm0 = vmmov 0   ;;  %v1305_v5 = vld [vmem:[#allocation2] sm:$0xff]  ;;  %vm1347_vm1 = vcmask 261120  }
 0x199   : > { %10494 = vsyncadd (%p12249_p7), [#allocation39], 4294967280  ;;  %s12251_s11 = sld [smem:[#allocation58_spill]]  ;;  %8566 = vmatprep.subr.bf16.mxu1 %v10573_v0  ;;  %8570 = vmatprep.mubr.msk.bf16.mxu1 %vm10574_vm0, %v10573_v0  ;;  %p1289_p4 = scmp.lt.s32.totalorder %s8122_s28, 3  ;;  %v8127_v9 = vld [vmem:[#allocation5] ss:$0 sm:$0xff] }
 0x19a   : > { %8582 = vmatprep.subr.bf16.mxu0 %v10573_v0  ;;  %8584 = vmatprep.mubr.msk.bf16.mxu0 %vm10574_vm0, %v10573_v0  ;;  %s10575_s3 = smov 96   ;;  %s10576_s10 = smov 120   ;;  %v9589_v19 = vld [vmem:[#allocation7 + $0x8] sm:$0xff]   ;;  %v9590_v20 = vld [vmem:[#allocation7] sm:$0xff]   ;;  %vm1466_vm2 = vcmask 64512   ;;  %vm1528_vm3 = vcmask 1043456  }
 0x19b   : > { %s12267_s28 = smov (!%p1289_p4, %s8122_s28), 3  ;;  %s10577_s18 = smov 88   ;;  %v8131_v37 = vld [vmem:[#allocation8] ss:$0 sm:$0xff]  ;;  %vm3051_vm4 = vcmask 130048   ;;  %vm4403_vm5 = vcmask 523264  }
 0x19c   : > { %s8123_s26 = sshll.u32 %s12267_s28, 3  ;;  %s10578_s2 = smov 80  }
 0x19d   : > { %s10579_s5 = smov 112   ;;  %s10580_s25 = smov 104  }
 0x19e   : > { %s1292_s23 = scalar_lea.vmem %s12250_s15, %s8123_s26  ;;  %s10581_s1 = smov 72  }
 0x19f   : > { %v9587_v1 = vld [vmem:[%s12251_s11 + $0x8] sm:$0xff]   ;;  %v9588_v2 = vld [vmem:[%s12251_s11] sm:$0xff]   ;;  %s12252_s0 = sld [smem:[#allocation56_spill]]  ;;  %s8322_s4 = sshll.u32 %s12267_s28, 4 }
 0x1a0   : > { %8567 = vmatpush3.bf16.msra.mxu1 %v9587_v1  ;;  %v11065_v3 = vld [vmem:[%s1292_s23] sm:$0xff]  ;;  %v11067_v4 = vld [vmem:[%s1292_s23 + $0x8] sm:$0xff]  ;;  %s12253_s6 = sld [smem:[#allocation57_spill]]  ;;  %s1285_s26 = sand.u32 1, %s10505_s16  }
 0x1a1   : > { %8568 = vmatprep.subr.bf16.mxu1 %v10573_v0  ;;  %v1320_v6 = vadd.f32 %v1305_v5, %v11065_v3  ;;  %v1321_v7 = vadd.f32 %v1305_v5, %v11067_v4  ;;  %v1323_v21 = vpack.c.bf16 %v11067_v4, %v11065_v3  ;;  %v1573_v5 = vld [vmem:[#allocation10] sm:$0xf]  ;;  %s12254_s28 = sld [smem:[#allocation71_spill]]  ;;  %s8121_s23 = sshll.u32 %s1285_s26, 4 }
 0x1a2   : > { %p12255_p0 = scmp.ne.s32.totalorder %s12201_s7, 0 }
 0x1a3   : > { %v1322_v8 = vpack.c.bf16 %v1321_v7, %v1320_v6  ;;  %v11132_v6 = vsel %vm1528_vm3, %v1573_v5, 0  ;;  %v1687_v7 = vld [vmem:[#allocation10 + $0x4] sm:$0xf] }
 0x1a4   : > { %8569 = vmatpush3.bf16.msra.mxu1 %v9588_v2 }
 0x1a5   : > { %8574 = vmatprep.subr.bf16.mxu1 %v10573_v0  ;;  %s1299_s15 = scalar_lea.vmem %s12252_s0, %s8322_s4 }
 0x1a7   : > { %8571 = vmatmul.mubr.msk.bf16.vlgmr.msra.gmra.mxu1 %vm1347_vm1, %v1322_v8  ;;  %v11137_v8 = vsel %vm1528_vm3, %v1687_v7, 0 }
 0x1a8   : > { %8578 = vmatprep.mubr.msk.bf16.mxu1 %vm10574_vm0, %v10573_v0  ;;  %8575 = vmatpush3.bf16.msra.mxu1 %v9589_v19 }
 0x1a9   : > { %8576 = vmatprep.subr.bf16.mxu1 %v10573_v0 }
 0x1ac   : > { %8577 = vmatpush3.bf16.msra.mxu1 %v9590_v20 }
 0x1ad   : > { %8588 = vmatprep.subr.bf16.mxu1 %v10573_v0 }
 0x1af   : > { %8579 = vmatmul.mubr.msk.bf16.vlgmr.msra.gmra.mxu1 %vm1347_vm1, %v1323_v21 }
 0x1b0   : > { %8590 = vmatprep.mubr.msk.bf16.mxu1 %vm10574_vm0, %v10573_v0 }
 0x267   : > { %v1385_v10 = vpop.f32.mrf.mxu1 }
 0x268   : > { %v1386_v11 = vadd.f32 %v8127_v9, %v1385_v10 }
 0x269   : > { %v8572_v12 = vpop.f32.mrf.mxu1 }
 0x26a   : > { %v1459_v13 = vmul.f32 0.35355338, %v1386_v11  ;;  %v11076_v14 = vpack.c.bf16 %v1386_v11, %v1386_v11 }
 0x26b   : > { %v1388_v15 = vpop.f32.mrf.mxu1 }
 0x26c   : > { %v11078_v16 = vpack.c.bf16 %v1459_v13, %v1459_v13  ;;  %v11080_v17 = vadd.f32 %v8127_v9, %v1388_v15  ;;  %1464 = vrot.lane.b32.xlu0 %v11076_v14, %s10575_s3 }
 0x26d   : > { %v8573_v18 = vpop.f32.mrf.mxu1 }
 0x26e   : > { %1575 = vrot.lane.b32.xlu1 %v11078_v16, %s10576_s10 }
 0x26f   : > { %v1452_v38 = vpop.f32.mrf.mxu1 }
 0x270   : > { %1577 = vrot.lane.b32.xlu0 %v11076_v14, %s10577_s18  ;;  %v1453_v39 = vadd.f32 %v8131_v37, %v1452_v38 }
 0x271   : > { %v8580_v40 = vpop.f32.mrf.mxu1 }
 0x272   : > { %v11108_v41 = vpack.c.bf16 %v1453_v39, %v1453_v39 }
 0x273   : > { %v1455_v42 = vpop.f32.mrf.mxu1 }
 0x274   : > { %v11110_v43 = vadd.f32 %v8131_v37, %v1455_v42  ;;  %v1530_v44 = vsel %vm1528_vm3, %v11108_v41, 0 }
 0x275   : > { %v8581_v45 = vpop.f32.mrf.mxu1  ;;  %8589 = vmatpush3.bf16.msra.mxu1 %v1530_v44 }
 0x276   : > { %8600 = vmatprep.subr.bf16.mxu1 %v10573_v0 }
 0x2de   : > { %v1465_v22 = vpop.permute.xlu0 %1464 }
 0x2df   : > { %v1471_v23 = vsel %vm1466_vm2, %v1465_v22, 0 }
 0x2e0   : > { %8583 = vmatpush3.bf16.xpose.msra.mxu0 %v1471_v23  ;;  %v1576_v26 = vpop.permute.xlu1 %1575 }
 0x2e1   : > { %8594 = vmatprep.subr.bf16.mxu0 %v10573_v0 }
 0x2e2   : > { %v1578_v24 = vpop.permute.xlu0 %1577 }
 0x2e3   : > { %v1583_v25 = vsel %vm1466_vm2, %v1578_v24, 0 }
 0x2e7   : > { %8585 = vmatmul.mubr.msk.bf16.vlgmr.msra.gmra.mxu0 %vm1466_vm2, %v11078_v16 }
 0x2e8   : > { %8595 = vmatpush3.bf16.xpose.msra.mxu0 %v1583_v25  ;;  %8596 = vmatprep.mubr.msk.bf16.mxu0 %vm10574_vm0, %v10573_v0 }
 0x2e9   : > { %8606 = vmatprep.subr.bf16.mxu0 %v10573_v0 }
 0x2ef   : > { %8597 = vmatmul.mubr.msk.bf16.vlgmr.msra.gmra.mxu0 %vm1466_vm2, %v1576_v26 }
 0x2f0   : > { %8608 = vmatprep.mubr.msk.bf16.mxu0 %vm10574_vm0, %v10573_v0  ;;  %8607 = vmatpush3.bf16.msra.mxu0 %v11137_v8 }
 0x2f1   : > { %8618 = vmatprep.subr.bf16.mxu0 %v10573_v0 }
 0x3a7   : > { %v1507_v27 = vpop.f32.mrf.mxu0 }
 0x3a8   : > { %v1513_v28 = vsel %vm1466_vm2, %v1507_v27, -inf }
 0x3a9   : > { %1514 = vmax.xlane.f32.xlu1 %v1513_v28  ;;  %v8586_v29 = vpop.f32.mrf.mxu0 }
 0x3ab   : > { %v1510_v30 = vpop.f32.mrf.mxu0 }
 0x3ad   : > { %v8587_v31 = vpop.f32.mrf.mxu0 }
 0x3af   : > { %v1619_v32 = vpop.f32.mrf.mxu0 }
 0x3b0   : > { %v1625_v33 = vsel %vm1466_vm2, %v1619_v32, -inf }
 0x3b1   : > { %1626 = vmax.xlane.f32.xlu0 %v1625_v33  ;;  %v8598_v34 = vpop.f32.mrf.mxu0 }
 0x3b3   : > { %v1622_v35 = vpop.f32.mrf.mxu0 }
 0x3b5   : > { %v8599_v36 = vpop.f32.mrf.mxu0 }
 0x432   : > { %v1515_v46 = vpop.xlane.xlu1 %1514 }
 0x433   : > { %v1516_v47 = vsub.f32 %v1507_v27, %v1515_v46 }
 0x435   : > { %v1517_v48 = vmul.f32 1.442695, %v1516_v47 }
 0x437   : > { %9619 = vpow2.f32 %v1517_v48 }
 0x43a   : > { %v1627_v49 = vpop.xlane.xlu0 %1626 }
 0x43b   : > { %v1628_v50 = vsub.f32 %v1619_v32, %v1627_v49 }
 0x43d   : > { %v1629_v51 = vmul.f32 1.442695, %v1628_v50 }
 0x43f   : > { %9621 = vpow2.f32 %v1629_v51 }
 0x444   : > { %v9620_v52 = vpop.eup %9619 }
 0x445   : > { %v1519_v53 = vsel %vm1466_vm2, %v9620_v52, 0.0 }
 0x446   : > { %1520 = vadd.xlane.f32.xlu0 %v1519_v53 }
 0x44c   : > { %v9622_v54 = vpop.eup %9621 }
 0x44d   : > { %v1631_v55 = vsel %vm1466_vm2, %v9622_v54, 0.0 }
 0x44e   : > { %1632 = vadd.xlane.f32.xlu1 %v1631_v55 }
 0x45c   : > { %1638 = vrot.lane.b32.xlu0 %v11108_v41, %s10576_s10 }
 0x45f   : > { %1782 = vrot.lane.b32.xlu1 %v11076_v14, %s10578_s2 }
 0x463   : > { %1780 = vrot.lane.b32.xlu1 %v11078_v16, %s10579_s5 }
 0x4cf   : > { %v1521_v56 = vpop.xlane.xlu0 %1520 }
 0x4d0   : > { %9623 = vrcp.f32 %v1521_v56 }
 0x4d3   : > { %v1639_v59 = vpop.permute.xlu0 %1638 }
 0x4d4   : > { %v1644_v61 = vsel %vm1528_vm3, %v1639_v59, 0 }
 0x4d7   : > { %v1633_v57 = vpop.xlane.xlu1 %1632 }
 0x4d8   : > { %9625 = vrcp.f32 %v1633_v57 }
 0x4db   : > { %v1783_v15 = vpop.permute.xlu1 %1782 }
 0x4dc   : > { %v1788_v21 = vsel %vm1466_vm2, %v1783_v15, 0 }
 0x4dd   : > { %v9624_v58 = vpop.eup %9623 }
 0x4de   : > { %v1523_v60 = vmul.f32 %v9624_v58, %v9620_v52 }
 0x4df   : > { %v1781_v24 = vpop.permute.xlu1 %1780 }
 0x4e0   : > { %v1524_v62 = vpack.c.bf16 %v1523_v60, %v1523_v60 }
 0x4e2   : > { %8591 = vmatmul.mubr.msk.bf16.vlgmr.msra.gmra.mxu1 %vm1466_vm2, %v1524_v62 }
 0x4e3   : > { %8601 = vmatpush3.bf16.msra.mxu1 %v1644_v61  ;;  %8602 = vmatprep.mubr.msk.bf16.mxu1 %vm10574_vm0, %v10573_v0 }
 0x4e4   : > { %8612 = vmatprep.subr.bf16.mxu1 %v10573_v0 }
 0x4e5   : > { %v9626_v63 = vpop.eup %9625 }
 0x4e6   : > { %v1635_v1 = vmul.f32 %v9626_v63, %v9622_v54 }
 0x4e8   : > { %v1636_v2 = vpack.c.bf16 %v1635_v1, %v1635_v1 }
 0x4ea   : > { %8603 = vmatmul.mubr.msk.bf16.vlgmr.msra.gmra.mxu1 %vm1466_vm2, %v1636_v2  ;;  %v11183_v2 = vpack.c.bf16 %v11080_v17, %v11080_v17 }
 0x4eb   : > { %8614 = vmatprep.mubr.msk.bf16.mxu1 %vm10574_vm0, %v10573_v0  ;;  %8613 = vmatpush3.bf16.msra.mxu1 %v11132_v6 }
 0x4ec   : > { %8624 = vmatprep.subr.bf16.mxu1 %v10573_v0 }
 0x5a2   : > { %v1566_v9 = vpop.f32.mrf.mxu1 }
 0x5a3   : > { %v1572_v10 = vpack.c.bf16 %v1566_v9, %v1566_v9 }
 0x5a4   : > { %v8592_v11 = vpop.f32.mrf.mxu1 }
 0x5a5   : > { %8615 = vmatmul.mubr.msk.bf16.vlgmr.msra.gmra.mxu1 %vm1466_vm2, %v1572_v10 }
 0x5a6   : > { %v1569_v12 = vpop.f32.mrf.mxu1  ;;  %8626 = vmatprep.mubr.msk.bf16.mxu1 %vm10574_vm0, %v10573_v0 }
 0x5a7   : > { %v2098_v12 = vmul.f32 0.35355338, %v11080_v17 }
 0x5a8   : > { %v8593_v13 = vpop.f32.mrf.mxu1 }
 0x5a9   : > { %v11193_v13 = vpack.c.bf16 %v2098_v12, %v2098_v12 }
 0x5aa   : > { %v1680_v18 = vpop.f32.mrf.mxu1 }
 0x5ab   : > { %v1686_v19 = vpack.c.bf16 %v1680_v18, %v1680_v18 }
 0x5ac   : > { %v8604_v20 = vpop.f32.mrf.mxu1 }
 0x5ad   : > { %8609 = vmatmul.mubr.msk.bf16.vlgmr.msra.gmra.mxu0 %vm1466_vm2, %v1686_v19 }
 0x5ae   : > { %8619 = vmatpush3.bf16.xpose.msra.mxu0 %v1788_v21  ;;  %v1683_v22 = vpop.f32.mrf.mxu1  ;;  %8620 = vmatprep.mubr.msk.bf16.mxu0 %vm10574_vm0, %v10573_v0 }
 0x5af   : > { %8630 = vmatprep.subr.bf16.mxu0 %v10573_v0  ;;  %v2050_v22 = vld [vmem:[#allocation10 + $0xc] sm:$0xf] }
 0x5b0   : > { %v8605_v23 = vpop.f32.mrf.mxu1 }
 0x5b1   : > { %v11201_v23 = vsel %vm1528_vm3, %v2050_v22, 0 }
 0x5b5   : > { %8621 = vmatmul.mubr.msk.bf16.vlgmr.msra.gmra.mxu0 %vm1466_vm2, %v1781_v24 }
 0x5b6   : > { %8632 = vmatprep.mubr.msk.bf16.mxu0 %vm10574_vm0, %v10573_v0 }
 0x665   : > { %v1774_v25 = vpop.f32.mrf.mxu1 }
 0x667   : > { %v8616_v26 = vpop.f32.mrf.mxu1 }
 0x669   : > { %v1777_v27 = vpop.f32.mrf.mxu1 }
 0x66b   : > { %v8617_v28 = vpop.f32.mrf.mxu1 }
 0x66d   : > { %v1728_v29 = vpop.f32.mrf.mxu0 }
 0x66e   : > { %v11152_v30 = vadd.f32 %v1774_v25, %v1728_v29 }
 0x66f   : > { %v8610_v31 = vpop.f32.mrf.mxu0 }
 0x671   : > { %v1731_v32 = vpop.f32.mrf.mxu0 }
 0x673   : > { %v8611_v33 = vpop.f32.mrf.mxu0 }
 0x674   : > { %v11225_v33 = vpack.c.bf16 %v11110_v43, %v11110_v43 }
 0x675   : > { %v1824_v34 = vpop.f32.mrf.mxu0 }
 0x676   : > { %v1830_v35 = vsel %vm1466_vm2, %v1824_v34, -inf }
 0x677   : > { %1831 = vmax.xlane.f32.xlu0 %v1830_v35  ;;  %v8622_v36 = vpop.f32.mrf.mxu0 }
 0x679   : > { %v1827_v37 = vpop.f32.mrf.mxu0 }
 0x67a   : > { %v2167_v37 = vsel %vm1528_vm3, %v11225_v33, 0 }
 0x67b   : > { %v8623_v38 = vpop.f32.mrf.mxu0 }
 0x68d   : > { %1842 = vrot.lane.b32.xlu0 %v11108_v41, %s10579_s5 }
 0x691   : > { %1939 = vrot.lane.b32.xlu0 %v11078_v16, %s10580_s25 }
 0x700   : > { %v1832_v39 = vpop.xlane.xlu0 %1831 }
 0x701   : > { %v1833_v40 = vsub.f32 %v1824_v34, %v1832_v39 }
 0x703   : > { %v1834_v42 = vmul.f32 1.442695, %v1833_v40 }
 0x704   : > { %v1843_v44 = vpop.permute.xlu0 %1842 }
 0x705   : > { %9627 = vpow2.f32 %v1834_v42  ;;  %v1848_v45 = vsel %vm1528_vm3, %v1843_v44, 0 }
 0x706   : > { %8625 = vmatpush3.bf16.msra.mxu1 %v1848_v45 }
 0x707   : > { %8636 = vmatprep.subr.bf16.mxu1 %v10573_v0 }
 0x708   : > { %v1940_v53 = vpop.permute.xlu0 %1939 }
 0x712   : > { %v9628_v46 = vpop.eup %9627 }
 0x713   : > { %v1836_v47 = vsel %vm1466_vm2, %v9628_v46, 0.0 }
 0x714   : > { %1837 = vadd.xlane.f32.xlu1 %v1836_v47 }
 0x725   : > { %1941 = vrot.lane.b32.xlu1 %v11076_v14, %s10581_s1  ;;  %v1891_v14 = vld [vmem:[#allocation10 + $0x8] sm:$0xf] }
 0x726   : > { %v11173_v54 = vsel %vm1528_vm3, %v1891_v14, 0 }
 0x727   : > { %8631 = vmatpush3.bf16.msra.mxu0 %v11173_v54 }
 0x728   : > { %8642 = vmatprep.subr.bf16.mxu0 %v10573_v0 }
 0x79d   : > { %v1838_v48 = vpop.xlane.xlu1 %1837 }
 0x79e   : > { %9629 = vrcp.f32 %v1838_v48 }
 0x7a1   : > { %v1942_v50 = vpop.permute.xlu1 %1941 }
 0x7a2   : > { %v1947_v52 = vsel %vm1466_vm2, %v1942_v50, 0 }
 0x7ab   : > { %v9630_v16 = vpop.eup %9629 }
 0x7ac   : > { %v1840_v49 = vmul.f32 %v9630_v16, %v9628_v46 }
 0x7ae   : > { %v1841_v51 = vpack.c.bf16 %v1840_v49, %v1840_v49 }
 0x7b0   : > { %8627 = vmatmul.mubr.msk.bf16.vlgmr.msra.gmra.mxu1 %vm1466_vm2, %v1841_v51 }
 0x7b1   : > { %8637 = vmatpush3.bf16.xpose.msra.mxu1 %v1947_v52  ;;  %8638 = vmatprep.mubr.msk.bf16.mxu1 %vm10574_vm0, %v10573_v0 }
 0x7b2   : > { %8648 = vmatprep.subr.bf16.mxu1 %v10573_v0 }
 0x7b8   : > { %8639 = vmatmul.mubr.msk.bf16.vlgmr.msra.gmra.mxu1 %vm1466_vm2, %v1940_v53 }
 0x7b9   : > { %8650 = vmatprep.mubr.msk.bf16.mxu1 %vm10574_vm0, %v10573_v0  ;;  %8649 = vmatpush3.bf16.msra.mxu1 %v11201_v23 }
 0x7ba   : > { %8660 = vmatprep.subr.bf16.mxu1 %v10573_v0 }
 0x870   : > { %v1884_v55 = vpop.f32.mrf.mxu1 }
 0x871   : > { %v1890_v56 = vpack.c.bf16 %v1884_v55, %v1884_v55 }
 0x872   : > { %v8628_v57 = vpop.f32.mrf.mxu1 }
 0x873   : > { %8633 = vmatmul.mubr.msk.bf16.vlgmr.msra.gmra.mxu0 %vm1466_vm2, %v1890_v56 }
 0x874   : > { %v1887_v58 = vpop.f32.mrf.mxu1  ;;  %8644 = vmatprep.mubr.msk.bf16.mxu0 %vm10574_vm0, %v10573_v0 }
 0x876   : > { %v8629_v59 = vpop.f32.mrf.mxu1 }
 0x878   : > { %v1983_v60 = vpop.f32.mrf.mxu1 }
 0x879   : > { %v1989_v61 = vsel %vm1466_vm2, %v1983_v60, -inf }
 0x87a   : > { %1990 = vmax.xlane.f32.xlu1 %v1989_v61  ;;  %v8640_v62 = vpop.f32.mrf.mxu1 }
 0x87c   : > { %v1986_v63 = vpop.f32.mrf.mxu1 }
 0x87e   : > { %v8641_v1 = vpop.f32.mrf.mxu1 }
 0x88b   : > { %2103 = vrot.lane.b32.xlu1 %v11183_v2, %s10575_s3 }
 0x88f   : > { %2213 = vrot.lane.b32.xlu1 %v11183_v2, %s10577_s18 }
 0x903   : > { %v1991_v5 = vpop.xlane.xlu1 %1990 }
 0x904   : > { %v1992_v7 = vsub.f32 %v1983_v60, %v1991_v5 }
 0x906   : > { %v1993_v9 = vmul.f32 1.442695, %v1992_v7 }
 0x907   : > { %v2104_v27 = vpop.permute.xlu1 %2103 }
 0x908   : > { %9631 = vpow2.f32 %v1993_v9  ;;  %v2109_v29 = vsel %vm1466_vm2, %v2104_v27, 0 }
 0x915   : > { %v9632_v10 = vpop.eup %9631 }
 0x916   : > { %v1995_v11 = vsel %vm1466_vm2, %v9632_v10, 0.0 }
 0x917   : > { %1996 = vadd.xlane.f32.xlu0 %v1995_v11 }
 0x92d   : > { %2001 = vrot.lane.b32.xlu0 %v11108_v41, %s10580_s25 }
 0x931   : > { %2211 = vrot.lane.b32.xlu0 %v11193_v13, %s10576_s10 }
 0x933   : > { %v1932_v15 = vpop.f32.mrf.mxu0 }
 0x934   : > { %v11198_v18 = vadd.f32 %v1932_v15, %v11152_v30  ;;  %v2214_v30 = vpop.permute.xlu1 %2213 }
 0x935   : > { %v8634_v19 = vpop.f32.mrf.mxu0  ;;  %v2219_v31 = vsel %vm1466_vm2, %v2214_v30, 0 }
 0x937   : > { %v1935_v20 = vpop.f32.mrf.mxu0 }
 0x939   : > { %v8635_v21 = vpop.f32.mrf.mxu0 }
 0x9a0   : > { %v1997_v17 = vpop.xlane.xlu0 %1996 }
 0x9a1   : > { %9633 = vrcp.f32 %v1997_v17 }
 0x9a4   : > { %v2002_v41 = vpop.permute.xlu0 %2001 }
 0x9a5   : > { %v2007_v24 = vsel %vm1528_vm3, %v2002_v41, 0 }
 0x9a6   : > { %8643 = vmatpush3.bf16.msra.mxu0 %v2007_v24 }
 0x9a7   : > { %8654 = vmatprep.subr.bf16.mxu0 %v10573_v0 }
 0x9a8   : > { %v2212_v32 = vpop.permute.xlu0 %2211 }
 0x9ae   : > { %v9634_v25 = vpop.eup %9633 }
 0x9af   : > { %v1999_v26 = vmul.f32 %v9634_v25, %v9632_v10 }
 0x9b1   : > { %v2000_v28 = vpack.c.bf16 %v1999_v26, %v1999_v26 }
 0x9b3   : > { %8645 = vmatmul.mubr.msk.bf16.vlgmr.msra.gmra.mxu0 %vm1466_vm2, %v2000_v28 }
 0x9b4   : > { %8655 = vmatpush3.bf16.xpose.msra.mxu0 %v2109_v29  ;;  %8656 = vmatprep.mubr.msk.bf16.mxu0 %vm10574_vm0, %v10573_v0 }
 0x9b5   : > { %8666 = vmatprep.subr.bf16.mxu0 %v10573_v0 }
 0x9bb   : > { %8657 = vmatmul.mubr.msk.bf16.vlgmr.msra.gmra.mxu0 %vm1466_vm2, %v11193_v13 }
 0x9bc   : > { %8667 = vmatpush3.bf16.xpose.msra.mxu0 %v2219_v31  ;;  %8668 = vmatprep.mubr.msk.bf16.mxu0 %vm10574_vm0, %v10573_v0 }
 0x9bd   : > { %8678 = vmatprep.subr.bf16.mxu0 %v10573_v0 }
 0x9c3   : > { %8669 = vmatmul.mubr.msk.bf16.vlgmr.msra.gmra.mxu0 %vm1466_vm2, %v2212_v32 }
 0x9c4   : > { %8679 = vmatpush3.bf16.msra.mxu0 %v11137_v8  ;;  %8680 = vmatprep.mubr.msk.bf16.mxu0 %vm10574_vm0, %v10573_v0 }
 0x9c5   : > { %8690 = vmatprep.subr.bf16.mxu0 %v10573_v0 }
 0xa73   : > { %v2043_v34 = vpop.f32.mrf.mxu0 }
 0xa74   : > { %v2049_v35 = vpack.c.bf16 %v2043_v34, %v2043_v34 }
 0xa75   : > { %v8646_v36 = vpop.f32.mrf.mxu0 }
 0xa76   : > { %8651 = vmatmul.mubr.msk.bf16.vlgmr.msra.gmra.mxu1 %vm1466_vm2, %v2049_v35 }
 0xa77   : > { %8661 = vmatpush3.bf16.msra.mxu1 %v2167_v37  ;;  %v2046_v38 = vpop.f32.mrf.mxu0  ;;  %8662 = vmatprep.mubr.msk.bf16.mxu1 %vm10574_vm0, %v10573_v0 }
 0xa78   : > { %8672 = vmatprep.subr.bf16.mxu1 %v10573_v0 }
 0xa79   : > { %v8647_v8 = vpop.f32.mrf.mxu0 }
 0xa7b   : > { %v2145_v39 = vpop.f32.mrf.mxu0 }
 0xa7c   : > { %v2151_v43 = vsel %vm1466_vm2, %v2145_v39, -inf }
 0xa7d   : > { %2152 = vmax.xlane.f32.xlu1 %v2151_v43  ;;  %v8658_v40 = vpop.f32.mrf.mxu0 }
 0xa7f   : > { %v2148_v42 = vpop.f32.mrf.mxu0 }
 0xa81   : > { %v8659_v44 = vpop.f32.mrf.mxu0 }
 0xa83   : > { %v2255_v45 = vpop.f32.mrf.mxu0 }
 0xa84   : > { %v2261_v46 = vsel %vm1466_vm2, %v2255_v45, -inf }
 0xa85   : > { %2262 = vmax.xlane.f32.xlu0 %v2261_v46  ;;  %v8670_v47 = vpop.f32.mrf.mxu0 }
 0xa87   : > { %v2258_v48 = vpop.f32.mrf.mxu0 }
 0xa89   : > { %v8671_v16 = vpop.f32.mrf.mxu0 }
 0xb06   : > { %v2153_v49 = vpop.xlane.xlu1 %2152 }
 0xb07   : > { %v2154_v50 = vsub.f32 %v2145_v39, %v2153_v49 }
 0xb09   : > { %v2155_v51 = vmul.f32 1.442695, %v2154_v50 }
 0xb0b   : > { %9635 = vpow2.f32 %v2155_v51 }
 0xb0e   : > { %v2263_v52 = vpop.xlane.xlu0 %2262 }
 0xb0f   : > { %v2264_v53 = vsub.f32 %v2255_v45, %v2263_v52 }
 0xb11   : > { %v2265_v14 = vmul.f32 1.442695, %v2264_v53 }
 0xb13   : > { %9637 = vpow2.f32 %v2265_v14 }
 0xb18   : > { %v9636_v55 = vpop.eup %9635 }
 0xb19   : > { %v2157_v56 = vsel %vm1466_vm2, %v9636_v55, 0.0 }
 0xb1a   : > { %2158 = vadd.xlane.f32.xlu0 %v2157_v56 }
 0xb20   : > { %v9638_v57 = vpop.eup %9637 }
 0xb21   : > { %v2267_v58 = vsel %vm1466_vm2, %v9638_v57, 0.0 }
 0xb22   : > { %2268 = vadd.xlane.f32.xlu1 %v2267_v58  ;;  %v8159_v58 = vld [vmem:[#allocation11] ss:$0 sm:$0xff] }
 0xb30   : > { %2274 = vrot.lane.b32.xlu0 %v11225_v33, %s10576_s10 }
 0xb33   : > { %2411 = vrot.lane.b32.xlu1 %v11183_v2, %s10578_s2 }
 0xb36   : > { %v2091_v59 = vpop.f32.mrf.mxu1 }
 0xb37   : > { %v11242_v60 = vadd.f32 %v2091_v59, %v11198_v18  ;;  %2409 = vrot.lane.b32.xlu1 %v11193_v13, %s10579_s5 }
 0xb38   : > { %v8652_v61 = vpop.f32.mrf.mxu1 }
 0xb3a   : > { %v2094_v62 = vpop.f32.mrf.mxu1 }
 0xb3b   : > { %v2726_v62 = vadd.f32 %v8159_v58, %v11242_v60 }
 0xb3c   : > { %v8653_v63 = vpop.f32.mrf.mxu1 }
 0xba3   : > { %v2159_v1 = vpop.xlane.xlu0 %2158 }
 0xba4   : > { %9639 = vrcp.f32 %v2159_v1 }
 0xba7   : > { %v2275_v10 = vpop.permute.xlu0 %2274 }
 0xba8   : > { %v2280_v12 = vsel %vm1528_vm3, %v2275_v10, 0 }
 0xbab   : > { %v2269_v5 = vpop.xlane.xlu1 %2268 }
 0xbac   : > { %9641 = vrcp.f32 %v2269_v5 }
 0xbaf   : > { %v2412_v24 = vpop.permute.xlu1 %2411 }
 0xbb1   : > { %v9640_v7 = vpop.eup %9639 }
 0xbb2   : > { %v2161_v9 = vmul.f32 %v9640_v7, %v9636_v55 }
 0xbb3   : > { %v2410_v30 = vpop.permute.xlu1 %2409 }
 0xbb4   : > { %v2162_v11 = vpack.c.bf16 %v2161_v9, %v2161_v9 }
 0xbb6   : > { %8663 = vmatmul.mubr.msk.bf16.vlgmr.msra.gmra.mxu1 %vm1466_vm2, %v2162_v11 }
 0xbb7   : > { %8673 = vmatpush3.bf16.msra.mxu1 %v2280_v12  ;;  %8674 = vmatprep.mubr.msk.bf16.mxu1 %vm10574_vm0, %v10573_v0 }
 0xbb8   : > { %8684 = vmatprep.subr.bf16.mxu1 %v10573_v0 }
 0xbb9   : > { %v9642_v15 = vpop.eup %9641 }
 0xbba   : > { %v2271_v18 = vmul.f32 %v9642_v15, %v9638_v57 }
 0xbbc   : > { %v2272_v19 = vpack.c.bf16 %v2271_v18, %v2271_v18 }
 0xbbe   : > { %8675 = vmatmul.mubr.msk.bf16.vlgmr.msra.gmra.mxu1 %vm1466_vm2, %v2272_v19 }
 0xbbf   : > { %8685 = vmatpush3.bf16.msra.mxu1 %v11132_v6  ;;  %8686 = vmatprep.mubr.msk.bf16.mxu1 %vm10574_vm0, %v10573_v0  ;;  %v2417_v6 = vsel %vm1466_vm2, %v2412_v24, 0 }
 0xbc0   : > { %8696 = vmatprep.subr.bf16.mxu1 %v10573_v0 }
 0xc76   : > { %v2203_v20 = vpop.f32.mrf.mxu1 }
 0xc77   : > { %v2209_v21 = vpack.c.bf16 %v2203_v20, %v2203_v20 }
 0xc78   : > { %v8664_v22 = vpop.f32.mrf.mxu1 }
 0xc79   : > { %8687 = vmatmul.mubr.msk.bf16.vlgmr.msra.gmra.mxu1 %vm1466_vm2, %v2209_v21 }
 0xc7a   : > { %v2206_v17 = vpop.f32.mrf.mxu1  ;;  %8698 = vmatprep.mubr.msk.bf16.mxu1 %vm10574_vm0, %v10573_v0 }
 0xc7c   : > { %v8665_v41 = vpop.f32.mrf.mxu1 }
 0xc7e   : > { %v2316_v25 = vpop.f32.mrf.mxu1 }
 0xc7f   : > { %v2322_v26 = vpack.c.bf16 %v2316_v25, %v2316_v25 }
 0xc80   : > { %v8676_v27 = vpop.f32.mrf.mxu1 }
 0xc81   : > { %8681 = vmatmul.mubr.msk.bf16.vlgmr.msra.gmra.mxu0 %vm1466_vm2, %v2322_v26 }
 0xc82   : > { %8691 = vmatpush3.bf16.xpose.msra.mxu0 %v2417_v6  ;;  %v2319_v28 = vpop.f32.mrf.mxu1  ;;  %8692 = vmatprep.mubr.msk.bf16.mxu0 %vm10574_vm0, %v10573_v0 }
 0xc83   : > { %8702 = vmatprep.subr.bf16.mxu0 %v10573_v0 }
 0xc84   : > { %v8677_v29 = vpop.f32.mrf.mxu1 }
 0xc89   : > { %8693 = vmatmul.mubr.msk.bf16.vlgmr.msra.gmra.mxu0 %vm1466_vm2, %v2410_v30 }
 0xc8a   : > { %8703 = vmatpush3.bf16.msra.mxu0 %v11173_v54  ;;  %8704 = vmatprep.mubr.msk.bf16.mxu0 %vm10574_vm0, %v10573_v0 }
 0xc8b   : > { %8714 = vmatprep.subr.bf16.mxu0 %v10573_v0 }
 0xd39   : > { %v2403_v31 = vpop.f32.mrf.mxu1 }
 0xd3b   : > { %v8688_v32 = vpop.f32.mrf.mxu1 }
 0xd3d   : > { %v2406_v34 = vpop.f32.mrf.mxu1 }
 0xd3f   : > { %v8689_v35 = vpop.f32.mrf.mxu1 }
 0xd41   : > { %v2360_v36 = vpop.f32.mrf.mxu0 }
 0xd42   : > { %v11269_v37 = vadd.f32 %v2403_v31, %v2360_v36 }
 0xd43   : > { %v8682_v38 = vpop.f32.mrf.mxu0 }
 0xd45   : > { %v2363_v8 = vpop.f32.mrf.mxu0 }
 0xd47   : > { %v8683_v39 = vpop.f32.mrf.mxu0 }
 0xd49   : > { %v2453_v43 = vpop.f32.mrf.mxu0 }
 0xd4a   : > { %v2459_v40 = vsel %vm1466_vm2, %v2453_v43, -inf }
 0xd4b   : > { %2460 = vmax.xlane.f32.xlu0 %v2459_v40  ;;  %v8694_v54 = vpop.f32.mrf.mxu0 }
 0xd4d   : > { %v2456_v42 = vpop.f32.mrf.mxu0 }
 0xd4f   : > { %v8695_v44 = vpop.f32.mrf.mxu0 }
 0xd61   : > { %2471 = vrot.lane.b32.xlu0 %v11225_v33, %s10579_s5 }
 0xd65   : > { %2564 = vrot.lane.b32.xlu0 %v11193_v13, %s10580_s25 }
 0xdd4   : > { %v2461_v45 = vpop.xlane.xlu0 %2460 }
 0xdd5   : > { %v2462_v46 = vsub.f32 %v2453_v43, %v2461_v45 }
 0xdd7   : > { %v2463_v47 = vmul.f32 1.442695, %v2462_v46 }
 0xdd8   : > { %v2472_v48 = vpop.permute.xlu0 %2471 }
 0xdd9   : > { %9643 = vpow2.f32 %v2463_v47  ;;  %v2477_v16 = vsel %vm1528_vm3, %v2472_v48, 0 }
 0xdda   : > { %8697 = vmatpush3.bf16.msra.mxu1 %v2477_v16 }
 0xddb   : > { %8708 = vmatprep.subr.bf16.mxu1 %v10573_v0 }
 0xddc   : > { %v2565_v56 = vpop.permute.xlu0 %2564 }
 0xde6   : > { %v9644_v49 = vpop.eup %9643 }
 0xde7   : > { %v2465_v50 = vsel %vm1466_vm2, %v9644_v49, 0.0 }
 0xde8   : > { %2466 = vadd.xlane.f32.xlu1 %v2465_v50  ;;  %v11313_v50 = vld [vmem:[%s1299_s15] sm:$0xff] }
 0xdf9   : > { %2566 = vrot.lane.b32.xlu1 %v11183_v2, %s10581_s1 }
 0xe71   : > { %v2467_v51 = vpop.xlane.xlu1 %2466 }
 0xe72   : > { %9645 = vrcp.f32 %v2467_v51  ;;  %v11315_v51 = vld [vmem:[%s1299_s15 + $0x8] sm:$0xff] }
 0xe75   : > { %v2567_v53 = vpop.permute.xlu1 %2566 }
 0xe76   : > { %v2572_v55 = vsel %vm1466_vm2, %v2567_v53, 0  ;;  %v1310_v53 = vld [vmem:[%s12253_s6] sm:$0xff] }
 0xe7f   : > { %v9646_v13 = vpop.eup %9645 }
 0xe80   : > { %v2469_v52 = vmul.f32 %v9646_v13, %v9644_v49  ;;  %v9591_v49 = vld [vmem:[#allocation19 + $0x8] sm:$0xff]   ;;  %v11317_v13 = vld [vmem:[%s1299_s15 + $0x10] sm:$0xff] }
 0xe82   : > { %v2470_v14 = vpack.c.bf16 %v2469_v52, %v2469_v52  ;;  %v11319_v52 = vld [vmem:[%s1299_s15 + $0x18] sm:$0xff] }
 0xe84   : > { %8699 = vmatmul.mubr.msk.bf16.vlgmr.msra.gmra.mxu1 %vm1466_vm2, %v2470_v14  ;;  %v1311_v14 = vld [vmem:[%s12253_s6 + $0x8] sm:$0xff] }
 0xe85   : > { %8709 = vmatpush3.bf16.xpose.msra.mxu1 %v2572_v55  ;;  %8710 = vmatprep.mubr.msk.bf16.mxu1 %vm10574_vm0, %v10573_v0  ;;  %v1312_v55 = vadd.f32 %v1310_v53, %v11313_v50 }
 0xe86   : > { %8720 = vmatprep.subr.bf16.mxu1 %v10573_v0 }
 0xe8c   : > { %8711 = vmatmul.mubr.msk.bf16.vlgmr.msra.gmra.mxu1 %vm1466_vm2, %v2565_v56  ;;  %v1314_v56 = vadd.f32 %v1310_v53, %v11317_v13 }
 0xe8d   : > { %8721 = vmatpush3.bf16.msra.mxu1 %v11201_v23  ;;  %8722 = vmatprep.mubr.msk.bf16.mxu1 %vm10574_vm0, %v10573_v0  ;;  %v2728_v23 = vadd.f32 %v2726_v62, %v11065_v3  ;;  %v9594_v62 = vld [vmem:[#allocation16] sm:$0xff]  }
 0xe8e   : > { %8734 = vmatprep.subr.bf16.mxu1 %v9591_v49 }
 0xe8f   : > { %v2732_v10 = vsel %vm1347_vm1, %v2728_v23, 0.0 }
 0xf44   : > { %v2513_v2 = vpop.f32.mrf.mxu1 }
 0xf45   : > { %v2519_v57 = vpack.c.bf16 %v2513_v2, %v2513_v2  ;;  %v1313_v2 = vadd.f32 %v1311_v14, %v11315_v51 }
 0xf46   : > { %v8700_v59 = vpop.f32.mrf.mxu1 }
 0xf47   : > { %8705 = vmatmul.mubr.msk.bf16.vlgmr.msra.gmra.mxu0 %vm1466_vm2, %v2519_v57  ;;  %v1315_v57 = vadd.f32 %v1311_v14, %v11319_v52 }
 0xf48   : > { %v2516_v61 = vpop.f32.mrf.mxu1  ;;  %8716 = vmatprep.mubr.msk.bf16.mxu0 %vm10574_vm0, %v10573_v0 }
 0xf49   : > { %v11330_v59 = vpack.c.bf16 %v1315_v57, %v1314_v56  ;;  %v9593_v61 = vld [vmem:[#allocation16 + $0x8] sm:$0xff]  }
 0xf4a   : > { %v8701_v63 = vpop.f32.mrf.mxu1 }
 0xf4c   : > { %v2608_v1 = vpop.f32.mrf.mxu1 }
 0xf4d   : > { %v2614_v5 = vsel %vm1466_vm2, %v2608_v1, -inf }
 0xf4e   : > { %2615 = vmax.xlane.f32.xlu1 %v2614_v5  ;;  %v8712_v7 = vpop.f32.mrf.mxu1 }
 0xf50   : > { %v2611_v9 = vpop.f32.mrf.mxu1 }
 0xf52   : > { %2733 = vadd.xlane.f32.xlu1 %v2732_v10  ;;  %v8713_v11 = vpop.f32.mrf.mxu1 }
 0xfd7   : > { %v2616_v12 = vpop.xlane.xlu1 %2615 }
 0xfd8   : > { %v2617_v15 = vsub.f32 %v2608_v1, %v2616_v12  ;;  %v8160_v12 = vld [vmem:[#allocation13] ss:$0 sm:$0xff] }
 0xfda   : > { %v2618_v18 = vmul.f32 1.442695, %v2617_v15 }
 0xfdb   : > { %v2734_v32 = vpop.xlane.xlu1 %2733 }
 0xfdc   : > { %9647 = vpow2.f32 %v2618_v18  ;;  %v2739_v34 = vmul.f32 0.03125, %v2734_v32 }
 0xfde   : > { %v2741_v38 = vsub.f32 %v2728_v23, %v2739_v34 }
 0xfe0   : > { %v2743_v42 = vmul.f32 %v2741_v38, %v2741_v38 }
 0xfe2   : > { %v2745_v44 = vsel %vm1347_vm1, %v2743_v42, 0.0 }
 0xfe9   : > { %v9648_v19 = vpop.eup %9647 }
 0xfea   : > { %v2620_v60 = vsel %vm1466_vm2, %v9648_v19, 0.0 }
 0xfeb   : > { %2621 = vadd.xlane.f32.xlu0 %v2620_v60 }
0x1001   : > { %2626 = vrot.lane.b32.xlu0 %v11225_v33, %s10580_s25 }
0x1007   : > { %v2557_v20 = vpop.f32.mrf.mxu0 }
0x1008   : > { %v2563_v3 = vadd.f32 %v2557_v20, %v11269_v37 }
0x1009   : > { %v8706_v21 = vpop.f32.mrf.mxu0 }
0x100b   : > { %v2560_v22 = vpop.f32.mrf.mxu0 }
0x100c   : > { %v9775_v22 = vld [vmem:[#allocation2] sm:$0xff] }
0x100d   : > { %v8707_v17 = vpop.f32.mrf.mxu0 }
0x1074   : > { %v2622_v41 = vpop.xlane.xlu0 %2621 }
0x1075   : > { %9649 = vrcp.f32 %v2622_v41 }
0x1078   : > { %v2627_v24 = vpop.permute.xlu0 %2626 }
0x1079   : > { %v2632_v25 = vsel %vm1528_vm3, %v2627_v24, 0 }
0x107a   : > { %8715 = vmatpush3.bf16.msra.mxu0 %v2632_v25  ;;  %v8166_v25 = vld [vmem:[#allocation20] ss:$0 sm:$0xff] }
0x107b   : > { %8726 = vmatprep.subr.bf16.mxu0 %v10573_v0 }
0x1082   : > { %v9650_v26 = vpop.eup %9649 }
0x1083   : > { %v2624_v27 = vmul.f32 %v9650_v26, %v9648_v19  ;;  %v8161_v19 = vld [vmem:[#allocation14] ss:$0 sm:$0xff] }
0x1085   : > { %v2625_v6 = vpack.c.bf16 %v2624_v27, %v2624_v27 }
0x1087   : > { %8717 = vmatmul.mubr.msk.bf16.vlgmr.msra.gmra.mxu0 %vm1466_vm2, %v2625_v6 }
0x1088   : > { %8730 = vmatprep.mubr.msk.bf16.mxu0 %vm10574_vm0, %v10573_v0  ;;  %8727 = vmatpush3.bf16.msra.mxu0 %v9593_v61 }
0x1089   : > { %8728 = vmatprep.subr.bf16.mxu0 %v10573_v0 }
0x108c   : > { %8729 = vmatpush3.bf16.msra.mxu0 %v9594_v62 }
0x1147   : > { %v2668_v33 = vpop.f32.mrf.mxu0 }
0x1148   : > { %v2674_v28 = vpack.c.bf16 %v2668_v33, %v2668_v33 }
0x1149   : > { %v8718_v29 = vpop.f32.mrf.mxu0 }
0x114a   : > { %8723 = vmatmul.mubr.msk.bf16.vlgmr.msra.gmra.mxu1 %vm1466_vm2, %v2674_v28 }
0x114b   : > { %v2671_v30 = vpop.f32.mrf.mxu0  ;;  %8735 = vmatpush3.bf16.msra.mxu1 %v9591_v49 }
0x114d   : > { %v8719_v31 = vpop.f32.mrf.mxu0 }
0x120a   : > { %v2712_v35 = vpop.f32.mrf.mxu1 }
0x120b   : > { %v2718_v36 = vadd.f32 %v2712_v35, %v2563_v3 }
0x120c   : > { %v8724_v37 = vpop.f32.mrf.mxu1 }
0x120d   : > { %v2727_v8 = vadd.f32 %v8159_v58, %v2718_v36  ;;  %v11328_v58 = vpack.c.bf16 %v1313_v2, %v1312_v55  ;;  %v8162_v36 = vld [vmem:[#allocation17] ss:$0 sm:$0xff] }
0x120e   : > { %v2715_v39 = vpop.f32.mrf.mxu1 }
0x120f   : > { %v2729_v43 = vadd.f32 %v2727_v8, %v11067_v4  ;;  %v9592_v4 = vld [vmem:[#allocation19] sm:$0xff]   ;;  %8738 = vmatprep.mubr.msk.bf16.mxu1 %vm1347_vm1, %v11328_v58 }
0x1210   : > { %v8725_v40 = vpop.f32.mrf.mxu1  ;;  %8736 = vmatprep.subr.bf16.mxu1 %v9592_v4 }
0x1211   : > { %v2735_v54 = vsel %vm1347_vm1, %v2729_v43, 0.0  ;;  %8737 = vmatpush3.bf16.msra.mxu1 %v9592_v4 }
0x1212   : > { %2736 = vadd.xlane.f32.xlu1 %v2735_v54  ;;  %8750 = vmatprep.subr.bf16.mxu1 %v10573_v0 }
0x1214   : > { %8739 = vmatmul.mubr.msk.bf16.vlgmr.msra.gmra.mxu1 %vm1347_vm1, %v11330_v59 }
0x1215   : > { %8752 = vmatprep.mubr.msk.bf16.mxu1 %vm10574_vm0, %v10573_v0 }
0x1216   : > { %2746 = vadd.xlane.f32.xlu1 %v2745_v44 }
0x129b   : > { %v2737_v45 = vpop.xlane.xlu1 %2736 }
0x129c   : > { %v2740_v46 = vmul.f32 0.03125, %v2737_v45 }
0x129e   : > { %v2742_v47 = vsub.f32 %v2729_v43, %v2740_v46  ;;  %v9595_v46 = vld [vmem:[#allocation22 + $0x8] sm:$0xff]  }
0x129f   : > { %v2747_v63 = vpop.xlane.xlu1 %2746  ;;  %8742 = vmatprep.subr.bf16.mxu0 %v9595_v46 }
0x12a0   : > { %v2744_v48 = vmul.f32 %v2742_v47, %v2742_v47  ;;  %v2751_v1 = vmul.f32 0.03125, %v2747_v63 }
0x12a2   : > { %v2748_v16 = vsel %vm1347_vm1, %v2744_v48, 0.0  ;;  %v2753_v5 = vadd.f32 1e-05, %v2751_v1  ;;  %v11369_v48 = vpack.c.bf16 %v11315_v51, %v11313_v50  ;;  %v8171_v1 = vld [vmem:[#allocation23] ss:$0 sm:$0xff] }
0x12a3   : > { %2749 = vadd.xlane.f32.xlu1 %v2748_v16  ;;  %v11375_v16 = vpack.c.bf16 %v11319_v52, %v11317_v13 }
0x12a4   : > { %9651 = vrsqrt.f32 %v2753_v5 }
0x12b1   : > { %v9652_v10 = vpop.eup %9651 }
0x12b2   : > { %v2757_v11 = vmul.f32 %v9652_v10, %v2741_v38 }
0x12b4   : > { %v2765_v15 = vmul.f32 %v8160_v12, %v2757_v11 }
0x12b6   : > { %v11339_v3 = vadd.f32 %v8161_v19, %v2765_v15 }
0x12b8   : > { %v2775_v17 = vadd.f32 %v9775_v22, %v11339_v3 }
0x12d4   : > { %v8740_v26 = vpop.f32.mrf.mxu1 }
0x12d5   : > { %v2917_v27 = vadd.f32 %v8740_v26, %v8166_v25 }
0x12d6   : > { %v2908_v6 = vpop.f32.mrf.mxu1 }
0x12d7   : > { %v2909_v28 = vadd.f32 %v8166_v25, %v2908_v6 }
0x12d8   : > { %v8741_v33 = vpop.f32.mrf.mxu1 }
0x12d9   : > { %v2920_v29 = vadd.f32 %v8741_v33, %v8166_v25  ;;  %v3221_v33 = vld [vmem:[#allocation25 + $0x4] sm:$0xf] }
0x12da   : > { %v2911_v30 = vpop.f32.mrf.mxu1 }
0x12db   : > { %v11346_v31 = vpack.c.bf16 %v2920_v29, %v2917_v27  ;;  %v2912_v32 = vadd.f32 %v8166_v25, %v2911_v30 }
0x12dd   : > { %v11348_v34 = vpack.c.bf16 %v2912_v32, %v2909_v28  ;;  %v11405_v28 = vsel %vm1528_vm3, %v3221_v33, 0 }
0x12df   : > { %3113 = vrot.lane.b32.xlu1 %v11348_v34, %s10576_s10  ;;  %v3009_v35 = vsel %vm1466_vm2, %v11348_v34, 0 }
0x12e0   : > { %8751 = vmatpush3.bf16.xpose.msra.mxu1 %v3009_v35  ;;  %v3108_v35 = vld [vmem:[#allocation25] sm:$0xf] }
0x12e1   : > { %8762 = vmatprep.subr.bf16.mxu1 %v10573_v0 }
0x132c   : > { %v2750_v23 = vpop.xlane.xlu1 %2749 }
0x132d   : > { %v2752_v7 = vmul.f32 0.03125, %v2750_v23 }
0x132f   : > { %v2754_v9 = vadd.f32 1e-05, %v2752_v7 }
0x1331   : > { %9653 = vrsqrt.f32 %v2754_v9 }
0x133e   : > { %v9654_v18 = vpop.eup %9653 }
0x133f   : > { %v2758_v60 = vmul.f32 %v9654_v18, %v2742_v47  ;;  %v9596_v47 = vld [vmem:[#allocation22] sm:$0xff]  }
0x1341   : > { %v2766_v20 = vmul.f32 %v8160_v12, %v2758_v60 }
0x1343   : > { %v11341_v21 = vadd.f32 %v8161_v19, %v2766_v20 }
0x1345   : > { %v2776_v41 = vadd.f32 %v9775_v22, %v11341_v21 }
0x1347   : > { %v2777_v24 = vpack.c.bf16 %v2776_v41, %v2775_v17 }
0x1349   : > { %8731 = vmatmul.mubr.msk.bf16.vlgmr.msra.gmra.mxu0 %vm1347_vm1, %v2777_v24 }
0x134a   : > { %8746 = vmatprep.mubr.msk.bf16.mxu0 %vm1347_vm1, %v11369_v48  ;;  %8743 = vmatpush3.bf16.msra.mxu0 %v9595_v46 }
0x134b   : > { %8744 = vmatprep.subr.bf16.mxu0 %v9596_v47 }
0x134e   : > { %8745 = vmatpush3.bf16.msra.mxu0 %v9596_v47 }
0x134f   : > { %8756 = vmatprep.subr.bf16.mxu0 %v10573_v0 }
0x1351   : > { %v3114_v39 = vpop.permute.xlu1 %3113  ;;  %8747 = vmatmul.mubr.msk.bf16.vlgmr.msra.gmra.mxu0 %vm1347_vm1, %v11375_v16 }
0x1352   : > { %v3119_v44 = vsel %vm1466_vm2, %v3114_v39, 0  ;;  %8758 = vmatprep.mubr.msk.bf16.mxu0 %vm10574_vm0, %v10573_v0 }
0x1409   : > { %v2838_v37 = vpop.f32.mrf.mxu0 }
0x140a   : > { %v2839_v38 = vadd.f32 %v8162_v36, %v2838_v37 }
0x140b   : > { %v8732_v8 = vpop.f32.mrf.mxu0 }
0x140c   : > { %v3001_v43 = vmul.f32 0.35355338, %v2839_v38  ;;  %v11411_v38 = vsel %vm1528_vm3, %v3108_v35, 0 }
0x140d   : > { %v2841_v40 = vpop.f32.mrf.mxu0 }
0x140e   : > { %v11355_v54 = vpack.c.bf16 %v3001_v43, %v3001_v43  ;;  %v11357_v42 = vadd.f32 %v8162_v36, %v2841_v40 }
0x140f   : > { %v8733_v45 = vpop.f32.mrf.mxu0 }
0x1410   : > { %3110 = vrot.lane.b32.xlu0 %v11355_v54, %s10576_s10  ;;  %8753 = vmatmul.mubr.msk.bf16.vlgmr.msra.gmra.mxu1 %vm1466_vm2, %v11355_v54 }
0x1411   : > { %8763 = vmatpush3.bf16.xpose.msra.mxu1 %v3119_v44  ;;  %8764 = vmatprep.mubr.msk.bf16.mxu1 %vm10574_vm0, %v10573_v0  ;;  %v8748_v63 = vpop.f32.mrf.mxu0 }
0x1412   : > { %8774 = vmatprep.subr.bf16.mxu1 %v10573_v0  ;;  %v2995_v5 = vadd.f32 %v8748_v63, %v8171_v1 }
0x1413   : > { %v2986_v23 = vpop.f32.mrf.mxu0 }
0x1414   : > { %v2987_v9 = vadd.f32 %v8171_v1, %v2986_v23 }
0x1415   : > { %v8749_v7 = vpop.f32.mrf.mxu0 }
0x1416   : > { %v2998_v10 = vadd.f32 %v8749_v7, %v8171_v1 }
0x1417   : > { %v2989_v11 = vpop.f32.mrf.mxu0 }
0x1418   : > { %v11389_v12 = vpack.c.bf16 %v2998_v10, %v2995_v5  ;;  %v2990_v15 = vadd.f32 %v8171_v1, %v2989_v11 }
0x141a   : > { %v11391_v18 = vpack.c.bf16 %v2990_v15, %v2987_v9 }
0x141c   : > { %8757 = vmatpush3.bf16.msra.mxu0 %v11391_v18 }
0x141d   : > { %8768 = vmatprep.subr.bf16.mxu0 %v10573_v0 }
0x1482   : > { %v3111_v49 = vpop.permute.xlu0 %3110 }
0x1483   : > { %8765 = vmatmul.mubr.msk.bf16.vlgmr.msra.gmra.mxu1 %vm1466_vm2, %v3111_v49 }
0x1484   : > { %8776 = vmatprep.mubr.msk.bf16.mxu1 %vm10574_vm0, %v10573_v0  ;;  %8775 = vmatpush3.bf16.msra.mxu1 %v11405_v28 }
0x1485   : > { %8786 = vmatprep.subr.bf16.mxu1 %v10573_v0 }
0x14d0   : > { %v3045_v4 = vpop.f32.mrf.mxu1 }
0x14d1   : > { %v3052_v50 = vsel %vm3051_vm4, %v3045_v4, -inf }
0x14d2   : > { %3053 = vmax.xlane.f32.xlu0 %v3052_v50  ;;  %v8754_v51 = vpop.f32.mrf.mxu1 }
0x14d4   : > { %v3048_v13 = vpop.f32.mrf.mxu1 }
0x14d6   : > { %v8755_v52 = vpop.f32.mrf.mxu1 }
0x1543   : > { %v3155_v53 = vpop.f32.mrf.mxu1 }
0x1544   : > { %v3161_v14 = vsel %vm3051_vm4, %v3155_v53, -inf }
0x1545   : > { %3162 = vmax.xlane.f32.xlu1 %v3161_v14  ;;  %v8766_v55 = vpop.f32.mrf.mxu1 }
0x1547   : > { %v3158_v56 = vpop.f32.mrf.mxu1 }
0x1549   : > { %v8767_v2 = vpop.f32.mrf.mxu1 }
0x1556   : > { %3316 = vrot.lane.b32.xlu1 %v11348_v34, %s10579_s5 }
0x155b   : > { %v3054_v57 = vpop.xlane.xlu0 %3053 }
0x155c   : > { %v3055_v61 = vsub.f32 %v3045_v4, %v3054_v57 }
0x155e   : > { %v3056_v62 = vmul.f32 1.442695, %v3055_v61 }
0x1560   : > { %9655 = vpow2.f32 %v3056_v62 }
0x156d   : > { %v9656_v19 = vpop.eup %9655 }
0x156e   : > { %v3058_v60 = vsel %vm3051_vm4, %v9656_v19, 0.0 }
0x156f   : > { %3059 = vadd.xlane.f32.xlu0 %v3058_v60 }
0x15ce   : > { %v3163_v20 = vpop.xlane.xlu1 %3162 }
0x15cf   : > { %v3164_v22 = vsub.f32 %v3155_v53, %v3163_v20 }
0x15d1   : > { %v3165_v17 = vmul.f32 1.442695, %v3164_v22 }
0x15d2   : > { %v3317_v45 = vpop.permute.xlu1 %3316 }
0x15d3   : > { %9657 = vpow2.f32 %v3165_v17  ;;  %v3322_v4 = vsel %vm1466_vm2, %v3317_v45, 0 }
0x15e0   : > { %v9658_v41 = vpop.eup %9657 }
0x15e1   : > { %v3167_v24 = vsel %vm3051_vm4, %v9658_v41, 0.0 }
0x15e2   : > { %3168 = vadd.xlane.f32.xlu0 %v3167_v24  ;;  %v3423_v24 = vld [vmem:[#allocation25 + $0x8] sm:$0xf] }
0x15f8   : > { %v3060_v25 = vpop.xlane.xlu0 %3059  ;;  %3174 = vrot.lane.b32.xlu0 %v11391_v18, %s10576_s10 }
0x15f9   : > { %9659 = vrcp.f32 %v3060_v25  ;;  %v11451_v25 = vsel %vm1528_vm3, %v3423_v24, 0 }
0x15fc   : > { %3314 = vrot.lane.b32.xlu0 %v11355_v54, %s10579_s5 }
0x1606   : > { %v9660_v26 = vpop.eup %9659 }
0x1607   : > { %v3062_v27 = vmul.f32 %v9660_v26, %v9656_v19 }
0x1609   : > { %v3063_v6 = vpack.c.bf16 %v3062_v27, %v3062_v27 }
0x160b   : > { %8759 = vmatmul.mubr.msk.bf16.vlgmr.msra.gmra.mxu0 %vm3051_vm4, %v3063_v6 }
0x160c   : > { %8770 = vmatprep.mubr.msk.bf16.mxu0 %vm10574_vm0, %v10573_v0 }
0x166b   : > { %v3169_v29 = vpop.xlane.xlu0 %3168 }
0x166c   : > { %9661 = vrcp.f32 %v3169_v29 }
0x166f   : > { %v3175_v30 = vpop.permute.xlu0 %3174 }
0x1670   : > { %8769 = vmatpush3.bf16.msra.mxu0 %v3175_v30 }
0x1671   : > { %8780 = vmatprep.subr.bf16.mxu0 %v10573_v0 }
0x1673   : > { %v3315_v13 = vpop.permute.xlu0 %3314 }
0x1679   : > { %v9662_v32 = vpop.eup %9661 }
0x167a   : > { %v3171_v36 = vmul.f32 %v9662_v32, %v9658_v41 }
0x167c   : > { %v3172_v37 = vpack.c.bf16 %v3171_v36, %v3171_v36 }
0x167e   : > { %8771 = vmatmul.mubr.msk.bf16.vlgmr.msra.gmra.mxu0 %vm3051_vm4, %v3172_v37 }
0x167f   : > { %8781 = vmatpush3.bf16.msra.mxu0 %v11411_v38  ;;  %8782 = vmatprep.mubr.msk.bf16.mxu0 %vm10574_vm0, %v10573_v0 }
0x1680   : > { %8792 = vmatprep.subr.bf16.mxu0 %v10573_v0 }
0x16cb   : > { %v3101_v8 = vpop.f32.mrf.mxu0 }
0x16cc   : > { %v3107_v39 = vpack.c.bf16 %v3101_v8, %v3101_v8  ;;  %v3628_v8 = vmul.f32 0.35355338, %v11357_v42 }
0x16cd   : > { %v8760_v43 = vpop.f32.mrf.mxu0 }
0x16ce   : > { %8783 = vmatmul.mubr.msk.bf16.vlgmr.msra.gmra.mxu0 %vm1466_vm2, %v3107_v39  ;;  %v11462_v39 = vpack.c.bf16 %v3628_v8, %v3628_v8 }
0x16cf   : > { %v3104_v40 = vpop.f32.mrf.mxu0  ;;  %8794 = vmatprep.mubr.msk.bf16.mxu0 %vm10574_vm0, %v10573_v0 }
0x16d1   : > { %v8761_v44 = vpop.f32.mrf.mxu0 }
0x173e   : > { %v3214_v46 = vpop.f32.mrf.mxu0 }
0x173f   : > { %v3220_v47 = vpack.c.bf16 %v3214_v46, %v3214_v46 }
0x1740   : > { %v8772_v49 = vpop.f32.mrf.mxu0 }
0x1741   : > { %8777 = vmatmul.mubr.msk.bf16.vlgmr.msra.gmra.mxu1 %vm1466_vm2, %v3220_v47 }
0x1742   : > { %8787 = vmatpush3.bf16.xpose.msra.mxu1 %v3322_v4  ;;  %v3217_v50 = vpop.f32.mrf.mxu0  ;;  %8788 = vmatprep.mubr.msk.bf16.mxu1 %vm10574_vm0, %v10573_v0 }
0x1743   : > { %8798 = vmatprep.subr.bf16.mxu1 %v10573_v0 }
0x1744   : > { %v8773_v51 = vpop.f32.mrf.mxu0 }
0x1749   : > { %8789 = vmatmul.mubr.msk.bf16.vlgmr.msra.gmra.mxu1 %vm1466_vm2, %v3315_v13  ;;  %v3580_v13 = vld [vmem:[#allocation25 + $0xc] sm:$0xf] }
0x174a   : > { %8800 = vmatprep.mubr.msk.bf16.mxu1 %vm10574_vm0, %v10573_v0  ;;  %8799 = vmatpush3.bf16.msra.mxu1 %v11451_v25 }
0x174b   : > { %8810 = vmatprep.subr.bf16.mxu1 %v10573_v0 }
0x178e   : > { %v11429_v52 = vpop.f32.mrf.mxu0 }
0x1790   : > { %v8784_v53 = vpop.f32.mrf.mxu0 }
0x1791   : > { %v11475_v53 = vsel %vm1528_vm3, %v3580_v13, 0 }
0x1792   : > { %v3311_v14 = vpop.f32.mrf.mxu0 }
0x1794   : > { %v8785_v55 = vpop.f32.mrf.mxu0 }
0x1801   : > { %v11431_v56 = vpop.f32.mrf.mxu1 }
0x1802   : > { %v3309_v42 = vadd.f32 %v11429_v52, %v11431_v56  ;;  %v3636_v52 = vsel %vm1466_vm2, %v11346_v31, 0 }
0x1803   : > { %v8778_v2 = vpop.f32.mrf.mxu1 }
0x1805   : > { %v3265_v57 = vpop.f32.mrf.mxu1 }
0x1807   : > { %v8779_v61 = vpop.f32.mrf.mxu1 }
0x1809   : > { %v3358_v62 = vpop.f32.mrf.mxu1 }
0x180a   : > { %v3364_v63 = vsel %vm3051_vm4, %v3358_v62, -inf }
0x180b   : > { %3365 = vmax.xlane.f32.xlu1 %v3364_v63  ;;  %v8790_v1 = vpop.f32.mrf.mxu1 }
0x180d   : > { %v3361_v5 = vpop.f32.mrf.mxu1 }
0x180f   : > { %v8791_v23 = vpop.f32.mrf.mxu1 }
0x181c   : > { %3473 = vrot.lane.b32.xlu1 %v11348_v34, %s10580_s25 }
0x1820   : > { %3471 = vrot.lane.b32.xlu1 %v11355_v54, %s10580_s25 }
0x1894   : > { %v3366_v7 = vpop.xlane.xlu1 %3365 }
0x1895   : > { %v3367_v9 = vsub.f32 %v3358_v62, %v3366_v7 }
0x1897   : > { %v3368_v10 = vmul.f32 1.442695, %v3367_v9 }
0x1898   : > { %v3474_v54 = vpop.permute.xlu1 %3473 }
0x1899   : > { %9663 = vpow2.f32 %v3368_v10  ;;  %v3479_v17 = vsel %vm1466_vm2, %v3474_v54, 0 }
0x189c   : > { %v3472_v41 = vpop.permute.xlu1 %3471 }
0x18a6   : > { %v9664_v11 = vpop.eup %9663 }
0x18a7   : > { %v3370_v15 = vsel %vm3051_vm4, %v9664_v11, 0.0 }
0x18a8   : > { %3371 = vadd.xlane.f32.xlu0 %v3370_v15 }
0x18be   : > { %3376 = vrot.lane.b32.xlu0 %v11391_v18, %s10579_s5 }
0x1931   : > { %v3372_v19 = vpop.xlane.xlu0 %3371 }
0x1932   : > { %9665 = vrcp.f32 %v3372_v19 }
0x1935   : > { %v3377_v60 = vpop.permute.xlu0 %3376 }
0x1936   : > { %8793 = vmatpush3.bf16.msra.mxu0 %v3377_v60 }
0x1937   : > { %8804 = vmatprep.subr.bf16.mxu0 %v10573_v0 }
0x193f   : > { %v9666_v34 = vpop.eup %9665 }
0x1940   : > { %v3374_v20 = vmul.f32 %v9666_v34, %v9664_v11 }
0x1942   : > { %v3375_v22 = vpack.c.bf16 %v3374_v20, %v3374_v20 }
0x1944   : > { %8795 = vmatmul.mubr.msk.bf16.vlgmr.msra.gmra.mxu0 %vm3051_vm4, %v3375_v22 }
0x1945   : > { %8805 = vmatpush3.bf16.xpose.msra.mxu0 %v3479_v17  ;;  %8806 = vmatprep.mubr.msk.bf16.mxu0 %vm10574_vm0, %v10573_v0 }
0x1946   : > { %8816 = vmatprep.subr.bf16.mxu0 %v10573_v0 }
0x194c   : > { %8807 = vmatmul.mubr.msk.bf16.vlgmr.msra.gmra.mxu0 %vm1466_vm2, %v3472_v41 }
0x194d   : > { %8818 = vmatprep.mubr.msk.bf16.mxu0 %vm10574_vm0, %v10573_v0  ;;  %8817 = vmatpush3.bf16.msra.mxu0 %v11475_v53 }
0x194e   : > { %8828 = vmatprep.subr.bf16.mxu0 %v10573_v0 }
0x1a04   : > { %v3416_v26 = vpop.f32.mrf.mxu0 }
0x1a05   : > { %v3422_v27 = vpack.c.bf16 %v3416_v26, %v3416_v26 }
0x1a06   : > { %v8796_v6 = vpop.f32.mrf.mxu0 }
0x1a07   : > { %8801 = vmatmul.mubr.msk.bf16.vlgmr.msra.gmra.mxu1 %vm1466_vm2, %v3422_v27 }
0x1a08   : > { %v3419_v33 = vpop.f32.mrf.mxu0  ;;  %8812 = vmatprep.mubr.msk.bf16.mxu1 %vm10574_vm0, %v10573_v0 }
0x1a0a   : > { %v8797_v29 = vpop.f32.mrf.mxu0 }
0x1a0c   : > { %v3515_v30 = vpop.f32.mrf.mxu0 }
0x1a0d   : > { %v3521_v32 = vsel %vm3051_vm4, %v3515_v30, -inf }
0x1a0e   : > { %3522 = vmax.xlane.f32.xlu0 %v3521_v32  ;;  %v8808_v35 = vpop.f32.mrf.mxu0 }
0x1a10   : > { %v3518_v36 = vpop.f32.mrf.mxu0 }
0x1a12   : > { %v8809_v37 = vpop.f32.mrf.mxu0 }
0x1a24   : > { %3533 = vrot.lane.b32.xlu0 %v11391_v18, %s10580_s25 }
0x1a28   : > { %3735 = vrot.lane.b32.xlu0 %v11462_v39, %s10576_s10 }
0x1a97   : > { %v3523_v43 = vpop.xlane.xlu0 %3522 }
0x1a98   : > { %v3524_v40 = vsub.f32 %v3515_v30, %v3523_v43 }
0x1a9a   : > { %v3525_v44 = vmul.f32 1.442695, %v3524_v40 }
0x1a9b   : > { %v3534_v45 = vpop.permute.xlu0 %3533 }
0x1a9c   : > { %9667 = vpow2.f32 %v3525_v44  ;;  %8811 = vmatpush3.bf16.msra.mxu1 %v3534_v45 }
0x1a9d   : > { %8822 = vmatprep.subr.bf16.mxu1 %v10573_v0 }
0x1a9f   : > { %v3736_v62 = vpop.permute.xlu0 %3735 }
0x1aa9   : > { %v9668_v46 = vpop.eup %9667 }
0x1aaa   : > { %v3527_v47 = vsel %vm3051_vm4, %v9668_v46, 0.0 }
0x1aab   : > { %3528 = vadd.xlane.f32.xlu1 %v3527_v47 }
0x1abc   : > { %3738 = vrot.lane.b32.xlu1 %v11346_v31, %s10576_s10 }
0x1ac7   : > { %v3464_v18 = vpop.f32.mrf.mxu1 }
0x1ac8   : > { %v11472_v49 = vadd.f32 %v3464_v18, %v3309_v42 }
0x1ac9   : > { %v8802_v4 = vpop.f32.mrf.mxu1 }
0x1acb   : > { %v3467_v50 = vpop.f32.mrf.mxu1 }
0x1acd   : > { %v8803_v51 = vpop.f32.mrf.mxu1 }
0x1b34   : > { %v3529_v14 = vpop.xlane.xlu1 %3528 }
0x1b35   : > { %9669 = vrcp.f32 %v3529_v14 }
0x1b38   : > { %v3739_v56 = vpop.permute.xlu1 %3738 }
0x1b39   : > { %v3744_v61 = vsel %vm1466_vm2, %v3739_v56, 0 }
0x1b42   : > { %v9670_v55 = vpop.eup %9669 }
0x1b43   : > { %v3531_v2 = vmul.f32 %v9670_v55, %v9668_v46 }
0x1b45   : > { %v3532_v57 = vpack.c.bf16 %v3531_v2, %v3531_v2 }
0x1b47   : > { %8813 = vmatmul.mubr.msk.bf16.vlgmr.msra.gmra.mxu1 %vm3051_vm4, %v3532_v57 }
0x1b48   : > { %8823 = vmatpush3.bf16.xpose.msra.mxu1 %v3636_v52  ;;  %8824 = vmatprep.mubr.msk.bf16.mxu1 %vm10574_vm0, %v10573_v0 }
0x1b49   : > { %8834 = vmatprep.subr.bf16.mxu1 %v10573_v0 }
0x1b4f   : > { %8825 = vmatmul.mubr.msk.bf16.vlgmr.msra.gmra.mxu1 %vm1466_vm2, %v11462_v39 }
0x1b50   : > { %8835 = vmatpush3.bf16.xpose.msra.mxu1 %v3744_v61  ;;  %8836 = vmatprep.mubr.msk.bf16.mxu1 %vm10574_vm0, %v10573_v0 }
0x1b51   : > { %8846 = vmatprep.subr.bf16.mxu1 %v10573_v0 }
0x1b57   : > { %8837 = vmatmul.mubr.msk.bf16.vlgmr.msra.gmra.mxu1 %vm1466_vm2, %v3736_v62 }
0x1b58   : > { %8847 = vmatpush3.bf16.msra.mxu1 %v11405_v28  ;;  %8848 = vmatprep.mubr.msk.bf16.mxu1 %vm10574_vm0, %v10573_v0 }
0x1b59   : > { %8858 = vmatprep.subr.bf16.mxu1 %v10573_v0 }
0x1c07   : > { %v3573_v63 = vpop.f32.mrf.mxu1 }
0x1c08   : > { %v3579_v1 = vpack.c.bf16 %v3573_v63, %v3573_v63 }
0x1c09   : > { %v8814_v5 = vpop.f32.mrf.mxu1 }
0x1c0a   : > { %8819 = vmatmul.mubr.msk.bf16.vlgmr.msra.gmra.mxu0 %vm1466_vm2, %v3579_v1 }
0x1c0b   : > { %8829 = vmatpush3.bf16.msra.mxu0 %v11389_v12  ;;  %v3576_v23 = vpop.f32.mrf.mxu1  ;;  %8830 = vmatprep.mubr.msk.bf16.mxu0 %vm10574_vm0, %v10573_v0 }
0x1c0c   : > { %8840 = vmatprep.subr.bf16.mxu0 %v10573_v0 }
0x1c0d   : > { %v8815_v7 = vpop.f32.mrf.mxu1 }
0x1c0f   : > { %v3672_v28 = vpop.f32.mrf.mxu1 }
0x1c10   : > { %v3678_v9 = vsel %vm3051_vm4, %v3672_v28, -inf }
0x1c11   : > { %3679 = vmax.xlane.f32.xlu1 %v3678_v9  ;;  %v8826_v10 = vpop.f32.mrf.mxu1 }
0x1c13   : > { %v3675_v11 = vpop.f32.mrf.mxu1 }
0x1c15   : > { %v8827_v15 = vpop.f32.mrf.mxu1 }
0x1c17   : > { %v3780_v19 = vpop.f32.mrf.mxu1 }
0x1c18   : > { %v3786_v60 = vsel %vm3051_vm4, %v3780_v19, -inf }
0x1c19   : > { %3787 = vmax.xlane.f32.xlu0 %v3786_v60  ;;  %v8838_v34 = vpop.f32.mrf.mxu1 }
0x1c1b   : > { %v3783_v20 = vpop.f32.mrf.mxu1 }
0x1c1d   : > { %v8839_v54 = vpop.f32.mrf.mxu1 }
0x1c9a   : > { %v3680_v22 = vpop.xlane.xlu1 %3679 }
0x1c9b   : > { %v3681_v17 = vsub.f32 %v3672_v28, %v3680_v22 }
0x1c9d   : > { %v3682_v41 = vmul.f32 1.442695, %v3681_v17 }
0x1c9f   : > { %9671 = vpow2.f32 %v3682_v41 }
0x1ca2   : > { %v3788_v24 = vpop.xlane.xlu0 %3787 }
0x1ca3   : > { %v3789_v26 = vsub.f32 %v3780_v19, %v3788_v24 }
0x1ca5   : > { %v3790_v27 = vmul.f32 1.442695, %v3789_v26 }
0x1ca7   : > { %9673 = vpow2.f32 %v3790_v27 }
0x1cac   : > { %v9672_v6 = vpop.eup %9671 }
0x1cad   : > { %v3684_v33 = vsel %vm3051_vm4, %v9672_v6, 0.0 }
0x1cae   : > { %3685 = vadd.xlane.f32.xlu0 %v3684_v33 }
0x1cb4   : > { %v9674_v29 = vpop.eup %9673 }
0x1cb5   : > { %v3792_v30 = vsel %vm3051_vm4, %v9674_v29, 0.0 }
0x1cb6   : > { %3793 = vadd.xlane.f32.xlu1 %v3792_v30 }
0x1cc4   : > { %3799 = vrot.lane.b32.xlu0 %v11389_v12, %s10576_s10 }
0x1cc7   : > { %3934 = vrot.lane.b32.xlu1 %v11346_v31, %s10579_s5 }
0x1cca   : > { %v3621_v32 = vpop.f32.mrf.mxu0 }
0x1ccb   : > { %v11510_v35 = vadd.f32 %v3621_v32, %v11472_v49  ;;  %3932 = vrot.lane.b32.xlu1 %v11462_v39, %s10579_s5 }
0x1ccc   : > { %v8820_v36 = vpop.f32.mrf.mxu0 }
0x1ccd   : > { %v8200_v36 = vld [vmem:[#allocation26] ss:$0 sm:$0xff] }
0x1cce   : > { %v3624_v37 = vpop.f32.mrf.mxu0 }
0x1cd0   : > { %v8821_v8 = vpop.f32.mrf.mxu0 }
0x1d37   : > { %v3686_v43 = vpop.xlane.xlu0 %3685 }
0x1d38   : > { %9675 = vrcp.f32 %v3686_v43  ;;  %v4245_v43 = vadd.f32 %v8200_v36, %v11510_v35 }
0x1d3b   : > { %v3800_v47 = vpop.permute.xlu0 %3799 }
0x1d3f   : > { %v3794_v40 = vpop.xlane.xlu1 %3793 }
0x1d40   : > { %9677 = vrcp.f32 %v3794_v40 }
0x1d43   : > { %v3935_v55 = vpop.permute.xlu1 %3934 }
0x1d45   : > { %v9676_v44 = vpop.eup %9675 }
0x1d46   : > { %v3688_v45 = vmul.f32 %v9676_v44, %v9672_v6 }
0x1d47   : > { %v3933_v62 = vpop.permute.xlu1 %3932 }
0x1d48   : > { %v3689_v46 = vpack.c.bf16 %v3688_v45, %v3688_v45  ;;  %v4247_v45 = vadd.f32 %v4245_v43, %v11339_v3 }
0x1d4a   : > { %8831 = vmatmul.mubr.msk.bf16.vlgmr.msra.gmra.mxu0 %vm3051_vm4, %v3689_v46 }
0x1d4b   : > { %8841 = vmatpush3.bf16.msra.mxu0 %v3800_v47  ;;  %8842 = vmatprep.mubr.msk.bf16.mxu0 %vm10574_vm0, %v10573_v0 }
0x1d4c   : > { %8852 = vmatprep.subr.bf16.mxu0 %v10573_v0 }
0x1d4d   : > { %v9678_v42 = vpop.eup %9677 }
0x1d4e   : > { %v3796_v18 = vmul.f32 %v9678_v42, %v9674_v29  ;;  %v4251_v42 = vsel %vm1347_vm1, %v4247_v45, 0.0 }
0x1d50   : > { %v3797_v49 = vpack.c.bf16 %v3796_v18, %v3796_v18 }
0x1d52   : > { %8843 = vmatmul.mubr.msk.bf16.vlgmr.msra.gmra.mxu0 %vm3051_vm4, %v3797_v49 }
0x1d53   : > { %8853 = vmatpush3.bf16.msra.mxu0 %v11411_v38  ;;  %8854 = vmatprep.mubr.msk.bf16.mxu0 %vm10574_vm0, %v10573_v0  ;;  %v3940_v38 = vsel %vm1466_vm2, %v3935_v55, 0 }
0x1d54   : > { %8864 = vmatprep.subr.bf16.mxu0 %v10573_v0 }
0x1e0a   : > { %v3727_v4 = vpop.f32.mrf.mxu0 }
0x1e0b   : > { %v3733_v50 = vpack.c.bf16 %v3727_v4, %v3727_v4 }
0x1e0c   : > { %v8832_v51 = vpop.f32.mrf.mxu0 }
0x1e0d   : > { %8855 = vmatmul.mubr.msk.bf16.vlgmr.msra.gmra.mxu0 %vm1466_vm2, %v3733_v50 }
0x1e0e   : > { %v3730_v13 = vpop.f32.mrf.mxu0  ;;  %8866 = vmatprep.mubr.msk.bf16.mxu0 %vm10574_vm0, %v10573_v0 }
0x1e10   : > { %v8833_v14 = vpop.f32.mrf.mxu0 }
0x1e12   : > { %v3839_v2 = vpop.f32.mrf.mxu0 }
0x1e13   : > { %v3845_v57 = vpack.c.bf16 %v3839_v2, %v3839_v2 }
0x1e14   : > { %v8844_v52 = vpop.f32.mrf.mxu0 }
0x1e15   : > { %8849 = vmatmul.mubr.msk.bf16.vlgmr.msra.gmra.mxu1 %vm1466_vm2, %v3845_v57 }
0x1e16   : > { %8859 = vmatpush3.bf16.xpose.msra.mxu1 %v3940_v38  ;;  %v3842_v56 = vpop.f32.mrf.mxu0  ;;  %8860 = vmatprep.mubr.msk.bf16.mxu1 %vm10574_vm0, %v10573_v0 }
0x1e17   : > { %8870 = vmatprep.subr.bf16.mxu1 %v10573_v0 }
0x1e18   : > { %v8845_v61 = vpop.f32.mrf.mxu0 }
0x1e1d   : > { %8861 = vmatmul.mubr.msk.bf16.vlgmr.msra.gmra.mxu1 %vm1466_vm2, %v3933_v62 }
0x1e1e   : > { %8871 = vmatpush3.bf16.msra.mxu1 %v11451_v25  ;;  %8872 = vmatprep.mubr.msk.bf16.mxu1 %vm10574_vm0, %v10573_v0 }
0x1e1f   : > { %8882 = vmatprep.subr.bf16.mxu1 %v10573_v0 }
0x1ecd   : > { %v3926_v63 = vpop.f32.mrf.mxu0 }
0x1ecf   : > { %v8856_v1 = vpop.f32.mrf.mxu0 }
0x1ed1   : > { %v3929_v5 = vpop.f32.mrf.mxu0 }
0x1ed3   : > { %v8857_v23 = vpop.f32.mrf.mxu0 }
0x1ed5   : > { %v3883_v7 = vpop.f32.mrf.mxu1 }
0x1ed6   : > { %v11536_v28 = vadd.f32 %v3926_v63, %v3883_v7 }
0x1ed7   : > { %v8850_v9 = vpop.f32.mrf.mxu1 }
0x1ed9   : > { %v3886_v10 = vpop.f32.mrf.mxu1 }
0x1edb   : > { %v8851_v11 = vpop.f32.mrf.mxu1 }
0x1edd   : > { %v3976_v15 = vpop.f32.mrf.mxu1 }
0x1ede   : > { %v3982_v19 = vsel %vm3051_vm4, %v3976_v15, -inf }
0x1edf   : > { %3983 = vmax.xlane.f32.xlu0 %v3982_v19  ;;  %v8862_v25 = vpop.f32.mrf.mxu1 }
0x1ee1   : > { %v3979_v60 = vpop.f32.mrf.mxu1 }
0x1ee3   : > { %v8863_v34 = vpop.f32.mrf.mxu1 }
0x1ef5   : > { %3994 = vrot.lane.b32.xlu0 %v11389_v12, %s10579_s5 }
0x1ef9   : > { %4085 = vrot.lane.b32.xlu0 %v11462_v39, %s10580_s25 }
0x1f68   : > { %v3984_v20 = vpop.xlane.xlu0 %3983 }
0x1f69   : > { %v3985_v54 = vsub.f32 %v3976_v15, %v3984_v20 }
0x1f6b   : > { %v3986_v22 = vmul.f32 1.442695, %v3985_v54 }
0x1f6c   : > { %v3995_v17 = vpop.permute.xlu0 %3994 }
0x1f6d   : > { %9679 = vpow2.f32 %v3986_v22  ;;  %8865 = vmatpush3.bf16.msra.mxu0 %v3995_v17 }
0x1f6e   : > { %8876 = vmatprep.subr.bf16.mxu0 %v10573_v0 }
0x1f70   : > { %v4086_v30 = vpop.permute.xlu0 %4085 }
0x1f7a   : > { %v9680_v41 = vpop.eup %9679 }
0x1f7b   : > { %v3988_v24 = vsel %vm3051_vm4, %v9680_v41, 0.0 }
0x1f7c   : > { %3989 = vadd.xlane.f32.xlu1 %v3988_v24 }
0x1f8d   : > { %4087 = vrot.lane.b32.xlu1 %v11346_v31, %s10580_s25 }
0x2005   : > { %v3990_v26 = vpop.xlane.xlu1 %3989 }
0x2006   : > { %9681 = vrcp.f32 %v3990_v26 }
0x2009   : > { %v4088_v39 = vpop.permute.xlu1 %4087 }
0x200a   : > { %v4093_v29 = vsel %vm1466_vm2, %v4088_v39, 0 }
0x2013   : > { %v9682_v27 = vpop.eup %9681 }
0x2014   : > { %v3992_v6 = vmul.f32 %v9682_v27, %v9680_v41  ;;  %v9597_v27 = vld [vmem:[#allocation31 + $0x8] sm:$0xff]  }
0x2016   : > { %v3993_v33 = vpack.c.bf16 %v3992_v6, %v3992_v6  ;;  %v9598_v6 = vld [vmem:[#allocation31] sm:$0xff]  }
0x2018   : > { %8867 = vmatmul.mubr.msk.bf16.vlgmr.msra.gmra.mxu0 %vm3051_vm4, %v3993_v33 }
0x2019   : > { %8877 = vmatpush3.bf16.xpose.msra.mxu0 %v4093_v29  ;;  %8878 = vmatprep.mubr.msk.bf16.mxu0 %vm10574_vm0, %v10573_v0 }
0x201a   : > { %8888 = vmatprep.subr.bf16.mxu0 %v10573_v0 }
0x2020   : > { %8879 = vmatmul.mubr.msk.bf16.vlgmr.msra.gmra.mxu0 %vm1466_vm2, %v4086_v30 }
0x2021   : > { %8889 = vmatpush3.bf16.msra.mxu0 %v11475_v53  ;;  %8890 = vmatprep.mubr.msk.bf16.mxu0 %vm10574_vm0, %v10573_v0 }
0x2022   : > { %8902 = vmatprep.subr.bf16.mxu0 %v10573_v0 }
0x20d8   : > { %v4034_v31 = vpop.f32.mrf.mxu0 }
0x20d9   : > { %v4040_v32 = vpack.c.bf16 %v4034_v31, %v4034_v31 }
0x20da   : > { %v8868_v37 = vpop.f32.mrf.mxu0 }
0x20db   : > { %8873 = vmatmul.mubr.msk.bf16.vlgmr.msra.gmra.mxu1 %vm1466_vm2, %v4040_v32 }
0x20dc   : > { %v4037_v8 = vpop.f32.mrf.mxu0  ;;  %8884 = vmatprep.mubr.msk.bf16.mxu1 %vm10574_vm0, %v10573_v0 }
0x20dd   : > { %v8201_v8 = vld [vmem:[#allocation28] ss:$0 sm:$0xff] }
0x20de   : > { %v8869_v40 = vpop.f32.mrf.mxu0 }
0x20e0   : > { %v4129_v44 = vpop.f32.mrf.mxu0 }
0x20e1   : > { %v4135_v53 = vsel %vm3051_vm4, %v4129_v44, -inf }
0x20e2   : > { %4136 = vmax.xlane.f32.xlu1 %v4135_v53  ;;  %v8880_v46 = vpop.f32.mrf.mxu0  ;;  %v8202_v53 = vld [vmem:[#allocation29] ss:$0 sm:$0xff] }
0x20e4   : > { %v4132_v47 = vpop.f32.mrf.mxu0 }
0x20e6   : > { %4252 = vadd.xlane.f32.xlu1 %v4251_v42  ;;  %v8881_v18 = vpop.f32.mrf.mxu0 }
0x20e7   : > { %v9600_v18 = vld [vmem:[%s12254_s28 + $0x10] sm:$0xff]  }
0x216b   : > { %v4137_v49 = vpop.xlane.xlu1 %4136 }
0x216c   : > { %v4138_v4 = vsub.f32 %v4129_v44, %v4137_v49  ;;  %v9601_v49 = vld [vmem:[%s12254_s28 + $0x8] sm:$0xff]  }
0x216e   : > { %v4139_v50 = vmul.f32 1.442695, %v4138_v4  ;;  %v9602_v4 = vld [vmem:[%s12254_s28] sm:$0xff]  }
0x216f   : > { %v4253_v23 = vpop.xlane.xlu1 %4252 }
0x2170   : > { %9683 = vpow2.f32 %v4139_v50  ;;  %v4257_v7 = vmul.f32 0.03125, %v4253_v23  ;;  %v8203_v50 = vld [vmem:[#allocation32] ss:$0 sm:$0xff] }
0x2172   : > { %v4259_v11 = vsub.f32 %v4247_v45, %v4257_v7 }
0x2174   : > { %v4261_v20 = vmul.f32 %v4259_v11, %v4259_v11 }
0x2176   : > { %v4263_v54 = vsel %vm1347_vm1, %v4261_v20, 0.0 }
0x217d   : > { %v9684_v51 = vpop.eup %9683 }
0x217e   : > { %v4141_v35 = vsel %vm3051_vm4, %v9684_v51, 0.0 }
0x217f   : > { %4142 = vadd.xlane.f32.xlu0 %v4141_v35 }
0x2195   : > { %4147 = vrot.lane.b32.xlu0 %v11389_v12, %s10580_s25 }
0x219b   : > { %v4078_v13 = vpop.f32.mrf.mxu1 }
0x219c   : > { %v4084_v3 = vadd.f32 %v4078_v13, %v11536_v28 }
0x219d   : > { %v8874_v14 = vpop.f32.mrf.mxu1 }
0x219f   : > { %v4081_v55 = vpop.f32.mrf.mxu1 }
0x21a1   : > { %v8875_v2 = vpop.f32.mrf.mxu1 }
0x2208   : > { %v4143_v57 = vpop.xlane.xlu0 %4142 }
0x2209   : > { %9685 = vrcp.f32 %v4143_v57 }
0x220c   : > { %v4148_v52 = vpop.permute.xlu0 %4147 }
0x220d   : > { %8883 = vmatpush3.bf16.msra.mxu1 %v4148_v52 }
0x220e   : > { %8894 = vmatprep.subr.bf16.mxu1 %v10573_v0 }
0x2216   : > { %v9686_v38 = vpop.eup %9685 }
0x2217   : > { %v4145_v56 = vmul.f32 %v9686_v38, %v9684_v51  ;;  %v8207_v38 = vld [vmem:[#allocation34] ss:$0 sm:$0xff] }
0x2219   : > { %v4146_v61 = vpack.c.bf16 %v4145_v56, %v4145_v56 }
0x221b   : > { %8885 = vmatmul.mubr.msk.bf16.vlgmr.msra.gmra.mxu1 %vm3051_vm4, %v4146_v61 }
0x221c   : > { %8898 = vmatprep.mubr.msk.bf16.mxu1 %vm10574_vm0, %v10573_v0  ;;  %8895 = vmatpush3.bf16.msra.mxu1 %v9597_v27 }
0x221d   : > { %8896 = vmatprep.subr.bf16.mxu1 %v10573_v0 }
0x2220   : > { %8897 = vmatpush3.bf16.msra.mxu1 %v9598_v6 }
0x2221   : > { %8914 = vmatprep.subr.bf16.mxu1 %v10573_v0 }
0x22db   : > { %v4187_v12 = vpop.f32.mrf.mxu1 }
0x22dc   : > { %v4193_v62 = vpack.c.bf16 %v4187_v12, %v4187_v12 }
0x22dd   : > { %v8886_v63 = vpop.f32.mrf.mxu1 }
0x22de   : > { %8891 = vmatmul.mubr.msk.bf16.vlgmr.msra.gmra.mxu0 %vm1466_vm2, %v4193_v62 }
0x22df   : > { %v4190_v1 = vpop.f32.mrf.mxu1  ;;  %8910 = vmatprep.mubr.msk.bf16.mxu0 %vm10574_vm0, %v10573_v0 }
0x22e1   : > { %v8887_v5 = vpop.f32.mrf.mxu1 }
0x239e   : > { %v4231_v28 = vpop.f32.mrf.mxu0 }
0x239f   : > { %v4237_v9 = vadd.f32 %v4231_v28, %v4084_v3 }
0x23a0   : > { %v8892_v10 = vpop.f32.mrf.mxu0 }
0x23a1   : > { %v4246_v15 = vadd.f32 %v8200_v36, %v4237_v9 }
0x23a2   : > { %v4234_v19 = vpop.f32.mrf.mxu0 }
0x23a3   : > { %v4248_v25 = vadd.f32 %v4246_v15, %v11341_v21  ;;  %v9599_v21 = vld [vmem:[%s12254_s28 + $0x18] sm:$0xff]  }
0x23a4   : > { %v8893_v60 = vpop.f32.mrf.mxu0  ;;  %8903 = vmatpush3.bf16.msra.mxu0 %v9599_v21 }
0x23a5   : > { %v4254_v34 = vsel %vm1347_vm1, %v4248_v25, 0.0  ;;  %8904 = vmatprep.subr.bf16.mxu0 %v10573_v0 }
0x23a6   : > { %4255 = vadd.xlane.f32.xlu1 %v4254_v34 }
0x23a8   : > { %8905 = vmatpush3.bf16.msra.mxu0 %v9600_v18  ;;  %v8219_v18 = vld [vmem:[#allocation5 + $0x1] ss:$0 sm:$0xff] }
0x23a9   : > { %8906 = vmatprep.subr.bf16.mxu0 %v10573_v0 }
0x23aa   : > { %4264 = vadd.xlane.f32.xlu1 %v4263_v54 }
0x23ac   : > { %8907 = vmatpush3.bf16.msra.mxu0 %v9601_v49 }
0x23ad   : > { %8908 = vmatprep.subr.bf16.mxu0 %v10573_v0 }
0x23b0   : > { %8909 = vmatpush3.bf16.msra.mxu0 %v9602_v4 }
0x23b1   : > { %8930 = vmatprep.subr.bf16.mxu0 %v10573_v0 }
0x242f   : > { %v4256_v22 = vpop.xlane.xlu1 %4255 }
0x2430   : > { %v4258_v17 = vmul.f32 0.03125, %v4256_v22  ;;  %v9603_v22 = vld [vmem:[%s12251_s11 + $0x18] sm:$0xff]  }
0x2432   : > { %v4260_v41 = vsub.f32 %v4248_v25, %v4258_v17  ;;  %v9604_v17 = vld [vmem:[%s12251_s11 + $0x10] sm:$0xff]  }
0x2433   : > { %v4265_v39 = vpop.xlane.xlu1 %4264 }
0x2434   : > { %v4262_v24 = vmul.f32 %v4260_v41, %v4260_v41  ;;  %v4269_v33 = vmul.f32 0.03125, %v4265_v39 }
0x2436   : > { %v4266_v26 = vsel %vm1347_vm1, %v4262_v24, 0.0  ;;  %v4271_v29 = vadd.f32 1e-05, %v4269_v33  ;;  %v8213_v33 = vld [vmem:[#allocation35] ss:$0 sm:$0xff] }
0x2437   : > { %4267 = vadd.xlane.f32.xlu1 %v4266_v26 }
0x2438   : > { %9687 = vrsqrt.f32 %v4271_v29 }
0x2445   : > { %v9688_v36 = vpop.eup %9687 }
0x2446   : > { %v4275_v37 = vmul.f32 %v9688_v36, %v4259_v11 }
0x2448   : > { %v4283_v44 = vmul.f32 %v8201_v8, %v4275_v37 }
0x244a   : > { %v4291_v46 = vadd.f32 %v8202_v53, %v4283_v44 }
0x24c0   : > { %v4268_v30 = vpop.xlane.xlu1 %4267 }
0x24c1   : > { %v4270_v31 = vmul.f32 0.03125, %v4268_v30 }
0x24c3   : > { %v4272_v32 = vadd.f32 1e-05, %v4270_v31 }
0x24c5   : > { %9689 = vrsqrt.f32 %v4272_v32  ;;  %v8214_v32 = vld [vmem:[#allocation37] ss:$0 sm:$0xff] }
0x24d2   : > { %v9690_v43 = vpop.eup %9689 }
0x24d3   : > { %v4276_v40 = vmul.f32 %v9690_v43, %v4260_v41 }
0x24d5   : > { %v4284_v45 = vmul.f32 %v8201_v8, %v4276_v40  ;;  %v11607_v40 = vld [vmem:[#allocation2] sm:$0xff] }
0x24d7   : > { %v4292_v47 = vadd.f32 %v8202_v53, %v4284_v45  ;;  %v9605_v45 = vld [vmem:[#allocation7 + $0x18] sm:$0xff]  }
0x24d9   : > { %v4293_v42 = vpack.c.bf16 %v4292_v47, %v4291_v46 }
0x24db   : > { %8899 = vmatmul.mubr.msk.bf16.vlgmr.msra.gmra.mxu1 %vm1347_vm1, %v4293_v42 }
0x24dc   : > { %8918 = vmatprep.mubr.msk.bf16.mxu1 %vm10574_vm0, %v10573_v0  ;;  %8915 = vmatpush3.bf16.msra.mxu1 %v9603_v22 }
0x24dd   : > { %8916 = vmatprep.subr.bf16.mxu1 %v10573_v0 }
0x24e0   : > { %8917 = vmatpush3.bf16.msra.mxu1 %v9604_v17 }
0x24e1   : > { %8922 = vmatprep.subr.bf16.mxu1 %v10573_v0 }
0x259b   : > { %v4354_v51 = vpop.f32.mrf.mxu1 }
0x259c   : > { %v4355_v13 = vadd.f32 %v8203_v50, %v4354_v51 }
0x259d   : > { %v8900_v35 = vpop.f32.mrf.mxu1 }
0x259e   : > { %v4361_v2 = vmax.f32 %v4355_v13, 0.0 }
0x259f   : > { %v4357_v3 = vpop.f32.mrf.mxu1 }
0x25a0   : > { %v4358_v14 = vadd.f32 %v8203_v50, %v4357_v3 }
0x25a1   : > { %v8901_v55 = vpop.f32.mrf.mxu1 }
0x25a2   : > { %v4362_v57 = vmax.f32 %v4358_v14, 0.0  ;;  %v8223_v14 = vld [vmem:[#allocation8 + $0x1] ss:$0 sm:$0xff] }
0x25a4   : > { %v4363_v52 = vpack.c.bf16 %v4362_v57, %v4361_v2 }
0x25a6   : > { %8911 = vmatmul.mubr.msk.bf16.vlgmr.msra.gmra.mxu0 %vm4403_vm5, %v4363_v52 }
0x25a7   : > { %8932 = vmatprep.mubr.msk.bf16.mxu0 %vm10574_vm0, %v10573_v0 }
0x2666   : > { %v4441_v56 = vpop.f32.mrf.mxu0 }
0x2667   : > { %v4442_v61 = vadd.f32 %v8207_v38, %v4441_v56 }
0x2668   : > { %v8912_v12 = vpop.f32.mrf.mxu0 }
0x2669   : > { %v4448_v62 = vadd.f32 %v4442_v61, %v4291_v46 }
0x266a   : > { %v4444_v63 = vpop.f32.mrf.mxu0 }
0x266b   : > { %v4445_v1 = vadd.f32 %v8207_v38, %v4444_v63  ;;  %v4452_v5 = vsel %vm1347_vm1, %v4448_v62, 0.0 }
0x266c   : > { %4453 = vadd.xlane.f32.xlu1 %v4452_v5  ;;  %v8913_v23 = vpop.f32.mrf.mxu0 }
0x266d   : > { %v4449_v7 = vadd.f32 %v4445_v1, %v4292_v47  ;;  %v9606_v47 = vld [vmem:[#allocation7 + $0x10] sm:$0xff]  }
0x266f   : > { %v4455_v28 = vsel %vm1347_vm1, %v4449_v7, 0.0 }
0x2670   : > { %4456 = vadd.xlane.f32.xlu1 %v4455_v28 }
0x26f5   : > { %v4454_v9 = vpop.xlane.xlu1 %4453 }
0x26f6   : > { %v4458_v10 = vmul.f32 0.03125, %v4454_v9 }
0x26f8   : > { %v4460_v11 = vsub.f32 %v4448_v62, %v4458_v10 }
0x26f9   : > { %v4457_v15 = vpop.xlane.xlu1 %4456 }
0x26fa   : > { %v4459_v19 = vmul.f32 0.03125, %v4457_v15  ;;  %v4462_v25 = vmul.f32 %v4460_v11, %v4460_v11 }
0x26fc   : > { %v4461_v60 = vsub.f32 %v4449_v7, %v4459_v19  ;;  %v4464_v34 = vsel %vm1347_vm1, %v4462_v25, 0.0 }
0x26fd   : > { %4465 = vadd.xlane.f32.xlu0 %v4464_v34 }
0x26fe   : > { %v4463_v20 = vmul.f32 %v4461_v60, %v4461_v60 }
0x2700   : > { %v4467_v54 = vsel %vm1347_vm1, %v4463_v20, 0.0 }
0x2701   : > { %4468 = vadd.xlane.f32.xlu1 %v4467_v54 }
0x2786   : > { %v4466_v41 = vpop.xlane.xlu0 %4465 }
0x2787   : > { %v4470_v24 = vmul.f32 0.03125, %v4466_v41 }
0x2789   : > { %v4472_v26 = vadd.f32 1e-05, %v4470_v24 }
0x278a   : > { %v4469_v27 = vpop.xlane.xlu1 %4468 }
0x278b   : > { %9691 = vrsqrt.f32 %v4472_v26  ;;  %v4471_v6 = vmul.f32 0.03125, %v4469_v27 }
0x278d   : > { %v4473_v21 = vadd.f32 1e-05, %v4471_v6 }
0x278f   : > { %9693 = vrsqrt.f32 %v4473_v21 }
0x2798   : > { %v9692_v39 = vpop.eup %9691 }
0x2799   : > { %v4476_v29 = vmul.f32 %v9692_v39, %v4460_v11 }
0x279b   : > { %v4484_v30 = vmul.f32 %v8213_v33, %v4476_v29 }
0x279c   : > { %v9694_v31 = vpop.eup %9693 }
0x279d   : > { %v4477_v36 = vmul.f32 %v9694_v31, %v4461_v60  ;;  %v11603_v37 = vadd.f32 %v8214_v32, %v4484_v30 }
0x279f   : > { %v4485_v8 = vmul.f32 %v8213_v33, %v4477_v36  ;;  %v4494_v44 = vadd.f32 %v11607_v40, %v11603_v37 }
0x27a1   : > { %v11605_v43 = vadd.f32 %v8214_v32, %v4485_v8 }
0x27a3   : > { %v4495_v53 = vadd.f32 %v11607_v40, %v11605_v43  ;;  %v4497_v42 = vpack.c.bf16 %v11605_v43, %v11603_v37 }
0x27a5   : > { %v4496_v46 = vpack.c.bf16 %v4495_v53, %v4494_v44 }
0x27a7   : > { %8919 = vmatmul.mubr.msk.bf16.vlgmr.msra.gmra.mxu1 %vm1347_vm1, %v4496_v46 }
0x27a8   : > { %8923 = vmatpush3.bf16.msra.mxu1 %v9605_v45  ;;  %8926 = vmatprep.mubr.msk.bf16.mxu1 %vm10574_vm0, %v10573_v0 }
0x27a9   : > { %8924 = vmatprep.subr.bf16.mxu1 %v10573_v0 }
0x27ac   : > { %8925 = vmatpush3.bf16.msra.mxu1 %v9606_v47  ;;  %v4749_v47 = vld [vmem:[#allocation10 + $0x10] sm:$0xf] }
0x27ad   : > { %8936 = vmatprep.subr.bf16.mxu1 %v10573_v0 }
0x27af   : > { %8927 = vmatmul.mubr.msk.bf16.vlgmr.msra.gmra.mxu1 %vm1347_vm1, %v4497_v42  ;;  %v11672_v42 = vsel %vm1528_vm3, %v4749_v47, 0 }
0x27b0   : > { %8938 = vmatprep.mubr.msk.bf16.mxu1 %vm10574_vm0, %v10573_v0 }
0x2867   : > { %v4560_v49 = vpop.f32.mrf.mxu1 }
0x2868   : > { %v4561_v4 = vadd.f32 %v8219_v18, %v4560_v49 }
0x2869   : > { %v8920_v50 = vpop.f32.mrf.mxu1 }
0x286a   : > { %v11623_v51 = vpack.c.bf16 %v4561_v4, %v4561_v4  ;;  %v4636_v55 = vmul.f32 0.35355338, %v4561_v4 }
0x286b   : > { %v4563_v35 = vpop.f32.mrf.mxu1 }
0x286c   : > { %v11625_v13 = vadd.f32 %v8219_v18, %v4563_v35  ;;  %4641 = vrot.lane.b32.xlu1 %v11623_v51, %s10575_s3  ;;  %v11631_v38 = vpack.c.bf16 %v4636_v55, %v4636_v55  ;;  %v4863_v18 = vld [vmem:[#allocation10 + $0x14] sm:$0xf] }
0x286d   : > { %v8921_v3 = vpop.f32.mrf.mxu1  ;;  %v11677_v49 = vsel %vm1528_vm3, %v4863_v18, 0 }
0x286f   : > { %v4629_v2 = vpop.f32.mrf.mxu1 }
0x2870   : > { %v4630_v57 = vadd.f32 %v8223_v14, %v4629_v2  ;;  %4753 = vrot.lane.b32.xlu1 %v11623_v51, %s10577_s18 }
0x2871   : > { %v8928_v52 = vpop.f32.mrf.mxu1 }
0x2872   : > { %v11633_v56 = vpack.c.bf16 %v4630_v57, %v4630_v57 }
0x2873   : > { %v4632_v61 = vpop.f32.mrf.mxu1 }
0x2874   : > { %v11635_v12 = vadd.f32 %v8223_v14, %v4632_v61  ;;  %4751 = vrot.lane.b32.xlu1 %v11631_v38, %s10576_s10  ;;  %v4705_v62 = vsel %vm1528_vm3, %v11633_v56, 0 }
0x2875   : > { %v8929_v63 = vpop.f32.mrf.mxu1  ;;  %8937 = vmatpush3.bf16.msra.mxu1 %v4705_v62 }
0x2876   : > { %8948 = vmatprep.subr.bf16.mxu1 %v10573_v0 }
0x28de   : > { %v4642_v1 = vpop.permute.xlu1 %4641 }
0x28df   : > { %v4647_v5 = vsel %vm1466_vm2, %v4642_v1, 0 }
0x28e0   : > { %8931 = vmatpush3.bf16.xpose.msra.mxu0 %v4647_v5 }
0x28e1   : > { %8942 = vmatprep.subr.bf16.mxu0 %v10573_v0 }
0x28e2   : > { %v4754_v23 = vpop.permute.xlu1 %4753 }
0x28e3   : > { %v4759_v7 = vsel %vm1466_vm2, %v4754_v23, 0 }
0x28e6   : > { %v4752_v28 = vpop.permute.xlu1 %4751 }
0x28e7   : > { %8933 = vmatmul.mubr.msk.bf16.vlgmr.msra.gmra.mxu0 %vm1466_vm2, %v11631_v38 }
0x28e8   : > { %8943 = vmatpush3.bf16.xpose.msra.mxu0 %v4759_v7  ;;  %8944 = vmatprep.mubr.msk.bf16.mxu0 %vm10574_vm0, %v10573_v0 }
0x28e9   : > { %8954 = vmatprep.subr.bf16.mxu0 %v10573_v0 }
0x28ef   : > { %8945 = vmatmul.mubr.msk.bf16.vlgmr.msra.gmra.mxu0 %vm1466_vm2, %v4752_v28 }
0x28f0   : > { %8956 = vmatprep.mubr.msk.bf16.mxu0 %vm10574_vm0, %v10573_v0  ;;  %8955 = vmatpush3.bf16.msra.mxu0 %v11677_v49 }
0x28f1   : > { %8966 = vmatprep.subr.bf16.mxu0 %v10573_v0 }
0x29a7   : > { %v4683_v9 = vpop.f32.mrf.mxu0 }
0x29a8   : > { %v4689_v10 = vsel %vm1466_vm2, %v4683_v9, -inf }
0x29a9   : > { %4690 = vmax.xlane.f32.xlu0 %v4689_v10  ;;  %v8934_v11 = vpop.f32.mrf.mxu0 }
0x29ab   : > { %v4686_v15 = vpop.f32.mrf.mxu0 }
0x29ad   : > { %v8935_v19 = vpop.f32.mrf.mxu0 }
0x29af   : > { %v4795_v25 = vpop.f32.mrf.mxu0 }
0x29b0   : > { %v4801_v60 = vsel %vm1466_vm2, %v4795_v25, -inf }
0x29b1   : > { %4802 = vmax.xlane.f32.xlu1 %v4801_v60  ;;  %v8946_v34 = vpop.f32.mrf.mxu0 }
0x29b3   : > { %v4798_v20 = vpop.f32.mrf.mxu0 }
0x29b5   : > { %v8947_v54 = vpop.f32.mrf.mxu0 }
0x29c2   : > { %4956 = vrot.lane.b32.xlu1 %v11631_v38, %s10579_s5 }
0x2a32   : > { %v4691_v22 = vpop.xlane.xlu0 %4690 }
0x2a33   : > { %v4692_v17 = vsub.f32 %v4683_v9, %v4691_v22 }
0x2a35   : > { %v4693_v41 = vmul.f32 1.442695, %v4692_v17 }
0x2a37   : > { %9695 = vpow2.f32 %v4693_v41 }
0x2a3a   : > { %v4803_v24 = vpop.xlane.xlu1 %4802 }
0x2a3b   : > { %v4804_v26 = vsub.f32 %v4795_v25, %v4803_v24 }
0x2a3d   : > { %v4805_v27 = vmul.f32 1.442695, %v4804_v26 }
0x2a3e   : > { %v4957_v1 = vpop.permute.xlu1 %4956 }
0x2a3f   : > { %9697 = vpow2.f32 %v4805_v27 }
0x2a44   : > { %v9696_v6 = vpop.eup %9695 }
0x2a45   : > { %v4695_v21 = vsel %vm1466_vm2, %v9696_v6, 0.0 }
0x2a46   : > { %4696 = vadd.xlane.f32.xlu0 %v4695_v21 }
0x2a4c   : > { %v9698_v39 = vpop.eup %9697 }
0x2a4d   : > { %v4807_v33 = vsel %vm1466_vm2, %v9698_v39, 0.0 }
0x2a4e   : > { %4808 = vadd.xlane.f32.xlu0 %v4807_v33 }
0x2a64   : > { %4814 = vrot.lane.b32.xlu0 %v11633_v56, %s10576_s10 }
0x2a68   : > { %4958 = vrot.lane.b32.xlu0 %v11623_v51, %s10578_s2 }
0x2acf   : > { %v4697_v29 = vpop.xlane.xlu0 %4696 }
0x2ad0   : > { %9699 = vrcp.f32 %v4697_v29 }
0x2ad7   : > { %v4809_v30 = vpop.xlane.xlu0 %4808 }
0x2ad8   : > { %9701 = vrcp.f32 %v4809_v30 }
0x2adb   : > { %v4815_v36 = vpop.permute.xlu0 %4814 }
0x2adc   : > { %v4820_v44 = vsel %vm1528_vm3, %v4815_v36, 0 }
0x2add   : > { %v9700_v31 = vpop.eup %9699 }
0x2ade   : > { %v4699_v32 = vmul.f32 %v9700_v31, %v9696_v6 }
0x2adf   : > { %v4959_v55 = vpop.permute.xlu0 %4958 }
0x2ae0   : > { %v4700_v8 = vpack.c.bf16 %v4699_v32, %v4699_v32  ;;  %v4964_v61 = vsel %vm1466_vm2, %v4959_v55, 0 }
0x2ae2   : > { %8939 = vmatmul.mubr.msk.bf16.vlgmr.msra.gmra.mxu1 %vm1466_vm2, %v4700_v8 }
0x2ae3   : > { %8949 = vmatpush3.bf16.msra.mxu1 %v4820_v44  ;;  %8950 = vmatprep.mubr.msk.bf16.mxu1 %vm10574_vm0, %v10573_v0 }
0x2ae4   : > { %8960 = vmatprep.subr.bf16.mxu1 %v10573_v0 }
0x2ae5   : > { %v9702_v53 = vpop.eup %9701 }
0x2ae6   : > { %v4811_v45 = vmul.f32 %v9702_v53, %v9698_v39 }
0x2ae8   : > { %v4812_v46 = vpack.c.bf16 %v4811_v45, %v4811_v45 }
0x2aea   : > { %8951 = vmatmul.mubr.msk.bf16.vlgmr.msra.gmra.mxu1 %vm1466_vm2, %v4812_v46 }
0x2aeb   : > { %8962 = vmatprep.mubr.msk.bf16.mxu1 %vm10574_vm0, %v10573_v0  ;;  %8961 = vmatpush3.bf16.msra.mxu1 %v11672_v42 }
0x2aec   : > { %8972 = vmatprep.subr.bf16.mxu1 %v10573_v0 }
0x2ba2   : > { %v4741_v4 = vpop.f32.mrf.mxu1 }
0x2ba3   : > { %v4747_v50 = vpack.c.bf16 %v4741_v4, %v4741_v4 }
0x2ba4   : > { %v8940_v35 = vpop.f32.mrf.mxu1 }
0x2ba5   : > { %8963 = vmatmul.mubr.msk.bf16.vlgmr.msra.gmra.mxu1 %vm1466_vm2, %v4747_v50  ;;  %v5274_v35 = vmul.f32 0.35355338, %v11625_v13 }
0x2ba6   : > { %v4744_v3 = vpop.f32.mrf.mxu1  ;;  %8974 = vmatprep.mubr.msk.bf16.mxu1 %vm10574_vm0, %v10573_v0 }
0x2ba7   : > { %v11726_v3 = vpack.c.bf16 %v11625_v13, %v11625_v13 }
0x2ba8   : > { %v8941_v14 = vpop.f32.mrf.mxu1 }
0x2ba9   : > { %v11730_v14 = vpack.c.bf16 %v5274_v35, %v5274_v35 }
0x2baa   : > { %v4856_v2 = vpop.f32.mrf.mxu1 }
0x2bab   : > { %v4862_v57 = vpack.c.bf16 %v4856_v2, %v4856_v2 }
0x2bac   : > { %v8952_v52 = vpop.f32.mrf.mxu1 }
0x2bad   : > { %8957 = vmatmul.mubr.msk.bf16.vlgmr.msra.gmra.mxu0 %vm1466_vm2, %v4862_v57 }
0x2bae   : > { %8967 = vmatpush3.bf16.xpose.msra.mxu0 %v4964_v61  ;;  %v4859_v62 = vpop.f32.mrf.mxu1  ;;  %8968 = vmatprep.mubr.msk.bf16.mxu0 %vm10574_vm0, %v10573_v0 }
0x2baf   : > { %8978 = vmatprep.subr.bf16.mxu0 %v10573_v0 }
0x2bb0   : > { %v8953_v63 = vpop.f32.mrf.mxu1 }
0x2bb5   : > { %8969 = vmatmul.mubr.msk.bf16.vlgmr.msra.gmra.mxu0 %vm1466_vm2, %v4957_v1 }
0x2bb6   : > { %8980 = vmatprep.mubr.msk.bf16.mxu0 %vm10574_vm0, %v10573_v0 }
0x2c65   : > { %v4950_v5 = vpop.f32.mrf.mxu1 }
0x2c67   : > { %v8964_v23 = vpop.f32.mrf.mxu1 }
0x2c69   : > { %v4953_v7 = vpop.f32.mrf.mxu1 }
0x2c6a   : > { %v5226_v7 = vld [vmem:[#allocation10 + $0x1c] sm:$0xf] }
0x2c6b   : > { %v8965_v28 = vpop.f32.mrf.mxu1 }
0x2c6c   : > { %v11743_v28 = vsel %vm1528_vm3, %v5226_v7, 0 }
0x2c6d   : > { %v4904_v9 = vpop.f32.mrf.mxu0 }
0x2c6e   : > { %v11692_v10 = vadd.f32 %v4950_v5, %v4904_v9 }
0x2c6f   : > { %v8958_v11 = vpop.f32.mrf.mxu0 }
0x2c71   : > { %v4907_v15 = vpop.f32.mrf.mxu0 }
0x2c73   : > { %v8959_v19 = vpop.f32.mrf.mxu0 }
0x2c75   : > { %v5000_v25 = vpop.f32.mrf.mxu0 }
0x2c76   : > { %v5006_v60 = vsel %vm1466_vm2, %v5000_v25, -inf }
0x2c77   : > { %5007 = vmax.xlane.f32.xlu0 %v5006_v60  ;;  %v8970_v34 = vpop.f32.mrf.mxu0 }
0x2c79   : > { %v5003_v20 = vpop.f32.mrf.mxu0 }
0x2c7b   : > { %v8971_v54 = vpop.f32.mrf.mxu0 }
0x2c7c   : > { %v11765_v54 = vpack.c.bf16 %v11635_v12, %v11635_v12 }
0x2c8d   : > { %5018 = vrot.lane.b32.xlu0 %v11633_v56, %s10579_s5 }
0x2c91   : > { %5115 = vrot.lane.b32.xlu0 %v11631_v38, %s10580_s25 }
0x2d00   : > { %v5008_v22 = vpop.xlane.xlu0 %5007 }
0x2d01   : > { %v5009_v17 = vsub.f32 %v5000_v25, %v5008_v22 }
0x2d03   : > { %v5010_v41 = vmul.f32 1.442695, %v5009_v17 }
0x2d04   : > { %v5019_v24 = vpop.permute.xlu0 %5018 }
0x2d05   : > { %9703 = vpow2.f32 %v5010_v41  ;;  %v5024_v26 = vsel %vm1528_vm3, %v5019_v24, 0  ;;  %v5343_v24 = vsel %vm1528_vm3, %v11765_v54, 0 }
0x2d06   : > { %8973 = vmatpush3.bf16.msra.mxu1 %v5024_v26 }
0x2d07   : > { %8984 = vmatprep.subr.bf16.mxu1 %v10573_v0 }
0x2d08   : > { %v5116_v31 = vpop.permute.xlu0 %5115 }
0x2d12   : > { %v9704_v27 = vpop.eup %9703 }
0x2d13   : > { %v5012_v6 = vsel %vm1466_vm2, %v9704_v27, 0.0 }
0x2d14   : > { %5013 = vadd.xlane.f32.xlu1 %v5012_v6 }
0x2d25   : > { %5117 = vrot.lane.b32.xlu1 %v11623_v51, %s10581_s1  ;;  %v5067_v51 = vld [vmem:[#allocation10 + $0x18] sm:$0xf] }
0x2d26   : > { %v11713_v32 = vsel %vm1528_vm3, %v5067_v51, 0 }
0x2d27   : > { %8979 = vmatpush3.bf16.msra.mxu0 %v11713_v32 }
0x2d28   : > { %8990 = vmatprep.subr.bf16.mxu0 %v10573_v0 }
0x2d9d   : > { %v5014_v21 = vpop.xlane.xlu1 %5013 }
0x2d9e   : > { %9705 = vrcp.f32 %v5014_v21 }
0x2da1   : > { %v5118_v33 = vpop.permute.xlu1 %5117 }
0x2da2   : > { %v5123_v30 = vsel %vm1466_vm2, %v5118_v33, 0 }
0x2dab   : > { %v9706_v38 = vpop.eup %9705 }
0x2dac   : > { %v5016_v39 = vmul.f32 %v9706_v38, %v9704_v27 }
0x2dae   : > { %v5017_v29 = vpack.c.bf16 %v5016_v39, %v5016_v39 }
0x2db0   : > { %8975 = vmatmul.mubr.msk.bf16.vlgmr.msra.gmra.mxu1 %vm1466_vm2, %v5017_v29 }
0x2db1   : > { %8985 = vmatpush3.bf16.xpose.msra.mxu1 %v5123_v30  ;;  %8986 = vmatprep.mubr.msk.bf16.mxu1 %vm10574_vm0, %v10573_v0 }
0x2db2   : > { %8996 = vmatprep.subr.bf16.mxu1 %v10573_v0 }
0x2db8   : > { %8987 = vmatmul.mubr.msk.bf16.vlgmr.msra.gmra.mxu1 %vm1466_vm2, %v5116_v31 }
0x2db9   : > { %8998 = vmatprep.mubr.msk.bf16.mxu1 %vm10574_vm0, %v10573_v0  ;;  %8997 = vmatpush3.bf16.msra.mxu1 %v11743_v28 }
0x2dba   : > { %9008 = vmatprep.subr.bf16.mxu1 %v10573_v0 }
0x2e70   : > { %v5060_v36 = vpop.f32.mrf.mxu1 }
0x2e71   : > { %v5066_v8 = vpack.c.bf16 %v5060_v36, %v5060_v36 }
0x2e72   : > { %v8976_v44 = vpop.f32.mrf.mxu1 }
0x2e73   : > { %8981 = vmatmul.mubr.msk.bf16.vlgmr.msra.gmra.mxu0 %vm1466_vm2, %v5066_v8 }
0x2e74   : > { %v5063_v53 = vpop.f32.mrf.mxu1  ;;  %8992 = vmatprep.mubr.msk.bf16.mxu0 %vm10574_vm0, %v10573_v0 }
0x2e76   : > { %v8977_v45 = vpop.f32.mrf.mxu1 }
0x2e78   : > { %v5159_v46 = vpop.f32.mrf.mxu1 }
0x2e79   : > { %v5165_v47 = vsel %vm1466_vm2, %v5159_v46, -inf }
0x2e7a   : > { %5166 = vmax.xlane.f32.xlu0 %v5165_v47  ;;  %v8988_v18 = vpop.f32.mrf.mxu1 }
0x2e7c   : > { %v5162_v4 = vpop.f32.mrf.mxu1 }
0x2e7e   : > { %v8989_v50 = vpop.f32.mrf.mxu1 }
0x2e90   : > { %5177 = vrot.lane.b32.xlu0 %v11633_v56, %s10580_s25 }
0x2e94   : > { %5389 = vrot.lane.b32.xlu0 %v11726_v3, %s10577_s18 }
0x2e98   : > { %5387 = vrot.lane.b32.xlu0 %v11730_v14, %s10576_s10 }
0x2f03   : > { %v5167_v55 = vpop.xlane.xlu0 %5166 }
0x2f04   : > { %v5168_v2 = vsub.f32 %v5159_v46, %v5167_v55 }
0x2f06   : > { %v5169_v57 = vmul.f32 1.442695, %v5168_v2 }
0x2f07   : > { %v5178_v52 = vpop.permute.xlu0 %5177 }
0x2f08   : > { %9707 = vpow2.f32 %v5169_v57  ;;  %v5183_v56 = vsel %vm1528_vm3, %v5178_v52, 0 }
0x2f09   : > { %8991 = vmatpush3.bf16.msra.mxu0 %v5183_v56 }
0x2f0a   : > { %9002 = vmatprep.subr.bf16.mxu0 %v10573_v0 }
0x2f0b   : > { %v5390_v60 = vpop.permute.xlu0 %5389 }
0x2f0c   : > { %v5395_v34 = vsel %vm1466_vm2, %v5390_v60, 0 }
0x2f0f   : > { %v5388_v20 = vpop.permute.xlu0 %5387 }
0x2f15   : > { %v9708_v13 = vpop.eup %9707 }
0x2f16   : > { %v5171_v61 = vsel %vm1466_vm2, %v9708_v13, 0.0 }
0x2f17   : > { %5172 = vadd.xlane.f32.xlu1 %v5171_v61 }
0x2f28   : > { %5279 = vrot.lane.b32.xlu1 %v11726_v3, %s10575_s3  ;;  %s8323_s3 = sshll.u32 %s10766_s22, 8  ;;  %s10582_s22 = smov [#allocation40]  }
0x2f33   : > { %v5108_v62 = vpop.f32.mrf.mxu0 }
0x2f34   : > { %v11740_v63 = vadd.f32 %v5108_v62, %v11692_v10 }
0x2f35   : > { %v8982_v1 = vpop.f32.mrf.mxu0 }
0x2f37   : > { %v5111_v5 = vpop.f32.mrf.mxu0 }
0x2f39   : > { %v8983_v23 = vpop.f32.mrf.mxu0 }
0x2fa0   : > { %v5173_v9 = vpop.xlane.xlu1 %5172 }
0x2fa1   : > { %9709 = vrcp.f32 %v5173_v9 }
0x2fa4   : > { %v5280_v19 = vpop.permute.xlu1 %5279 }
0x2fa5   : > { %v5285_v10 = vsel %vm1466_vm2, %v5280_v19, 0 }
0x2fae   : > { %v9710_v11 = vpop.eup %9709 }
0x2faf   : > { %v5175_v15 = vmul.f32 %v9710_v11, %v9708_v13 }
0x2fb1   : > { %v5176_v25 = vpack.c.bf16 %v5175_v15, %v5175_v15 }
0x2fb3   : > { %8993 = vmatmul.mubr.msk.bf16.vlgmr.msra.gmra.mxu0 %vm1466_vm2, %v5176_v25 }
0x2fb4   : > { %9003 = vmatpush3.bf16.xpose.msra.mxu0 %v5285_v10  ;;  %9004 = vmatprep.mubr.msk.bf16.mxu0 %vm10574_vm0, %v10573_v0 }
0x2fb5   : > { %9014 = vmatprep.subr.bf16.mxu0 %v10573_v0 }
0x2fbb   : > { %9005 = vmatmul.mubr.msk.bf16.vlgmr.msra.gmra.mxu0 %vm1466_vm2, %v11730_v14 }
0x2fbc   : > { %9015 = vmatpush3.bf16.xpose.msra.mxu0 %v5395_v34  ;;  %9016 = vmatprep.mubr.msk.bf16.mxu0 %vm10574_vm0, %v10573_v0 }
0x2fbd   : > { %9026 = vmatprep.subr.bf16.mxu0 %v10573_v0 }
0x2fc3   : > { %9017 = vmatmul.mubr.msk.bf16.vlgmr.msra.gmra.mxu0 %vm1466_vm2, %v5388_v20 }
0x2fc4   : > { %9027 = vmatpush3.bf16.msra.mxu0 %v11677_v49  ;;  %9028 = vmatprep.mubr.msk.bf16.mxu0 %vm10574_vm0, %v10573_v0 }
0x2fc5   : > { %9038 = vmatprep.subr.bf16.mxu0 %v10573_v0 }
0x3073   : > { %v5219_v22 = vpop.f32.mrf.mxu0 }
0x3074   : > { %v5225_v17 = vpack.c.bf16 %v5219_v22, %v5219_v22 }
0x3075   : > { %v8994_v41 = vpop.f32.mrf.mxu0 }
0x3076   : > { %8999 = vmatmul.mubr.msk.bf16.vlgmr.msra.gmra.mxu1 %vm1466_vm2, %v5225_v17 }
0x3077   : > { %9009 = vmatpush3.bf16.msra.mxu1 %v5343_v24  ;;  %v5222_v26 = vpop.f32.mrf.mxu0  ;;  %9010 = vmatprep.mubr.msk.bf16.mxu1 %vm10574_vm0, %v10573_v0 }
0x3078   : > { %9020 = vmatprep.subr.bf16.mxu1 %v10573_v0 }
0x3079   : > { %v8995_v49 = vpop.f32.mrf.mxu0 }
0x307b   : > { %v5321_v27 = vpop.f32.mrf.mxu0 }
0x307c   : > { %v5327_v12 = vsel %vm1466_vm2, %v5321_v27, -inf }
0x307d   : > { %5328 = vmax.xlane.f32.xlu0 %v5327_v12  ;;  %v9006_v6 = vpop.f32.mrf.mxu0 }
0x307f   : > { %v5324_v21 = vpop.f32.mrf.mxu0 }
0x3081   : > { %v9007_v38 = vpop.f32.mrf.mxu0 }
0x3083   : > { %v5431_v39 = vpop.f32.mrf.mxu0 }
0x3084   : > { %v5437_v33 = vsel %vm1466_vm2, %v5431_v39, -inf }
0x3085   : > { %5438 = vmax.xlane.f32.xlu1 %v5437_v33  ;;  %v9018_v29 = vpop.f32.mrf.mxu0 }
0x3087   : > { %v5434_v30 = vpop.f32.mrf.mxu0 }
0x3089   : > { %v9019_v31 = vpop.f32.mrf.mxu0 }
0x3096   : > { %5587 = vrot.lane.b32.xlu1 %v11726_v3, %s10578_s2  ;;  %s12116_s2 = scalar_lea.hbm %s10743_s19, %s8323_s3 }
0x309a   : > { %5585 = vrot.lane.b32.xlu1 %v11730_v14, %s10579_s5 }
0x3106   : > { %v5329_v51 = vpop.xlane.xlu0 %5328 }
0x3107   : > { %v5330_v36 = vsub.f32 %v5321_v27, %v5329_v51 }
0x3109   : > { %v5331_v8 = vmul.f32 1.442695, %v5330_v36 }
0x310b   : > { %9711 = vpow2.f32 %v5331_v8 }
0x310e   : > { %v5439_v44 = vpop.xlane.xlu1 %5438 }
0x310f   : > { %v5440_v53 = vsub.f32 %v5431_v39, %v5439_v44 }
0x3111   : > { %v5441_v45 = vmul.f32 1.442695, %v5440_v53 }
0x3112   : > { %v5588_v10 = vpop.permute.xlu1 %5587 }
0x3113   : > { %9713 = vpow2.f32 %v5441_v45 }
0x3116   : > { %v5586_v41 = vpop.permute.xlu1 %5585 }
0x3118   : > { %v9712_v46 = vpop.eup %9711 }
0x3119   : > { %v5333_v47 = vsel %vm1466_vm2, %v9712_v46, 0.0 }
0x311a   : > { %5334 = vadd.xlane.f32.xlu0 %v5333_v47 }
0x3120   : > { %v9714_v18 = vpop.eup %9713 }
0x3121   : > { %v5443_v4 = vsel %vm1466_vm2, %v9714_v18, 0.0 }
0x3122   : > { %5444 = vadd.xlane.f32.xlu0 %v5443_v4 }
0x3136   : > { %v5267_v50 = vpop.f32.mrf.mxu1 }
0x3137   : > { %v11782_v35 = vadd.f32 %v5267_v50, %v11740_v63 }
0x3138   : > { %5450 = vrot.lane.b32.xlu0 %v11765_v54, %s10576_s10  ;;  %v9000_v55 = vpop.f32.mrf.mxu1 }
0x313a   : > { %v5270_v2 = vpop.f32.mrf.mxu1 }
0x313c   : > { %v9001_v57 = vpop.f32.mrf.mxu1 }
0x31a3   : > { %v5335_v52 = vpop.xlane.xlu0 %5334 }
0x31a4   : > { %9715 = vrcp.f32 %v5335_v52  ;;  %v8251_v52 = vld [vmem:[#allocation11 + $0x1] ss:$0 sm:$0xff] }
0x31ab   : > { %v5445_v56 = vpop.xlane.xlu0 %5444 }
0x31ac   : > { %9717 = vrcp.f32 %v5445_v56 }
0x31af   : > { %v5451_v62 = vpop.permute.xlu0 %5450 }
0x31b0   : > { %v5456_v5 = vsel %vm1528_vm3, %v5451_v62, 0 }
0x31b1   : > { %v9716_v13 = vpop.eup %9715 }
0x31b2   : > { %v5337_v61 = vmul.f32 %v9716_v13, %v9712_v46 }
0x31b4   : > { %v5338_v1 = vpack.c.bf16 %v5337_v61, %v5337_v61  ;;  %v5903_v61 = vadd.f32 %v8251_v52, %v11782_v35 }
0x31b6   : > { %9011 = vmatmul.mubr.msk.bf16.vlgmr.msra.gmra.mxu1 %vm1466_vm2, %v5338_v1 }
0x31b7   : > { %9021 = vmatpush3.bf16.msra.mxu1 %v5456_v5  ;;  %9022 = vmatprep.mubr.msk.bf16.mxu1 %vm10574_vm0, %v10573_v0 }
0x31b8   : > { %9032 = vmatprep.subr.bf16.mxu1 %v10573_v0 }
0x31b9   : > { %v9718_v63 = vpop.eup %9717 }
0x31ba   : > { %v5447_v23 = vmul.f32 %v9718_v63, %v9714_v18 }
0x31bc   : > { %v5448_v7 = vpack.c.bf16 %v5447_v23, %v5447_v23 }
0x31be   : > { %9023 = vmatmul.mubr.msk.bf16.vlgmr.msra.gmra.mxu1 %vm1466_vm2, %v5448_v7 }
0x31bf   : > { %9033 = vmatpush3.bf16.msra.mxu1 %v11672_v42  ;;  %9034 = vmatprep.mubr.msk.bf16.mxu1 %vm10574_vm0, %v10573_v0  ;;  %v5593_v42 = vsel %vm1466_vm2, %v5588_v10, 0 }
0x31c0   : > { %9044 = vmatprep.subr.bf16.mxu1 %v10573_v0 }
0x3276   : > { %v5379_v9 = vpop.f32.mrf.mxu1 }
0x3277   : > { %v5385_v11 = vpack.c.bf16 %v5379_v9, %v5379_v9 }
0x3278   : > { %v9012_v15 = vpop.f32.mrf.mxu1 }
0x3279   : > { %9035 = vmatmul.mubr.msk.bf16.vlgmr.msra.gmra.mxu1 %vm1466_vm2, %v5385_v11 }
0x327a   : > { %v5382_v19 = vpop.f32.mrf.mxu1  ;;  %9046 = vmatprep.mubr.msk.bf16.mxu1 %vm10574_vm0, %v10573_v0 }
0x327c   : > { %v9013_v25 = vpop.f32.mrf.mxu1 }
0x327e   : > { %v5492_v60 = vpop.f32.mrf.mxu1 }
0x327f   : > { %v5498_v34 = vpack.c.bf16 %v5492_v60, %v5492_v60 }
0x3280   : > { %v9024_v20 = vpop.f32.mrf.mxu1 }
0x3281   : > { %9029 = vmatmul.mubr.msk.bf16.vlgmr.msra.gmra.mxu0 %vm1466_vm2, %v5498_v34 }
0x3282   : > { %9039 = vmatpush3.bf16.xpose.msra.mxu0 %v5593_v42  ;;  %v5495_v22 = vpop.f32.mrf.mxu1  ;;  %9040 = vmatprep.mubr.msk.bf16.mxu0 %vm10574_vm0, %v10573_v0 }
0x3283   : > { %9050 = vmatprep.subr.bf16.mxu0 %v10573_v0 }
0x3284   : > { %v9025_v17 = vpop.f32.mrf.mxu1 }
0x3289   : > { %9041 = vmatmul.mubr.msk.bf16.vlgmr.msra.gmra.mxu0 %vm1466_vm2, %v5586_v41 }
0x328a   : > { %9051 = vmatpush3.bf16.msra.mxu0 %v11713_v32  ;;  %9052 = vmatprep.mubr.msk.bf16.mxu0 %vm10574_vm0, %v10573_v0 }
0x328b   : > { %9062 = vmatprep.subr.bf16.mxu0 %v10573_v0 }
0x3339   : > { %v5579_v24 = vpop.f32.mrf.mxu1 }
0x333b   : > { %v9036_v26 = vpop.f32.mrf.mxu1 }
0x333d   : > { %v5582_v49 = vpop.f32.mrf.mxu1 }
0x333f   : > { %v9037_v27 = vpop.f32.mrf.mxu1 }
0x3341   : > { %v5536_v12 = vpop.f32.mrf.mxu0 }
0x3342   : > { %v11809_v6 = vadd.f32 %v5579_v24, %v5536_v12 }
0x3343   : > { %v9030_v21 = vpop.f32.mrf.mxu0 }
0x3345   : > { %v5539_v38 = vpop.f32.mrf.mxu0 }
0x3347   : > { %v9031_v39 = vpop.f32.mrf.mxu0 }
0x3349   : > { %v5629_v33 = vpop.f32.mrf.mxu0 }
0x334a   : > { %v5635_v29 = vsel %vm1466_vm2, %v5629_v33, -inf }
0x334b   : > { %5636 = vmax.xlane.f32.xlu0 %v5635_v29  ;;  %v9042_v32 = vpop.f32.mrf.mxu0 }
0x334d   : > { %v5632_v30 = vpop.f32.mrf.mxu0 }
0x334f   : > { %v9043_v31 = vpop.f32.mrf.mxu0 }
0x3361   : > { %5647 = vrot.lane.b32.xlu0 %v11765_v54, %s10579_s5 }
0x3365   : > { %5740 = vrot.lane.b32.xlu0 %v11730_v14, %s10580_s25 }
0x33d4   : > { %v5637_v51 = vpop.xlane.xlu0 %5636 }
0x33d5   : > { %v5638_v36 = vsub.f32 %v5629_v33, %v5637_v51 }
0x33d7   : > { %v5639_v8 = vmul.f32 1.442695, %v5638_v36 }
0x33d8   : > { %v5648_v44 = vpop.permute.xlu0 %5647 }
0x33d9   : > { %9719 = vpow2.f32 %v5639_v8  ;;  %v5653_v53 = vsel %vm1528_vm3, %v5648_v44, 0 }
0x33da   : > { %9045 = vmatpush3.bf16.msra.mxu1 %v5653_v53 }
0x33db   : > { %9056 = vmatprep.subr.bf16.mxu1 %v10573_v0 }
0x33dc   : > { %v5741_v2 = vpop.permute.xlu0 %5740 }
0x33e6   : > { %v9720_v45 = vpop.eup %9719 }
0x33e7   : > { %v5641_v46 = vsel %vm1466_vm2, %v9720_v45, 0.0 }
0x33e8   : > { %5642 = vadd.xlane.f32.xlu1 %v5641_v46 }
0x33f9   : > { %5742 = vrot.lane.b32.xlu1 %v11726_v3, %s10581_s1  ;;  %s10405_s1 = sshll.u32 %s10582_s22, 4  ;;  %s10406_s1 = int_to_ptr.vmem [resolvable:$false] %s10405_s1 }
0x33fa   : > { %s10407_s0 = scalar_lea.vmem %s10406_s1, 512 }
0x3471   : > { %v5643_v47 = vpop.xlane.xlu1 %5642 }
0x3472   : > { %9721 = vrcp.f32 %v5643_v47 }
0x3475   : > { %v5743_v4 = vpop.permute.xlu1 %5742 }
0x3476   : > { %v5748_v55 = vsel %vm1466_vm2, %v5743_v4, 0  ;;  %v9608_v4 = vld [vmem:[#allocation19 + $0x10] sm:$0xff]  }
0x347f   : > { %v9722_v14 = vpop.eup %9721 }
0x3480   : > { %v5645_v18 = vmul.f32 %v9722_v14, %v9720_v45 }
0x3482   : > { %v5646_v50 = vpack.c.bf16 %v5645_v18, %v5645_v18  ;;  %v9607_v18 = vld [vmem:[#allocation19 + $0x18] sm:$0xff]  }
0x3484   : > { %9047 = vmatmul.mubr.msk.bf16.vlgmr.msra.gmra.mxu1 %vm1466_vm2, %v5646_v50  ;;  %v9610_v50 = vld [vmem:[#allocation16 + $0x10] sm:$0xff]  }
0x3485   : > { %9057 = vmatpush3.bf16.xpose.msra.mxu1 %v5748_v55  ;;  %9058 = vmatprep.mubr.msk.bf16.mxu1 %vm10574_vm0, %v10573_v0 }
0x3486   : > { %9068 = vmatprep.subr.bf16.mxu1 %v10573_v0 }
0x348c   : > { %9059 = vmatmul.mubr.msk.bf16.vlgmr.msra.gmra.mxu1 %vm1466_vm2, %v5741_v2 }
0x348d   : > { %9069 = vmatpush3.bf16.msra.mxu1 %v11743_v28  ;;  %9070 = vmatprep.mubr.msk.bf16.mxu1 %vm10574_vm0, %v10573_v0  ;;  %v5905_v28 = vadd.f32 %v5903_v61, %v11603_v37 }
0x348e   : > { %9082 = vmatprep.subr.bf16.mxu1 %v9607_v18 }
0x348f   : > { %v5911_v7 = vsel %vm1347_vm1, %v5905_v28, 0.0 }
0x3544   : > { %v5689_v3 = vpop.f32.mrf.mxu1 }
0x3545   : > { %v5695_v57 = vpack.c.bf16 %v5689_v3, %v5689_v3 }
0x3546   : > { %v9048_v56 = vpop.f32.mrf.mxu1 }
0x3547   : > { %9053 = vmatmul.mubr.msk.bf16.vlgmr.msra.gmra.mxu0 %vm1466_vm2, %v5695_v57 }
0x3548   : > { %v5692_v13 = vpop.f32.mrf.mxu1  ;;  %9064 = vmatprep.mubr.msk.bf16.mxu0 %vm10574_vm0, %v10573_v0 }
0x354a   : > { %v9049_v62 = vpop.f32.mrf.mxu1 }
0x354c   : > { %v5784_v1 = vpop.f32.mrf.mxu1 }
0x354d   : > { %v5790_v5 = vsel %vm1466_vm2, %v5784_v1, -inf }
0x354e   : > { %5791 = vmax.xlane.f32.xlu1 %v5790_v5  ;;  %v9060_v63 = vpop.f32.mrf.mxu1  ;;  %v8253_v5 = vld [vmem:[#allocation14 + $0x1] ss:$0 sm:$0xff] }
0x3550   : > { %v5787_v23 = vpop.f32.mrf.mxu1 }
0x3552   : > { %5912 = vadd.xlane.f32.xlu1 %v5911_v7  ;;  %v9061_v9 = vpop.f32.mrf.mxu1 }
0x35d7   : > { %v5792_v11 = vpop.xlane.xlu1 %5791 }
0x35d8   : > { %v5793_v15 = vsub.f32 %v5784_v1, %v5792_v11 }
0x35da   : > { %v5794_v19 = vmul.f32 1.442695, %v5793_v15 }
0x35db   : > { %v5913_v21 = vpop.xlane.xlu1 %5912 }
0x35dc   : > { %9723 = vpow2.f32 %v5794_v19  ;;  %v5917_v38 = vmul.f32 0.03125, %v5913_v21  ;;  %v8258_v19 = vld [vmem:[#allocation20 + $0x1] ss:$0 sm:$0xff] }
0x35de   : > { %v5919_v32 = vsub.f32 %v5905_v28, %v5917_v38 }
0x35e0   : > { %v5921_v44 = vmul.f32 %v5919_v32, %v5919_v32 }
0x35e2   : > { %v5923_v53 = vsel %vm1347_vm1, %v5921_v44, 0.0 }
0x35e9   : > { %v9724_v25 = vpop.eup %9723 }
0x35ea   : > { %v5796_v35 = vsel %vm1466_vm2, %v9724_v25, 0.0 }
0x35eb   : > { %5797 = vadd.xlane.f32.xlu0 %v5796_v35 }
0x3601   : > { %5802 = vrot.lane.b32.xlu0 %v11765_v54, %s10580_s25 }
0x3607   : > { %v5733_v10 = vpop.f32.mrf.mxu0 }
0x3608   : > { %v5739_v37 = vadd.f32 %v5733_v10, %v11809_v6 }
0x3609   : > { %v9054_v60 = vpop.f32.mrf.mxu0 }
0x360b   : > { %v5736_v34 = vpop.f32.mrf.mxu0 }
0x360d   : > { %v9055_v20 = vpop.f32.mrf.mxu0 }
0x3674   : > { %v5798_v42 = vpop.xlane.xlu0 %5797 }
0x3675   : > { %9725 = vrcp.f32 %v5798_v42 }
0x3678   : > { %v5803_v22 = vpop.permute.xlu0 %5802 }
0x3679   : > { %v5808_v17 = vsel %vm1528_vm3, %v5803_v22, 0 }
0x367a   : > { %9063 = vmatpush3.bf16.msra.mxu0 %v5808_v17 }
0x367b   : > { %9074 = vmatprep.subr.bf16.mxu0 %v10573_v0 }
0x3682   : > { %v9726_v41 = vpop.eup %9725 }
0x3683   : > { %v5800_v24 = vmul.f32 %v9726_v41, %v9724_v25 }
0x3685   : > { %v5801_v26 = vpack.c.bf16 %v5800_v24, %v5800_v24 }
0x3687   : > { %9065 = vmatmul.mubr.msk.bf16.vlgmr.msra.gmra.mxu0 %vm1466_vm2, %v5801_v26 }
0x3688   : > { %9078 = vmatprep.mubr.msk.bf16.mxu0 %vm10574_vm0, %v10573_v0 }
0x3747   : > { %v5844_v54 = vpop.f32.mrf.mxu0 }
0x3748   : > { %v5850_v49 = vpack.c.bf16 %v5844_v54, %v5844_v54 }
0x3749   : > { %v9066_v27 = vpop.f32.mrf.mxu0 }
0x374a   : > { %9071 = vmatmul.mubr.msk.bf16.vlgmr.msra.gmra.mxu1 %vm1466_vm2, %v5850_v49 }
0x374b   : > { %v5847_v12 = vpop.f32.mrf.mxu0  ;;  %9086 = vmatprep.mubr.msk.bf16.mxu1 %vm1347_vm1, %v11328_v58  ;;  %9083 = vmatpush3.bf16.msra.mxu1 %v9607_v18  ;;  %v8263_v18 = vld [vmem:[#allocation23 + $0x1] ss:$0 sm:$0xff] }
0x374c   : > { %9084 = vmatprep.subr.bf16.mxu1 %v9608_v4 }
0x374d   : > { %v9067_v6 = vpop.f32.mrf.mxu0 }
0x374f   : > { %9085 = vmatpush3.bf16.msra.mxu1 %v9608_v4 }
0x3750   : > { %9098 = vmatprep.subr.bf16.mxu1 %v10573_v0 }
0x3752   : > { %9087 = vmatmul.mubr.msk.bf16.vlgmr.msra.gmra.mxu1 %vm1347_vm1, %v11330_v59  ;;  %v8252_v59 = vld [vmem:[#allocation13 + $0x1] ss:$0 sm:$0xff] }
0x3753   : > { %9100 = vmatprep.mubr.msk.bf16.mxu1 %vm10574_vm0, %v10573_v0 }
0x380a   : > { %v5888_v39 = vpop.f32.mrf.mxu1 }
0x380b   : > { %v5894_v33 = vadd.f32 %v5888_v39, %v5739_v37  ;;  %v9611_v39 = vld [vmem:[#allocation22 + $0x18] sm:$0xff]  }
0x380c   : > { %v9072_v29 = vpop.f32.mrf.mxu1 }
0x380d   : > { %v5904_v30 = vadd.f32 %v8251_v52, %v5894_v33  ;;  %v9612_v33 = vld [vmem:[#allocation22 + $0x10] sm:$0xff]  }
0x380e   : > { %v5891_v31 = vpop.f32.mrf.mxu1 }
0x380f   : > { %v5906_v51 = vadd.f32 %v5904_v30, %v11605_v43  ;;  %v9609_v43 = vld [vmem:[#allocation16 + $0x18] sm:$0xff]  }
0x3810   : > { %v9073_v36 = vpop.f32.mrf.mxu1  ;;  %9075 = vmatpush3.bf16.msra.mxu0 %v9609_v43 }
0x3811   : > { %v5914_v8 = vsel %vm1347_vm1, %v5906_v51, 0.0  ;;  %9076 = vmatprep.subr.bf16.mxu0 %v10573_v0 }
0x3812   : > { %5915 = vadd.xlane.f32.xlu1 %v5914_v8  ;;  %v9088_v25 = vpop.f32.mrf.mxu1 }
0x3813   : > { %v6093_v35 = vadd.f32 %v9088_v25, %v8258_v19 }
0x3814   : > { %9077 = vmatpush3.bf16.msra.mxu0 %v9610_v50  ;;  %v6084_v10 = vpop.f32.mrf.mxu1 }
0x3815   : > { %v6085_v60 = vadd.f32 %v8258_v19, %v6084_v10  ;;  %9090 = vmatprep.subr.bf16.mxu0 %v9611_v39 }
0x3816   : > { %5924 = vadd.xlane.f32.xlu1 %v5923_v53  ;;  %v9089_v37 = vpop.f32.mrf.mxu1 }
0x3817   : > { %v6096_v34 = vadd.f32 %v9089_v37, %v8258_v19 }
0x3818   : > { %v6087_v20 = vpop.f32.mrf.mxu1 }
0x3819   : > { %v11870_v42 = vpack.c.bf16 %v6096_v34, %v6093_v35  ;;  %v6088_v22 = vadd.f32 %v8258_v19, %v6087_v20  ;;  %v6393_v19 = vld [vmem:[#allocation25 + $0x14] sm:$0xf] }
0x381a   : > { %v11919_v25 = vsel %vm1528_vm3, %v6393_v19, 0 }
0x381b   : > { %v11872_v17 = vpack.c.bf16 %v6088_v22, %v6085_v60  ;;  %v6280_v60 = vld [vmem:[#allocation25 + $0x10] sm:$0xf] }
0x381c   : > { %v11925_v22 = vsel %vm1528_vm3, %v6280_v60, 0 }
0x389b   : > { %v5916_v58 = vpop.xlane.xlu1 %5915 }
0x389c   : > { %v5918_v45 = vmul.f32 0.03125, %v5916_v58 }
0x389e   : > { %v5920_v46 = vsub.f32 %v5906_v51, %v5918_v45 }
0x389f   : > { %v5925_v55 = vpop.xlane.xlu1 %5924 }
0x38a0   : > { %v5922_v47 = vmul.f32 %v5920_v46, %v5920_v46  ;;  %v5929_v2 = vmul.f32 0.03125, %v5925_v55 }
0x38a2   : > { %v5926_v14 = vsel %vm1347_vm1, %v5922_v47, 0.0  ;;  %v5931_v3 = vadd.f32 1e-05, %v5929_v2 }
0x38a3   : > { %5927 = vadd.xlane.f32.xlu1 %v5926_v14 }
0x38a4   : > { %9727 = vrsqrt.f32 %v5931_v3 }
0x38b1   : > { %v9728_v13 = vpop.eup %9727 }
0x38b2   : > { %v5935_v61 = vmul.f32 %v9728_v13, %v5919_v32 }
0x38b4   : > { %v5943_v62 = vmul.f32 %v8252_v59, %v5935_v61  ;;  %6285 = vrot.lane.b32.xlu1 %v11872_v17, %s10576_s10 }
0x38b6   : > { %v11859_v63 = vadd.f32 %v8253_v5, %v5943_v62 }
0x38b8   : > { %v5953_v9 = vadd.f32 %v11607_v40, %v11859_v63 }
0x392c   : > { %v5928_v57 = vpop.xlane.xlu1 %5927 }
0x392d   : > { %v5930_v52 = vmul.f32 0.03125, %v5928_v57 }
0x392f   : > { %v5932_v56 = vadd.f32 1e-05, %v5930_v52 }
0x3930   : > { %v6286_v54 = vpop.permute.xlu1 %6285 }
0x3931   : > { %9729 = vrsqrt.f32 %v5932_v56  ;;  %v6291_v21 = vsel %vm1466_vm2, %v6286_v54, 0 }
0x393e   : > { %v9730_v1 = vpop.eup %9729 }
0x393f   : > { %v5936_v28 = vmul.f32 %v9730_v1, %v5920_v46 }
0x3941   : > { %v5944_v23 = vmul.f32 %v8252_v59, %v5936_v28 }
0x3943   : > { %v11861_v7 = vadd.f32 %v8253_v5, %v5944_v23 }
0x3945   : > { %v5954_v11 = vadd.f32 %v11607_v40, %v11861_v7  ;;  %v6181_v40 = vsel %vm1466_vm2, %v11872_v17, 0 }
0x3946   : > { %9099 = vmatpush3.bf16.xpose.msra.mxu1 %v6181_v40 }
0x3947   : > { %v5955_v15 = vpack.c.bf16 %v5954_v11, %v5953_v9  ;;  %9110 = vmatprep.subr.bf16.mxu1 %v10573_v0 }
0x3949   : > { %9079 = vmatmul.mubr.msk.bf16.vlgmr.msra.gmra.mxu0 %vm1347_vm1, %v5955_v15 }
0x394a   : > { %9094 = vmatprep.mubr.msk.bf16.mxu0 %vm1347_vm1, %v11369_v48  ;;  %v8254_v48 = vld [vmem:[#allocation17 + $0x1] ss:$0 sm:$0xff]  ;;  %9091 = vmatpush3.bf16.msra.mxu0 %v9611_v39 }
0x394b   : > { %9092 = vmatprep.subr.bf16.mxu0 %v9612_v33 }
0x394e   : > { %9093 = vmatpush3.bf16.msra.mxu0 %v9612_v33 }
0x394f   : > { %9104 = vmatprep.subr.bf16.mxu0 %v10573_v0 }
0x3951   : > { %9095 = vmatmul.mubr.msk.bf16.vlgmr.msra.gmra.mxu0 %vm1347_vm1, %v11375_v16 }
0x3952   : > { %9106 = vmatprep.mubr.msk.bf16.mxu0 %vm10574_vm0, %v10573_v0 }
0x3a09   : > { %v6018_v41 = vpop.f32.mrf.mxu0 }
0x3a0a   : > { %v6019_v24 = vadd.f32 %v8254_v48, %v6018_v41 }
0x3a0b   : > { %v9080_v26 = vpop.f32.mrf.mxu0 }
0x3a0c   : > { %v6173_v49 = vmul.f32 0.35355338, %v6019_v24 }
0x3a0d   : > { %v6021_v27 = vpop.f32.mrf.mxu0 }
0x3a0e   : > { %v11879_v12 = vpack.c.bf16 %v6173_v49, %v6173_v49  ;;  %v11881_v6 = vadd.f32 %v8254_v48, %v6021_v27 }
0x3a0f   : > { %v9081_v38 = vpop.f32.mrf.mxu0 }
0x3a10   : > { %6282 = vrot.lane.b32.xlu0 %v11879_v12, %s10576_s10  ;;  %9101 = vmatmul.mubr.msk.bf16.vlgmr.msra.gmra.mxu1 %vm1466_vm2, %v11879_v12 }
0x3a11   : > { %9111 = vmatpush3.bf16.xpose.msra.mxu1 %v6291_v21  ;;  %9112 = vmatprep.mubr.msk.bf16.mxu1 %vm10574_vm0, %v10573_v0  ;;  %v9096_v14 = vpop.f32.mrf.mxu0 }
0x3a12   : > { %9122 = vmatprep.subr.bf16.mxu1 %v10573_v0  ;;  %v6167_v4 = vadd.f32 %v9096_v14, %v8263_v18 }
0x3a13   : > { %v6158_v43 = vpop.f32.mrf.mxu0 }
0x3a14   : > { %v6159_v55 = vadd.f32 %v8263_v18, %v6158_v43 }
0x3a15   : > { %v9097_v50 = vpop.f32.mrf.mxu0 }
0x3a16   : > { %v6170_v2 = vadd.f32 %v9097_v50, %v8263_v18 }
0x3a17   : > { %v6161_v3 = vpop.f32.mrf.mxu0 }
0x3a18   : > { %v11903_v57 = vpack.c.bf16 %v6170_v2, %v6167_v4  ;;  %v6162_v52 = vadd.f32 %v8263_v18, %v6161_v3 }
0x3a1a   : > { %v11905_v56 = vpack.c.bf16 %v6162_v52, %v6159_v55 }
0x3a1c   : > { %9105 = vmatpush3.bf16.msra.mxu0 %v11905_v56 }
0x3a1d   : > { %9116 = vmatprep.subr.bf16.mxu0 %v10573_v0 }
0x3a82   : > { %v6283_v29 = vpop.permute.xlu0 %6282 }
0x3a83   : > { %9113 = vmatmul.mubr.msk.bf16.vlgmr.msra.gmra.mxu1 %vm1466_vm2, %v6283_v29 }
0x3a84   : > { %9124 = vmatprep.mubr.msk.bf16.mxu1 %vm10574_vm0, %v10573_v0  ;;  %9123 = vmatpush3.bf16.msra.mxu1 %v11919_v25 }
0x3a85   : > { %9134 = vmatprep.subr.bf16.mxu1 %v10573_v0 }
0x3ad0   : > { %v6217_v32 = vpop.f32.mrf.mxu1 }
0x3ad1   : > { %v6223_v30 = vsel %vm3051_vm4, %v6217_v32, -inf }
0x3ad2   : > { %6224 = vmax.xlane.f32.xlu0 %v6223_v30  ;;  %v9102_v31 = vpop.f32.mrf.mxu1 }
0x3ad4   : > { %v6220_v51 = vpop.f32.mrf.mxu1 }
0x3ad6   : > { %v9103_v36 = vpop.f32.mrf.mxu1 }
0x3b43   : > { %v6327_v8 = vpop.f32.mrf.mxu1 }
0x3b44   : > { %v6333_v44 = vsel %vm3051_vm4, %v6327_v8, -inf }
0x3b45   : > { %6334 = vmax.xlane.f32.xlu1 %v6333_v44  ;;  %v9114_v16 = vpop.f32.mrf.mxu1 }
0x3b47   : > { %v6330_v53 = vpop.f32.mrf.mxu1 }
0x3b49   : > { %v9115_v58 = vpop.f32.mrf.mxu1 }
0x3b56   : > { %6488 = vrot.lane.b32.xlu1 %v11872_v17, %s10579_s5 }
0x3b5b   : > { %v6225_v45 = vpop.xlane.xlu0 %6224 }
0x3b5c   : > { %v6226_v46 = vsub.f32 %v6217_v32, %v6225_v45 }
0x3b5e   : > { %v6227_v47 = vmul.f32 1.442695, %v6226_v46 }
0x3b60   : > { %9731 = vpow2.f32 %v6227_v47 }
0x3b6d   : > { %v9732_v13 = vpop.eup %9731 }
0x3b6e   : > { %v6229_v61 = vsel %vm3051_vm4, %v9732_v13, 0.0 }
0x3b6f   : > { %6230 = vadd.xlane.f32.xlu0 %v6229_v61 }
0x3bce   : > { %v6335_v59 = vpop.xlane.xlu1 %6334 }
0x3bcf   : > { %v6336_v62 = vsub.f32 %v6327_v8, %v6335_v59  ;;  %v6595_v59 = vld [vmem:[#allocation25 + $0x18] sm:$0xf] }
0x3bd1   : > { %v6337_v1 = vmul.f32 1.442695, %v6336_v62  ;;  %v11965_v62 = vsel %vm1528_vm3, %v6595_v59, 0 }
0x3bd2   : > { %v6489_v54 = vpop.permute.xlu1 %6488 }
0x3bd3   : > { %9733 = vpow2.f32 %v6337_v1  ;;  %v6494_v38 = vsel %vm1466_vm2, %v6489_v54, 0 }
0x3be0   : > { %v9734_v5 = vpop.eup %9733 }
0x3be1   : > { %v6339_v28 = vsel %vm3051_vm4, %v9734_v5, 0.0 }
0x3be2   : > { %6340 = vadd.xlane.f32.xlu0 %v6339_v28 }
0x3bf8   : > { %v6231_v23 = vpop.xlane.xlu0 %6230  ;;  %6346 = vrot.lane.b32.xlu0 %v11905_v56, %s10576_s10 }
0x3bf9   : > { %9735 = vrcp.f32 %v6231_v23 }
0x3bfc   : > { %6486 = vrot.lane.b32.xlu0 %v11879_v12, %s10579_s5 }
0x3c06   : > { %v9736_v9 = vpop.eup %9735 }
0x3c07   : > { %v6233_v11 = vmul.f32 %v9736_v9, %v9732_v13 }
0x3c09   : > { %v6234_v15 = vpack.c.bf16 %v6233_v11, %v6233_v11 }
0x3c0b   : > { %9107 = vmatmul.mubr.msk.bf16.vlgmr.msra.gmra.mxu0 %vm3051_vm4, %v6234_v15 }
0x3c0c   : > { %9118 = vmatprep.mubr.msk.bf16.mxu0 %vm10574_vm0, %v10573_v0 }
0x3c6b   : > { %v6341_v35 = vpop.xlane.xlu0 %6340 }
0x3c6c   : > { %9737 = vrcp.f32 %v6341_v35 }
0x3c6f   : > { %v6347_v10 = vpop.permute.xlu0 %6346 }
0x3c70   : > { %9117 = vmatpush3.bf16.msra.mxu0 %v6347_v10 }
0x3c71   : > { %9128 = vmatprep.subr.bf16.mxu0 %v10573_v0 }
0x3c73   : > { %v6487_v29 = vpop.permute.xlu0 %6486 }
0x3c79   : > { %v9738_v37 = vpop.eup %9737 }
0x3c7a   : > { %v6343_v34 = vmul.f32 %v9738_v37, %v9734_v5  ;;  %v6800_v37 = vmul.f32 0.35355338, %v11881_v6 }
0x3c7c   : > { %v6344_v20 = vpack.c.bf16 %v6343_v34, %v6343_v34  ;;  %v11976_v60 = vpack.c.bf16 %v6800_v37, %v6800_v37 }
0x3c7e   : > { %9119 = vmatmul.mubr.msk.bf16.vlgmr.msra.gmra.mxu0 %vm3051_vm4, %v6344_v20 }
0x3c7f   : > { %9129 = vmatpush3.bf16.msra.mxu0 %v11925_v22  ;;  %9130 = vmatprep.mubr.msk.bf16.mxu0 %vm10574_vm0, %v10573_v0 }
0x3c80   : > { %9140 = vmatprep.subr.bf16.mxu0 %v10573_v0 }
0x3ccb   : > { %v6272_v40 = vpop.f32.mrf.mxu0 }
0x3ccc   : > { %v6278_v48 = vpack.c.bf16 %v6272_v40, %v6272_v40 }
0x3ccd   : > { %v9108_v41 = vpop.f32.mrf.mxu0 }
0x3cce   : > { %9131 = vmatmul.mubr.msk.bf16.vlgmr.msra.gmra.mxu0 %vm1466_vm2, %v6278_v48 }
0x3ccf   : > { %v6275_v24 = vpop.f32.mrf.mxu0  ;;  %9142 = vmatprep.mubr.msk.bf16.mxu0 %vm10574_vm0, %v10573_v0 }
0x3cd1   : > { %v9109_v26 = vpop.f32.mrf.mxu0 }
0x3d3e   : > { %v6386_v49 = vpop.f32.mrf.mxu0 }
0x3d3f   : > { %v6392_v27 = vpack.c.bf16 %v6386_v49, %v6386_v49 }
0x3d40   : > { %v9120_v21 = vpop.f32.mrf.mxu0 }
0x3d41   : > { %9125 = vmatmul.mubr.msk.bf16.vlgmr.msra.gmra.mxu1 %vm1466_vm2, %v6392_v27  ;;  %v6752_v21 = vld [vmem:[#allocation25 + $0x1c] sm:$0xf] }
0x3d42   : > { %9135 = vmatpush3.bf16.xpose.msra.mxu1 %v6494_v38  ;;  %v6389_v39 = vpop.f32.mrf.mxu0  ;;  %9136 = vmatprep.mubr.msk.bf16.mxu1 %vm10574_vm0, %v10573_v0  ;;  %v11989_v38 = vsel %vm1528_vm3, %v6752_v21, 0 }
0x3d43   : > { %9146 = vmatprep.subr.bf16.mxu1 %v10573_v0 }
0x3d44   : > { %v9121_v33 = vpop.f32.mrf.mxu0 }
0x3d49   : > { %9137 = vmatmul.mubr.msk.bf16.vlgmr.msra.gmra.mxu1 %vm1466_vm2, %v6487_v29 }
0x3d4a   : > { %9148 = vmatprep.mubr.msk.bf16.mxu1 %vm10574_vm0, %v10573_v0  ;;  %9147 = vmatpush3.bf16.msra.mxu1 %v11965_v62 }
0x3d4b   : > { %9158 = vmatprep.subr.bf16.mxu1 %v10573_v0 }
0x3d8e   : > { %v11943_v32 = vpop.f32.mrf.mxu0 }
0x3d90   : > { %v9132_v30 = vpop.f32.mrf.mxu0 }
0x3d92   : > { %v6483_v31 = vpop.f32.mrf.mxu0 }
0x3d94   : > { %v9133_v51 = vpop.f32.mrf.mxu0 }
0x3e01   : > { %v11945_v36 = vpop.f32.mrf.mxu1 }
0x3e02   : > { %v6481_v6 = vadd.f32 %v11943_v32, %v11945_v36  ;;  %v6808_v32 = vsel %vm1466_vm2, %v11870_v42, 0 }
0x3e03   : > { %v9126_v8 = vpop.f32.mrf.mxu1 }
0x3e05   : > { %v6437_v44 = vpop.f32.mrf.mxu1 }
0x3e07   : > { %v9127_v16 = vpop.f32.mrf.mxu1 }
0x3e09   : > { %v6530_v53 = vpop.f32.mrf.mxu1 }
0x3e0a   : > { %v6536_v58 = vsel %vm3051_vm4, %v6530_v53, -inf }
0x3e0b   : > { %6537 = vmax.xlane.f32.xlu1 %v6536_v58  ;;  %v9138_v45 = vpop.f32.mrf.mxu1 }
0x3e0d   : > { %v6533_v46 = vpop.f32.mrf.mxu1 }
0x3e0f   : > { %v9139_v47 = vpop.f32.mrf.mxu1 }
0x3e1c   : > { %6645 = vrot.lane.b32.xlu1 %v11872_v17, %s10580_s25 }
0x3e20   : > { %6643 = vrot.lane.b32.xlu1 %v11879_v12, %s10580_s25 }
0x3e94   : > { %v6538_v14 = vpop.xlane.xlu1 %6537 }
0x3e95   : > { %v6539_v18 = vsub.f32 %v6530_v53, %v6538_v14 }
0x3e97   : > { %v6540_v4 = vmul.f32 1.442695, %v6539_v18 }
0x3e98   : > { %v6646_v12 = vpop.permute.xlu1 %6645 }
0x3e99   : > { %9739 = vpow2.f32 %v6540_v4  ;;  %v6651_v13 = vsel %vm1466_vm2, %v6646_v12, 0 }
0x3e9c   : > { %v6644_v61 = vpop.permute.xlu1 %6643 }
0x3ea6   : > { %v9740_v43 = vpop.eup %9739 }
0x3ea7   : > { %v6542_v50 = vsel %vm3051_vm4, %v9740_v43, 0.0 }
0x3ea8   : > { %6543 = vadd.xlane.f32.xlu0 %v6542_v50 }
0x3ebe   : > { %6548 = vrot.lane.b32.xlu0 %v11905_v56, %s10579_s5 }
0x3f31   : > { %v6544_v55 = vpop.xlane.xlu0 %6543 }
0x3f32   : > { %9741 = vrcp.f32 %v6544_v55 }
0x3f35   : > { %v6549_v2 = vpop.permute.xlu0 %6548 }
0x3f36   : > { %9141 = vmatpush3.bf16.msra.mxu0 %v6549_v2 }
0x3f37   : > { %9152 = vmatprep.subr.bf16.mxu0 %v10573_v0 }
0x3f3f   : > { %v9742_v17 = vpop.eup %9741 }
0x3f40   : > { %v6546_v3 = vmul.f32 %v9742_v17, %v9740_v43 }
0x3f42   : > { %v6547_v52 = vpack.c.bf16 %v6546_v3, %v6546_v3 }
0x3f44   : > { %9143 = vmatmul.mubr.msk.bf16.vlgmr.msra.gmra.mxu0 %vm3051_vm4, %v6547_v52 }
0x3f45   : > { %9153 = vmatpush3.bf16.xpose.msra.mxu0 %v6651_v13  ;;  %9154 = vmatprep.mubr.msk.bf16.mxu0 %vm10574_vm0, %v10573_v0 }
0x3f46   : > { %9164 = vmatprep.subr.bf16.mxu0 %v10573_v0 }
0x3f4c   : > { %9155 = vmatmul.mubr.msk.bf16.vlgmr.msra.gmra.mxu0 %vm1466_vm2, %v6644_v61 }
0x3f4d   : > { %9166 = vmatprep.mubr.msk.bf16.mxu0 %vm10574_vm0, %v10573_v0  ;;  %9165 = vmatpush3.bf16.msra.mxu0 %v11989_v38 }
0x3f4e   : > { %9176 = vmatprep.subr.bf16.mxu0 %v10573_v0 }
0x4004   : > { %v6588_v1 = vpop.f32.mrf.mxu0 }
0x4005   : > { %v6594_v5 = vpack.c.bf16 %v6588_v1, %v6588_v1 }
0x4006   : > { %v9144_v28 = vpop.f32.mrf.mxu0 }
0x4007   : > { %9149 = vmatmul.mubr.msk.bf16.vlgmr.msra.gmra.mxu1 %vm1466_vm2, %v6594_v5 }
0x4008   : > { %v6591_v23 = vpop.f32.mrf.mxu0  ;;  %9160 = vmatprep.mubr.msk.bf16.mxu1 %vm10574_vm0, %v10573_v0 }
0x400a   : > { %v9145_v9 = vpop.f32.mrf.mxu0 }
0x400c   : > { %v6687_v11 = vpop.f32.mrf.mxu0 }
0x400d   : > { %v6693_v15 = vsel %vm3051_vm4, %v6687_v11, -inf }
0x400e   : > { %6694 = vmax.xlane.f32.xlu0 %v6693_v15  ;;  %v9156_v19 = vpop.f32.mrf.mxu0 }
0x4010   : > { %v6690_v35 = vpop.f32.mrf.mxu0 }
0x4012   : > { %v9157_v10 = vpop.f32.mrf.mxu0 }
0x4024   : > { %6705 = vrot.lane.b32.xlu0 %v11905_v56, %s10580_s25 }
0x4028   : > { %6907 = vrot.lane.b32.xlu0 %v11976_v60, %s10576_s10 }
0x4097   : > { %v6695_v34 = vpop.xlane.xlu0 %6694 }
0x4098   : > { %v6696_v20 = vsub.f32 %v6687_v11, %v6695_v34 }
0x409a   : > { %v6697_v40 = vmul.f32 1.442695, %v6696_v20 }
0x409b   : > { %v6706_v48 = vpop.permute.xlu0 %6705 }
0x409c   : > { %9743 = vpow2.f32 %v6697_v40  ;;  %9159 = vmatpush3.bf16.msra.mxu1 %v6706_v48 }
0x409d   : > { %9170 = vmatprep.subr.bf16.mxu1 %v10573_v0 }
0x409f   : > { %v6908_v36 = vpop.permute.xlu0 %6907 }
0x40a9   : > { %v9744_v41 = vpop.eup %9743 }
0x40aa   : > { %v6699_v24 = vsel %vm3051_vm4, %v9744_v41, 0.0 }
0x40ab   : > { %6700 = vadd.xlane.f32.xlu1 %v6699_v24 }
0x40bc   : > { %6910 = vrot.lane.b32.xlu1 %v11870_v42, %s10576_s10 }
0x40c7   : > { %v6636_v56 = vpop.f32.mrf.mxu1 }
0x40c8   : > { %v11986_v26 = vadd.f32 %v6636_v56, %v6481_v6 }
0x40c9   : > { %v9150_v54 = vpop.f32.mrf.mxu1 }
0x40cb   : > { %v6639_v49 = vpop.f32.mrf.mxu1 }
0x40cd   : > { %v9151_v27 = vpop.f32.mrf.mxu1 }
0x4134   : > { %v6701_v39 = vpop.xlane.xlu1 %6700 }
0x4135   : > { %9745 = vrcp.f32 %v6701_v39 }
0x4138   : > { %v6911_v31 = vpop.permute.xlu1 %6910 }
0x4139   : > { %v6916_v51 = vsel %vm1466_vm2, %v6911_v31, 0 }
0x4142   : > { %v9746_v33 = vpop.eup %9745 }
0x4143   : > { %v6703_v29 = vmul.f32 %v9746_v33, %v9744_v41 }
0x4145   : > { %v6704_v30 = vpack.c.bf16 %v6703_v29, %v6703_v29 }
0x4147   : > { %9161 = vmatmul.mubr.msk.bf16.vlgmr.msra.gmra.mxu1 %vm3051_vm4, %v6704_v30 }
0x4148   : > { %9171 = vmatpush3.bf16.xpose.msra.mxu1 %v6808_v32  ;;  %9172 = vmatprep.mubr.msk.bf16.mxu1 %vm10574_vm0, %v10573_v0 }
0x4149   : > { %9182 = vmatprep.subr.bf16.mxu1 %v10573_v0 }
0x414f   : > { %9173 = vmatmul.mubr.msk.bf16.vlgmr.msra.gmra.mxu1 %vm1466_vm2, %v11976_v60 }
0x4150   : > { %9183 = vmatpush3.bf16.xpose.msra.mxu1 %v6916_v51  ;;  %9184 = vmatprep.mubr.msk.bf16.mxu1 %vm10574_vm0, %v10573_v0 }
0x4151   : > { %9194 = vmatprep.subr.bf16.mxu1 %v10573_v0 }
0x4157   : > { %9185 = vmatmul.mubr.msk.bf16.vlgmr.msra.gmra.mxu1 %vm1466_vm2, %v6908_v36 }
0x4158   : > { %9195 = vmatpush3.bf16.msra.mxu1 %v11919_v25  ;;  %9196 = vmatprep.mubr.msk.bf16.mxu1 %vm10574_vm0, %v10573_v0 }
0x4159   : > { %9206 = vmatprep.subr.bf16.mxu1 %v10573_v0 }
0x4207   : > { %v6745_v8 = vpop.f32.mrf.mxu1 }
0x4208   : > { %v6751_v44 = vpack.c.bf16 %v6745_v8, %v6745_v8 }
0x4209   : > { %v9162_v16 = vpop.f32.mrf.mxu1 }
0x420a   : > { %9167 = vmatmul.mubr.msk.bf16.vlgmr.msra.gmra.mxu0 %vm1466_vm2, %v6751_v44 }
0x420b   : > { %9177 = vmatpush3.bf16.msra.mxu0 %v11903_v57  ;;  %v6748_v53 = vpop.f32.mrf.mxu1  ;;  %9178 = vmatprep.mubr.msk.bf16.mxu0 %vm10574_vm0, %v10573_v0 }
0x420c   : > { %9188 = vmatprep.subr.bf16.mxu0 %v10573_v0 }
0x420d   : > { %v9163_v58 = vpop.f32.mrf.mxu1 }
0x420f   : > { %v6844_v25 = vpop.f32.mrf.mxu1 }
0x4210   : > { %v6850_v45 = vsel %vm3051_vm4, %v6844_v25, -inf }
0x4211   : > { %6851 = vmax.xlane.f32.xlu1 %v6850_v45  ;;  %v9174_v46 = vpop.f32.mrf.mxu1 }
0x4213   : > { %v6847_v47 = vpop.f32.mrf.mxu1 }
0x4215   : > { %v9175_v14 = vpop.f32.mrf.mxu1 }
0x4217   : > { %v6952_v18 = vpop.f32.mrf.mxu1 }
0x4218   : > { %v6958_v4 = vsel %vm3051_vm4, %v6952_v18, -inf }
0x4219   : > { %6959 = vmax.xlane.f32.xlu0 %v6958_v4  ;;  %v9186_v43 = vpop.f32.mrf.mxu1 }
0x421b   : > { %v6955_v50 = vpop.f32.mrf.mxu1 }
0x421d   : > { %v9187_v55 = vpop.f32.mrf.mxu1 }
0x429a   : > { %v6852_v2 = vpop.xlane.xlu1 %6851 }
0x429b   : > { %v6853_v17 = vsub.f32 %v6844_v25, %v6852_v2 }
0x429d   : > { %v6854_v3 = vmul.f32 1.442695, %v6853_v17 }
0x429f   : > { %9747 = vpow2.f32 %v6854_v3 }
0x42a2   : > { %v6960_v12 = vpop.xlane.xlu0 %6959 }
0x42a3   : > { %v6961_v52 = vsub.f32 %v6952_v18, %v6960_v12 }
0x42a5   : > { %v6962_v13 = vmul.f32 1.442695, %v6961_v52 }
0x42a7   : > { %9749 = vpow2.f32 %v6962_v13 }
0x42ac   : > { %v9748_v61 = vpop.eup %9747 }
0x42ad   : > { %v6856_v59 = vsel %vm3051_vm4, %v9748_v61, 0.0 }
0x42ae   : > { %6857 = vadd.xlane.f32.xlu0 %v6856_v59  ;;  %v8292_v59 = vld [vmem:[#allocation26 + $0x1] ss:$0 sm:$0xff] }
0x42b4   : > { %v9750_v1 = vpop.eup %9749 }
0x42b5   : > { %v6964_v5 = vsel %vm3051_vm4, %v9750_v1, 0.0 }
0x42b6   : > { %6965 = vadd.xlane.f32.xlu1 %v6964_v5 }
0x42c4   : > { %6971 = vrot.lane.b32.xlu0 %v11903_v57, %s10576_s10  ;;  %s1287_s10 = scalar_lea.vmem [#allocation40], %s8121_s23 }
0x42c5   : > { %s7734_s18 = sshll.u32 %s1287_s10, 4  ;;  %s12118_s18 = int_to_ptr.vmem [resolvable:$true] %s7734_s18 }
0x42c6   : > { %p10408_p6 = scmp.lt.s32.totalorder %s12118_s18, %s10406_s1 }
0x42c7   : > { %7106 = vrot.lane.b32.xlu1 %v11870_v42, %s10579_s5 }
0x42ca   : > { %v6793_v28 = vpop.f32.mrf.mxu0 }
0x42cb   : > { %v12024_v23 = vadd.f32 %v6793_v28, %v11986_v26  ;;  %7104 = vrot.lane.b32.xlu1 %v11976_v60, %s10579_s5 }
0x42cc   : > { %v9168_v9 = vpop.f32.mrf.mxu0 }
0x42cd   : > { %v7418_v28 = vadd.f32 %v8292_v59, %v12024_v23 }
0x42ce   : > { %v6796_v11 = vpop.f32.mrf.mxu0 }
0x42d0   : > { %v9169_v15 = vpop.f32.mrf.mxu0 }
0x42d1   : > { %v7420_v15 = vadd.f32 %v7418_v28, %v11859_v63 }
0x4337   : > { %v6858_v19 = vpop.xlane.xlu0 %6857 }
0x4338   : > { %9751 = vrcp.f32 %v6858_v19 }
0x433b   : > { %v6972_v20 = vpop.permute.xlu0 %6971 }
0x433f   : > { %v6966_v35 = vpop.xlane.xlu1 %6965 }
0x4340   : > { %9753 = vrcp.f32 %v6966_v35 }
0x4343   : > { %v7107_v49 = vpop.permute.xlu1 %7106 }
0x4345   : > { %v9752_v10 = vpop.eup %9751 }
0x4346   : > { %v6860_v37 = vmul.f32 %v9752_v10, %v9748_v61  ;;  %v7426_v10 = vsel %vm1347_vm1, %v7420_v15, 0.0 }
0x4347   : > { %v7105_v30 = vpop.permute.xlu1 %7104 }
0x4348   : > { %v6861_v34 = vpack.c.bf16 %v6860_v37, %v6860_v37 }
0x434a   : > { %9179 = vmatmul.mubr.msk.bf16.vlgmr.msra.gmra.mxu0 %vm3051_vm4, %v6861_v34 }
0x434b   : > { %9189 = vmatpush3.bf16.msra.mxu0 %v6972_v20  ;;  %9190 = vmatprep.mubr.msk.bf16.mxu0 %vm10574_vm0, %v10573_v0 }
0x434c   : > { %9200 = vmatprep.subr.bf16.mxu0 %v10573_v0 }
0x434d   : > { %v9754_v40 = vpop.eup %9753 }
0x434e   : > { %v6968_v48 = vmul.f32 %v9754_v40, %v9750_v1 }
0x4350   : > { %v6969_v41 = vpack.c.bf16 %v6968_v48, %v6968_v48 }
0x4352   : > { %9191 = vmatmul.mubr.msk.bf16.vlgmr.msra.gmra.mxu0 %vm3051_vm4, %v6969_v41 }
0x4353   : > { %9201 = vmatpush3.bf16.msra.mxu0 %v11925_v22  ;;  %9202 = vmatprep.mubr.msk.bf16.mxu0 %vm10574_vm0, %v10573_v0  ;;  %v7112_v22 = vsel %vm1466_vm2, %v7107_v49, 0 }
0x4354   : > { %9212 = vmatprep.subr.bf16.mxu0 %v10573_v0 }
0x440a   : > { %v6899_v24 = vpop.f32.mrf.mxu0 }
0x440b   : > { %v6905_v6 = vpack.c.bf16 %v6899_v24, %v6899_v24 }
0x440c   : > { %v9180_v56 = vpop.f32.mrf.mxu0 }
0x440d   : > { %9203 = vmatmul.mubr.msk.bf16.vlgmr.msra.gmra.mxu0 %vm1466_vm2, %v6905_v6 }
0x440e   : > { %v6902_v26 = vpop.f32.mrf.mxu0  ;;  %9214 = vmatprep.mubr.msk.bf16.mxu0 %vm10574_vm0, %v10573_v0 }
0x4410   : > { %v9181_v54 = vpop.f32.mrf.mxu0 }
0x4412   : > { %v7011_v27 = vpop.f32.mrf.mxu0 }
0x4413   : > { %v7017_v21 = vpack.c.bf16 %v7011_v27, %v7011_v27 }
0x4414   : > { %v9192_v39 = vpop.f32.mrf.mxu0 }
0x4415   : > { %9197 = vmatmul.mubr.msk.bf16.vlgmr.msra.gmra.mxu1 %vm1466_vm2, %v7017_v21 }
0x4416   : > { %9207 = vmatpush3.bf16.xpose.msra.mxu1 %v7112_v22  ;;  %v7014_v33 = vpop.f32.mrf.mxu0  ;;  %9208 = vmatprep.mubr.msk.bf16.mxu1 %vm10574_vm0, %v10573_v0 }
0x4417   : > { %9218 = vmatprep.subr.bf16.mxu1 %v10573_v0 }
0x4418   : > { %v9193_v29 = vpop.f32.mrf.mxu0 }
0x441d   : > { %9209 = vmatmul.mubr.msk.bf16.vlgmr.msra.gmra.mxu1 %vm1466_vm2, %v7105_v30 }
0x441e   : > { %9219 = vmatpush3.bf16.msra.mxu1 %v11965_v62  ;;  %9220 = vmatprep.mubr.msk.bf16.mxu1 %vm10574_vm0, %v10573_v0 }
0x441f   : > { %9230 = vmatprep.subr.bf16.mxu1 %v10573_v0 }
0x44cd   : > { %v7098_v32 = vpop.f32.mrf.mxu0 }
0x44cf   : > { %v9204_v31 = vpop.f32.mrf.mxu0 }
0x44d1   : > { %v7101_v51 = vpop.f32.mrf.mxu0 }
0x44d3   : > { %v9205_v36 = vpop.f32.mrf.mxu0 }
0x44d5   : > { %v7055_v8 = vpop.f32.mrf.mxu1 }
0x44d6   : > { %v12050_v44 = vadd.f32 %v7098_v32, %v7055_v8 }
0x44d7   : > { %v9198_v16 = vpop.f32.mrf.mxu1 }
0x44d9   : > { %v7058_v53 = vpop.f32.mrf.mxu1 }
0x44db   : > { %v9199_v58 = vpop.f32.mrf.mxu1 }
0x44dd   : > { %v7148_v25 = vpop.f32.mrf.mxu1 }
0x44de   : > { %v7154_v45 = vsel %vm3051_vm4, %v7148_v25, -inf }
0x44df   : > { %7155 = vmax.xlane.f32.xlu0 %v7154_v45  ;;  %v9210_v62 = vpop.f32.mrf.mxu1 }
0x44e1   : > { %v7151_v46 = vpop.f32.mrf.mxu1 }
0x44e3   : > { %v9211_v47 = vpop.f32.mrf.mxu1 }
0x44f5   : > { %7166 = vrot.lane.b32.xlu0 %v11903_v57, %s10579_s5  ;;  %s12121_s5 = scalar_lea.sflag [#allocation4], %s1285_s26 }
0x44f9   : > { %7257 = vrot.lane.b32.xlu0 %v11976_v60, %s10580_s25 }
0x4568   : > { %v7156_v14 = vpop.xlane.xlu0 %7155 }
0x4569   : > { %v7157_v18 = vsub.f32 %v7148_v25, %v7156_v14 }
0x456b   : > { %v7158_v4 = vmul.f32 1.442695, %v7157_v18 }
0x456c   : > { %v7167_v43 = vpop.permute.xlu0 %7166 }
0x456d   : > { %9755 = vpow2.f32 %v7158_v4  ;;  %9213 = vmatpush3.bf16.msra.mxu0 %v7167_v43  ;;  %v9613_v43 = vld [vmem:[#allocation31 + $0x18] sm:$0xff]  }
0x456e   : > { %9224 = vmatprep.subr.bf16.mxu0 %v10573_v0 }
0x4570   : > { %v7258_v13 = vpop.permute.xlu0 %7257 }
0x457a   : > { %v9756_v50 = vpop.eup %9755 }
0x457b   : > { %v7160_v55 = vsel %vm3051_vm4, %v9756_v50, 0.0 }
0x457c   : > { %7161 = vadd.xlane.f32.xlu1 %v7160_v55 }
0x458d   : > { %7259 = vrot.lane.b32.xlu1 %v11870_v42, %s10580_s25 }
0x4605   : > { %v7162_v2 = vpop.xlane.xlu1 %7161 }
0x4606   : > { %9757 = vrcp.f32 %v7162_v2 }
0x4609   : > { %v7260_v60 = vpop.permute.xlu1 %7259 }
0x460a   : > { %v7265_v52 = vsel %vm1466_vm2, %v7260_v60, 0 }
0x4613   : > { %v9758_v17 = vpop.eup %9757 }
0x4614   : > { %v7164_v3 = vmul.f32 %v9758_v17, %v9756_v50  ;;  %v9614_v50 = vld [vmem:[#allocation31 + $0x10] sm:$0xff]  }
0x4616   : > { %v7165_v12 = vpack.c.bf16 %v7164_v3, %v7164_v3 }
0x4618   : > { %9215 = vmatmul.mubr.msk.bf16.vlgmr.msra.gmra.mxu0 %vm3051_vm4, %v7165_v12 }
0x4619   : > { %9225 = vmatpush3.bf16.xpose.msra.mxu0 %v7265_v52  ;;  %9226 = vmatprep.mubr.msk.bf16.mxu0 %vm10574_vm0, %v10573_v0 }
0x461a   : > { %9236 = vmatprep.subr.bf16.mxu0 %v10573_v0 }
0x4620   : > { %9227 = vmatmul.mubr.msk.bf16.vlgmr.msra.gmra.mxu0 %vm1466_vm2, %v7258_v13 }
0x4621   : > { %9237 = vmatpush3.bf16.msra.mxu0 %v11989_v38  ;;  %9238 = vmatprep.mubr.msk.bf16.mxu0 %vm10574_vm0, %v10573_v0 }
0x4622   : > { %9250 = vmatprep.subr.bf16.mxu0 %v10573_v0 }
0x46d8   : > { %v7206_v42 = vpop.f32.mrf.mxu0 }
0x46d9   : > { %v7212_v61 = vpack.c.bf16 %v7206_v42, %v7206_v42  ;;  %v8293_v42 = vld [vmem:[#allocation28 + $0x1] ss:$0 sm:$0xff] }
0x46da   : > { %v9216_v1 = vpop.f32.mrf.mxu0 }
0x46db   : > { %9221 = vmatmul.mubr.msk.bf16.vlgmr.msra.gmra.mxu1 %vm1466_vm2, %v7212_v61 }
0x46dc   : > { %v7209_v5 = vpop.f32.mrf.mxu0  ;;  %9232 = vmatprep.mubr.msk.bf16.mxu1 %vm10574_vm0, %v10573_v0 }
0x46dd   : > { %v8294_v5 = vld [vmem:[#allocation29 + $0x1] ss:$0 sm:$0xff] }
0x46de   : > { %v9217_v9 = vpop.f32.mrf.mxu0 }
0x46e0   : > { %v7301_v11 = vpop.f32.mrf.mxu0 }
0x46e1   : > { %v7307_v38 = vsel %vm3051_vm4, %v7301_v11, -inf }
0x46e2   : > { %7308 = vmax.xlane.f32.xlu1 %v7307_v38  ;;  %v9228_v19 = vpop.f32.mrf.mxu0 }
0x46e3   : > { %v9617_v19 = vld [vmem:[%s12254_s28 + $0x28] sm:$0xff]  }
0x46e4   : > { %v7304_v35 = vpop.f32.mrf.mxu0 }
0x46e5   : > { %v9618_v35 = vld [vmem:[%s12254_s28 + $0x20] sm:$0xff]  }
0x46e6   : > { %7427 = vadd.xlane.f32.xlu1 %v7426_v10  ;;  %v9229_v37 = vpop.f32.mrf.mxu0  ;;  %v8295_v10 = vld [vmem:[#allocation32 + $0x1] ss:$0 sm:$0xff] }
0x476b   : > { %v7309_v34 = vpop.xlane.xlu1 %7308 }
0x476c   : > { %v7310_v20 = vsub.f32 %v7301_v11, %v7309_v34 }
0x476e   : > { %v7311_v40 = vmul.f32 1.442695, %v7310_v20 }
0x476f   : > { %v7428_v30 = vpop.xlane.xlu1 %7427 }
0x4770   : > { %9759 = vpow2.f32 %v7311_v40  ;;  %v7432_v32 = vmul.f32 0.03125, %v7428_v30 }
0x4772   : > { %v7434_v8 = vsub.f32 %v7420_v15, %v7432_v32  ;;  %v9616_v15 = vld [vmem:[%s12254_s28 + $0x30] sm:$0xff]  }
0x4774   : > { %v7436_v45 = vmul.f32 %v7434_v8, %v7434_v8 }
0x4776   : > { %v7438_v62 = vsel %vm1347_vm1, %v7436_v45, 0.0 }
0x477d   : > { %v9760_v48 = vpop.eup %9759 }
0x477e   : > { %v7313_v23 = vsel %vm3051_vm4, %v9760_v48, 0.0 }
0x477f   : > { %7314 = vadd.xlane.f32.xlu0 %v7313_v23 }
0x4795   : > { %7319 = vrot.lane.b32.xlu0 %v11903_v57, %s10580_s25  ;;  %s10401_s25 = scalar_lea.vmem %s12118_s18, 256 }
0x4796   : > { %p10402_p8 = scmp.ne.s32.totalorder %s12118_s18, %s10401_s25  ;;  %p10409_p1 = scmp.lt.s32.totalorder %s10407_s0, %s10401_s25 }
0x4798   : > { %p10403_p11 = pnand %p10402_p8, %p12255_p0  ;;  %p10410_p12 = por %p10409_p1, %p10408_p6 }
0x479a   : > { %p10404_p13 = pneg %p10403_p11 }
0x479b   : > { %v7250_v41 = vpop.f32.mrf.mxu1 }
0x479c   : > { %v7256_v63 = vadd.f32 %v7250_v41, %v12050_v44  ;;  %p10411_p9 = pnand %p10410_p12, %p10404_p13 }
0x479d   : > { %v9222_v24 = vpop.f32.mrf.mxu1 }
0x479f   : > { %v7253_v6 = vpop.f32.mrf.mxu1 }
0x47a0   : > { %v8307_v6 = vld [vmem:[#allocation34 + $0x1] ss:$0 sm:$0xff] }
0x47a1   : > { %v9223_v56 = vpop.f32.mrf.mxu1 }
0x4808   : > { %v7315_v26 = vpop.xlane.xlu0 %7314 }
0x4809   : > { %9761 = vrcp.f32 %v7315_v26 }
0x480c   : > { %v7320_v54 = vpop.permute.xlu0 %7319 }
0x480d   : > { %9231 = vmatpush3.bf16.msra.mxu1 %v7320_v54 }
0x480e   : > { %9242 = vmatprep.subr.bf16.mxu1 %v10573_v0 }
0x4816   : > { %v9762_v49 = vpop.eup %9761 }
0x4817   : > { %v7317_v27 = vmul.f32 %v9762_v49, %v9760_v48 }
0x4819   : > { %v7318_v21 = vpack.c.bf16 %v7317_v27, %v7317_v27 }
0x481b   : > { %9233 = vmatmul.mubr.msk.bf16.vlgmr.msra.gmra.mxu1 %vm3051_vm4, %v7318_v21 }
0x481c   : > { %9246 = vmatprep.mubr.msk.bf16.mxu1 %vm10574_vm0, %v10573_v0  ;;  %9243 = vmatpush3.bf16.msra.mxu1 %v9613_v43 }
0x481d   : > { %9244 = vmatprep.subr.bf16.mxu1 %v10573_v0 }
0x4820   : > { %9245 = vmatpush3.bf16.msra.mxu1 %v9614_v50 }
0x48db   : > { %v7359_v57 = vpop.f32.mrf.mxu1 }
0x48dc   : > { %v7365_v39 = vpack.c.bf16 %v7359_v57, %v7359_v57 }
0x48dd   : > { %v9234_v22 = vpop.f32.mrf.mxu1 }
0x48de   : > { %9239 = vmatmul.mubr.msk.bf16.vlgmr.msra.gmra.mxu0 %vm1466_vm2, %v7365_v39 }
0x48df   : > { %v7362_v33 = vpop.f32.mrf.mxu1  ;;  %9258 = vmatprep.mubr.msk.bf16.mxu0 %vm10574_vm0, %v10573_v0 }
0x48e1   : > { %v9235_v29 = vpop.f32.mrf.mxu1 }
0x499e   : > { %v7403_v31 = vpop.f32.mrf.mxu0 }
0x499f   : > { %v7409_v51 = vadd.f32 %v7403_v31, %v7256_v63 }
0x49a0   : > { %v9240_v36 = vpop.f32.mrf.mxu0 }
0x49a1   : > { %v7419_v44 = vadd.f32 %v8292_v59, %v7409_v51 }
0x49a2   : > { %v7406_v16 = vpop.f32.mrf.mxu0 }
0x49a3   : > { %v7421_v53 = vadd.f32 %v7419_v44, %v11861_v7  ;;  %v9615_v7 = vld [vmem:[%s12254_s28 + $0x38] sm:$0xff]  }
0x49a4   : > { %v9241_v58 = vpop.f32.mrf.mxu0  ;;  %9251 = vmatpush3.bf16.msra.mxu0 %v9615_v7 }
0x49a5   : > { %v7429_v25 = vsel %vm1347_vm1, %v7421_v53, 0.0  ;;  %9252 = vmatprep.subr.bf16.mxu0 %v10573_v0 }
0x49a6   : > { %7430 = vadd.xlane.f32.xlu1 %v7429_v25 }
0x49a8   : > { %9253 = vmatpush3.bf16.msra.mxu0 %v9616_v15 }
0x49a9   : > { %9254 = vmatprep.subr.bf16.mxu0 %v10573_v0 }
0x49aa   : > { %7439 = vadd.xlane.f32.xlu1 %v7438_v62 }
0x49ac   : > { %9255 = vmatpush3.bf16.msra.mxu0 %v9617_v19 }
0x49ad   : > { %9256 = vmatprep.subr.bf16.mxu0 %v10573_v0 }
0x49b0   : > { %9257 = vmatpush3.bf16.msra.mxu0 %v9618_v35 }
0x4a2f   : > { %v7431_v46 = vpop.xlane.xlu1 %7430 }
0x4a30   : > { %v7433_v47 = vmul.f32 0.03125, %v7431_v46 }
0x4a32   : > { %v7435_v14 = vsub.f32 %v7421_v53, %v7433_v47 }
0x4a33   : > { %v7440_v55 = vpop.xlane.xlu1 %7439 }
0x4a34   : > { %v7437_v18 = vmul.f32 %v7435_v14, %v7435_v14  ;;  %v7444_v2 = vmul.f32 0.03125, %v7440_v55 }
0x4a36   : > { %v7441_v4 = vsel %vm1347_vm1, %v7437_v18, 0.0  ;;  %v7446_v17 = vadd.f32 1e-05, %v7444_v2 }
0x4a37   : > { %7442 = vadd.xlane.f32.xlu1 %v7441_v4  ;;  %v8314_v4 = vld [vmem:[#allocation37 + $0x1] ss:$0 sm:$0xff] }
0x4a38   : > { %9763 = vrsqrt.f32 %v7446_v17 }
0x4a45   : > { %v9764_v52 = vpop.eup %9763 }
0x4a46   : > { %v7450_v13 = vmul.f32 %v9764_v52, %v7434_v8 }
0x4a48   : > { %v7458_v59 = vmul.f32 %v8293_v42, %v7450_v13 }
0x4a4a   : > { %v7466_v9 = vadd.f32 %v8294_v5, %v7458_v59 }
0x4ac0   : > { %v7443_v3 = vpop.xlane.xlu1 %7442 }
0x4ac1   : > { %v7445_v60 = vmul.f32 0.03125, %v7443_v3 }
0x4ac3   : > { %v7447_v12 = vadd.f32 1e-05, %v7445_v60 }
0x4ac5   : > { %9765 = vrsqrt.f32 %v7447_v12 }
0x4ad2   : > { %v9766_v61 = vpop.eup %9765 }
0x4ad3   : > { %v7451_v1 = vmul.f32 %v9766_v61, %v7435_v14  ;;  %v8313_v14 = vld [vmem:[#allocation35 + $0x1] ss:$0 sm:$0xff] }
0x4ad5   : > { %v7459_v28 = vmul.f32 %v8293_v42, %v7451_v1 }
0x4ad7   : > { %v7467_v11 = vadd.f32 %v8294_v5, %v7459_v28 }
0x4ad9   : > { %v7468_v38 = vpack.c.bf16 %v7467_v11, %v7466_v9 }
0x4adb   : > { %9247 = vmatmul.mubr.msk.bf16.vlgmr.msra.gmra.mxu1 %vm1347_vm1, %v7468_v38 }
0x4b9b   : > { %v7531_v37 = vpop.f32.mrf.mxu1 }
0x4b9c   : > { %v7532_v20 = vadd.f32 %v8295_v10, %v7531_v37 }
0x4b9d   : > { %v9248_v34 = vpop.f32.mrf.mxu1 }
0x4b9e   : > { %v7538_v41 = vmax.f32 %v7532_v20, 0.0  ;;  %v8315_v34 = vld [vmem:[%s10733_s21] ss:$0 sm:$0xff] }
0x4b9f   : > { %v7534_v40 = vpop.f32.mrf.mxu1 }
0x4ba0   : > { %v7535_v48 = vadd.f32 %v8295_v10, %v7534_v40  ;;  %v8316_v40 = vld [vmem:[#allocation38] ss:$0 sm:$0xff] }
0x4ba1   : > { %v9249_v23 = vpop.f32.mrf.mxu1 }
0x4ba2   : > { %v7539_v63 = vmax.f32 %v7535_v48, 0.0 }
0x4ba4   : > { %v7540_v24 = vpack.c.bf16 %v7539_v63, %v7538_v41 }
0x4ba6   : > { %9259 = vmatmul.mubr.msk.bf16.vlgmr.msra.gmra.mxu0 %vm4403_vm5, %v7540_v24 }
0x4c66   : > { %v7619_v56 = vpop.f32.mrf.mxu0 }
0x4c67   : > { %v7620_v26 = vadd.f32 %v8307_v6, %v7619_v56 }
0x4c68   : > { %v9260_v54 = vpop.f32.mrf.mxu0 }
0x4c69   : > { %v7626_v49 = vadd.f32 %v7620_v26, %v7466_v9 }
0x4c6a   : > { %v7622_v0 = vpop.f32.mrf.mxu0 }
0x4c6b   : > { %v7623_v27 = vadd.f32 %v8307_v6, %v7622_v0  ;;  %v7632_v21 = vsel %vm1347_vm1, %v7626_v49, 0.0 }
0x4c6c   : > { %7633 = vadd.xlane.f32.xlu1 %v7632_v21  ;;  %v9261_v57 = vpop.f32.mrf.mxu0 }
0x4c6d   : > { %v7627_v39 = vadd.f32 %v7623_v27, %v7467_v11 }
0x4c6f   : > { %v7635_v22 = vsel %vm1347_vm1, %v7627_v39, 0.0 }
0x4c70   : > { %7636 = vadd.xlane.f32.xlu1 %v7635_v22 }
0x4cf5   : > { %v7634_v33 = vpop.xlane.xlu1 %7633 }
0x4cf6   : > { %v7638_v29 = vmul.f32 0.03125, %v7634_v33 }
0x4cf8   : > { %v7640_v30 = vsub.f32 %v7626_v49, %v7638_v29 }
0x4cf9   : > { %v7637_v32 = vpop.xlane.xlu1 %7636 }
0x4cfa   : > { %v7639_v31 = vmul.f32 0.03125, %v7637_v32  ;;  %v7642_v51 = vmul.f32 %v7640_v30, %v7640_v30 }
0x4cfc   : > { %v7641_v36 = vsub.f32 %v7627_v39, %v7639_v31  ;;  %v7644_v8 = vsel %vm1347_vm1, %v7642_v51, 0.0 }
0x4cfd   : > { %7645 = vadd.xlane.f32.xlu0 %v7644_v8 }
0x4cfe   : > { %v7643_v44 = vmul.f32 %v7641_v36, %v7641_v36 }
0x4d00   : > { %v7647_v16 = vsel %vm1347_vm1, %v7643_v44, 0.0 }
0x4d01   : > { %7648 = vadd.xlane.f32.xlu1 %v7647_v16 }
0x4d86   : > { %v7646_v53 = vpop.xlane.xlu0 %7645 }
0x4d87   : > { %v7650_v58 = vmul.f32 0.03125, %v7646_v53 }
0x4d89   : > { %v7652_v25 = vadd.f32 1e-05, %v7650_v58 }
0x4d8a   : > { %v7649_v45 = vpop.xlane.xlu1 %7648 }
0x4d8b   : > { %9767 = vrsqrt.f32 %v7652_v25  ;;  %v7651_v62 = vmul.f32 0.03125, %v7649_v45 }
0x4d8d   : > { %v7653_v46 = vadd.f32 1e-05, %v7651_v62 }
0x4d8f   : > { %9769 = vrsqrt.f32 %v7653_v46 }
0x4d98   : > { %v9768_v47 = vpop.eup %9767 }
0x4d99   : > { %v7656_v18 = vmul.f32 %v9768_v47, %v7640_v30 }
0x4d9b   : > { %v7664_v43 = vmul.f32 %v8313_v14, %v7656_v18 }
0x4d9c   : > { %v9770_v50 = vpop.eup %9769 }
0x4d9d   : > { %v7672_v7 = vadd.f32 %v8314_v4, %v7664_v43  ;;  %v7657_v55 = vmul.f32 %v9770_v50, %v7641_v36 }
0x4d9f   : > { %v7676_v2 = vsel %vm1347_vm1, %v7672_v7, 0.0  ;;  %v7665_v17 = vmul.f32 %v8313_v14, %v7657_v55 }
0x4da0   : > { %7677 = vadd.xlane.f32.xlu1 %v7676_v2 }
0x4da1   : > { %v7673_v3 = vadd.f32 %v8314_v4, %v7665_v17 }
0x4da3   : > { %v7679_v60 = vsel %vm1347_vm1, %v7673_v3, 0.0 }
0x4da4   : > { %7680 = vadd.xlane.f32.xlu1 %v7679_v60 }
0x4e29   : > { %v7678_v12 = vpop.xlane.xlu1 %7677 }
0x4e2a   : > { %v7682_v52 = vmul.f32 0.03125, %v7678_v12 }
0x4e2c   : > { %v7684_v13 = vsub.f32 %v7672_v7, %v7682_v52 }
0x4e2d   : > { %v7681_v42 = vpop.xlane.xlu1 %7680 }
0x4e2e   : > { %v7683_v61 = vmul.f32 0.03125, %v7681_v42  ;;  %v7686_v59 = vmul.f32 %v7684_v13, %v7684_v13 }
0x4e30   : > { %v7685_v1 = vsub.f32 %v7673_v3, %v7683_v61  ;;  %v7688_v5 = vsel %vm1347_vm1, %v7686_v59, 0.0 }
0x4e31   : > { %7689 = vadd.xlane.f32.xlu1 %v7688_v5 }
0x4e32   : > { %v7687_v28 = vmul.f32 %v7685_v1, %v7685_v1 }
0x4e34   : > { %v7691_v9 = vsel %vm1347_vm1, %v7687_v28, 0.0 }
0x4e35   : > { %7692 = vadd.xlane.f32.xlu1 %v7691_v9 }
0x4eba   : > { %v7690_v11 = vpop.xlane.xlu1 %7689 }
0x4ebb   : > { %v7694_v38 = vmul.f32 0.03125, %v7690_v11 }
0x4ebd   : > { %v7696_v15 = vadd.f32 1e-05, %v7694_v38 }
0x4ebe   : > { %v7693_v19 = vpop.xlane.xlu1 %7692 }
0x4ebf   : > { %9771 = vrsqrt.f32 %v7696_v15  ;;  %v7695_v35 = vmul.f32 0.03125, %v7693_v19 }
0x4ec1   : > { %v7697_v10 = vadd.f32 1e-05, %v7695_v35 }
0x4ec3   : > { %9773 = vrsqrt.f32 %v7697_v10 }
0x4ecc   : > { %v9772_v37 = vpop.eup %9771 }
0x4ecd   : > { %v7700_v20 = vmul.f32 %v9772_v37, %v7684_v13 }
0x4ecf   : > { %v7708_v48 = vmul.f32 %v8315_v34, %v7700_v20 }
0x4ed0   : > { %v9774_v23 = vpop.eup %9773 }
0x4ed1   : > { %v7716_v41 = vadd.f32 %v8316_v40, %v7708_v48  ;;  %v7701_v63 = vmul.f32 %v9774_v23, %v7685_v1 }
0x4ed3   : > { %v7709_v24 = vmul.f32 %v8315_v34, %v7701_v63  ;;  %7718 = vst.msk [vmem:[%s1287_s10] sm:$0xff] %vm1347_vm1, %v7716_v41 }
0x4ed5   : > { %v7717_v6 = vadd.f32 %v8316_v40, %v7709_v24 }
0x4ed7   : > { %7719 = vst.msk [vmem:[%s1287_s10 + $0x8] sm:$0xff] %vm1347_vm1, %v7717_v6 }
0x4ed8   : > { %10414 = shalt.err (!%p10411_p9)
}
0x4ed9   : > { %s10415_s4 = scalar_lea.hbm %s12116_s2, 256  ;;  %s10419_s15 = scalar_lea.hbm %s10743_s19, 512 }
0x4eda   : > { %p10416_p5 = scmp.ne.s32.totalorder %s12116_s2, %s10415_s4  ;;  %p10420_p2 = scmp.lt.s32.totalorder %s12116_s2, %s10743_s19 }
0x4edb   : > { %p10421_p7 = scmp.lt.s32.totalorder %s10419_s15, %s10415_s4 }
0x4edc   : > { %p10417_p3 = pnand %p10416_p5, %p12255_p0 }
0x4edd   : > { %p10422_p4 = por %p10421_p7, %p10420_p2 }
0x4ede   : > { %p10418_p10 = pneg %p10417_p3 }
0x4ee0   : > { %p10423_p8 = pnand %p10422_p4, %p10418_p10 }
0x4ee2   : > { %10426 = shalt.err (!%p10423_p8)
}
0x4ee3   : > { %s10583_s26 = smov 128   ;;  %s10584_s23 = smov 8  }
0x4ee4   : > { %9358 = dma.vmem_to_hbm [thread:$0]  (%p12255_p0), %s12118_s18, 256, %s12116_s2, %s12121_s5, %s10583_s26, %s10583_s26, %s10584_s23  }
0x4ee5 PF: > { %s12256_s3 = sld [smem:[#allocation75_spill]] }
0x4ee6   : > { %s12257_s10 = sld [smem:[#allocation73_spill]] }
0x4ee7   : > { %s12258_s25 = sld [smem:[#allocation78_spill]] }
0x4eeb   : > { %p9485_p11 = scmp.ge.s32.totalorder %s12256_s3, 2 }
0x4eec   : > { %s7749_s22 = sand.u32 1, %s12257_s10  }
0x4eed   : > { %p12259_p13 = scmp.ne.s32.totalorder %s12258_s25, 0  ;;  %s7750_s1 = scalar_lea.sflag [#allocation4], %s7749_s22 }
0x4eef   : > { %p9434_p6 = pnand %p9485_p11, %p12259_p13 }
0x4ef1   : > { %p9435_p1 = pneg %p9434_p6 }
0x4ef3   : > { %10496 = dma.done.wait (%p9435_p1), %s7750_s1, 256  }
0x4ef4   : > { %10498 = vsyncadd (%p9435_p1), %s7750_s1, 4294967040  ;;  %s12260_s18 = sld [smem:[#allocation76_spill]]  ;;  %s12263_s15 = smov %s10505_s16 }
0x4ef5   : > { %s12261_s0 = sld [smem:[#allocation74_spill]] }
0x4ef6   : > { %s12262_s4 = sld [smem:[#allocation77_spill]] }
0x4efa   : > { %p84_p12 = scmp.ge.s32.totalorder %s12260_s18, 4  }
0x4efb   : > { %s12264_s16 = smov %s12261_s0 }
0x4efc   : > { %s12265_s0 = smov %s12262_s4  ;;  %86 = sbr.rel (!%p84_p12) target bundleno = 66 (0x42), region = 329 }
0x4f01   :  { %7755 = vsyncpa [#allocation3], 1 }
0x4f02   :  { %7757 = vsyncpa [#allocation3 + $0x1], 1 }
0x4f03   :  { %7758 = vsyncpa [#allocation6], 1 }
0x4f04   :  { %7759 = vsyncpa [#allocation9], 1 }
0x4f05   :  { %7760 = vsyncpa [#allocation12], 1 }
0x4f06   :  { %7761 = vsyncpa [#allocation15], 1 }
0x4f07   :  { %7762 = vsyncpa [#allocation18], 1 }
0x4f08   :  { %7763 = vsyncpa [#allocation21], 1 }
0x4f09   :  { %7764 = vsyncpa [#allocation24], 1 }
0x4f0a   :  { %7765 = vsyncpa [#allocation27], 1 }
0x4f0b   :  { %7766 = vsyncpa [#allocation30], 1 }
0x4f0c   :  { %7767 = vsyncpa [#allocation33], 1 }
0x4f0d   :  { %7768 = vsyncpa [#allocation36], 1 }
0x4f0e   :  { %7769 = vsyncpa [#allocation39], 1 }
0x4f0f   :  { %7770 = vsyncpa [#allocation4], 1 }
0x4f10   :  { %7772 = vsyncpa [#allocation4 + $0x1], 1 }

</bundles_post_ra>
